<compile_context>
chip_gen: v7x
topology: tpu7x:2x2x1
jax: 0.10.0
libtpu: 0.0.40
codegen_flags: <defaults>
</compile_context>

<pallas_src>
import functools

import jax
import jax.numpy as jnp
from jax.experimental import pallas as pl
from jax.experimental.pallas import tpu as pltpu


_BN_EPS = 1e-5
_VMEM_LIMIT = 32 * 1024 * 1024   # explicit cap; tiles below use well under this


# ---------------------------------------------------------------------------
# Small static helpers
# ---------------------------------------------------------------------------
def _round_up(v, m):
    return ((v + m - 1) // m) * m


def _pick_tile(dim, cap, quantum):
    """Largest divisor of `dim` that is <= cap and a multiple of `quantum`.

    Falls back to `dim` itself (a full-extent block is always legal)."""
    best = None
    d = quantum
    limit = min(dim, cap)
    while d <= limit:
        if dim % d == 0:
            best = d
        d += quantum
    return best if best is not None else dim


def _pad_axis(x, axis, target):
    amt = target - x.shape[axis]
    if amt <= 0:
        return x
    cfg = [(0, 0)] * x.ndim
    cfg[axis] = (0, amt)
    return jnp.pad(x, cfg)


# ---------------------------------------------------------------------------
# Pallas kernels
# ---------------------------------------------------------------------------
def _matmul_lrelu_kernel(x_ref, w_ref, o_ref, acc_ref):
    """Tiled bf16 matmul, f32 accumulate, LeakyReLU(0.2), bf16 store (conv1)."""
    @pl.when(pl.program_id(2) == 0)
    def _():
        acc_ref[...] = jnp.zeros_like(acc_ref)

    acc_ref[...] += jnp.dot(x_ref[...], w_ref[...],
                            preferred_element_type=jnp.float32)

    @pl.when(pl.program_id(2) == pl.num_programs(2) - 1)
    def _():
        acc = acc_ref[...]
        o_ref[...] = jnp.where(acc >= 0.0, acc, 0.2 * acc).astype(o_ref.dtype)


def _matmul_stats_kernel(x_ref, w_ref, y_ref, stats_ref, acc_ref):
    """Tiled bf16 matmul; emits pre-BN f32 tile plus per-tile column sum/sumsq."""
    @pl.when(pl.program_id(2) == 0)
    def _():
        acc_ref[...] = jnp.zeros_like(acc_ref)

    acc_ref[...] += jnp.dot(x_ref[...], w_ref[...],
                            preferred_element_type=jnp.float32)

    @pl.when(pl.program_id(2) == pl.num_programs(2) - 1)
    def _():
        acc = acc_ref[...]
        y_ref[...] = acc
        col_sum = jnp.sum(acc, axis=0, keepdims=True)          # (1, tn)
        col_sq = jnp.sum(acc * acc, axis=0, keepdims=True)     # (1, tn)
        stats_ref[...] = jnp.concatenate([col_sum, col_sq], axis=0)[None]


def _bn_lrelu_kernel(y_ref, p_ref, o_ref):
    """y*scale + shift (train-mode BN folded into scale/shift) + LeakyReLU(0.2)."""
    y = y_ref[...] * p_ref[0:1, :] + p_ref[1:2, :]
    o_ref[...] = jnp.where(y >= 0.0, y, 0.2 * y).astype(o_ref.dtype)


def _tail_kernel(x_ref, a_ref, w1_ref, b1_ref, w2s_ref, w2a_ref, b2_ref,
                 w3_ref, b3_ref, q_ref):
    """lin1 -> lrelu -> concat(a) -> lin2 -> relu -> lin3, fully fused."""
    s = jnp.dot(x_ref[...], w1_ref[...], preferred_element_type=jnp.float32)
    s = s + b1_ref[...]
    s = jnp.where(s >= 0.0, s, 0.2 * s)
    # concat(a) folded into a split matmul: [s, a] @ W2^T == s@W2s + a@W2a
    h = jnp.dot(s.astype(jnp.bfloat16), w2s_ref[...],
                preferred_element_type=jnp.float32)
    h = h + a_ref[...] * w2a_ref[...] + b2_ref[...]
    h = jnp.maximum(h, 0.0)
    q = jnp.dot(h.astype(jnp.bfloat16), w3_ref[...],
                preferred_element_type=jnp.float32)
    q_ref[...] = q + b3_ref[...]


# ---------------------------------------------------------------------------
# pallas_call wrappers
# ---------------------------------------------------------------------------
def _matmul_tiles(M, K, N):
    tm = _pick_tile(M, 512, 8)
    tk = _pick_tile(K, 1024, 128)
    tn = _pick_tile(N, 256, 128)
    return tm, tk, tn


def matmul_lrelu(x, w):
    M, K = x.shape
    _, N = w.shape
    tm, tk, tn = _matmul_tiles(M, K, N)
    grid = (M // tm, N // tn, K // tk)
    return pl.pallas_call(
        _matmul_lrelu_kernel,
        out_shape=jax.ShapeDtypeStruct((M, N), jnp.bfloat16),
        grid=grid,
        in_specs=[pl.BlockSpec((tm, tk), lambda m, n, k: (m, k)),
                  pl.BlockSpec((tk, tn), lambda m, n, k: (k, n))],
        out_specs=pl.BlockSpec((tm, tn), lambda m, n, k: (m, n)),
        scratch_shapes=[pltpu.VMEM((tm, tn), jnp.float32)],
        compiler_params=pltpu.CompilerParams(
            dimension_semantics=("parallel", "parallel", "arbitrary"),
            vmem_limit_bytes=_VMEM_LIMIT),
    )(x, w)


def matmul_stats(x, w):
    M, K = x.shape
    _, N = w.shape
    tm, tk, tn = _matmul_tiles(M, K, N)
    nm, nn, nk = M // tm, N // tn, K // tk
    return pl.pallas_call(
        _matmul_stats_kernel,
        out_shape=(jax.ShapeDtypeStruct((M, N), jnp.float32),
                   jax.ShapeDtypeStruct((nm, 2, N), jnp.float32)),
        grid=(nm, nn, nk),
        in_specs=[pl.BlockSpec((tm, tk), lambda m, n, k: (m, k)),
                  pl.BlockSpec((tk, tn), lambda m, n, k: (k, n))],
        out_specs=(pl.BlockSpec((tm, tn), lambda m, n, k: (m, n)),
                   pl.BlockSpec((1, 2, tn), lambda m, n, k: (m, 0, n))),
        scratch_shapes=[pltpu.VMEM((tm, tn), jnp.float32)],
        compiler_params=pltpu.CompilerParams(
            dimension_semantics=("parallel", "parallel", "arbitrary"),
            vmem_limit_bytes=_VMEM_LIMIT),
    )(x, w)


def bn_lrelu(y, scale_shift):
    M, N = y.shape
    tm = _pick_tile(M, 1024, 8)
    tn = _pick_tile(N, 512, 128)
    return pl.pallas_call(
        _bn_lrelu_kernel,
        out_shape=jax.ShapeDtypeStruct((M, N), jnp.bfloat16),
        grid=(M // tm, N // tn),
        in_specs=[pl.BlockSpec((tm, tn), lambda m, n: (m, n)),
                  pl.BlockSpec((2, tn), lambda m, n: (0, n))],
        out_specs=pl.BlockSpec((tm, tn), lambda m, n: (m, n)),
        compiler_params=pltpu.CompilerParams(
            dimension_semantics=("parallel", "parallel"),
            vmem_limit_bytes=_VMEM_LIMIT),
    )(y, scale_shift)


def tail_linear(x_flat, a, p):
    B = x_flat.shape[0]
    qpad = p["lin3_w"].shape[1]
    args = (x_flat, a, p["lin1_w"], p["lin1_b"], p["lin2_ws"], p["lin2_wa"],
            p["lin2_b"], p["lin3_w"], p["lin3_b"])
    in_specs = [pl.BlockSpec(v.shape, lambda i: (0, 0)) for v in args]
    return pl.pallas_call(
        _tail_kernel,
        out_shape=jax.ShapeDtypeStruct((B, qpad), jnp.float32),
        grid=(1,),
        in_specs=in_specs,
        out_specs=pl.BlockSpec((B, qpad), lambda i: (0, 0)),
        compiler_params=pltpu.CompilerParams(
            dimension_semantics=("arbitrary",),
            vmem_limit_bytes=_VMEM_LIMIT),
    )(*args)


# ---------------------------------------------------------------------------
# im2col for 4x4 / stride 2 / pad 1 convs (layout plumbing, bf16)
# ---------------------------------------------------------------------------
def im2col(x_nhwc, k=4, stride=2, pad=1):
    # TODO(synk): im2col is still materialized by XLA (16x expanded read/write in HBM);
    # fully fusing the tap gather into the matmul kernel (manual DMA over overlapping
    # input windows) is the remaining bandwidth optimization.
    B, H, W, C = x_nhwc.shape
    xp = jnp.pad(x_nhwc, ((0, 0), (pad, pad), (pad, pad), (0, 0)))
    Ho = (H + 2 * pad - k) // stride + 1
    Wo = (W + 2 * pad - k) // stride + 1
    patches = []
    for di in range(k):
        for dj in range(k):
            patches.append(
                xp[:, di:di + stride * Ho:stride, dj:dj + stride * Wo:stride, :])
    cols = jnp.stack(patches, axis=3)          # (B, Ho, Wo, k*k, C), kh-major
    return cols.reshape(B * Ho * Wo, k * k * C), (B, Ho, Wo)


# ---------------------------------------------------------------------------
# Forward pass
# ---------------------------------------------------------------------------
def _conv_bn_lrelu(x_nhwc, wmat, gamma, beta):
    cols, (B, Ho, Wo) = im2col(x_nhwc)
    y, stats = matmul_stats(cols, wmat)
    m_rows = float(cols.shape[0])
    col_sum = jnp.sum(stats[:, 0, :], axis=0)
    col_sq = jnp.sum(stats[:, 1, :], axis=0)
    mean = col_sum / m_rows
    var = jnp.maximum(col_sq / m_rows - mean * mean, 0.0)     # biased var (BN train)
    scale = gamma * jax.lax.rsqrt(var + _BN_EPS)
    shift = beta - mean * scale
    act = bn_lrelu(y, jnp.stack([scale, shift], axis=0))
    return act.reshape(B, Ho, Wo, wmat.shape[1])


def discriminator_critic_forward(p, s_nchw, a):
    # NCHW -> NHWC; pad input channels so K = 16*Cin is a multiple of 128.
    x = jnp.transpose(s_nchw, (0, 2, 3, 1)).astype(jnp.float32)
    cin_pad = p["conv1_w"].shape[0] // 16
    x = _pad_axis(x, 3, cin_pad).astype(jnp.bfloat16)

    # conv1 + leaky relu (no BN, no bias)
    cols, (B, Ho, Wo) = im2col(x)
    x = matmul_lrelu(cols, p["conv1_w"]).reshape(B, Ho, Wo, p["conv1_w"].shape[1])

    # conv2..4 + BatchNorm (training-mode batch stats) + leaky relu
    x = _conv_bn_lrelu(x, p["conv2_w"], p["bn2_g"], p["bn2_b"])
    x = _conv_bn_lrelu(x, p["conv3_w"], p["bn3_g"], p["bn3_b"])
    x = _conv_bn_lrelu(x, p["conv4_w"], p["bn4_g"], p["bn4_b"])

    # flatten; the torch NCHW .view(B, -1) permutation is pre-folded into lin1_w.
    x_flat = x.reshape(x.shape[0], -1)

    # lin1 -> lrelu -> concat(a) -> lin2 -> relu -> lin3, one fused kernel.
    # TODO(synk): reference forward calls `F.lin3(q)` (typo); implemented as self.lin3.
    q = tail_linear(x_flat, a.astype(jnp.float32), p)
    return q[:, :p["disc_q"]]


# ---------------------------------------------------------------------------
# Parameters: raw (torch-shaped) construction + one-time layout preparation
# ---------------------------------------------------------------------------
def make_raw_params(key, nc, ndf, nz, dc_hidden, disc_q):
    ks = jax.random.split(key, 16)

    def w(k, shape, scale=0.05):
        return jax.random.normal(k, shape, jnp.float32) * scale

    return {
        "conv1_w": w(ks[0], (ndf, nc, 4, 4)),
        "conv2_w": w(ks[1], (ndf * 2, ndf, 4, 4)),
        "bn2_g": 1.0 + 0.1 * jax.random.normal(ks[2], (ndf * 2,), jnp.float32),
        "bn2_b": 0.1 * jax.random.normal(ks[3], (ndf * 2,), jnp.float32),
        "conv3_w": w(ks[4], (ndf * 4, ndf * 2, 4, 4)),
        "bn3_g": 1.0 + 0.1 * jax.random.normal(ks[5], (ndf * 4,), jnp.float32),
        "bn3_b": 0.1 * jax.random.normal(ks[6], (ndf * 4,), jnp.float32),
        "conv4_w": w(ks[7], (ndf * 8, ndf * 4, 4, 4)),
        "bn4_g": 1.0 + 0.1 * jax.random.normal(ks[8], (ndf * 8,), jnp.float32),
        "bn4_b": 0.1 * jax.random.normal(ks[9], (ndf * 8,), jnp.float32),
        "lin1_w": w(ks[10], (nz, ndf * 8 * 4 * 4)),
        "lin1_b": 0.1 * jax.random.normal(ks[11], (nz,), jnp.float32),
        "lin2_w": w(ks[12], (dc_hidden, nz + 1)),
        "lin2_b": 0.1 * jax.random.normal(ks[13], (dc_hidden,), jnp.float32),
        "lin3_w": w(ks[14], (disc_q, dc_hidden)),
        "lin3_b": 0.1 * jax.random.normal(ks[15], (disc_q,), jnp.float32),
    }


def prepare_params(raw, nc, ndf, nz, dc_hidden, disc_q):
    """One-time layout prep: channel padding, im2col weight packing, transposes."""
    cin0 = _round_up(nc, 8)                       # conv1 K = 16*cin0 (multiple of 128)
    cpad = [_round_up(ndf, 128), _round_up(ndf * 2, 128),
            _round_up(ndf * 4, 128), _round_up(ndf * 8, 128)]

    def conv_wmat(w_oihw, cin_pad, cout_pad):
        w = _pad_axis(_pad_axis(w_oihw, 1, cin_pad), 0, cout_pad)
        co, ci, kh, kw = w.shape
        w = jnp.transpose(w, (2, 3, 1, 0)).reshape(kh * kw * ci, co)   # (kh,kw,cin)-major
        return w.astype(jnp.bfloat16)

    # lin1: fold the NCHW flatten permutation + channel padding into the weight.
    c_real = ndf * 8
    w1 = raw["lin1_w"].reshape(nz, c_real, 4, 4)
    w1 = jnp.transpose(w1, (2, 3, 1, 0))                      # (h, w, c, nz)
    w1 = _pad_axis(w1, 2, cpad[3]).reshape(16 * cpad[3], nz)

    w2t = raw["lin2_w"].T                                     # (nz+1, DC_hidden)
    qpad = _round_up(disc_q, 128)
    w3t = _pad_axis(raw["lin3_w"].T, 1, qpad)                 # (DC_hidden, qpad)

    return {
        "conv1_w": conv_wmat(raw["conv1_w"], cin0, cpad[0]),
        "conv2_w": conv_wmat(raw["conv2_w"], cpad[0], cpad[1]),
        "conv3_w": conv_wmat(raw["conv3_w"], cpad[1], cpad[2]),
        "conv4_w": conv_wmat(raw["conv4_w"], cpad[2], cpad[3]),
        "bn2_g": _pad_axis(raw["bn2_g"], 0, cpad[1]),
        "bn2_b": _pad_axis(raw["bn2_b"], 0, cpad[1]),
        "bn3_g": _pad_axis(raw["bn3_g"], 0, cpad[2]),
        "bn3_b": _pad_axis(raw["bn3_b"], 0, cpad[2]),
        "bn4_g": _pad_axis(raw["bn4_g"], 0, cpad[3]),
        "bn4_b": _pad_axis(raw["bn4_b"], 0, cpad[3]),
        "lin1_w": w1.astype(jnp.bfloat16),
        "lin1_b": raw["lin1_b"].reshape(1, nz),
        "lin2_ws": w2t[:nz].astype(jnp.bfloat16),
        "lin2_wa": w2t[nz:nz + 1],                            # (1, DC_hidden) f32
        "lin2_b": raw["lin2_b"].reshape(1, dc_hidden),
        "lin3_w": w3t.astype(jnp.bfloat16),
        "lin3_b": _pad_axis(raw["lin3_b"], 0, qpad).reshape(1, qpad),
        "disc_q": disc_q,
    }


if __name__ == "__main__":
    # Spatial must be 64 so the conv stack ends at 4x4 (lin1 expects ndf*8*4*4).
    B, NC, H, W = 2, 3, 64, 64
    NDF, NZ, DC_HIDDEN, DISC_Q = 8, 16, 32, 1

    key = jax.random.PRNGKey(0)
    k_p, k_s, k_a = jax.random.split(key, 3)

    raw = make_raw_params(k_p, NC, NDF, NZ, DC_HIDDEN, DISC_Q)
    params = prepare_params(raw, NC, NDF, NZ, DC_HIDDEN, DISC_Q)

    s = jax.random.normal(k_s, (B, NC, H, W), jnp.float32)    # NCHW like PyTorch
    a = jax.random.normal(k_a, (B, 1), jnp.float32)

    fwd = jax.jit(functools.partial(discriminator_critic_forward, params))
    q = fwd(s, a)
    jax.block_until_ready(q)
    assert q.shape == (B, DISC_Q) and q.dtype == jnp.float32
    print("KERNEL_OK")
</pallas_src>

<mosaic_0001>
module attributes {stable_mosaic.version = 11 : i64} {
  func.func @_matmul_lrelu_kernel(%arg0: i32, %arg1: i32, %arg2: i32, %arg3: memref<512x128xbf16, #tpu.memory_space<vmem>>, %arg4: memref<128x128xbf16, #tpu.memory_space<vmem>>, %arg5: memref<512x128xbf16, #tpu.memory_space<vmem>>, %arg6: memref<512x128xf32, #tpu.memory_space<vmem>>) attributes {dimension_semantics = [#tpu.dimension_semantics<parallel>, #tpu.dimension_semantics<parallel>, #tpu.dimension_semantics<arbitrary>], iteration_bounds = array<i64: 4, 1, 1>, scalar_prefetch = 0 : i64, scratch_operands = 1 : i64, tpu.core_type = #tpu.core_type<tc>, window_params = [{transform_indices = @transform_0, window_bounds = array<i64: 512, 128>}, {transform_indices = @transform_1, window_bounds = array<i64: 128, 128>}, {transform_indices = @transform_2, window_bounds = array<i64: 512, 128>}]} {
    %c0_i32 = arith.constant 0 : i32
    %0 = arith.cmpi eq, %arg2, %c0_i32 : i32
    %1 = arith.extui %0 : i1 to i32
    %c0_i32_0 = arith.constant 0 : i32
    %2 = arith.cmpi ne, %1, %c0_i32_0 : i32
    scf.if %2 {
      %cst_10 = arith.constant 0.000000e+00 : f32
      %12 = vector.broadcast %cst_10 : f32 to vector<512x128xf32>
      %c0_11 = arith.constant 0 : index
      %c0_12 = arith.constant 0 : index
      %13 = vector.load %arg6[%c0_11, %c0_12] : memref<512x128xf32, #tpu.memory_space<vmem>>, vector<512x128xf32>
      tpu.vector_store %arg6[%c0_11, %c0_12], %12 {strides = array<i32>} : memref<512x128xf32, #tpu.memory_space<vmem>>, vector<512x128xf32>,
    } else {
    }
    %c0 = arith.constant 0 : index
    %c0_1 = arith.constant 0 : index
    %3 = vector.load %arg6[%c0, %c0_1] : memref<512x128xf32, #tpu.memory_space<vmem>>, vector<512x128xf32>
    %c0_2 = arith.constant 0 : index
    %c0_3 = arith.constant 0 : index
    %4 = vector.load %arg3[%c0_2, %c0_3] : memref<512x128xbf16, #tpu.memory_space<vmem>>, vector<512x128xbf16>
    %c0_4 = arith.constant 0 : index
    %c0_5 = arith.constant 0 : index
    %5 = vector.load %arg4[%c0_4, %c0_5] : memref<128x128xbf16, #tpu.memory_space<vmem>>, vector<128x128xbf16>
    %cst = arith.constant dense<0.000000e+00> : vector<512x128xf32>
    %6 = tpu.matmul %4, %5, %cst {dimension_numbers = #tpu.dot_dimension_numbers<[1], [0], [0], [1], [0, 0, 1, 1], [], []>} : vector<512x128xbf16>, vector<128x128xbf16>, vector<512x128xf32> -> vector<512x128xf32>
    %7 = arith.addf %3, %6 : vector<512x128xf32>
    %c0_6 = arith.constant 0 : index
    %c0_7 = arith.constant 0 : index
    %8 = vector.load %arg6[%c0_6, %c0_7] : memref<512x128xf32, #tpu.memory_space<vmem>>, vector<512x128xf32>
    tpu.vector_store %arg6[%c0_6, %c0_7], %7 {strides = array<i32>} : memref<512x128xf32, #tpu.memory_space<vmem>>, vector<512x128xf32>,
    %c0_i32_8 = arith.constant 0 : i32
    %9 = arith.cmpi eq, %arg2, %c0_i32_8 : i32
    %10 = arith.extui %9 : i1 to i32
    %c0_i32_9 = arith.constant 0 : i32
    %11 = arith.cmpi ne, %10, %c0_i32_9 : i32
    scf.if %11 {
      %c0_10 = arith.constant 0 : index
      %c0_11 = arith.constant 0 : index
      %12 = vector.load %arg6[%c0_10, %c0_11] : memref<512x128xf32, #tpu.memory_space<vmem>>, vector<512x128xf32>
      %cst_12 = arith.constant 0.000000e+00 : f32
      %13 = vector.broadcast %cst_12 : f32 to vector<512x128xf32>
      %14 = arith.cmpf oge, %12, %13 : vector<512x128xf32>
      %cst_13 = arith.constant 2.000000e-01 : f32
      %15 = vector.broadcast %cst_13 : f32 to vector<512x128xf32>
      %16 = arith.mulf %15, %12 : vector<512x128xf32>
      %17 = arith.select %14, %12, %16 : vector<512x128xi1>, vector<512x128xf32>
      %18 = arith.truncf %17 : vector<512x128xf32> to vector<512x128xbf16>
      %c0_14 = arith.constant 0 : index
      %c0_15 = arith.constant 0 : index
      %19 = vector.load %arg5[%c0_14, %c0_15] : memref<512x128xbf16, #tpu.memory_space<vmem>>, vector<512x128xbf16>
      tpu.vector_store %arg5[%c0_14, %c0_15], %18 {strides = array<i32>} : memref<512x128xbf16, #tpu.memory_space<vmem>>, vector<512x128xbf16>,
    } else {
    }
    return
  }
  func.func @transform_0(%arg0: i32, %arg1: i32, %arg2: i32) -> (i32, i32) {
    %c0_i32 = arith.constant 0 : i32
    return %arg0, %arg2 : i32, i32
  }
  func.func @transform_1(%arg0: i32, %arg1: i32, %arg2: i32) -> (i32, i32) {
    %c0_i32 = arith.constant 0 : i32
    return %arg2, %arg1 : i32, i32
  }
  func.func @transform_2(%arg0: i32, %arg1: i32, %arg2: i32) -> (i32, i32) {
    %c0_i32 = arith.constant 0 : i32
    return %arg0, %arg1 : i32, i32
  }
}

module attributes {stable_mosaic.version = 11 : i64} {
  func.func @_matmul_stats_kernel(%arg0: i32, %arg1: i32, %arg2: i32, %arg3: memref<512x1024xbf16, #tpu.memory_space<vmem>>, %arg4: memref<1024x128xbf16, #tpu.memory_space<vmem>>, %arg5: memref<512x128xf32, #tpu.memory_space<vmem>>, %arg6: memref<1x2x128xf32, #tpu.memory_space<vmem>>, %arg7: memref<512x128xf32, #tpu.memory_space<vmem>>) attributes {dimension_semantics = [#tpu.dimension_semantics<parallel>, #tpu.dimension_semantics<parallel>, #tpu.dimension_semantics<arbitrary>], iteration_bounds = array<i64: 1, 1, 2>, scalar_prefetch = 0 : i64, scratch_operands = 1 : i64, tpu.core_type = #tpu.core_type<tc>, window_params = [{transform_indices = @transform_0, window_bounds = array<i64: 512, 1024>}, {transform_indices = @transform_1, window_bounds = array<i64: 1024, 128>}, {transform_indices = @transform_2, window_bounds = array<i64: 512, 128>}, {transform_indices = @transform_3, window_bounds = array<i64: 1, 2, 128>}]} {
    %c0_i32 = arith.constant 0 : i32
    %0 = arith.cmpi eq, %arg2, %c0_i32 : i32
    %1 = arith.extui %0 : i1 to i32
    %c0_i32_0 = arith.constant 0 : i32
    %2 = arith.cmpi ne, %1, %c0_i32_0 : i32
    scf.if %2 {
      %cst_9 = arith.constant 0.000000e+00 : f32
      %12 = vector.broadcast %cst_9 : f32 to vector<512x128xf32>
      %c0_10 = arith.constant 0 : index
      %c0_11 = arith.constant 0 : index
      %13 = vector.load %arg7[%c0_10, %c0_11] : memref<512x128xf32, #tpu.memory_space<vmem>>, vector<512x128xf32>
      tpu.vector_store %arg7[%c0_10, %c0_11], %12 {strides = array<i32>} : memref<512x128xf32, #tpu.memory_space<vmem>>, vector<512x128xf32>,
    } else {
    }
    %c0 = arith.constant 0 : index
    %c0_1 = arith.constant 0 : index
    %3 = vector.load %arg7[%c0, %c0_1] : memref<512x128xf32, #tpu.memory_space<vmem>>, vector<512x128xf32>
    %c0_2 = arith.constant 0 : index
    %c0_3 = arith.constant 0 : index
    %4 = vector.load %arg3[%c0_2, %c0_3] : memref<512x1024xbf16, #tpu.memory_space<vmem>>, vector<512x1024xbf16>
    %c0_4 = arith.constant 0 : index
    %c0_5 = arith.constant 0 : index
    %5 = vector.load %arg4[%c0_4, %c0_5] : memref<1024x128xbf16, #tpu.memory_space<vmem>>, vector<1024x128xbf16>
    %cst = arith.constant dense<0.000000e+00> : vector<512x128xf32>
    %6 = tpu.matmul %4, %5, %cst {dimension_numbers = #tpu.dot_dimension_numbers<[1], [0], [0], [1], [0, 0, 1, 1], [], []>} : vector<512x1024xbf16>, vector<1024x128xbf16>, vector<512x128xf32> -> vector<512x128xf32>
    %7 = arith.addf %3, %6 : vector<512x128xf32>
    %c0_6 = arith.constant 0 : index
    %c0_7 = arith.constant 0 : index
    %8 = vector.load %arg7[%c0_6, %c0_7] : memref<512x128xf32, #tpu.memory_space<vmem>>, vector<512x128xf32>
    tpu.vector_store %arg7[%c0_6, %c0_7], %7 {strides = array<i32>} : memref<512x128xf32, #tpu.memory_space<vmem>>, vector<512x128xf32>,
    %c1_i32 = arith.constant 1 : i32
    %9 = arith.cmpi eq, %arg2, %c1_i32 : i32
    %10 = arith.extui %9 : i1 to i32
    %c0_i32_8 = arith.constant 0 : i32
    %11 = arith.cmpi ne, %10, %c0_i32_8 : i32
    scf.if %11 {
      %c0_9 = arith.constant 0 : index
      %c0_10 = arith.constant 0 : index
      %12 = vector.load %arg7[%c0_9, %c0_10] : memref<512x128xf32, #tpu.memory_space<vmem>>, vector<512x128xf32>
      %c0_11 = arith.constant 0 : index
      %c0_12 = arith.constant 0 : index
      %13 = vector.load %arg5[%c0_11, %c0_12] : memref<512x128xf32, #tpu.memory_space<vmem>>, vector<512x128xf32>
      tpu.vector_store %arg5[%c0_11, %c0_12], %12 {strides = array<i32>} : memref<512x128xf32, #tpu.memory_space<vmem>>, vector<512x128xf32>,
      %cst_13 = arith.constant dense<0.000000e+00> : vector<128xf32>
      %14 = vector.multi_reduction <add>, %12, %cst_13 [0] : vector<512x128xf32> to vector<128xf32>
      %15 = vector.shape_cast %14 : vector<128xf32> to vector<1x128xf32>
      %16 = arith.mulf %12, %12 : vector<512x128xf32>
      %cst_14 = arith.constant dense<0.000000e+00> : vector<128xf32>
      %17 = vector.multi_reduction <add>, %16, %cst_14 [0] : vector<512x128xf32> to vector<128xf32>
      %18 = vector.shape_cast %17 : vector<128xf32> to vector<1x128xf32>
      %19 = tpu.concatenate %15, %18 in 0 : vector<1x128xf32>, vector<1x128xf32> -> vector<2x128xf32>
      %20 = vector.shape_cast %19 : vector<2x128xf32> to vector<1x2x128xf32>
      %c0_15 = arith.constant 0 : index
      %c0_16 = arith.constant 0 : index
      %c0_17 = arith.constant 0 : index
      %21 = vector.load %arg6[%c0_15, %c0_16, %c0_17] : memref<1x2x128xf32, #tpu.memory_space<vmem>>, vector<1x2x128xf32>
      tpu.vector_store %arg6[%c0_15, %c0_16, %c0_17], %20 {strides = array<i32>} : memref<1x2x128xf32, #tpu.memory_space<vmem>>, vector<1x2x128xf32>,
    } else {
    }
    return
  }
  func.func @transform_0(%arg0: i32, %arg1: i32, %arg2: i32) -> (i32, i32) {
    %c0_i32 = arith.constant 0 : i32
    return %arg0, %arg2 : i32, i32
  }
  func.func @transform_1(%arg0: i32, %arg1: i32, %arg2: i32) -> (i32, i32) {
    %c0_i32 = arith.constant 0 : i32
    return %arg2, %arg1 : i32, i32
  }
  func.func @transform_2(%arg0: i32, %arg1: i32, %arg2: i32) -> (i32, i32) {
    %c0_i32 = arith.constant 0 : i32
    return %arg0, %arg1 : i32, i32
  }
  func.func @transform_3(%arg0: i32, %arg1: i32, %arg2: i32) -> (i32, i32, i32) {
    %c0_i32 = arith.constant 0 : i32
    %c0_i32_0 = arith.constant 0 : i32
    return %arg0, %c0_i32, %arg1 : i32, i32, i32
  }
}

module attributes {stable_mosaic.version = 11 : i64} {
  func.func @_bn_lrelu_kernel(%arg0: i32, %arg1: i32, %arg2: memref<512x128xf32, #tpu.memory_space<vmem>>, %arg3: memref<2x128xf32, #tpu.memory_space<vmem>>, %arg4: memref<512x128xbf16, #tpu.memory_space<vmem>>) attributes {dimension_semantics = [#tpu.dimension_semantics<parallel>, #tpu.dimension_semantics<parallel>], iteration_bounds = array<i64: 1, 1>, scalar_prefetch = 0 : i64, scratch_operands = 0 : i64, tpu.core_type = #tpu.core_type<tc>, window_params = [{transform_indices = @transform_0, window_bounds = array<i64: 512, 128>}, {transform_indices = @transform_1, window_bounds = array<i64: 2, 128>}, {transform_indices = @transform_2, window_bounds = array<i64: 512, 128>}]} {
    %c0 = arith.constant 0 : index
    %c0_0 = arith.constant 0 : index
    %0 = vector.load %arg2[%c0, %c0_0] : memref<512x128xf32, #tpu.memory_space<vmem>>, vector<512x128xf32>
    %c0_1 = arith.constant 0 : index
    %c0_2 = arith.constant 0 : index
    %1 = vector.load %arg3[%c0_1, %c0_2] : memref<2x128xf32, #tpu.memory_space<vmem>>, vector<1x128xf32>
    %2 = vector.broadcast %1 : vector<1x128xf32> to vector<512x128xf32>
    %3 = arith.mulf %0, %2 : vector<512x128xf32>
    %c1 = arith.constant 1 : index
    %c0_3 = arith.constant 0 : index
    %4 = vector.load %arg3[%c1, %c0_3] : memref<2x128xf32, #tpu.memory_space<vmem>>, vector<1x128xf32>
    %5 = vector.broadcast %4 : vector<1x128xf32> to vector<512x128xf32>
    %6 = arith.addf %3, %5 : vector<512x128xf32>
    %cst = arith.constant 0.000000e+00 : f32
    %7 = vector.broadcast %cst : f32 to vector<512x128xf32>
    %8 = arith.cmpf oge, %6, %7 : vector<512x128xf32>
    %cst_4 = arith.constant 2.000000e-01 : f32
    %9 = vector.broadcast %cst_4 : f32 to vector<512x128xf32>
    %10 = arith.mulf %9, %6 : vector<512x128xf32>
    %11 = arith.select %8, %6, %10 : vector<512x128xi1>, vector<512x128xf32>
    %12 = arith.truncf %11 : vector<512x128xf32> to vector<512x128xbf16>
    %c0_5 = arith.constant 0 : index
    %c0_6 = arith.constant 0 : index
    %13 = vector.load %arg4[%c0_5, %c0_6] : memref<512x128xbf16, #tpu.memory_space<vmem>>, vector<512x128xbf16>
    tpu.vector_store %arg4[%c0_5, %c0_6], %12 {strides = array<i32>} : memref<512x128xbf16, #tpu.memory_space<vmem>>, vector<512x128xbf16>,
    return
  }
  func.func @transform_0(%arg0: i32, %arg1: i32) -> (i32, i32) {
    %c0_i32 = arith.constant 0 : i32
    return %arg0, %arg1 : i32, i32
  }
  func.func @transform_1(%arg0: i32, %arg1: i32) -> (i32, i32) {
    %c0_i32 = arith.constant 0 : i32
    %c0_i32_0 = arith.constant 0 : i32
    return %c0_i32, %arg1 : i32, i32
  }
  func.func @transform_2(%arg0: i32, %arg1: i32) -> (i32, i32) {
    %c0_i32 = arith.constant 0 : i32
    return %arg0, %arg1 : i32, i32
  }
}

module attributes {stable_mosaic.version = 11 : i64} {
  func.func @_matmul_stats_kernel(%arg0: i32, %arg1: i32, %arg2: i32, %arg3: memref<128x1024xbf16, #tpu.memory_space<vmem>>, %arg4: memref<1024x128xbf16, #tpu.memory_space<vmem>>, %arg5: memref<128x128xf32, #tpu.memory_space<vmem>>, %arg6: memref<1x2x128xf32, #tpu.memory_space<vmem>>, %arg7: memref<128x128xf32, #tpu.memory_space<vmem>>) attributes {dimension_semantics = [#tpu.dimension_semantics<parallel>, #tpu.dimension_semantics<parallel>, #tpu.dimension_semantics<arbitrary>], iteration_bounds = array<i64: 1, 1, 2>, scalar_prefetch = 0 : i64, scratch_operands = 1 : i64, tpu.core_type = #tpu.core_type<tc>, window_params = [{transform_indices = @transform_0, window_bounds = array<i64: 128, 1024>}, {transform_indices = @transform_1, window_bounds = array<i64: 1024, 128>}, {transform_indices = @transform_2, window_bounds = array<i64: 128, 128>}, {transform_indices = @transform_3, window_bounds = array<i64: 1, 2, 128>}]} {
    %c0_i32 = arith.constant 0 : i32
    %0 = arith.cmpi eq, %arg2, %c0_i32 : i32
    %1 = arith.extui %0 : i1 to i32
    %c0_i32_0 = arith.constant 0 : i32
    %2 = arith.cmpi ne, %1, %c0_i32_0 : i32
    scf.if %2 {
      %cst_9 = arith.constant 0.000000e+00 : f32
      %12 = vector.broadcast %cst_9 : f32 to vector<128x128xf32>
      %c0_10 = arith.constant 0 : index
      %c0_11 = arith.constant 0 : index
      %13 = vector.load %arg7[%c0_10, %c0_11] : memref<128x128xf32, #tpu.memory_space<vmem>>, vector<128x128xf32>
      tpu.vector_store %arg7[%c0_10, %c0_11], %12 {strides = array<i32>} : memref<128x128xf32, #tpu.memory_space<vmem>>, vector<128x128xf32>,
    } else {
    }
    %c0 = arith.constant 0 : index
    %c0_1 = arith.constant 0 : index
    %3 = vector.load %arg7[%c0, %c0_1] : memref<128x128xf32, #tpu.memory_space<vmem>>, vector<128x128xf32>
    %c0_2 = arith.constant 0 : index
    %c0_3 = arith.constant 0 : index
    %4 = vector.load %arg3[%c0_2, %c0_3] : memref<128x1024xbf16, #tpu.memory_space<vmem>>, vector<128x1024xbf16>
    %c0_4 = arith.constant 0 : index
    %c0_5 = arith.constant 0 : index
    %5 = vector.load %arg4[%c0_4, %c0_5] : memref<1024x128xbf16, #tpu.memory_space<vmem>>, vector<1024x128xbf16>
    %cst = arith.constant dense<0.000000e+00> : vector<128x128xf32>
    %6 = tpu.matmul %4, %5, %cst {dimension_numbers = #tpu.dot_dimension_numbers<[1], [0], [0], [1], [0, 0, 1, 1], [], []>} : vector<128x1024xbf16>, vector<1024x128xbf16>, vector<128x128xf32> -> vector<128x128xf32>
    %7 = arith.addf %3, %6 : vector<128x128xf32>
    %c0_6 = arith.constant 0 : index
    %c0_7 = arith.constant 0 : index
    %8 = vector.load %arg7[%c0_6, %c0_7] : memref<128x128xf32, #tpu.memory_space<vmem>>, vector<128x128xf32>
    tpu.vector_store %arg7[%c0_6, %c0_7], %7 {strides = array<i32>} : memref<128x128xf32, #tpu.memory_space<vmem>>, vector<128x128xf32>,
    %c1_i32 = arith.constant 1 : i32
    %9 = arith.cmpi eq, %arg2, %c1_i32 : i32
    %10 = arith.extui %9 : i1 to i32
    %c0_i32_8 = arith.constant 0 : i32
    %11 = arith.cmpi ne, %10, %c0_i32_8 : i32
    scf.if %11 {
      %c0_9 = arith.constant 0 : index
      %c0_10 = arith.constant 0 : index
      %12 = vector.load %arg7[%c0_9, %c0_10] : memref<128x128xf32, #tpu.memory_space<vmem>>, vector<128x128xf32>
      %c0_11 = arith.constant 0 : index
      %c0_12 = arith.constant 0 : index
      %13 = vector.load %arg5[%c0_11, %c0_12] : memref<128x128xf32, #tpu.memory_space<vmem>>, vector<128x128xf32>
      tpu.vector_store %arg5[%c0_11, %c0_12], %12 {strides = array<i32>} : memref<128x128xf32, #tpu.memory_space<vmem>>, vector<128x128xf32>,
      %cst_13 = arith.constant dense<0.000000e+00> : vector<128xf32>
      %14 = vector.multi_reduction <add>, %12, %cst_13 [0] : vector<128x128xf32> to vector<128xf32>
      %15 = vector.shape_cast %14 : vector<128xf32> to vector<1x128xf32>
      %16 = arith.mulf %12, %12 : vector<128x128xf32>
      %cst_14 = arith.constant dense<0.000000e+00> : vector<128xf32>
      %17 = vector.multi_reduction <add>, %16, %cst_14 [0] : vector<128x128xf32> to vector<128xf32>
      %18 = vector.shape_cast %17 : vector<128xf32> to vector<1x128xf32>
      %19 = tpu.concatenate %15, %18 in 0 : vector<1x128xf32>, vector<1x128xf32> -> vector<2x128xf32>
      %20 = vector.shape_cast %19 : vector<2x128xf32> to vector<1x2x128xf32>
      %c0_15 = arith.constant 0 : index
      %c0_16 = arith.constant 0 : index
      %c0_17 = arith.constant 0 : index
      %21 = vector.load %arg6[%c0_15, %c0_16, %c0_17] : memref<1x2x128xf32, #tpu.memory_space<vmem>>, vector<1x2x128xf32>
      tpu.vector_store %arg6[%c0_15, %c0_16, %c0_17], %20 {strides = array<i32>} : memref<1x2x128xf32, #tpu.memory_space<vmem>>, vector<1x2x128xf32>,
    } else {
    }
    return
  }
  func.func @transform_0(%arg0: i32, %arg1: i32, %arg2: i32) -> (i32, i32) {
    %c0_i32 = arith.constant 0 : i32
    return %arg0, %arg2 : i32, i32
  }
  func.func @transform_1(%arg0: i32, %arg1: i32, %arg2: i32) -> (i32, i32) {
    %c0_i32 = arith.constant 0 : i32
    return %arg2, %arg1 : i32, i32
  }
  func.func @transform_2(%arg0: i32, %arg1: i32, %arg2: i32) -> (i32, i32) {
    %c0_i32 = arith.constant 0 : i32
    return %arg0, %arg1 : i32, i32
  }
  func.func @transform_3(%arg0: i32, %arg1: i32, %arg2: i32) -> (i32, i32, i32) {
    %c0_i32 = arith.constant 0 : i32
    %c0_i32_0 = arith.constant 0 : i32
    return %arg0, %c0_i32, %arg1 : i32, i32, i32
  }
}

module attributes {stable_mosaic.version = 11 : i64} {
  func.func @_bn_lrelu_kernel(%arg0: i32, %arg1: i32, %arg2: memref<128x128xf32, #tpu.memory_space<vmem>>, %arg3: memref<2x128xf32, #tpu.memory_space<vmem>>, %arg4: memref<128x128xbf16, #tpu.memory_space<vmem>>) attributes {dimension_semantics = [#tpu.dimension_semantics<parallel>, #tpu.dimension_semantics<parallel>], iteration_bounds = array<i64: 1, 1>, scalar_prefetch = 0 : i64, scratch_operands = 0 : i64, tpu.core_type = #tpu.core_type<tc>, window_params = [{transform_indices = @transform_0, window_bounds = array<i64: 128, 128>}, {transform_indices = @transform_1, window_bounds = array<i64: 2, 128>}, {transform_indices = @transform_2, window_bounds = array<i64: 128, 128>}]} {
    %c0 = arith.constant 0 : index
    %c0_0 = arith.constant 0 : index
    %0 = vector.load %arg2[%c0, %c0_0] : memref<128x128xf32, #tpu.memory_space<vmem>>, vector<128x128xf32>
    %c0_1 = arith.constant 0 : index
    %c0_2 = arith.constant 0 : index
    %1 = vector.load %arg3[%c0_1, %c0_2] : memref<2x128xf32, #tpu.memory_space<vmem>>, vector<1x128xf32>
    %2 = vector.broadcast %1 : vector<1x128xf32> to vector<128x128xf32>
    %3 = arith.mulf %0, %2 : vector<128x128xf32>
    %c1 = arith.constant 1 : index
    %c0_3 = arith.constant 0 : index
    %4 = vector.load %arg3[%c1, %c0_3] : memref<2x128xf32, #tpu.memory_space<vmem>>, vector<1x128xf32>
    %5 = vector.broadcast %4 : vector<1x128xf32> to vector<128x128xf32>
    %6 = arith.addf %3, %5 : vector<128x128xf32>
    %cst = arith.constant 0.000000e+00 : f32
    %7 = vector.broadcast %cst : f32 to vector<128x128xf32>
    %8 = arith.cmpf oge, %6, %7 : vector<128x128xf32>
    %cst_4 = arith.constant 2.000000e-01 : f32
    %9 = vector.broadcast %cst_4 : f32 to vector<128x128xf32>
    %10 = arith.mulf %9, %6 : vector<128x128xf32>
    %11 = arith.select %8, %6, %10 : vector<128x128xi1>, vector<128x128xf32>
    %12 = arith.truncf %11 : vector<128x128xf32> to vector<128x128xbf16>
    %c0_5 = arith.constant 0 : index
    %c0_6 = arith.constant 0 : index
    %13 = vector.load %arg4[%c0_5, %c0_6] : memref<128x128xbf16, #tpu.memory_space<vmem>>, vector<128x128xbf16>
    tpu.vector_store %arg4[%c0_5, %c0_6], %12 {strides = array<i32>} : memref<128x128xbf16, #tpu.memory_space<vmem>>, vector<128x128xbf16>,
    return
  }
  func.func @transform_0(%arg0: i32, %arg1: i32) -> (i32, i32) {
    %c0_i32 = arith.constant 0 : i32
    return %arg0, %arg1 : i32, i32
  }
  func.func @transform_1(%arg0: i32, %arg1: i32) -> (i32, i32) {
    %c0_i32 = arith.constant 0 : i32
    %c0_i32_0 = arith.constant 0 : i32
    return %c0_i32, %arg1 : i32, i32
  }
  func.func @transform_2(%arg0: i32, %arg1: i32) -> (i32, i32) {
    %c0_i32 = arith.constant 0 : i32
    return %arg0, %arg1 : i32, i32
  }
}

module attributes {stable_mosaic.version = 11 : i64} {
  func.func @_bn_lrelu_kernel(%arg0: i32, %arg1: i32, %arg2: memref<32x128xf32, #tpu.memory_space<vmem>>, %arg3: memref<2x128xf32, #tpu.memory_space<vmem>>, %arg4: memref<32x128xbf16, #tpu.memory_space<vmem>>) attributes {dimension_semantics = [#tpu.dimension_semantics<parallel>, #tpu.dimension_semantics<parallel>], iteration_bounds = array<i64: 1, 1>, scalar_prefetch = 0 : i64, scratch_operands = 0 : i64, tpu.core_type = #tpu.core_type<tc>, window_params = [{transform_indices = @transform_0, window_bounds = array<i64: 32, 128>}, {transform_indices = @transform_1, window_bounds = array<i64: 2, 128>}, {transform_indices = @transform_2, window_bounds = array<i64: 32, 128>}]} {
    %c0 = arith.constant 0 : index
    %c0_0 = arith.constant 0 : index
    %0 = vector.load %arg2[%c0, %c0_0] : memref<32x128xf32, #tpu.memory_space<vmem>>, vector<32x128xf32>
    %c0_1 = arith.constant 0 : index
    %c0_2 = arith.constant 0 : index
    %1 = vector.load %arg3[%c0_1, %c0_2] : memref<2x128xf32, #tpu.memory_space<vmem>>, vector<1x128xf32>
    %2 = vector.broadcast %1 : vector<1x128xf32> to vector<32x128xf32>
    %3 = arith.mulf %0, %2 : vector<32x128xf32>
    %c1 = arith.constant 1 : index
    %c0_3 = arith.constant 0 : index
    %4 = vector.load %arg3[%c1, %c0_3] : memref<2x128xf32, #tpu.memory_space<vmem>>, vector<1x128xf32>
    %5 = vector.broadcast %4 : vector<1x128xf32> to vector<32x128xf32>
    %6 = arith.addf %3, %5 : vector<32x128xf32>
    %cst = arith.constant 0.000000e+00 : f32
    %7 = vector.broadcast %cst : f32 to vector<32x128xf32>
    %8 = arith.cmpf oge, %6, %7 : vector<32x128xf32>
    %cst_4 = arith.constant 2.000000e-01 : f32
    %9 = vector.broadcast %cst_4 : f32 to vector<32x128xf32>
    %10 = arith.mulf %9, %6 : vector<32x128xf32>
    %11 = arith.select %8, %6, %10 : vector<32x128xi1>, vector<32x128xf32>
    %12 = arith.truncf %11 : vector<32x128xf32> to vector<32x128xbf16>
    %c0_5 = arith.constant 0 : index
    %c0_6 = arith.constant 0 : index
    %13 = vector.load %arg4[%c0_5, %c0_6] : memref<32x128xbf16, #tpu.memory_space<vmem>>, vector<32x128xbf16>
    tpu.vector_store %arg4[%c0_5, %c0_6], %12 {strides = array<i32>} : memref<32x128xbf16, #tpu.memory_space<vmem>>, vector<32x128xbf16>,
    return
  }
  func.func @transform_0(%arg0: i32, %arg1: i32) -> (i32, i32) {
    %c0_i32 = arith.constant 0 : i32
    return %arg0, %arg1 : i32, i32
  }
  func.func @transform_1(%arg0: i32, %arg1: i32) -> (i32, i32) {
    %c0_i32 = arith.constant 0 : i32
    %c0_i32_0 = arith.constant 0 : i32
    return %c0_i32, %arg1 : i32, i32
  }
  func.func @transform_2(%arg0: i32, %arg1: i32) -> (i32, i32) {
    %c0_i32 = arith.constant 0 : i32
    return %arg0, %arg1 : i32, i32
  }
}

module attributes {stable_mosaic.version = 11 : i64} {
  func.func @_matmul_stats_kernel(%arg0: i32, %arg1: i32, %arg2: i32, %arg3: memref<32x1024xbf16, #tpu.memory_space<vmem>>, %arg4: memref<1024x128xbf16, #tpu.memory_space<vmem>>, %arg5: memref<32x128xf32, #tpu.memory_space<vmem>>, %arg6: memref<1x2x128xf32, #tpu.memory_space<vmem>>, %arg7: memref<32x128xf32, #tpu.memory_space<vmem>>) attributes {dimension_semantics = [#tpu.dimension_semantics<parallel>, #tpu.dimension_semantics<parallel>, #tpu.dimension_semantics<arbitrary>], iteration_bounds = array<i64: 1, 1, 2>, scalar_prefetch = 0 : i64, scratch_operands = 1 : i64, tpu.core_type = #tpu.core_type<tc>, window_params = [{transform_indices = @transform_0, window_bounds = array<i64: 32, 1024>}, {transform_indices = @transform_1, window_bounds = array<i64: 1024, 128>}, {transform_indices = @transform_2, window_bounds = array<i64: 32, 128>}, {transform_indices = @transform_3, window_bounds = array<i64: 1, 2, 128>}]} {
    %c0_i32 = arith.constant 0 : i32
    %0 = arith.cmpi eq, %arg2, %c0_i32 : i32
    %1 = arith.extui %0 : i1 to i32
    %c0_i32_0 = arith.constant 0 : i32
    %2 = arith.cmpi ne, %1, %c0_i32_0 : i32
    scf.if %2 {
      %cst_9 = arith.constant 0.000000e+00 : f32
      %12 = vector.broadcast %cst_9 : f32 to vector<32x128xf32>
      %c0_10 = arith.constant 0 : index
      %c0_11 = arith.constant 0 : index
      %13 = vector.load %arg7[%c0_10, %c0_11] : memref<32x128xf32, #tpu.memory_space<vmem>>, vector<32x128xf32>
      tpu.vector_store %arg7[%c0_10, %c0_11], %12 {strides = array<i32>} : memref<32x128xf32, #tpu.memory_space<vmem>>, vector<32x128xf32>,
    } else {
    }
    %c0 = arith.constant 0 : index
    %c0_1 = arith.constant 0 : index
    %3 = vector.load %arg7[%c0, %c0_1] : memref<32x128xf32, #tpu.memory_space<vmem>>, vector<32x128xf32>
    %c0_2 = arith.constant 0 : index
    %c0_3 = arith.constant 0 : index
    %4 = vector.load %arg3[%c0_2, %c0_3] : memref<32x1024xbf16, #tpu.memory_space<vmem>>, vector<32x1024xbf16>
    %c0_4 = arith.constant 0 : index
    %c0_5 = arith.constant 0 : index
    %5 = vector.load %arg4[%c0_4, %c0_5] : memref<1024x128xbf16, #tpu.memory_space<vmem>>, vector<1024x128xbf16>
    %cst = arith.constant dense<0.000000e+00> : vector<32x128xf32>
    %6 = tpu.matmul %4, %5, %cst {dimension_numbers = #tpu.dot_dimension_numbers<[1], [0], [0], [1], [0, 0, 1, 1], [], []>} : vector<32x1024xbf16>, vector<1024x128xbf16>, vector<32x128xf32> -> vector<32x128xf32>
    %7 = arith.addf %3, %6 : vector<32x128xf32>
    %c0_6 = arith.constant 0 : index
    %c0_7 = arith.constant 0 : index
    %8 = vector.load %arg7[%c0_6, %c0_7] : memref<32x128xf32, #tpu.memory_space<vmem>>, vector<32x128xf32>
    tpu.vector_store %arg7[%c0_6, %c0_7], %7 {strides = array<i32>} : memref<32x128xf32, #tpu.memory_space<vmem>>, vector<32x128xf32>,
    %c1_i32 = arith.constant 1 : i32
    %9 = arith.cmpi eq, %arg2, %c1_i32 : i32
    %10 = arith.extui %9 : i1 to i32
    %c0_i32_8 = arith.constant 0 : i32
    %11 = arith.cmpi ne, %10, %c0_i32_8 : i32
    scf.if %11 {
      %c0_9 = arith.constant 0 : index
      %c0_10 = arith.constant 0 : index
      %12 = vector.load %arg7[%c0_9, %c0_10] : memref<32x128xf32, #tpu.memory_space<vmem>>, vector<32x128xf32>
      %c0_11 = arith.constant 0 : index
      %c0_12 = arith.constant 0 : index
      %13 = vector.load %arg5[%c0_11, %c0_12] : memref<32x128xf32, #tpu.memory_space<vmem>>, vector<32x128xf32>
      tpu.vector_store %arg5[%c0_11, %c0_12], %12 {strides = array<i32>} : memref<32x128xf32, #tpu.memory_space<vmem>>, vector<32x128xf32>,
      %cst_13 = arith.constant dense<0.000000e+00> : vector<128xf32>
      %14 = vector.multi_reduction <add>, %12, %cst_13 [0] : vector<32x128xf32> to vector<128xf32>
      %15 = vector.shape_cast %14 : vector<128xf32> to vector<1x128xf32>
      %16 = arith.mulf %12, %12 : vector<32x128xf32>
      %cst_14 = arith.constant dense<0.000000e+00> : vector<128xf32>
      %17 = vector.multi_reduction <add>, %16, %cst_14 [0] : vector<32x128xf32> to vector<128xf32>
      %18 = vector.shape_cast %17 : vector<128xf32> to vector<1x128xf32>
      %19 = tpu.concatenate %15, %18 in 0 : vector<1x128xf32>, vector<1x128xf32> -> vector<2x128xf32>
      %20 = vector.shape_cast %19 : vector<2x128xf32> to vector<1x2x128xf32>
      %c0_15 = arith.constant 0 : index
      %c0_16 = arith.constant 0 : index
      %c0_17 = arith.constant 0 : index
      %21 = vector.load %arg6[%c0_15, %c0_16, %c0_17] : memref<1x2x128xf32, #tpu.memory_space<vmem>>, vector<1x2x128xf32>
      tpu.vector_store %arg6[%c0_15, %c0_16, %c0_17], %20 {strides = array<i32>} : memref<1x2x128xf32, #tpu.memory_space<vmem>>, vector<1x2x128xf32>,
    } else {
    }
    return
  }
  func.func @transform_0(%arg0: i32, %arg1: i32, %arg2: i32) -> (i32, i32) {
    %c0_i32 = arith.constant 0 : i32
    return %arg0, %arg2 : i32, i32
  }
  func.func @transform_1(%arg0: i32, %arg1: i32, %arg2: i32) -> (i32, i32) {
    %c0_i32 = arith.constant 0 : i32
    return %arg2, %arg1 : i32, i32
  }
  func.func @transform_2(%arg0: i32, %arg1: i32, %arg2: i32) -> (i32, i32) {
    %c0_i32 = arith.constant 0 : i32
    return %arg0, %arg1 : i32, i32
  }
  func.func @transform_3(%arg0: i32, %arg1: i32, %arg2: i32) -> (i32, i32, i32) {
    %c0_i32 = arith.constant 0 : i32
    %c0_i32_0 = arith.constant 0 : i32
    return %arg0, %c0_i32, %arg1 : i32, i32, i32
  }
}

module attributes {stable_mosaic.version = 11 : i64} {
  func.func @_tail_kernel(%arg0: i32, %arg1: memref<2x2048xbf16, #tpu.memory_space<vmem>>, %arg2: memref<2x1xf32, #tpu.memory_space<vmem>>, %arg3: memref<2048x16xbf16, #tpu.memory_space<vmem>>, %arg4: memref<1x16xf32, #tpu.memory_space<vmem>>, %arg5: memref<16x32xbf16, #tpu.memory_space<vmem>>, %arg6: memref<1x32xf32, #tpu.memory_space<vmem>>, %arg7: memref<1x32xf32, #tpu.memory_space<vmem>>, %arg8: memref<32x128xbf16, #tpu.memory_space<vmem>>, %arg9: memref<1x128xf32, #tpu.memory_space<vmem>>, %arg10: memref<2x128xf32, #tpu.memory_space<vmem>>) attributes {dimension_semantics = [#tpu.dimension_semantics<arbitrary>], iteration_bounds = array<i64: 1>, scalar_prefetch = 0 : i64, scratch_operands = 0 : i64, tpu.core_type = #tpu.core_type<tc>, window_params = [{pipeline_mode = #tpu.pipeline_mode<synchronous>, transform_indices = @transform_0, window_bounds = array<i64: 2, 2048>}, {pipeline_mode = #tpu.pipeline_mode<synchronous>, transform_indices = @transform_1, window_bounds = array<i64: 2, 1>}, {pipeline_mode = #tpu.pipeline_mode<synchronous>, transform_indices = @transform_2, window_bounds = array<i64: 2048, 16>}, {pipeline_mode = #tpu.pipeline_mode<synchronous>, transform_indices = @transform_3, window_bounds = array<i64: 1, 16>}, {pipeline_mode = #tpu.pipeline_mode<synchronous>, transform_indices = @transform_4, window_bounds = array<i64: 16, 32>}, {pipeline_mode = #tpu.pipeline_mode<synchronous>, transform_indices = @transform_5, window_bounds = array<i64: 1, 32>}, {pipeline_mode = #tpu.pipeline_mode<synchronous>, transform_indices = @transform_6, window_bounds = array<i64: 1, 32>}, {pipeline_mode = #tpu.pipeline_mode<synchronous>, transform_indices = @transform_7, window_bounds = array<i64: 32, 128>}, {pipeline_mode = #tpu.pipeline_mode<synchronous>, transform_indices = @transform_8, window_bounds = array<i64: 1, 128>}, {pipeline_mode = #tpu.pipeline_mode<synchronous>, transform_indices = @transform_9, window_bounds = array<i64: 2, 128>}]} {
    %c0 = arith.constant 0 : index
    %c0_0 = arith.constant 0 : index
    %0 = vector.load %arg1[%c0, %c0_0] : memref<2x2048xbf16, #tpu.memory_space<vmem>>, vector<2x2048xbf16>
    %c0_1 = arith.constant 0 : index
    %c0_2 = arith.constant 0 : index
    %1 = vector.load %arg3[%c0_1, %c0_2] : memref<2048x16xbf16, #tpu.memory_space<vmem>>, vector<2048x16xbf16>
    %cst = arith.constant dense<0.000000e+00> : vector<2x16xf32>
    %2 = tpu.matmul %0, %1, %cst {dimension_numbers = #tpu.dot_dimension_numbers<[1], [0], [0], [1], [0, 0, 1, 1], [], []>} : vector<2x2048xbf16>, vector<2048x16xbf16>, vector<2x16xf32> -> vector<2x16xf32>
    %c0_3 = arith.constant 0 : index
    %c0_4 = arith.constant 0 : index
    %3 = vector.load %arg4[%c0_3, %c0_4] : memref<1x16xf32, #tpu.memory_space<vmem>>, vector<1x16xf32>
    %4 = vector.broadcast %3 : vector<1x16xf32> to vector<2x16xf32>
    %5 = arith.addf %2, %4 : vector<2x16xf32>
    %cst_5 = arith.constant 0.000000e+00 : f32
    %6 = vector.broadcast %cst_5 : f32 to vector<2x16xf32>
    %7 = arith.cmpf oge, %5, %6 : vector<2x16xf32>
    %cst_6 = arith.constant 2.000000e-01 : f32
    %8 = vector.broadcast %cst_6 : f32 to vector<2x16xf32>
    %9 = arith.mulf %8, %5 : vector<2x16xf32>
    %10 = arith.select %7, %5, %9 : vector<2x16xi1>, vector<2x16xf32>
    %11 = arith.truncf %10 : vector<2x16xf32> to vector<2x16xbf16>
    %c0_7 = arith.constant 0 : index
    %c0_8 = arith.constant 0 : index
    %12 = vector.load %arg5[%c0_7, %c0_8] : memref<16x32xbf16, #tpu.memory_space<vmem>>, vector<16x32xbf16>
    %cst_9 = arith.constant dense<0.000000e+00> : vector<2x32xf32>
    %13 = tpu.matmul %11, %12, %cst_9 {dimension_numbers = #tpu.dot_dimension_numbers<[1], [0], [0], [1], [0, 0, 1, 1], [], []>} : vector<2x16xbf16>, vector<16x32xbf16>, vector<2x32xf32> -> vector<2x32xf32>
    %c0_10 = arith.constant 0 : index
    %c0_11 = arith.constant 0 : index
    %14 = vector.load %arg2[%c0_10, %c0_11] : memref<2x1xf32, #tpu.memory_space<vmem>>, vector<2x1xf32>
    %c0_12 = arith.constant 0 : index
    %c0_13 = arith.constant 0 : index
    %15 = vector.load %arg6[%c0_12, %c0_13] : memref<1x32xf32, #tpu.memory_space<vmem>>, vector<1x32xf32>
    %16 = vector.broadcast %14 : vector<2x1xf32> to vector<2x32xf32>
    %17 = vector.broadcast %15 : vector<1x32xf32> to vector<2x32xf32>
    %18 = arith.mulf %16, %17 : vector<2x32xf32>
    %19 = arith.addf %13, %18 : vector<2x32xf32>
    %c0_14 = arith.constant 0 : index
    %c0_15 = arith.constant 0 : index
    %20 = vector.load %arg7[%c0_14, %c0_15] : memref<1x32xf32, #tpu.memory_space<vmem>>, vector<1x32xf32>
    %21 = vector.broadcast %20 : vector<1x32xf32> to vector<2x32xf32>
    %22 = arith.addf %19, %21 : vector<2x32xf32>
    %cst_16 = arith.constant 0.000000e+00 : f32
    %23 = vector.broadcast %cst_16 : f32 to vector<2x32xf32>
    %24 = arith.maximumf %22, %23 : vector<2x32xf32>
    %25 = arith.truncf %24 : vector<2x32xf32> to vector<2x32xbf16>
    %c0_17 = arith.constant 0 : index
    %c0_18 = arith.constant 0 : index
    %26 = vector.load %arg8[%c0_17, %c0_18] : memref<32x128xbf16, #tpu.memory_space<vmem>>, vector<32x128xbf16>
    %cst_19 = arith.constant dense<0.000000e+00> : vector<2x128xf32>
    %27 = tpu.matmul %25, %26, %cst_19 {dimension_numbers = #tpu.dot_dimension_numbers<[1], [0], [0], [1], [0, 0, 1, 1], [], []>} : vector<2x32xbf16>, vector<32x128xbf16>, vector<2x128xf32> -> vector<2x128xf32>
    %c0_20 = arith.constant 0 : index
    %c0_21 = arith.constant 0 : index
    %28 = vector.load %arg9[%c0_20, %c0_21] : memref<1x128xf32, #tpu.memory_space<vmem>>, vector<1x128xf32>
    %29 = vector.broadcast %28 : vector<1x128xf32> to vector<2x128xf32>
    %30 = arith.addf %27, %29 : vector<2x128xf32>
    %c0_22 = arith.constant 0 : index
    %c0_23 = arith.constant 0 : index
    %31 = vector.load %arg10[%c0_22, %c0_23] : memref<2x128xf32, #tpu.memory_space<vmem>>, vector<2x128xf32>
    tpu.vector_store %arg10[%c0_22, %c0_23], %30 {strides = array<i32>} : memref<2x128xf32, #tpu.memory_space<vmem>>, vector<2x128xf32>,
    return
  }
  func.func @transform_0(%arg0: i32) -> (i32, i32) {
    %c0_i32 = arith.constant 0 : i32
    %c0_i32_0 = arith.constant 0 : i32
    %c0_i32_1 = arith.constant 0 : i32
    return %c0_i32, %c0_i32_0 : i32, i32
  }
  func.func @transform_1(%arg0: i32) -> (i32, i32) {
    %c0_i32 = arith.constant 0 : i32
    %c0_i32_0 = arith.constant 0 : i32
    %c0_i32_1 = arith.constant 0 : i32
    return %c0_i32, %c0_i32_0 : i32, i32
  }
  func.func @transform_2(%arg0: i32) -> (i32, i32) {
    %c0_i32 = arith.constant 0 : i32
    %c0_i32_0 = arith.constant 0 : i32
    %c0_i32_1 = arith.constant 0 : i32
    return %c0_i32, %c0_i32_0 : i32, i32
  }
  func.func @transform_3(%arg0: i32) -> (i32, i32) {
    %c0_i32 = arith.constant 0 : i32
    %c0_i32_0 = arith.constant 0 : i32
    %c0_i32_1 = arith.constant 0 : i32
    return %c0_i32, %c0_i32_0 : i32, i32
  }
  func.func @transform_4(%arg0: i32) -> (i32, i32) {
    %c0_i32 = arith.constant 0 : i32
    %c0_i32_0 = arith.constant 0 : i32
    %c0_i32_1 = arith.constant 0 : i32
    return %c0_i32, %c0_i32_0 : i32, i32
  }
  func.func @transform_5(%arg0: i32) -> (i32, i32) {
    %c0_i32 = arith.constant 0 : i32
    %c0_i32_0 = arith.constant 0 : i32
    %c0_i32_1 = arith.constant 0 : i32
    return %c0_i32, %c0_i32_0 : i32, i32
  }
  func.func @transform_6(%arg0: i32) -> (i32, i32) {
    %c0_i32 = arith.constant 0 : i32
    %c0_i32_0 = arith.constant 0 : i32
    %c0_i32_1 = arith.constant 0 : i32
    return %c0_i32, %c0_i32_0 : i32, i32
  }
  func.func @transform_7(%arg0: i32) -> (i32, i32) {
    %c0_i32 = arith.constant 0 : i32
    %c0_i32_0 = arith.constant 0 : i32
    %c0_i32_1 = arith.constant 0 : i32
    return %c0_i32, %c0_i32_0 : i32, i32
  }
  func.func @transform_8(%arg0: i32) -> (i32, i32) {
    %c0_i32 = arith.constant 0 : i32
    %c0_i32_0 = arith.constant 0 : i32
    %c0_i32_1 = arith.constant 0 : i32
    return %c0_i32, %c0_i32_0 : i32, i32
  }
  func.func @transform_9(%arg0: i32) -> (i32, i32) {
    %c0_i32 = arith.constant 0 : i32
    %c0_i32_0 = arith.constant 0 : i32
    %c0_i32_1 = arith.constant 0 : i32
    return %c0_i32, %c0_i32_0 : i32, i32
  }
}

</mosaic_0001>

<bundles_post_ra>
// kernel: discriminator_critic_forward.8
= control target key start
LH: loop header
LB: loop body
LE: loop exit
PB: predicated region body
PF: predicated region fallthrough
CT: control target
= control target key end

     0   :  { %s2376_s9 = smov 0   ;;  %s2378_s10 = smov 0   ;;  %s2515_s0 = inlined_call_operand.vmem [shape: bf16[2048,128], index: 0, kind: input, shape index: {}]   ;;  %s2516_s1 = inlined_call_operand.vmem [shape: bf16[128,128], index: 1, kind: input, shape index: {}]   ;;  %s2517_s2 = inlined_call_operand.vmem [shape: bf16[2048,128], index: 2, kind: output, shape index: {}]  }
   0x1   :  { %s2380_s11 = smov 0  }
   0x2 LB: > { %s31_s12 = sadd.s32 1, %s2355_s10  ;;  %p1771_p0 = scmp.ge.s32.totalorder %s2359_s11, 1  ;;  %s2359_s11 = sphi %s2380_s11, %s12_s11   ;;  %s2355_s10 = sphi %s2378_s10, %s2519_s10   ;;  %s2351_s9 = sphi %s2376_s9, %s2518_s9  }
   0x3   : > { %p33_p1 = scmp.ge.s32.totalorder %s31_s12, 4  ;;  %p155_p2 = scmp.lt.s32.totalorder %s2359_s11, 5 }
   0x5   : > { %s2521_s12 = smov (%p33_p1, %s31_s12), 0  ;;  %p156_p3 = pnand %p1771_p0, %p155_p2 }
   0x6   : > { %v2297_v0 = vld [vmem:[%s2516_s1] sm:$0xff] (!%p156_p3)   ;;  %s1772_s15 = sshll.u32 (!%p156_p3), %s2351_s9, 6  ;;  %v2298_v1 = vld [vmem:[%s2516_s1 + $0x8] sm:$0xff] (!%p156_p3)   ;;  %v2299_v2 = vld [vmem:[%s2516_s1 + $0x10] sm:$0xff] (!%p156_p3)  }
   0x7   : > { %159 = sbr.rel (%p156_p3) target bundleno = 318 (0x13e), region = 28  ;;  %p192_p4 = scmp.lt.s32.totalorder (!%p156_p3), %s1772_s15, 255  ;;  %2177 = vmatprep.subr.bf16.mxu0 (!%p156_p3), %v2297_v0  ;;  %2257 = vmatprep.subr.bf16.mxu1 (!%p156_p3), %v2297_v0  ;;  %v2300_v3 = vld [vmem:[%s2516_s1 + $0x18] sm:$0xff] (!%p156_p3)   ;;  %v2301_v6 = vld [vmem:[%s2516_s1 + $0x20] sm:$0xff] (!%p156_p3)   ;;  %v2302_v7 = vld [vmem:[%s2516_s1 + $0x28] sm:$0xff] (!%p156_p3)  }
   0x8   : > { %2178 = vmatpush3.bf16.msra.mxu0 (!%p156_p3), %v2297_v0  ;;  %2265 = vmatpush3.bf16.msra.mxu1 (!%p156_p3), %v2297_v0  ;;  %v2303_v8 = vld [vmem:[%s2516_s1 + $0x30] sm:$0xff] (!%p156_p3)   ;;  %v2304_v9 = vld [vmem:[%s2516_s1 + $0x38] sm:$0xff] (!%p156_p3)  }
   0x9   : > { %2179 = vmatprep.subr.bf16.mxu0 (!%p156_p3), %v2298_v1  ;;  %2258 = vmatprep.subr.bf16.mxu1 (!%p156_p3), %v2298_v1 }
   0xc   : > { %2180 = vmatpush3.bf16.msra.mxu0 (!%p156_p3), %v2298_v1  ;;  %2266 = vmatpush3.bf16.msra.mxu1 (!%p156_p3), %v2298_v1 }
   0xd   : > { %2181 = vmatprep.subr.bf16.mxu0 (!%p156_p3), %v2299_v2  ;;  %2259 = vmatprep.subr.bf16.mxu1 (!%p156_p3), %v2299_v2 }
   0xe   : > { %s2523_s15 = smov (!%p192_p4, %s1772_s15), 255 }
   0xf   : > { %s1773_s20 = sshll.u32 %s2523_s15, 2 }
  0x10   : > { %s2411_s23 = scalar_lea.vmem %s2515_s0, %s1773_s20  ;;  %2182 = vmatpush3.bf16.msra.mxu0 %v2299_v2  ;;  %2267 = vmatpush3.bf16.msra.mxu1 %v2299_v2  ;;  %s2465_s8 = scalar_lea.vmem %s2517_s2, %s1773_s20 }
  0x11   : > { %v2305_v4 = vld [vmem:[%s2411_s23] sm:$0xff]   ;;  %2183 = vmatprep.subr.bf16.mxu0 %v2300_v3  ;;  %2260 = vmatprep.subr.bf16.mxu1 %v2300_v3  ;;  %v2307_v10 = vld [vmem:[%s2411_s23 + $0x8] sm:$0xff]   ;;  %v2309_v12 = vld [vmem:[%s2411_s23 + $0x10] sm:$0xff]  }
  0x12   : > { %v2306_v5 = vld [vmem:[%s2411_s23 + $0x80] sm:$0xff]   ;;  %2193 = vmatprep.mubr.bf16.mxu0 %v2305_v4  ;;  %v2308_v11 = vld [vmem:[%s2411_s23 + $0x88] sm:$0xff]   ;;  %v2310_v13 = vld [vmem:[%s2411_s23 + $0x90] sm:$0xff]  }
  0x13   : > { %2225 = vmatprep.mubr.bf16.mxu1 %v2306_v5  ;;  %v2311_v14 = vld [vmem:[%s2411_s23 + $0x18] sm:$0xff]   ;;  %v2313_v16 = vld [vmem:[%s2411_s23 + $0x20] sm:$0xff]   ;;  %v2315_v18 = vld [vmem:[%s2411_s23 + $0x28] sm:$0xff]  }
  0x14   : > { %2184 = vmatpush3.bf16.msra.mxu0 %v2300_v3  ;;  %2268 = vmatpush3.bf16.msra.mxu1 %v2300_v3  ;;  %v2312_v15 = vld [vmem:[%s2411_s23 + $0x98] sm:$0xff]   ;;  %v2314_v17 = vld [vmem:[%s2411_s23 + $0xa0] sm:$0xff]   ;;  %v2316_v19 = vld [vmem:[%s2411_s23 + $0xa8] sm:$0xff]  }
  0x15   : > { %2185 = vmatprep.subr.bf16.mxu0 %v2301_v6  ;;  %2261 = vmatprep.subr.bf16.mxu1 %v2301_v6  ;;  %v2317_v20 = vld [vmem:[%s2411_s23 + $0x30] sm:$0xff]   ;;  %v2319_v22 = vld [vmem:[%s2411_s23 + $0x38] sm:$0xff]   ;;  %v2321_v24 = vld [vmem:[%s2411_s23 + $0x40] sm:$0xff]  }
  0x16   : > { %v2318_v21 = vld [vmem:[%s2411_s23 + $0xb0] sm:$0xff]   ;;  %v2320_v23 = vld [vmem:[%s2411_s23 + $0xb8] sm:$0xff]   ;;  %v2322_v25 = vld [vmem:[%s2411_s23 + $0xc0] sm:$0xff]  }
  0x17   : > { %v2323_v26 = vld [vmem:[%s2411_s23 + $0x48] sm:$0xff]   ;;  %v2325_v28 = vld [vmem:[%s2411_s23 + $0x50] sm:$0xff]   ;;  %v2327_v30 = vld [vmem:[%s2411_s23 + $0x58] sm:$0xff]  }
  0x18   : > { %2186 = vmatpush3.bf16.msra.mxu0 %v2301_v6  ;;  %2269 = vmatpush3.bf16.msra.mxu1 %v2301_v6  ;;  %v2324_v27 = vld [vmem:[%s2411_s23 + $0xc8] sm:$0xff]   ;;  %v2326_v29 = vld [vmem:[%s2411_s23 + $0xd0] sm:$0xff]   ;;  %v2328_v31 = vld [vmem:[%s2411_s23 + $0xd8] sm:$0xff]  }
  0x19   : > { %2187 = vmatprep.subr.bf16.mxu0 %v2302_v7  ;;  %2262 = vmatprep.subr.bf16.mxu1 %v2302_v7  ;;  %v2329_v32 = vld [vmem:[%s2411_s23 + $0x60] sm:$0xff]   ;;  %v2331_v34 = vld [vmem:[%s2411_s23 + $0x68] sm:$0xff]   ;;  %v2333_v36 = vld [vmem:[%s2411_s23 + $0x70] sm:$0xff]  }
  0x1a   : > { %v2330_v33 = vld [vmem:[%s2411_s23 + $0xe0] sm:$0xff]   ;;  %v2332_v35 = vld [vmem:[%s2411_s23 + $0xe8] sm:$0xff]   ;;  %v2334_v37 = vld [vmem:[%s2411_s23 + $0xf0] sm:$0xff]  }
  0x1b   : > { %v2335_v38 = vld [vmem:[%s2411_s23 + $0x78] sm:$0xff]  }
  0x1c   : > { %2188 = vmatpush3.bf16.msra.mxu0 %v2302_v7  ;;  %2270 = vmatpush3.bf16.msra.mxu1 %v2302_v7  ;;  %v2336_v39 = vld [vmem:[%s2411_s23 + $0xf8] sm:$0xff]  }
  0x1d   : > { %2189 = vmatprep.subr.bf16.mxu0 %v2303_v8  ;;  %2263 = vmatprep.subr.bf16.mxu1 %v2303_v8 }
  0x20   : > { %2190 = vmatpush3.bf16.msra.mxu0 %v2303_v8  ;;  %2271 = vmatpush3.bf16.msra.mxu1 %v2303_v8 }
  0x21   : > { %2191 = vmatprep.subr.bf16.mxu0 %v2304_v9  ;;  %2264 = vmatprep.subr.bf16.mxu1 %v2304_v9 }
  0x24   : > { %2192 = vmatpush3.bf16.msra.mxu0 %v2304_v9  ;;  %2272 = vmatpush3.bf16.msra.mxu1 %v2304_v9 }
  0x27   : > { %2194 = vmatmul.mubr.bf16.vlgmr.msra.gmra.mrb[0].mxu0 %v2307_v10  ;;  %2226 = vmatmul.mubr.bf16.vlgmr.msra.gmra.mrb[0].mxu1 %v2308_v11 }
  0x28   : > { %2197 = vmatprep.mubr.bf16.mxu0 %v2309_v12  ;;  %2229 = vmatprep.mubr.bf16.mxu1 %v2310_v13 }
  0x2f   : > { %2198 = vmatmul.mubr.bf16.gmra.mrb[4].mxu0 %v2311_v14  ;;  %2230 = vmatmul.mubr.bf16.gmra.mrb[4].mxu1 %v2312_v15 }
  0x30   : > { %2201 = vmatprep.mubr.bf16.mxu0 %v2313_v16  ;;  %2233 = vmatprep.mubr.bf16.mxu1 %v2314_v17 }
  0x37   : > { %2202 = vmatmul.mubr.bf16.gmra.mrb[8].mxu0 %v2315_v18  ;;  %2234 = vmatmul.mubr.bf16.gmra.mrb[8].mxu1 %v2316_v19 }
  0x38   : > { %2205 = vmatprep.mubr.bf16.mxu0 %v2317_v20  ;;  %2237 = vmatprep.mubr.bf16.mxu1 %v2318_v21 }
  0x3f   : > { %2206 = vmatmul.mubr.bf16.gmra.mrb[12].mxu0 %v2319_v22  ;;  %2238 = vmatmul.mubr.bf16.gmra.mrb[12].mxu1 %v2320_v23 }
  0x40   : > { %2209 = vmatprep.mubr.bf16.mxu0 %v2321_v24  ;;  %2241 = vmatprep.mubr.bf16.mxu1 %v2322_v25 }
  0x47   : > { %2210 = vmatmul.mubr.bf16.gmra.mrb[16].mxu0 %v2323_v26  ;;  %2242 = vmatmul.mubr.bf16.gmra.mrb[16].mxu1 %v2324_v27 }
  0x48   : > { %2213 = vmatprep.mubr.bf16.mxu0 %v2325_v28  ;;  %2245 = vmatprep.mubr.bf16.mxu1 %v2326_v29 }
  0x4f   : > { %2214 = vmatmul.mubr.bf16.gmra.mrb[20].mxu0 %v2327_v30  ;;  %2246 = vmatmul.mubr.bf16.gmra.mrb[20].mxu1 %v2328_v31 }
  0x50   : > { %2217 = vmatprep.mubr.bf16.mxu0 %v2329_v32  ;;  %2249 = vmatprep.mubr.bf16.mxu1 %v2330_v33 }
  0x57   : > { %2218 = vmatmul.mubr.bf16.gmra.mrb[24].mxu0 %v2331_v34  ;;  %2250 = vmatmul.mubr.bf16.gmra.mrb[24].mxu1 %v2332_v35 }
  0x58   : > { %2221 = vmatprep.mubr.bf16.mxu0 %v2333_v36  ;;  %2253 = vmatprep.mubr.bf16.mxu1 %v2334_v37 }
  0x5f   : > { %2222 = vmatmul.mubr.bf16.gmra.mrb[28].mxu0 %v2335_v38  ;;  %2254 = vmatmul.mubr.bf16.gmra.mrb[28].mxu1 %v2336_v39 }
  0xfa   : > { %v2195_v40 = vpop.f32.mrb[0].mxu0  ;;  %v2227_v41 = vpop.f32.mrb[0].mxu1 }
  0xfb   : > { %vm1157_vm0 = vcmp.ge.f32.partialorder %v2195_v40, 0.0  ;;  %v1221_v42 = vmul.f32 0.2, %v2195_v40  ;;  %v1253_v43 = vmul.f32 0.2, %v2227_v41  ;;  %vm1189_vm1 = vcmp.ge.f32.partialorder %v2227_v41, 0.0 }
  0xfc   : > { %v705_v44 = vpop.f32.mrb[1].mxu0  ;;  %v833_v45 = vpop.f32.mrb[1].mxu1 }
  0xfd   : > { %v1219_v46 = vmul.f32 0.2, %v705_v44  ;;  %v2196_v47 = vpop.f32.mrb[2].mxu0  ;;  %v2228_v48 = vpop.f32.mrb[2].mxu1  ;;  %v1285_v49 = vsel %vm1157_vm0, %v2195_v40, %v1221_v42  ;;  %v1251_v50 = vmul.f32 0.2, %v833_v45  ;;  %v1317_v52 = vsel %vm1189_vm1, %v2227_v41, %v1253_v43 }
  0xfe   : > { %vm1158_vm2 = vcmp.ge.f32.partialorder %v2196_v47, 0.0  ;;  %v1222_v51 = vmul.f32 0.2, %v2196_v47  ;;  %vm1155_vm3 = vcmp.ge.f32.partialorder %v705_v44, 0.0  ;;  %vm1190_vm4 = vcmp.ge.f32.partialorder %v2228_v48, 0.0  ;;  %v708_v54 = vpop.f32.mrb[3].mxu0 }
  0xff   : > { %v1254_v53 = vmul.f32 0.2, %v2228_v48  ;;  %v836_v55 = vpop.f32.mrb[3].mxu1  ;;  %vm1187_vm5 = vcmp.ge.f32.partialorder %v833_v45, 0.0  ;;  %vm1156_vm6 = vcmp.ge.f32.partialorder %v708_v54, 0.0  ;;  %v1283_v61 = vsel %vm1155_vm3, %v705_v44, %v1219_v46 }
 0x100   : > { %v1286_v56 = vsel %vm1158_vm2, %v2196_v47, %v1222_v51  ;;  %v1220_v57 = vmul.f32 0.2, %v708_v54  ;;  %vm1188_vm7 = vcmp.ge.f32.partialorder %v836_v55, 0.0  ;;  %v1252_v60 = vmul.f32 0.2, %v836_v55 }
 0x101   : > { %v1954_v58 = vpack.c.bf16 %v1286_v56, %v1285_v49  ;;  %v1318_v59 = vsel %vm1190_vm4, %v2228_v48, %v1254_v53  ;;  %v1315_v2 = vsel %vm1187_vm5, %v833_v45, %v1251_v50 }
 0x102   : > { %v2034_v62 = vpack.c.bf16 %v1318_v59, %v1317_v52  ;;  %v1284_v63 = vsel %vm1156_vm6, %v708_v54, %v1220_v57  ;;  %v2199_v0 = vpop.f32.mrb[4].mxu0  ;;  %v2231_v1 = vpop.f32.mrb[4].mxu1  ;;  %v1316_v4 = vsel %vm1188_vm7, %v836_v55, %v1252_v60 }
 0x103   : > { %2106 = vst [vmem:[%s2465_s8 + $0x8] sm:$0xff] %v1954_v58   ;;  %v1949_v3 = vpack.c.bf16 %v1284_v63, %v1283_v61  ;;  %v1225_v5 = vmul.f32 0.2, %v2199_v0  ;;  %v721_v6 = vpop.f32.mrb[5].mxu0  ;;  %v849_v7 = vpop.f32.mrb[5].mxu1  ;;  %v2029_v8 = vpack.c.bf16 %v1316_v4, %v1315_v2  ;;  %vm1161_vm8 = vcmp.ge.f32.partialorder %v2199_v0, 0.0 }
 0x104   : > { %2122 = vst [vmem:[%s2465_s8 + $0x88] sm:$0xff] %v2034_v62   ;;  %v1257_v9 = vmul.f32 0.2, %v2231_v1  ;;  %v2200_v10 = vpop.f32.mrb[6].mxu0  ;;  %v2232_v11 = vpop.f32.mrb[6].mxu1  ;;  %vm1193_vm9 = vcmp.ge.f32.partialorder %v2231_v1, 0.0 }
 0x105   : > { %1950 = vst [vmem:[%s2465_s8] sm:$0xff] %v1949_v3   ;;  %v1223_v12 = vmul.f32 0.2, %v721_v6  ;;  %v1255_v13 = vmul.f32 0.2, %v849_v7  ;;  %v724_v14 = vpop.f32.mrb[7].mxu0  ;;  %2121 = vst [vmem:[%s2465_s8 + $0x80] sm:$0xff] %v2029_v8   ;;  %v1289_v17 = vsel %vm1161_vm8, %v2199_v0, %v1225_v5 }
 0x106   : > { %vm1159_vm10 = vcmp.ge.f32.partialorder %v721_v6, 0.0  ;;  %vm1162_vm11 = vcmp.ge.f32.partialorder %v2200_v10, 0.0  ;;  %v1226_v15 = vmul.f32 0.2, %v2200_v10  ;;  %vm1194_vm12 = vcmp.ge.f32.partialorder %v2232_v11, 0.0  ;;  %v852_v16 = vpop.f32.mrb[7].mxu1 }
 0x107   : > { %vm1191_vm13 = vcmp.ge.f32.partialorder %v849_v7, 0.0  ;;  %v1258_v18 = vmul.f32 0.2, %v2232_v11  ;;  %vm1160_vm14 = vcmp.ge.f32.partialorder %v724_v14, 0.0  ;;  %v1224_v20 = vmul.f32 0.2, %v724_v14 }
 0x108   : > { %v1290_v19 = vsel %vm1162_vm11, %v2200_v10, %v1226_v15  ;;  %vm1192_vm15 = vcmp.ge.f32.partialorder %v852_v16, 0.0  ;;  %v1256_v21 = vmul.f32 0.2, %v852_v16  ;;  %v1321_v22 = vsel %vm1193_vm9, %v2231_v1, %v1257_v9 }
 0x109   : > { %v1287_v23 = vsel %vm1159_vm10, %v721_v6, %v1223_v12  ;;  %v1964_v24 = vpack.c.bf16 %v1290_v19, %v1289_v17  ;;  %v1322_v25 = vsel %vm1194_vm12, %v2232_v11, %v1258_v18  ;;  %v1319_v26 = vsel %vm1191_vm13, %v849_v7, %v1255_v13 }
 0x10a   : > { %v2044_v27 = vpack.c.bf16 %v1322_v25, %v1321_v22  ;;  %v1288_v28 = vsel %vm1160_vm14, %v724_v14, %v1224_v20  ;;  %v1320_v29 = vsel %vm1192_vm15, %v852_v16, %v1256_v21  ;;  %v2203_v30 = vpop.f32.mrb[8].mxu0  ;;  %v2235_v31 = vpop.f32.mrb[8].mxu1 }
 0x10b   : > { %2108 = vst [vmem:[%s2465_s8 + $0x18] sm:$0xff] %v1964_v24   ;;  %v1959_v32 = vpack.c.bf16 %v1288_v28, %v1287_v23  ;;  %v2039_v33 = vpack.c.bf16 %v1320_v29, %v1319_v26  ;;  %vm1165_vm0 = vcmp.ge.f32.partialorder %v2203_v30, 0.0  ;;  %v1229_v34 = vmul.f32 0.2, %v2203_v30  ;;  %v737_v35 = vpop.f32.mrb[9].mxu0  ;;  %v865_v36 = vpop.f32.mrb[9].mxu1 }
 0x10c   : > { %2124 = vst [vmem:[%s2465_s8 + $0x98] sm:$0xff] %v2044_v27   ;;  %vm1197_vm1 = vcmp.ge.f32.partialorder %v2235_v31, 0.0  ;;  %v1261_v37 = vmul.f32 0.2, %v2235_v31  ;;  %v1227_v38 = vmul.f32 0.2, %v737_v35 }
 0x10d   : > { %2107 = vst [vmem:[%s2465_s8 + $0x10] sm:$0xff] %v1959_v32   ;;  %2123 = vst [vmem:[%s2465_s8 + $0x90] sm:$0xff] %v2039_v33   ;;  %v1259_v39 = vmul.f32 0.2, %v865_v36  ;;  %v2204_v40 = vpop.f32.mrb[10].mxu0  ;;  %v2236_v41 = vpop.f32.mrb[10].mxu1  ;;  %v1293_v42 = vsel %vm1165_vm0, %v2203_v30, %v1229_v34 }
 0x10e   : > { %vm1163_vm2 = vcmp.ge.f32.partialorder %v737_v35, 0.0  ;;  %vm1166_vm3 = vcmp.ge.f32.partialorder %v2204_v40, 0.0  ;;  %v1230_v43 = vmul.f32 0.2, %v2204_v40  ;;  %v740_v44 = vpop.f32.mrb[11].mxu0  ;;  %v868_v45 = vpop.f32.mrb[11].mxu1  ;;  %v1325_v50 = vsel %vm1197_vm1, %v2235_v31, %v1261_v37 }
 0x10f   : > { %vm1195_vm4 = vcmp.ge.f32.partialorder %v865_v36, 0.0  ;;  %vm1198_vm5 = vcmp.ge.f32.partialorder %v2236_v41, 0.0  ;;  %v1262_v46 = vmul.f32 0.2, %v2236_v41  ;;  %vm1164_vm6 = vcmp.ge.f32.partialorder %v740_v44, 0.0 }
 0x110   : > { %v1294_v47 = vsel %vm1166_vm3, %v2204_v40, %v1230_v43  ;;  %v1228_v48 = vmul.f32 0.2, %v740_v44  ;;  %vm1196_vm7 = vcmp.ge.f32.partialorder %v868_v45, 0.0  ;;  %v1260_v49 = vmul.f32 0.2, %v868_v45 }
 0x111   : > { %v1291_v51 = vsel %vm1163_vm2, %v737_v35, %v1227_v38  ;;  %v1974_v52 = vpack.c.bf16 %v1294_v47, %v1293_v42  ;;  %v1326_v53 = vsel %vm1198_vm5, %v2236_v41, %v1262_v46  ;;  %v1323_v54 = vsel %vm1195_vm4, %v865_v36, %v1259_v39 }
 0x112   : > { %v2054_v55 = vpack.c.bf16 %v1326_v53, %v1325_v50  ;;  %v1292_v56 = vsel %vm1164_vm6, %v740_v44, %v1228_v48  ;;  %v1324_v57 = vsel %vm1196_vm7, %v868_v45, %v1260_v49  ;;  %v2207_v58 = vpop.f32.mrb[12].mxu0  ;;  %v2239_v59 = vpop.f32.mrb[12].mxu1 }
 0x113   : > { %2110 = vst [vmem:[%s2465_s8 + $0x28] sm:$0xff] %v1974_v52   ;;  %v1969_v60 = vpack.c.bf16 %v1292_v56, %v1291_v51  ;;  %v2049_v61 = vpack.c.bf16 %v1324_v57, %v1323_v54  ;;  %vm1169_vm8 = vcmp.ge.f32.partialorder %v2207_v58, 0.0  ;;  %v1233_v62 = vmul.f32 0.2, %v2207_v58  ;;  %v753_v63 = vpop.f32.mrb[13].mxu0  ;;  %v881_v0 = vpop.f32.mrb[13].mxu1 }
 0x114   : > { %2126 = vst [vmem:[%s2465_s8 + $0xa8] sm:$0xff] %v2054_v55   ;;  %vm1201_vm9 = vcmp.ge.f32.partialorder %v2239_v59, 0.0  ;;  %v1265_v1 = vmul.f32 0.2, %v2239_v59  ;;  %v1231_v2 = vmul.f32 0.2, %v753_v63 }
 0x115   : > { %2109 = vst [vmem:[%s2465_s8 + $0x20] sm:$0xff] %v1969_v60   ;;  %2125 = vst [vmem:[%s2465_s8 + $0xa0] sm:$0xff] %v2049_v61   ;;  %v1263_v3 = vmul.f32 0.2, %v881_v0  ;;  %v2208_v4 = vpop.f32.mrb[14].mxu0  ;;  %v2240_v5 = vpop.f32.mrb[14].mxu1  ;;  %v1297_v6 = vsel %vm1169_vm8, %v2207_v58, %v1233_v62 }
 0x116   : > { %vm1167_vm10 = vcmp.ge.f32.partialorder %v753_v63, 0.0  ;;  %vm1170_vm11 = vcmp.ge.f32.partialorder %v2208_v4, 0.0  ;;  %v1234_v7 = vmul.f32 0.2, %v2208_v4  ;;  %v756_v8 = vpop.f32.mrb[15].mxu0  ;;  %v884_v9 = vpop.f32.mrb[15].mxu1  ;;  %v1329_v14 = vsel %vm1201_vm9, %v2239_v59, %v1265_v1 }
 0x117   : > { %vm1199_vm12 = vcmp.ge.f32.partialorder %v881_v0, 0.0  ;;  %vm1202_vm13 = vcmp.ge.f32.partialorder %v2240_v5, 0.0  ;;  %v1266_v10 = vmul.f32 0.2, %v2240_v5  ;;  %vm1168_vm14 = vcmp.ge.f32.partialorder %v756_v8, 0.0 }
 0x118   : > { %v1298_v11 = vsel %vm1170_vm11, %v2208_v4, %v1234_v7  ;;  %v1232_v12 = vmul.f32 0.2, %v756_v8  ;;  %vm1200_vm15 = vcmp.ge.f32.partialorder %v884_v9, 0.0  ;;  %v1264_v13 = vmul.f32 0.2, %v884_v9 }
 0x119   : > { %v1295_v15 = vsel %vm1167_vm10, %v753_v63, %v1231_v2  ;;  %v1984_v16 = vpack.c.bf16 %v1298_v11, %v1297_v6  ;;  %v1330_v17 = vsel %vm1202_vm13, %v2240_v5, %v1266_v10  ;;  %v1327_v18 = vsel %vm1199_vm12, %v881_v0, %v1263_v3 }
 0x11a   : > { %v2064_v19 = vpack.c.bf16 %v1330_v17, %v1329_v14  ;;  %v1296_v20 = vsel %vm1168_vm14, %v756_v8, %v1232_v12  ;;  %v1328_v21 = vsel %vm1200_vm15, %v884_v9, %v1264_v13  ;;  %v2211_v22 = vpop.f32.mrb[16].mxu0  ;;  %v2243_v23 = vpop.f32.mrb[16].mxu1 }
 0x11b   : > { %2112 = vst [vmem:[%s2465_s8 + $0x38] sm:$0xff] %v1984_v16   ;;  %v1979_v24 = vpack.c.bf16 %v1296_v20, %v1295_v15  ;;  %v2059_v25 = vpack.c.bf16 %v1328_v21, %v1327_v18  ;;  %vm1173_vm0 = vcmp.ge.f32.partialorder %v2211_v22, 0.0  ;;  %v1237_v26 = vmul.f32 0.2, %v2211_v22  ;;  %v769_v27 = vpop.f32.mrb[17].mxu0  ;;  %v897_v28 = vpop.f32.mrb[17].mxu1 }
 0x11c   : > { %2128 = vst [vmem:[%s2465_s8 + $0xb8] sm:$0xff] %v2064_v19   ;;  %vm1205_vm1 = vcmp.ge.f32.partialorder %v2243_v23, 0.0  ;;  %v1269_v29 = vmul.f32 0.2, %v2243_v23  ;;  %v1235_v30 = vmul.f32 0.2, %v769_v27 }
 0x11d   : > { %2111 = vst [vmem:[%s2465_s8 + $0x30] sm:$0xff] %v1979_v24   ;;  %2127 = vst [vmem:[%s2465_s8 + $0xb0] sm:$0xff] %v2059_v25   ;;  %v1267_v31 = vmul.f32 0.2, %v897_v28  ;;  %v2212_v32 = vpop.f32.mrb[18].mxu0  ;;  %v2244_v33 = vpop.f32.mrb[18].mxu1  ;;  %v1301_v34 = vsel %vm1173_vm0, %v2211_v22, %v1237_v26 }
 0x11e   : > { %vm1171_vm2 = vcmp.ge.f32.partialorder %v769_v27, 0.0  ;;  %vm1174_vm3 = vcmp.ge.f32.partialorder %v2212_v32, 0.0  ;;  %v1238_v35 = vmul.f32 0.2, %v2212_v32  ;;  %v772_v36 = vpop.f32.mrb[19].mxu0  ;;  %v900_v37 = vpop.f32.mrb[19].mxu1  ;;  %v1333_v42 = vsel %vm1205_vm1, %v2243_v23, %v1269_v29 }
 0x11f   : > { %vm1203_vm4 = vcmp.ge.f32.partialorder %v897_v28, 0.0  ;;  %vm1206_vm5 = vcmp.ge.f32.partialorder %v2244_v33, 0.0  ;;  %v1270_v38 = vmul.f32 0.2, %v2244_v33  ;;  %vm1172_vm6 = vcmp.ge.f32.partialorder %v772_v36, 0.0 }
 0x120   : > { %v1302_v39 = vsel %vm1174_vm3, %v2212_v32, %v1238_v35  ;;  %v1236_v40 = vmul.f32 0.2, %v772_v36  ;;  %vm1204_vm7 = vcmp.ge.f32.partialorder %v900_v37, 0.0  ;;  %v1268_v41 = vmul.f32 0.2, %v900_v37 }
 0x121   : > { %v1299_v43 = vsel %vm1171_vm2, %v769_v27, %v1235_v30  ;;  %v1994_v44 = vpack.c.bf16 %v1302_v39, %v1301_v34  ;;  %v1334_v45 = vsel %vm1206_vm5, %v2244_v33, %v1270_v38  ;;  %v1331_v46 = vsel %vm1203_vm4, %v897_v28, %v1267_v31 }
 0x122   : > { %v2074_v47 = vpack.c.bf16 %v1334_v45, %v1333_v42  ;;  %v1300_v48 = vsel %vm1172_vm6, %v772_v36, %v1236_v40  ;;  %v1332_v49 = vsel %vm1204_vm7, %v900_v37, %v1268_v41  ;;  %v2215_v50 = vpop.f32.mrb[20].mxu0  ;;  %v2247_v51 = vpop.f32.mrb[20].mxu1 }
 0x123   : > { %2114 = vst [vmem:[%s2465_s8 + $0x48] sm:$0xff] %v1994_v44   ;;  %v1989_v52 = vpack.c.bf16 %v1300_v48, %v1299_v43  ;;  %v2069_v53 = vpack.c.bf16 %v1332_v49, %v1331_v46  ;;  %vm1177_vm8 = vcmp.ge.f32.partialorder %v2215_v50, 0.0  ;;  %v1241_v54 = vmul.f32 0.2, %v2215_v50  ;;  %v785_v55 = vpop.f32.mrb[21].mxu0  ;;  %v913_v56 = vpop.f32.mrb[21].mxu1 }
 0x124   : > { %2130 = vst [vmem:[%s2465_s8 + $0xc8] sm:$0xff] %v2074_v47   ;;  %vm1209_vm9 = vcmp.ge.f32.partialorder %v2247_v51, 0.0  ;;  %v1273_v57 = vmul.f32 0.2, %v2247_v51  ;;  %v1239_v58 = vmul.f32 0.2, %v785_v55 }
 0x125   : > { %2113 = vst [vmem:[%s2465_s8 + $0x40] sm:$0xff] %v1989_v52   ;;  %2129 = vst [vmem:[%s2465_s8 + $0xc0] sm:$0xff] %v2069_v53   ;;  %v1271_v59 = vmul.f32 0.2, %v913_v56  ;;  %v2216_v60 = vpop.f32.mrb[22].mxu0  ;;  %v2248_v61 = vpop.f32.mrb[22].mxu1  ;;  %v1305_v62 = vsel %vm1177_vm8, %v2215_v50, %v1241_v54 }
 0x126   : > { %vm1175_vm10 = vcmp.ge.f32.partialorder %v785_v55, 0.0  ;;  %vm1178_vm11 = vcmp.ge.f32.partialorder %v2216_v60, 0.0  ;;  %v1242_v63 = vmul.f32 0.2, %v2216_v60  ;;  %v788_v0 = vpop.f32.mrb[23].mxu0  ;;  %v916_v1 = vpop.f32.mrb[23].mxu1  ;;  %v1337_v6 = vsel %vm1209_vm9, %v2247_v51, %v1273_v57 }
 0x127   : > { %vm1207_vm12 = vcmp.ge.f32.partialorder %v913_v56, 0.0  ;;  %vm1210_vm13 = vcmp.ge.f32.partialorder %v2248_v61, 0.0  ;;  %v1274_v2 = vmul.f32 0.2, %v2248_v61  ;;  %vm1176_vm14 = vcmp.ge.f32.partialorder %v788_v0, 0.0 }
 0x128   : > { %v1306_v3 = vsel %vm1178_vm11, %v2216_v60, %v1242_v63  ;;  %v1240_v4 = vmul.f32 0.2, %v788_v0  ;;  %vm1208_vm15 = vcmp.ge.f32.partialorder %v916_v1, 0.0  ;;  %v1272_v5 = vmul.f32 0.2, %v916_v1 }
 0x129   : > { %v1303_v7 = vsel %vm1175_vm10, %v785_v55, %v1239_v58  ;;  %v2004_v8 = vpack.c.bf16 %v1306_v3, %v1305_v62  ;;  %v1338_v9 = vsel %vm1210_vm13, %v2248_v61, %v1274_v2  ;;  %v1335_v10 = vsel %vm1207_vm12, %v913_v56, %v1271_v59 }
 0x12a   : > { %v2084_v11 = vpack.c.bf16 %v1338_v9, %v1337_v6  ;;  %v1304_v12 = vsel %vm1176_vm14, %v788_v0, %v1240_v4  ;;  %v1336_v13 = vsel %vm1208_vm15, %v916_v1, %v1272_v5  ;;  %v2219_v14 = vpop.f32.mrb[24].mxu0  ;;  %v2251_v15 = vpop.f32.mrb[24].mxu1 }
 0x12b   : > { %2116 = vst [vmem:[%s2465_s8 + $0x58] sm:$0xff] %v2004_v8   ;;  %v1999_v16 = vpack.c.bf16 %v1304_v12, %v1303_v7  ;;  %v2079_v17 = vpack.c.bf16 %v1336_v13, %v1335_v10  ;;  %vm1181_vm0 = vcmp.ge.f32.partialorder %v2219_v14, 0.0  ;;  %v1245_v18 = vmul.f32 0.2, %v2219_v14  ;;  %v801_v19 = vpop.f32.mrb[25].mxu0  ;;  %v929_v20 = vpop.f32.mrb[25].mxu1 }
 0x12c   : > { %2132 = vst [vmem:[%s2465_s8 + $0xd8] sm:$0xff] %v2084_v11   ;;  %vm1213_vm1 = vcmp.ge.f32.partialorder %v2251_v15, 0.0  ;;  %v1277_v21 = vmul.f32 0.2, %v2251_v15  ;;  %v1243_v22 = vmul.f32 0.2, %v801_v19 }
 0x12d   : > { %2115 = vst [vmem:[%s2465_s8 + $0x50] sm:$0xff] %v1999_v16   ;;  %2131 = vst [vmem:[%s2465_s8 + $0xd0] sm:$0xff] %v2079_v17   ;;  %v1275_v23 = vmul.f32 0.2, %v929_v20  ;;  %v2220_v24 = vpop.f32.mrb[26].mxu0  ;;  %v2252_v25 = vpop.f32.mrb[26].mxu1  ;;  %v1309_v26 = vsel %vm1181_vm0, %v2219_v14, %v1245_v18 }
 0x12e   : > { %vm1179_vm2 = vcmp.ge.f32.partialorder %v801_v19, 0.0  ;;  %vm1182_vm3 = vcmp.ge.f32.partialorder %v2220_v24, 0.0  ;;  %v1246_v27 = vmul.f32 0.2, %v2220_v24  ;;  %v804_v28 = vpop.f32.mrb[27].mxu0  ;;  %v932_v29 = vpop.f32.mrb[27].mxu1  ;;  %v1341_v34 = vsel %vm1213_vm1, %v2251_v15, %v1277_v21 }
 0x12f   : > { %vm1211_vm4 = vcmp.ge.f32.partialorder %v929_v20, 0.0  ;;  %vm1214_vm5 = vcmp.ge.f32.partialorder %v2252_v25, 0.0  ;;  %v1278_v30 = vmul.f32 0.2, %v2252_v25  ;;  %vm1180_vm6 = vcmp.ge.f32.partialorder %v804_v28, 0.0 }
 0x130   : > { %v1310_v31 = vsel %vm1182_vm3, %v2220_v24, %v1246_v27  ;;  %v1244_v32 = vmul.f32 0.2, %v804_v28  ;;  %vm1212_vm7 = vcmp.ge.f32.partialorder %v932_v29, 0.0  ;;  %v1276_v33 = vmul.f32 0.2, %v932_v29 }
 0x131   : > { %v1307_v35 = vsel %vm1179_vm2, %v801_v19, %v1243_v22  ;;  %v2014_v36 = vpack.c.bf16 %v1310_v31, %v1309_v26  ;;  %v1342_v37 = vsel %vm1214_vm5, %v2252_v25, %v1278_v30  ;;  %v1339_v38 = vsel %vm1211_vm4, %v929_v20, %v1275_v23 }
 0x132   : > { %v2094_v39 = vpack.c.bf16 %v1342_v37, %v1341_v34  ;;  %v1308_v40 = vsel %vm1180_vm6, %v804_v28, %v1244_v32  ;;  %v1340_v41 = vsel %vm1212_vm7, %v932_v29, %v1276_v33  ;;  %v2223_v42 = vpop.f32.mrb[28].mxu0  ;;  %v2255_v43 = vpop.f32.mrb[28].mxu1 }
 0x133   : > { %2118 = vst [vmem:[%s2465_s8 + $0x68] sm:$0xff] %v2014_v36   ;;  %v2009_v44 = vpack.c.bf16 %v1308_v40, %v1307_v35  ;;  %v2089_v45 = vpack.c.bf16 %v1340_v41, %v1339_v38  ;;  %vm1185_vm8 = vcmp.ge.f32.partialorder %v2223_v42, 0.0  ;;  %v1249_v46 = vmul.f32 0.2, %v2223_v42  ;;  %v817_v47 = vpop.f32.mrb[29].mxu0  ;;  %v945_v48 = vpop.f32.mrb[29].mxu1 }
 0x134   : > { %2134 = vst [vmem:[%s2465_s8 + $0xe8] sm:$0xff] %v2094_v39   ;;  %vm1217_vm9 = vcmp.ge.f32.partialorder %v2255_v43, 0.0  ;;  %v1281_v49 = vmul.f32 0.2, %v2255_v43  ;;  %v1247_v50 = vmul.f32 0.2, %v817_v47 }
 0x135   : > { %2117 = vst [vmem:[%s2465_s8 + $0x60] sm:$0xff] %v2009_v44   ;;  %2133 = vst [vmem:[%s2465_s8 + $0xe0] sm:$0xff] %v2089_v45   ;;  %v1279_v51 = vmul.f32 0.2, %v945_v48  ;;  %v2224_v52 = vpop.f32.mrb[30].mxu0  ;;  %v2256_v53 = vpop.f32.mrb[30].mxu1  ;;  %v1313_v54 = vsel %vm1185_vm8, %v2223_v42, %v1249_v46 }
 0x136   : > { %vm1183_vm10 = vcmp.ge.f32.partialorder %v817_v47, 0.0  ;;  %vm1186_vm11 = vcmp.ge.f32.partialorder %v2224_v52, 0.0  ;;  %v1250_v55 = vmul.f32 0.2, %v2224_v52  ;;  %v820_v56 = vpop.f32.mrb[31].mxu0  ;;  %v948_v57 = vpop.f32.mrb[31].mxu1  ;;  %v1345_v62 = vsel %vm1217_vm9, %v2255_v43, %v1281_v49 }
 0x137   : > { %vm1215_vm12 = vcmp.ge.f32.partialorder %v945_v48, 0.0  ;;  %vm1218_vm13 = vcmp.ge.f32.partialorder %v2256_v53, 0.0  ;;  %v1282_v58 = vmul.f32 0.2, %v2256_v53  ;;  %vm1184_vm14 = vcmp.ge.f32.partialorder %v820_v56, 0.0 }
 0x138   : > { %v1314_v59 = vsel %vm1186_vm11, %v2224_v52, %v1250_v55  ;;  %v1248_v60 = vmul.f32 0.2, %v820_v56  ;;  %vm1216_vm15 = vcmp.ge.f32.partialorder %v948_v57, 0.0  ;;  %v1280_v61 = vmul.f32 0.2, %v948_v57 }
 0x139   : > { %v1311_v63 = vsel %vm1183_vm10, %v817_v47, %v1247_v50  ;;  %v2024_v0 = vpack.c.bf16 %v1314_v59, %v1313_v54  ;;  %v1346_v1 = vsel %vm1218_vm13, %v2256_v53, %v1282_v58  ;;  %v1343_v2 = vsel %vm1215_vm12, %v945_v48, %v1279_v51 }
 0x13a   : > { %v2104_v3 = vpack.c.bf16 %v1346_v1, %v1345_v62  ;;  %v1312_v4 = vsel %vm1184_vm14, %v820_v56, %v1248_v60  ;;  %v1344_v5 = vsel %vm1216_vm15, %v948_v57, %v1280_v61 }
 0x13b   : > { %2120 = vst [vmem:[%s2465_s8 + $0x78] sm:$0xff] %v2024_v0   ;;  %v2019_v6 = vpack.c.bf16 %v1312_v4, %v1311_v63  ;;  %v2099_v7 = vpack.c.bf16 %v1344_v5, %v1343_v2 }
 0x13c   : > { %2136 = vst [vmem:[%s2465_s8 + $0xf8] sm:$0xff] %v2104_v3  }
 0x13d   : > { %2119 = vst [vmem:[%s2465_s8 + $0x70] sm:$0xff] %v2019_v6   ;;  %2135 = vst [vmem:[%s2465_s8 + $0xf0] sm:$0xff] %v2099_v7  }
 0x13e PF: > { %s12_s11 = sadd.s32 1, %s2359_s11   ;;  %s2518_s9 = smov %s2355_s10 }
 0x13f   : > { %p9_p5 = scmp.ge.s32.totalorder %s12_s11, 6   ;;  %s2519_s10 = smov %s2521_s12 }
 0x141   :  { %11 = sbr.rel (!%p9_p5) target bundleno = 2 (0x2), region = 69 }

// kernel: discriminator_critic_forward.9
= control target key start
LH: loop header
LB: loop body
LE: loop exit
PB: predicated region body
PF: predicated region fallthrough
CT: control target
= control target key end

     0   :  { %s5233_s12 = smov 0   ;;  %s5235_s13 = smov 0   ;;  %s7019_s0 = inlined_call_operand.vmem [shape: bf16[512,2048], index: 0, kind: input, shape index: {}]   ;;  %s7020_s1 = inlined_call_operand.vmem [shape: bf16[2048,128], index: 1, kind: input, shape index: {}]   ;;  %s7021_s2 = inlined_call_operand.vmem [shape: f32[512,128], index: 2, kind: output, shape index: {0}]   ;;  %s7022_s3 = inlined_call_operand.vmem [shape: f32[1,2,128], index: 3, kind: output, shape index: {1}]  }
   0x1   :  { %s5237_s14 = smov 0   ;;  %s5239_s15 = smov 0  }
   0x2   :  { %s5241_s16 = smov 0  }
   0x3 LB: > { %s26_s17 = sadd.s32 1, %s5205_s15  ;;  %p49_p1 = scmp.ne.s32.totalorder %s5197_s13, %s5193_s12  ;;  %s5209_s16 = sphi %s5241_s16, %s14_s16   ;;  %s5205_s15 = sphi %s5239_s15, %s7082_s15   ;;  %s5201_s14 = sphi %s5237_s14, %s7081_s14   ;;  %s5197_s13 = sphi %s5235_s13, %s7080_s13   ;;  %s5193_s12 = sphi %s5233_s12, %s7079_s12  }
   0x4   : > { %p27_p0 = scmp.ge.s32.totalorder %s26_s17, 2  ;;  %p50_p2 = scmp.eq.s32.totalorder %s5209_s16, 0 }
   0x5   : > { %s42_s19 = sadd.s32 1, %s5197_s13  ;;  %p4729_p5 = scmp.ge.s32.totalorder %s5209_s16, 2 }
   0x6   : > { %s7084_s17 = smov (%p27_p0, %s26_s17), 0  ;;  %p51_p3 = por %p50_p2, %p49_p1 }
   0x7   : > { %s38_s18 = ssub.s32 %s5205_s15, %s7084_s17  ;;  %159 = sbr.rel (%p4729_p5) target bundleno = 146 (0x92), region = 16 }
   0x8   : > { %p40_p4 = scmp.eq.s32.totalorder %s38_s18, 0 }
   0xa   : > { %s5268_s20 = scalar_select %p40_p4, %s5197_s13, %s42_s19  }
   0xe   : > { %162 = sbr.rel (!%p51_p3) target bundleno = 146 (0x92), region = 20  ;;  %s164_s21 = sand.u32 (%p51_p3), 1, %s5197_s13  }
   0xf   : > { %s5064_s22 = sshll.u32 (%p51_p3), %s5205_s15, 5  ;;  %s4730_s23 = sshll.u32 (%p51_p3), %s164_s21, 11 }
  0x10   : > { %s5276_s26 = scalar_lea.vmem (%p51_p3), %s7019_s0, %s5064_s22  ;;  %s5281_s27 = scalar_lea.vmem (%p51_p3), [#allocation3], %s4730_s23 }
  0x11   : > { %v185_v0 = vld [vmem:[%s5276_s26] sm:$0xff] (%p51_p3)  ;;  %v187_v1 = vld [vmem:[%s5276_s26 + $0x8] sm:$0xff] (%p51_p3)  ;;  %v189_v2 = vld [vmem:[%s5276_s26 + $0x10] sm:$0xff] (%p51_p3) }
  0x12   : > { %186 = vst [vmem:[%s5281_s27] sm:$0xff] (%p51_p3), %v185_v0  ;;  %188 = vst [vmem:[%s5281_s27 + $0x8] sm:$0xff] (%p51_p3), %v187_v1  ;;  %v191_v3 = vld [vmem:[%s5276_s26 + $0x18] sm:$0xff] (%p51_p3)  ;;  %v193_v4 = vld [vmem:[%s5276_s26 + $0x40] sm:$0xff] (%p51_p3) }
  0x13   : > { %190 = vst [vmem:[%s5281_s27 + $0x10] sm:$0xff] (%p51_p3), %v189_v2  ;;  %v195_v5 = vld [vmem:[%s5276_s26 + $0x48] sm:$0xff] (%p51_p3)  ;;  %192 = vst [vmem:[%s5281_s27 + $0x18] sm:$0xff] (%p51_p3), %v191_v3  ;;  %v197_v6 = vld [vmem:[%s5276_s26 + $0x50] sm:$0xff] (%p51_p3) }
  0x14   : > { %194 = vst [vmem:[%s5281_s27 + $0x20] sm:$0xff] (%p51_p3), %v193_v4  ;;  %196 = vst [vmem:[%s5281_s27 + $0x28] sm:$0xff] (%p51_p3), %v195_v5  ;;  %v199_v7 = vld [vmem:[%s5276_s26 + $0x58] sm:$0xff] (%p51_p3)  ;;  %v201_v8 = vld [vmem:[%s5276_s26 + $0x80] sm:$0xff] (%p51_p3) }
  0x15   : > { %198 = vst [vmem:[%s5281_s27 + $0x30] sm:$0xff] %v197_v6  ;;  %200 = vst [vmem:[%s5281_s27 + $0x38] sm:$0xff] %v199_v7  ;;  %v203_v9 = vld [vmem:[%s5276_s26 + $0x88] sm:$0xff]  ;;  %v205_v10 = vld [vmem:[%s5276_s26 + $0x90] sm:$0xff] }
  0x16   : > { %202 = vst [vmem:[%s5281_s27 + $0x40] sm:$0xff] %v201_v8  ;;  %v207_v11 = vld [vmem:[%s5276_s26 + $0x98] sm:$0xff]  ;;  %204 = vst [vmem:[%s5281_s27 + $0x48] sm:$0xff] %v203_v9  ;;  %v209_v12 = vld [vmem:[%s5276_s26 + $0xc0] sm:$0xff] }
  0x17   : > { %206 = vst [vmem:[%s5281_s27 + $0x50] sm:$0xff] %v205_v10  ;;  %208 = vst [vmem:[%s5281_s27 + $0x58] sm:$0xff] %v207_v11  ;;  %v211_v13 = vld [vmem:[%s5276_s26 + $0xc8] sm:$0xff]  ;;  %v213_v14 = vld [vmem:[%s5276_s26 + $0xd0] sm:$0xff] }
  0x18   : > { %210 = vst [vmem:[%s5281_s27 + $0x60] sm:$0xff] %v209_v12  ;;  %212 = vst [vmem:[%s5281_s27 + $0x68] sm:$0xff] %v211_v13  ;;  %v215_v15 = vld [vmem:[%s5276_s26 + $0xd8] sm:$0xff]  ;;  %v217_v16 = vld [vmem:[%s5276_s26 + $0x100] sm:$0xff] }
  0x19   : > { %214 = vst [vmem:[%s5281_s27 + $0x70] sm:$0xff] %v213_v14  ;;  %v219_v17 = vld [vmem:[%s5276_s26 + $0x108] sm:$0xff]  ;;  %216 = vst [vmem:[%s5281_s27 + $0x78] sm:$0xff] %v215_v15  ;;  %v221_v18 = vld [vmem:[%s5276_s26 + $0x110] sm:$0xff] }
  0x1a   : > { %218 = vst [vmem:[%s5281_s27 + $0x80] sm:$0xff] %v217_v16  ;;  %220 = vst [vmem:[%s5281_s27 + $0x88] sm:$0xff] %v219_v17  ;;  %v223_v19 = vld [vmem:[%s5276_s26 + $0x118] sm:$0xff]  ;;  %v225_v20 = vld [vmem:[%s5276_s26 + $0x140] sm:$0xff] }
  0x1b   : > { %222 = vst [vmem:[%s5281_s27 + $0x90] sm:$0xff] %v221_v18  ;;  %224 = vst [vmem:[%s5281_s27 + $0x98] sm:$0xff] %v223_v19  ;;  %v227_v21 = vld [vmem:[%s5276_s26 + $0x148] sm:$0xff]  ;;  %v229_v22 = vld [vmem:[%s5276_s26 + $0x150] sm:$0xff] }
  0x1c   : > { %226 = vst [vmem:[%s5281_s27 + $0xa0] sm:$0xff] %v225_v20  ;;  %v231_v23 = vld [vmem:[%s5276_s26 + $0x158] sm:$0xff]  ;;  %228 = vst [vmem:[%s5281_s27 + $0xa8] sm:$0xff] %v227_v21  ;;  %v233_v24 = vld [vmem:[%s5276_s26 + $0x180] sm:$0xff] }
  0x1d   : > { %230 = vst [vmem:[%s5281_s27 + $0xb0] sm:$0xff] %v229_v22  ;;  %232 = vst [vmem:[%s5281_s27 + $0xb8] sm:$0xff] %v231_v23  ;;  %v235_v25 = vld [vmem:[%s5276_s26 + $0x188] sm:$0xff]  ;;  %v237_v26 = vld [vmem:[%s5276_s26 + $0x190] sm:$0xff] }
  0x1e   : > { %234 = vst [vmem:[%s5281_s27 + $0xc0] sm:$0xff] %v233_v24  ;;  %236 = vst [vmem:[%s5281_s27 + $0xc8] sm:$0xff] %v235_v25  ;;  %v239_v27 = vld [vmem:[%s5276_s26 + $0x198] sm:$0xff]  ;;  %v241_v28 = vld [vmem:[%s5276_s26 + $0x1c0] sm:$0xff] }
  0x1f   : > { %238 = vst [vmem:[%s5281_s27 + $0xd0] sm:$0xff] %v237_v26  ;;  %v243_v29 = vld [vmem:[%s5276_s26 + $0x1c8] sm:$0xff]  ;;  %240 = vst [vmem:[%s5281_s27 + $0xd8] sm:$0xff] %v239_v27  ;;  %v245_v30 = vld [vmem:[%s5276_s26 + $0x1d0] sm:$0xff] }
  0x20   : > { %242 = vst [vmem:[%s5281_s27 + $0xe0] sm:$0xff] %v241_v28  ;;  %244 = vst [vmem:[%s5281_s27 + $0xe8] sm:$0xff] %v243_v29  ;;  %v247_v31 = vld [vmem:[%s5276_s26 + $0x1d8] sm:$0xff]  ;;  %v249_v32 = vld [vmem:[%s5276_s26 + $0x200] sm:$0xff] }
  0x21   : > { %246 = vst [vmem:[%s5281_s27 + $0xf0] sm:$0xff] %v245_v30  ;;  %248 = vst [vmem:[%s5281_s27 + $0xf8] sm:$0xff] %v247_v31  ;;  %v251_v33 = vld [vmem:[%s5276_s26 + $0x208] sm:$0xff]  ;;  %v253_v34 = vld [vmem:[%s5276_s26 + $0x210] sm:$0xff] }
  0x22   : > { %250 = vst [vmem:[%s5281_s27 + $0x100] sm:$0xff] %v249_v32  ;;  %v255_v35 = vld [vmem:[%s5276_s26 + $0x218] sm:$0xff]  ;;  %252 = vst [vmem:[%s5281_s27 + $0x108] sm:$0xff] %v251_v33  ;;  %v257_v36 = vld [vmem:[%s5276_s26 + $0x240] sm:$0xff] }
  0x23   : > { %254 = vst [vmem:[%s5281_s27 + $0x110] sm:$0xff] %v253_v34  ;;  %256 = vst [vmem:[%s5281_s27 + $0x118] sm:$0xff] %v255_v35  ;;  %v259_v37 = vld [vmem:[%s5276_s26 + $0x248] sm:$0xff]  ;;  %v261_v38 = vld [vmem:[%s5276_s26 + $0x250] sm:$0xff] }
  0x24   : > { %258 = vst [vmem:[%s5281_s27 + $0x120] sm:$0xff] %v257_v36  ;;  %260 = vst [vmem:[%s5281_s27 + $0x128] sm:$0xff] %v259_v37  ;;  %v263_v39 = vld [vmem:[%s5276_s26 + $0x258] sm:$0xff]  ;;  %v265_v40 = vld [vmem:[%s5276_s26 + $0x280] sm:$0xff] }
  0x25   : > { %262 = vst [vmem:[%s5281_s27 + $0x130] sm:$0xff] %v261_v38  ;;  %v267_v41 = vld [vmem:[%s5276_s26 + $0x288] sm:$0xff]  ;;  %264 = vst [vmem:[%s5281_s27 + $0x138] sm:$0xff] %v263_v39  ;;  %v269_v42 = vld [vmem:[%s5276_s26 + $0x290] sm:$0xff] }
  0x26   : > { %266 = vst [vmem:[%s5281_s27 + $0x140] sm:$0xff] %v265_v40  ;;  %268 = vst [vmem:[%s5281_s27 + $0x148] sm:$0xff] %v267_v41  ;;  %v271_v43 = vld [vmem:[%s5276_s26 + $0x298] sm:$0xff]  ;;  %v273_v44 = vld [vmem:[%s5276_s26 + $0x2c0] sm:$0xff] }
  0x27   : > { %270 = vst [vmem:[%s5281_s27 + $0x150] sm:$0xff] %v269_v42  ;;  %272 = vst [vmem:[%s5281_s27 + $0x158] sm:$0xff] %v271_v43  ;;  %v275_v45 = vld [vmem:[%s5276_s26 + $0x2c8] sm:$0xff]  ;;  %v277_v46 = vld [vmem:[%s5276_s26 + $0x2d0] sm:$0xff] }
  0x28   : > { %274 = vst [vmem:[%s5281_s27 + $0x160] sm:$0xff] %v273_v44  ;;  %v279_v47 = vld [vmem:[%s5276_s26 + $0x2d8] sm:$0xff]  ;;  %276 = vst [vmem:[%s5281_s27 + $0x168] sm:$0xff] %v275_v45  ;;  %v281_v48 = vld [vmem:[%s5276_s26 + $0x300] sm:$0xff] }
  0x29   : > { %278 = vst [vmem:[%s5281_s27 + $0x170] sm:$0xff] %v277_v46  ;;  %280 = vst [vmem:[%s5281_s27 + $0x178] sm:$0xff] %v279_v47  ;;  %v283_v49 = vld [vmem:[%s5276_s26 + $0x308] sm:$0xff]  ;;  %v285_v50 = vld [vmem:[%s5276_s26 + $0x310] sm:$0xff] }
  0x2a   : > { %282 = vst [vmem:[%s5281_s27 + $0x180] sm:$0xff] %v281_v48  ;;  %284 = vst [vmem:[%s5281_s27 + $0x188] sm:$0xff] %v283_v49  ;;  %v287_v51 = vld [vmem:[%s5276_s26 + $0x318] sm:$0xff]  ;;  %v289_v52 = vld [vmem:[%s5276_s26 + $0x340] sm:$0xff] }
  0x2b   : > { %286 = vst [vmem:[%s5281_s27 + $0x190] sm:$0xff] %v285_v50  ;;  %v291_v53 = vld [vmem:[%s5276_s26 + $0x348] sm:$0xff]  ;;  %288 = vst [vmem:[%s5281_s27 + $0x198] sm:$0xff] %v287_v51  ;;  %v293_v54 = vld [vmem:[%s5276_s26 + $0x350] sm:$0xff] }
  0x2c   : > { %290 = vst [vmem:[%s5281_s27 + $0x1a0] sm:$0xff] %v289_v52  ;;  %292 = vst [vmem:[%s5281_s27 + $0x1a8] sm:$0xff] %v291_v53  ;;  %v295_v55 = vld [vmem:[%s5276_s26 + $0x358] sm:$0xff]  ;;  %v297_v56 = vld [vmem:[%s5276_s26 + $0x380] sm:$0xff] }
  0x2d   : > { %294 = vst [vmem:[%s5281_s27 + $0x1b0] sm:$0xff] %v293_v54  ;;  %296 = vst [vmem:[%s5281_s27 + $0x1b8] sm:$0xff] %v295_v55  ;;  %v299_v57 = vld [vmem:[%s5276_s26 + $0x388] sm:$0xff]  ;;  %v301_v58 = vld [vmem:[%s5276_s26 + $0x390] sm:$0xff] }
  0x2e   : > { %298 = vst [vmem:[%s5281_s27 + $0x1c0] sm:$0xff] %v297_v56  ;;  %v303_v59 = vld [vmem:[%s5276_s26 + $0x398] sm:$0xff]  ;;  %300 = vst [vmem:[%s5281_s27 + $0x1c8] sm:$0xff] %v299_v57  ;;  %v305_v60 = vld [vmem:[%s5276_s26 + $0x3c0] sm:$0xff] }
  0x2f   : > { %302 = vst [vmem:[%s5281_s27 + $0x1d0] sm:$0xff] %v301_v58  ;;  %304 = vst [vmem:[%s5281_s27 + $0x1d8] sm:$0xff] %v303_v59  ;;  %v307_v61 = vld [vmem:[%s5276_s26 + $0x3c8] sm:$0xff]  ;;  %v309_v62 = vld [vmem:[%s5276_s26 + $0x3d0] sm:$0xff] }
  0x30   : > { %306 = vst [vmem:[%s5281_s27 + $0x1e0] sm:$0xff] %v305_v60  ;;  %308 = vst [vmem:[%s5281_s27 + $0x1e8] sm:$0xff] %v307_v61  ;;  %v311_v63 = vld [vmem:[%s5276_s26 + $0x3d8] sm:$0xff]  ;;  %v313_v0 = vld [vmem:[%s5276_s26 + $0x400] sm:$0xff] }
  0x31   : > { %310 = vst [vmem:[%s5281_s27 + $0x1f0] sm:$0xff] %v309_v62  ;;  %v315_v1 = vld [vmem:[%s5276_s26 + $0x408] sm:$0xff]  ;;  %312 = vst [vmem:[%s5281_s27 + $0x1f8] sm:$0xff] %v311_v63  ;;  %v317_v2 = vld [vmem:[%s5276_s26 + $0x410] sm:$0xff] }
  0x32   : > { %314 = vst [vmem:[%s5281_s27 + $0x200] sm:$0xff] %v313_v0  ;;  %316 = vst [vmem:[%s5281_s27 + $0x208] sm:$0xff] %v315_v1  ;;  %v319_v3 = vld [vmem:[%s5276_s26 + $0x418] sm:$0xff]  ;;  %v321_v4 = vld [vmem:[%s5276_s26 + $0x440] sm:$0xff] }
  0x33   : > { %318 = vst [vmem:[%s5281_s27 + $0x210] sm:$0xff] %v317_v2  ;;  %320 = vst [vmem:[%s5281_s27 + $0x218] sm:$0xff] %v319_v3  ;;  %v323_v5 = vld [vmem:[%s5276_s26 + $0x448] sm:$0xff]  ;;  %v325_v6 = vld [vmem:[%s5276_s26 + $0x450] sm:$0xff] }
  0x34   : > { %322 = vst [vmem:[%s5281_s27 + $0x220] sm:$0xff] %v321_v4  ;;  %v327_v7 = vld [vmem:[%s5276_s26 + $0x458] sm:$0xff]  ;;  %324 = vst [vmem:[%s5281_s27 + $0x228] sm:$0xff] %v323_v5  ;;  %v329_v8 = vld [vmem:[%s5276_s26 + $0x480] sm:$0xff] }
  0x35   : > { %326 = vst [vmem:[%s5281_s27 + $0x230] sm:$0xff] %v325_v6  ;;  %328 = vst [vmem:[%s5281_s27 + $0x238] sm:$0xff] %v327_v7  ;;  %v331_v9 = vld [vmem:[%s5276_s26 + $0x488] sm:$0xff]  ;;  %v333_v10 = vld [vmem:[%s5276_s26 + $0x490] sm:$0xff] }
  0x36   : > { %330 = vst [vmem:[%s5281_s27 + $0x240] sm:$0xff] %v329_v8  ;;  %332 = vst [vmem:[%s5281_s27 + $0x248] sm:$0xff] %v331_v9  ;;  %v335_v11 = vld [vmem:[%s5276_s26 + $0x498] sm:$0xff]  ;;  %v337_v12 = vld [vmem:[%s5276_s26 + $0x4c0] sm:$0xff] }
  0x37   : > { %334 = vst [vmem:[%s5281_s27 + $0x250] sm:$0xff] %v333_v10  ;;  %v339_v13 = vld [vmem:[%s5276_s26 + $0x4c8] sm:$0xff]  ;;  %336 = vst [vmem:[%s5281_s27 + $0x258] sm:$0xff] %v335_v11  ;;  %v341_v14 = vld [vmem:[%s5276_s26 + $0x4d0] sm:$0xff] }
  0x38   : > { %338 = vst [vmem:[%s5281_s27 + $0x260] sm:$0xff] %v337_v12  ;;  %340 = vst [vmem:[%s5281_s27 + $0x268] sm:$0xff] %v339_v13  ;;  %v343_v15 = vld [vmem:[%s5276_s26 + $0x4d8] sm:$0xff]  ;;  %v345_v16 = vld [vmem:[%s5276_s26 + $0x500] sm:$0xff] }
  0x39   : > { %342 = vst [vmem:[%s5281_s27 + $0x270] sm:$0xff] %v341_v14  ;;  %344 = vst [vmem:[%s5281_s27 + $0x278] sm:$0xff] %v343_v15  ;;  %v347_v17 = vld [vmem:[%s5276_s26 + $0x508] sm:$0xff]  ;;  %v349_v18 = vld [vmem:[%s5276_s26 + $0x510] sm:$0xff] }
  0x3a   : > { %346 = vst [vmem:[%s5281_s27 + $0x280] sm:$0xff] %v345_v16  ;;  %v351_v19 = vld [vmem:[%s5276_s26 + $0x518] sm:$0xff]  ;;  %348 = vst [vmem:[%s5281_s27 + $0x288] sm:$0xff] %v347_v17  ;;  %v353_v20 = vld [vmem:[%s5276_s26 + $0x540] sm:$0xff] }
  0x3b   : > { %350 = vst [vmem:[%s5281_s27 + $0x290] sm:$0xff] %v349_v18  ;;  %352 = vst [vmem:[%s5281_s27 + $0x298] sm:$0xff] %v351_v19  ;;  %v355_v21 = vld [vmem:[%s5276_s26 + $0x548] sm:$0xff]  ;;  %v357_v22 = vld [vmem:[%s5276_s26 + $0x550] sm:$0xff] }
  0x3c   : > { %354 = vst [vmem:[%s5281_s27 + $0x2a0] sm:$0xff] %v353_v20  ;;  %356 = vst [vmem:[%s5281_s27 + $0x2a8] sm:$0xff] %v355_v21  ;;  %v359_v23 = vld [vmem:[%s5276_s26 + $0x558] sm:$0xff]  ;;  %v361_v24 = vld [vmem:[%s5276_s26 + $0x580] sm:$0xff] }
  0x3d   : > { %358 = vst [vmem:[%s5281_s27 + $0x2b0] sm:$0xff] %v357_v22  ;;  %v363_v25 = vld [vmem:[%s5276_s26 + $0x588] sm:$0xff]  ;;  %360 = vst [vmem:[%s5281_s27 + $0x2b8] sm:$0xff] %v359_v23  ;;  %v365_v26 = vld [vmem:[%s5276_s26 + $0x590] sm:$0xff] }
  0x3e   : > { %362 = vst [vmem:[%s5281_s27 + $0x2c0] sm:$0xff] %v361_v24  ;;  %364 = vst [vmem:[%s5281_s27 + $0x2c8] sm:$0xff] %v363_v25  ;;  %v367_v27 = vld [vmem:[%s5276_s26 + $0x598] sm:$0xff]  ;;  %v369_v28 = vld [vmem:[%s5276_s26 + $0x5c0] sm:$0xff] }
  0x3f   : > { %366 = vst [vmem:[%s5281_s27 + $0x2d0] sm:$0xff] %v365_v26  ;;  %368 = vst [vmem:[%s5281_s27 + $0x2d8] sm:$0xff] %v367_v27  ;;  %v371_v29 = vld [vmem:[%s5276_s26 + $0x5c8] sm:$0xff]  ;;  %v373_v30 = vld [vmem:[%s5276_s26 + $0x5d0] sm:$0xff] }
  0x40   : > { %370 = vst [vmem:[%s5281_s27 + $0x2e0] sm:$0xff] %v369_v28  ;;  %v375_v31 = vld [vmem:[%s5276_s26 + $0x5d8] sm:$0xff]  ;;  %372 = vst [vmem:[%s5281_s27 + $0x2e8] sm:$0xff] %v371_v29  ;;  %v377_v32 = vld [vmem:[%s5276_s26 + $0x600] sm:$0xff] }
  0x41   : > { %374 = vst [vmem:[%s5281_s27 + $0x2f0] sm:$0xff] %v373_v30  ;;  %376 = vst [vmem:[%s5281_s27 + $0x2f8] sm:$0xff] %v375_v31  ;;  %v379_v33 = vld [vmem:[%s5276_s26 + $0x608] sm:$0xff]  ;;  %v381_v34 = vld [vmem:[%s5276_s26 + $0x610] sm:$0xff] }
  0x42   : > { %378 = vst [vmem:[%s5281_s27 + $0x300] sm:$0xff] %v377_v32  ;;  %380 = vst [vmem:[%s5281_s27 + $0x308] sm:$0xff] %v379_v33  ;;  %v383_v35 = vld [vmem:[%s5276_s26 + $0x618] sm:$0xff]  ;;  %v385_v36 = vld [vmem:[%s5276_s26 + $0x640] sm:$0xff] }
  0x43   : > { %382 = vst [vmem:[%s5281_s27 + $0x310] sm:$0xff] %v381_v34  ;;  %v387_v37 = vld [vmem:[%s5276_s26 + $0x648] sm:$0xff]  ;;  %384 = vst [vmem:[%s5281_s27 + $0x318] sm:$0xff] %v383_v35  ;;  %v389_v38 = vld [vmem:[%s5276_s26 + $0x650] sm:$0xff] }
  0x44   : > { %386 = vst [vmem:[%s5281_s27 + $0x320] sm:$0xff] %v385_v36  ;;  %388 = vst [vmem:[%s5281_s27 + $0x328] sm:$0xff] %v387_v37  ;;  %v391_v39 = vld [vmem:[%s5276_s26 + $0x658] sm:$0xff]  ;;  %v393_v40 = vld [vmem:[%s5276_s26 + $0x680] sm:$0xff] }
  0x45   : > { %390 = vst [vmem:[%s5281_s27 + $0x330] sm:$0xff] %v389_v38  ;;  %392 = vst [vmem:[%s5281_s27 + $0x338] sm:$0xff] %v391_v39  ;;  %v395_v41 = vld [vmem:[%s5276_s26 + $0x688] sm:$0xff]  ;;  %v397_v42 = vld [vmem:[%s5276_s26 + $0x690] sm:$0xff] }
  0x46   : > { %394 = vst [vmem:[%s5281_s27 + $0x340] sm:$0xff] %v393_v40  ;;  %v399_v43 = vld [vmem:[%s5276_s26 + $0x698] sm:$0xff]  ;;  %396 = vst [vmem:[%s5281_s27 + $0x348] sm:$0xff] %v395_v41  ;;  %v401_v44 = vld [vmem:[%s5276_s26 + $0x6c0] sm:$0xff] }
  0x47   : > { %398 = vst [vmem:[%s5281_s27 + $0x350] sm:$0xff] %v397_v42  ;;  %400 = vst [vmem:[%s5281_s27 + $0x358] sm:$0xff] %v399_v43  ;;  %v403_v45 = vld [vmem:[%s5276_s26 + $0x6c8] sm:$0xff]  ;;  %v405_v46 = vld [vmem:[%s5276_s26 + $0x6d0] sm:$0xff] }
  0x48   : > { %402 = vst [vmem:[%s5281_s27 + $0x360] sm:$0xff] %v401_v44  ;;  %404 = vst [vmem:[%s5281_s27 + $0x368] sm:$0xff] %v403_v45  ;;  %v407_v47 = vld [vmem:[%s5276_s26 + $0x6d8] sm:$0xff]  ;;  %v409_v48 = vld [vmem:[%s5276_s26 + $0x700] sm:$0xff] }
  0x49   : > { %406 = vst [vmem:[%s5281_s27 + $0x370] sm:$0xff] %v405_v46  ;;  %v411_v49 = vld [vmem:[%s5276_s26 + $0x708] sm:$0xff]  ;;  %408 = vst [vmem:[%s5281_s27 + $0x378] sm:$0xff] %v407_v47  ;;  %v413_v50 = vld [vmem:[%s5276_s26 + $0x710] sm:$0xff] }
  0x4a   : > { %410 = vst [vmem:[%s5281_s27 + $0x380] sm:$0xff] %v409_v48  ;;  %412 = vst [vmem:[%s5281_s27 + $0x388] sm:$0xff] %v411_v49  ;;  %v415_v51 = vld [vmem:[%s5276_s26 + $0x718] sm:$0xff]  ;;  %v417_v52 = vld [vmem:[%s5276_s26 + $0x740] sm:$0xff] }
  0x4b   : > { %414 = vst [vmem:[%s5281_s27 + $0x390] sm:$0xff] %v413_v50  ;;  %416 = vst [vmem:[%s5281_s27 + $0x398] sm:$0xff] %v415_v51  ;;  %v419_v53 = vld [vmem:[%s5276_s26 + $0x748] sm:$0xff]  ;;  %v421_v54 = vld [vmem:[%s5276_s26 + $0x750] sm:$0xff] }
  0x4c   : > { %418 = vst [vmem:[%s5281_s27 + $0x3a0] sm:$0xff] %v417_v52  ;;  %v423_v55 = vld [vmem:[%s5276_s26 + $0x758] sm:$0xff]  ;;  %420 = vst [vmem:[%s5281_s27 + $0x3a8] sm:$0xff] %v419_v53  ;;  %v425_v56 = vld [vmem:[%s5276_s26 + $0x780] sm:$0xff] }
  0x4d   : > { %422 = vst [vmem:[%s5281_s27 + $0x3b0] sm:$0xff] %v421_v54  ;;  %424 = vst [vmem:[%s5281_s27 + $0x3b8] sm:$0xff] %v423_v55  ;;  %v427_v57 = vld [vmem:[%s5276_s26 + $0x788] sm:$0xff]  ;;  %v429_v58 = vld [vmem:[%s5276_s26 + $0x790] sm:$0xff] }
  0x4e   : > { %426 = vst [vmem:[%s5281_s27 + $0x3c0] sm:$0xff] %v425_v56  ;;  %428 = vst [vmem:[%s5281_s27 + $0x3c8] sm:$0xff] %v427_v57  ;;  %v431_v59 = vld [vmem:[%s5276_s26 + $0x798] sm:$0xff]  ;;  %v433_v60 = vld [vmem:[%s5276_s26 + $0x7c0] sm:$0xff] }
  0x4f   : > { %430 = vst [vmem:[%s5281_s27 + $0x3d0] sm:$0xff] %v429_v58  ;;  %v435_v61 = vld [vmem:[%s5276_s26 + $0x7c8] sm:$0xff]  ;;  %432 = vst [vmem:[%s5281_s27 + $0x3d8] sm:$0xff] %v431_v59  ;;  %v437_v62 = vld [vmem:[%s5276_s26 + $0x7d0] sm:$0xff] }
  0x50   : > { %434 = vst [vmem:[%s5281_s27 + $0x3e0] sm:$0xff] %v433_v60  ;;  %436 = vst [vmem:[%s5281_s27 + $0x3e8] sm:$0xff] %v435_v61  ;;  %v439_v63 = vld [vmem:[%s5276_s26 + $0x7d8] sm:$0xff]  ;;  %v441_v0 = vld [vmem:[%s5276_s26 + $0x800] sm:$0xff] }
  0x51   : > { %438 = vst [vmem:[%s5281_s27 + $0x3f0] sm:$0xff] %v437_v62  ;;  %440 = vst [vmem:[%s5281_s27 + $0x3f8] sm:$0xff] %v439_v63  ;;  %v443_v1 = vld [vmem:[%s5276_s26 + $0x808] sm:$0xff]  ;;  %v445_v2 = vld [vmem:[%s5276_s26 + $0x810] sm:$0xff] }
  0x52   : > { %442 = vst [vmem:[%s5281_s27 + $0x400] sm:$0xff] %v441_v0  ;;  %v447_v3 = vld [vmem:[%s5276_s26 + $0x818] sm:$0xff]  ;;  %444 = vst [vmem:[%s5281_s27 + $0x408] sm:$0xff] %v443_v1  ;;  %v449_v4 = vld [vmem:[%s5276_s26 + $0x840] sm:$0xff] }
  0x53   : > { %446 = vst [vmem:[%s5281_s27 + $0x410] sm:$0xff] %v445_v2  ;;  %448 = vst [vmem:[%s5281_s27 + $0x418] sm:$0xff] %v447_v3  ;;  %v451_v5 = vld [vmem:[%s5276_s26 + $0x848] sm:$0xff]  ;;  %v453_v6 = vld [vmem:[%s5276_s26 + $0x850] sm:$0xff] }
  0x54   : > { %450 = vst [vmem:[%s5281_s27 + $0x420] sm:$0xff] %v449_v4  ;;  %452 = vst [vmem:[%s5281_s27 + $0x428] sm:$0xff] %v451_v5  ;;  %v455_v7 = vld [vmem:[%s5276_s26 + $0x858] sm:$0xff]  ;;  %v457_v8 = vld [vmem:[%s5276_s26 + $0x880] sm:$0xff] }
  0x55   : > { %454 = vst [vmem:[%s5281_s27 + $0x430] sm:$0xff] %v453_v6  ;;  %v459_v9 = vld [vmem:[%s5276_s26 + $0x888] sm:$0xff]  ;;  %456 = vst [vmem:[%s5281_s27 + $0x438] sm:$0xff] %v455_v7  ;;  %v461_v10 = vld [vmem:[%s5276_s26 + $0x890] sm:$0xff] }
  0x56   : > { %458 = vst [vmem:[%s5281_s27 + $0x440] sm:$0xff] %v457_v8  ;;  %460 = vst [vmem:[%s5281_s27 + $0x448] sm:$0xff] %v459_v9  ;;  %v463_v11 = vld [vmem:[%s5276_s26 + $0x898] sm:$0xff]  ;;  %v465_v12 = vld [vmem:[%s5276_s26 + $0x8c0] sm:$0xff] }
  0x57   : > { %462 = vst [vmem:[%s5281_s27 + $0x450] sm:$0xff] %v461_v10  ;;  %464 = vst [vmem:[%s5281_s27 + $0x458] sm:$0xff] %v463_v11  ;;  %v467_v13 = vld [vmem:[%s5276_s26 + $0x8c8] sm:$0xff]  ;;  %v469_v14 = vld [vmem:[%s5276_s26 + $0x8d0] sm:$0xff] }
  0x58   : > { %466 = vst [vmem:[%s5281_s27 + $0x460] sm:$0xff] %v465_v12  ;;  %v471_v15 = vld [vmem:[%s5276_s26 + $0x8d8] sm:$0xff]  ;;  %468 = vst [vmem:[%s5281_s27 + $0x468] sm:$0xff] %v467_v13  ;;  %v473_v16 = vld [vmem:[%s5276_s26 + $0x900] sm:$0xff] }
  0x59   : > { %470 = vst [vmem:[%s5281_s27 + $0x470] sm:$0xff] %v469_v14  ;;  %472 = vst [vmem:[%s5281_s27 + $0x478] sm:$0xff] %v471_v15  ;;  %v475_v17 = vld [vmem:[%s5276_s26 + $0x908] sm:$0xff]  ;;  %v477_v18 = vld [vmem:[%s5276_s26 + $0x910] sm:$0xff] }
  0x5a   : > { %474 = vst [vmem:[%s5281_s27 + $0x480] sm:$0xff] %v473_v16  ;;  %476 = vst [vmem:[%s5281_s27 + $0x488] sm:$0xff] %v475_v17  ;;  %v479_v19 = vld [vmem:[%s5276_s26 + $0x918] sm:$0xff]  ;;  %v481_v20 = vld [vmem:[%s5276_s26 + $0x940] sm:$0xff] }
  0x5b   : > { %478 = vst [vmem:[%s5281_s27 + $0x490] sm:$0xff] %v477_v18  ;;  %v483_v21 = vld [vmem:[%s5276_s26 + $0x948] sm:$0xff]  ;;  %480 = vst [vmem:[%s5281_s27 + $0x498] sm:$0xff] %v479_v19  ;;  %v485_v22 = vld [vmem:[%s5276_s26 + $0x950] sm:$0xff] }
  0x5c   : > { %482 = vst [vmem:[%s5281_s27 + $0x4a0] sm:$0xff] %v481_v20  ;;  %484 = vst [vmem:[%s5281_s27 + $0x4a8] sm:$0xff] %v483_v21  ;;  %v487_v23 = vld [vmem:[%s5276_s26 + $0x958] sm:$0xff]  ;;  %v489_v24 = vld [vmem:[%s5276_s26 + $0x980] sm:$0xff] }
  0x5d   : > { %486 = vst [vmem:[%s5281_s27 + $0x4b0] sm:$0xff] %v485_v22  ;;  %488 = vst [vmem:[%s5281_s27 + $0x4b8] sm:$0xff] %v487_v23  ;;  %v491_v25 = vld [vmem:[%s5276_s26 + $0x988] sm:$0xff]  ;;  %v493_v26 = vld [vmem:[%s5276_s26 + $0x990] sm:$0xff] }
  0x5e   : > { %490 = vst [vmem:[%s5281_s27 + $0x4c0] sm:$0xff] %v489_v24  ;;  %v495_v27 = vld [vmem:[%s5276_s26 + $0x998] sm:$0xff]  ;;  %492 = vst [vmem:[%s5281_s27 + $0x4c8] sm:$0xff] %v491_v25  ;;  %v497_v28 = vld [vmem:[%s5276_s26 + $0x9c0] sm:$0xff] }
  0x5f   : > { %494 = vst [vmem:[%s5281_s27 + $0x4d0] sm:$0xff] %v493_v26  ;;  %496 = vst [vmem:[%s5281_s27 + $0x4d8] sm:$0xff] %v495_v27  ;;  %v499_v29 = vld [vmem:[%s5276_s26 + $0x9c8] sm:$0xff]  ;;  %v501_v30 = vld [vmem:[%s5276_s26 + $0x9d0] sm:$0xff] }
  0x60   : > { %498 = vst [vmem:[%s5281_s27 + $0x4e0] sm:$0xff] %v497_v28  ;;  %500 = vst [vmem:[%s5281_s27 + $0x4e8] sm:$0xff] %v499_v29  ;;  %v503_v31 = vld [vmem:[%s5276_s26 + $0x9d8] sm:$0xff]  ;;  %v505_v32 = vld [vmem:[%s5276_s26 + $0xa00] sm:$0xff] }
  0x61   : > { %502 = vst [vmem:[%s5281_s27 + $0x4f0] sm:$0xff] %v501_v30  ;;  %v507_v33 = vld [vmem:[%s5276_s26 + $0xa08] sm:$0xff]  ;;  %504 = vst [vmem:[%s5281_s27 + $0x4f8] sm:$0xff] %v503_v31  ;;  %v509_v34 = vld [vmem:[%s5276_s26 + $0xa10] sm:$0xff] }
  0x62   : > { %506 = vst [vmem:[%s5281_s27 + $0x500] sm:$0xff] %v505_v32  ;;  %508 = vst [vmem:[%s5281_s27 + $0x508] sm:$0xff] %v507_v33  ;;  %v511_v35 = vld [vmem:[%s5276_s26 + $0xa18] sm:$0xff]  ;;  %v513_v36 = vld [vmem:[%s5276_s26 + $0xa40] sm:$0xff] }
  0x63   : > { %510 = vst [vmem:[%s5281_s27 + $0x510] sm:$0xff] %v509_v34  ;;  %512 = vst [vmem:[%s5281_s27 + $0x518] sm:$0xff] %v511_v35  ;;  %v515_v37 = vld [vmem:[%s5276_s26 + $0xa48] sm:$0xff]  ;;  %v517_v38 = vld [vmem:[%s5276_s26 + $0xa50] sm:$0xff] }
  0x64   : > { %514 = vst [vmem:[%s5281_s27 + $0x520] sm:$0xff] %v513_v36  ;;  %v519_v39 = vld [vmem:[%s5276_s26 + $0xa58] sm:$0xff]  ;;  %516 = vst [vmem:[%s5281_s27 + $0x528] sm:$0xff] %v515_v37  ;;  %v521_v40 = vld [vmem:[%s5276_s26 + $0xa80] sm:$0xff] }
  0x65   : > { %518 = vst [vmem:[%s5281_s27 + $0x530] sm:$0xff] %v517_v38  ;;  %520 = vst [vmem:[%s5281_s27 + $0x538] sm:$0xff] %v519_v39  ;;  %v523_v41 = vld [vmem:[%s5276_s26 + $0xa88] sm:$0xff]  ;;  %v525_v42 = vld [vmem:[%s5276_s26 + $0xa90] sm:$0xff] }
  0x66   : > { %522 = vst [vmem:[%s5281_s27 + $0x540] sm:$0xff] %v521_v40  ;;  %524 = vst [vmem:[%s5281_s27 + $0x548] sm:$0xff] %v523_v41  ;;  %v527_v43 = vld [vmem:[%s5276_s26 + $0xa98] sm:$0xff]  ;;  %v529_v44 = vld [vmem:[%s5276_s26 + $0xac0] sm:$0xff] }
  0x67   : > { %526 = vst [vmem:[%s5281_s27 + $0x550] sm:$0xff] %v525_v42  ;;  %v531_v45 = vld [vmem:[%s5276_s26 + $0xac8] sm:$0xff]  ;;  %528 = vst [vmem:[%s5281_s27 + $0x558] sm:$0xff] %v527_v43  ;;  %v533_v46 = vld [vmem:[%s5276_s26 + $0xad0] sm:$0xff] }
  0x68   : > { %530 = vst [vmem:[%s5281_s27 + $0x560] sm:$0xff] %v529_v44  ;;  %532 = vst [vmem:[%s5281_s27 + $0x568] sm:$0xff] %v531_v45  ;;  %v535_v47 = vld [vmem:[%s5276_s26 + $0xad8] sm:$0xff]  ;;  %v537_v48 = vld [vmem:[%s5276_s26 + $0xb00] sm:$0xff] }
  0x69   : > { %534 = vst [vmem:[%s5281_s27 + $0x570] sm:$0xff] %v533_v46  ;;  %536 = vst [vmem:[%s5281_s27 + $0x578] sm:$0xff] %v535_v47  ;;  %v539_v49 = vld [vmem:[%s5276_s26 + $0xb08] sm:$0xff]  ;;  %v541_v50 = vld [vmem:[%s5276_s26 + $0xb10] sm:$0xff] }
  0x6a   : > { %538 = vst [vmem:[%s5281_s27 + $0x580] sm:$0xff] %v537_v48  ;;  %v543_v51 = vld [vmem:[%s5276_s26 + $0xb18] sm:$0xff]  ;;  %540 = vst [vmem:[%s5281_s27 + $0x588] sm:$0xff] %v539_v49  ;;  %v545_v52 = vld [vmem:[%s5276_s26 + $0xb40] sm:$0xff] }
  0x6b   : > { %542 = vst [vmem:[%s5281_s27 + $0x590] sm:$0xff] %v541_v50  ;;  %544 = vst [vmem:[%s5281_s27 + $0x598] sm:$0xff] %v543_v51  ;;  %v547_v53 = vld [vmem:[%s5276_s26 + $0xb48] sm:$0xff]  ;;  %v549_v54 = vld [vmem:[%s5276_s26 + $0xb50] sm:$0xff] }
  0x6c   : > { %546 = vst [vmem:[%s5281_s27 + $0x5a0] sm:$0xff] %v545_v52  ;;  %548 = vst [vmem:[%s5281_s27 + $0x5a8] sm:$0xff] %v547_v53  ;;  %v551_v55 = vld [vmem:[%s5276_s26 + $0xb58] sm:$0xff]  ;;  %v553_v56 = vld [vmem:[%s5276_s26 + $0xb80] sm:$0xff] }
  0x6d   : > { %550 = vst [vmem:[%s5281_s27 + $0x5b0] sm:$0xff] %v549_v54  ;;  %v555_v57 = vld [vmem:[%s5276_s26 + $0xb88] sm:$0xff]  ;;  %552 = vst [vmem:[%s5281_s27 + $0x5b8] sm:$0xff] %v551_v55  ;;  %v557_v58 = vld [vmem:[%s5276_s26 + $0xb90] sm:$0xff] }
  0x6e   : > { %554 = vst [vmem:[%s5281_s27 + $0x5c0] sm:$0xff] %v553_v56  ;;  %556 = vst [vmem:[%s5281_s27 + $0x5c8] sm:$0xff] %v555_v57  ;;  %v559_v59 = vld [vmem:[%s5276_s26 + $0xb98] sm:$0xff]  ;;  %v561_v60 = vld [vmem:[%s5276_s26 + $0xbc0] sm:$0xff] }
  0x6f   : > { %558 = vst [vmem:[%s5281_s27 + $0x5d0] sm:$0xff] %v557_v58  ;;  %560 = vst [vmem:[%s5281_s27 + $0x5d8] sm:$0xff] %v559_v59  ;;  %v563_v61 = vld [vmem:[%s5276_s26 + $0xbc8] sm:$0xff]  ;;  %v565_v62 = vld [vmem:[%s5276_s26 + $0xbd0] sm:$0xff] }
  0x70   : > { %562 = vst [vmem:[%s5281_s27 + $0x5e0] sm:$0xff] %v561_v60  ;;  %v567_v63 = vld [vmem:[%s5276_s26 + $0xbd8] sm:$0xff]  ;;  %564 = vst [vmem:[%s5281_s27 + $0x5e8] sm:$0xff] %v563_v61  ;;  %v569_v0 = vld [vmem:[%s5276_s26 + $0xc00] sm:$0xff] }
  0x71   : > { %566 = vst [vmem:[%s5281_s27 + $0x5f0] sm:$0xff] %v565_v62  ;;  %568 = vst [vmem:[%s5281_s27 + $0x5f8] sm:$0xff] %v567_v63  ;;  %v571_v1 = vld [vmem:[%s5276_s26 + $0xc08] sm:$0xff]  ;;  %v573_v2 = vld [vmem:[%s5276_s26 + $0xc10] sm:$0xff] }
  0x72   : > { %570 = vst [vmem:[%s5281_s27 + $0x600] sm:$0xff] %v569_v0  ;;  %572 = vst [vmem:[%s5281_s27 + $0x608] sm:$0xff] %v571_v1  ;;  %v575_v3 = vld [vmem:[%s5276_s26 + $0xc18] sm:$0xff]  ;;  %v577_v4 = vld [vmem:[%s5276_s26 + $0xc40] sm:$0xff] }
  0x73   : > { %574 = vst [vmem:[%s5281_s27 + $0x610] sm:$0xff] %v573_v2  ;;  %v579_v5 = vld [vmem:[%s5276_s26 + $0xc48] sm:$0xff]  ;;  %576 = vst [vmem:[%s5281_s27 + $0x618] sm:$0xff] %v575_v3  ;;  %v581_v6 = vld [vmem:[%s5276_s26 + $0xc50] sm:$0xff] }
  0x74   : > { %578 = vst [vmem:[%s5281_s27 + $0x620] sm:$0xff] %v577_v4  ;;  %580 = vst [vmem:[%s5281_s27 + $0x628] sm:$0xff] %v579_v5  ;;  %v583_v7 = vld [vmem:[%s5276_s26 + $0xc58] sm:$0xff]  ;;  %v585_v8 = vld [vmem:[%s5276_s26 + $0xc80] sm:$0xff] }
  0x75   : > { %582 = vst [vmem:[%s5281_s27 + $0x630] sm:$0xff] %v581_v6  ;;  %584 = vst [vmem:[%s5281_s27 + $0x638] sm:$0xff] %v583_v7  ;;  %v587_v9 = vld [vmem:[%s5276_s26 + $0xc88] sm:$0xff]  ;;  %v589_v10 = vld [vmem:[%s5276_s26 + $0xc90] sm:$0xff] }
  0x76   : > { %586 = vst [vmem:[%s5281_s27 + $0x640] sm:$0xff] %v585_v8  ;;  %v591_v11 = vld [vmem:[%s5276_s26 + $0xc98] sm:$0xff]  ;;  %588 = vst [vmem:[%s5281_s27 + $0x648] sm:$0xff] %v587_v9  ;;  %v593_v12 = vld [vmem:[%s5276_s26 + $0xcc0] sm:$0xff] }
  0x77   : > { %590 = vst [vmem:[%s5281_s27 + $0x650] sm:$0xff] %v589_v10  ;;  %592 = vst [vmem:[%s5281_s27 + $0x658] sm:$0xff] %v591_v11  ;;  %v595_v13 = vld [vmem:[%s5276_s26 + $0xcc8] sm:$0xff]  ;;  %v597_v14 = vld [vmem:[%s5276_s26 + $0xcd0] sm:$0xff] }
  0x78   : > { %594 = vst [vmem:[%s5281_s27 + $0x660] sm:$0xff] %v593_v12  ;;  %596 = vst [vmem:[%s5281_s27 + $0x668] sm:$0xff] %v595_v13  ;;  %v599_v15 = vld [vmem:[%s5276_s26 + $0xcd8] sm:$0xff]  ;;  %v601_v16 = vld [vmem:[%s5276_s26 + $0xd00] sm:$0xff] }
  0x79   : > { %598 = vst [vmem:[%s5281_s27 + $0x670] sm:$0xff] %v597_v14  ;;  %v603_v17 = vld [vmem:[%s5276_s26 + $0xd08] sm:$0xff]  ;;  %600 = vst [vmem:[%s5281_s27 + $0x678] sm:$0xff] %v599_v15  ;;  %v605_v18 = vld [vmem:[%s5276_s26 + $0xd10] sm:$0xff] }
  0x7a   : > { %602 = vst [vmem:[%s5281_s27 + $0x680] sm:$0xff] %v601_v16  ;;  %604 = vst [vmem:[%s5281_s27 + $0x688] sm:$0xff] %v603_v17  ;;  %v607_v19 = vld [vmem:[%s5276_s26 + $0xd18] sm:$0xff]  ;;  %v609_v20 = vld [vmem:[%s5276_s26 + $0xd40] sm:$0xff] }
  0x7b   : > { %606 = vst [vmem:[%s5281_s27 + $0x690] sm:$0xff] %v605_v18  ;;  %608 = vst [vmem:[%s5281_s27 + $0x698] sm:$0xff] %v607_v19  ;;  %v611_v21 = vld [vmem:[%s5276_s26 + $0xd48] sm:$0xff]  ;;  %v613_v22 = vld [vmem:[%s5276_s26 + $0xd50] sm:$0xff] }
  0x7c   : > { %610 = vst [vmem:[%s5281_s27 + $0x6a0] sm:$0xff] %v609_v20  ;;  %v615_v23 = vld [vmem:[%s5276_s26 + $0xd58] sm:$0xff]  ;;  %612 = vst [vmem:[%s5281_s27 + $0x6a8] sm:$0xff] %v611_v21  ;;  %v617_v24 = vld [vmem:[%s5276_s26 + $0xd80] sm:$0xff] }
  0x7d   : > { %614 = vst [vmem:[%s5281_s27 + $0x6b0] sm:$0xff] %v613_v22  ;;  %616 = vst [vmem:[%s5281_s27 + $0x6b8] sm:$0xff] %v615_v23  ;;  %v619_v25 = vld [vmem:[%s5276_s26 + $0xd88] sm:$0xff]  ;;  %v621_v26 = vld [vmem:[%s5276_s26 + $0xd90] sm:$0xff] }
  0x7e   : > { %618 = vst [vmem:[%s5281_s27 + $0x6c0] sm:$0xff] %v617_v24  ;;  %620 = vst [vmem:[%s5281_s27 + $0x6c8] sm:$0xff] %v619_v25  ;;  %v623_v27 = vld [vmem:[%s5276_s26 + $0xd98] sm:$0xff]  ;;  %v625_v28 = vld [vmem:[%s5276_s26 + $0xdc0] sm:$0xff] }
  0x7f   : > { %622 = vst [vmem:[%s5281_s27 + $0x6d0] sm:$0xff] %v621_v26  ;;  %v627_v29 = vld [vmem:[%s5276_s26 + $0xdc8] sm:$0xff]  ;;  %624 = vst [vmem:[%s5281_s27 + $0x6d8] sm:$0xff] %v623_v27  ;;  %v629_v30 = vld [vmem:[%s5276_s26 + $0xdd0] sm:$0xff] }
  0x80   : > { %626 = vst [vmem:[%s5281_s27 + $0x6e0] sm:$0xff] %v625_v28  ;;  %628 = vst [vmem:[%s5281_s27 + $0x6e8] sm:$0xff] %v627_v29  ;;  %v631_v31 = vld [vmem:[%s5276_s26 + $0xdd8] sm:$0xff]  ;;  %v633_v32 = vld [vmem:[%s5276_s26 + $0xe00] sm:$0xff] }
  0x81   : > { %630 = vst [vmem:[%s5281_s27 + $0x6f0] sm:$0xff] %v629_v30  ;;  %632 = vst [vmem:[%s5281_s27 + $0x6f8] sm:$0xff] %v631_v31  ;;  %v635_v33 = vld [vmem:[%s5276_s26 + $0xe08] sm:$0xff]  ;;  %v637_v34 = vld [vmem:[%s5276_s26 + $0xe10] sm:$0xff] }
  0x82   : > { %634 = vst [vmem:[%s5281_s27 + $0x700] sm:$0xff] %v633_v32  ;;  %v639_v35 = vld [vmem:[%s5276_s26 + $0xe18] sm:$0xff]  ;;  %636 = vst [vmem:[%s5281_s27 + $0x708] sm:$0xff] %v635_v33  ;;  %v641_v36 = vld [vmem:[%s5276_s26 + $0xe40] sm:$0xff] }
  0x83   : > { %638 = vst [vmem:[%s5281_s27 + $0x710] sm:$0xff] %v637_v34  ;;  %640 = vst [vmem:[%s5281_s27 + $0x718] sm:$0xff] %v639_v35  ;;  %v643_v37 = vld [vmem:[%s5276_s26 + $0xe48] sm:$0xff]  ;;  %v645_v38 = vld [vmem:[%s5276_s26 + $0xe50] sm:$0xff] }
  0x84   : > { %642 = vst [vmem:[%s5281_s27 + $0x720] sm:$0xff] %v641_v36  ;;  %644 = vst [vmem:[%s5281_s27 + $0x728] sm:$0xff] %v643_v37  ;;  %v647_v39 = vld [vmem:[%s5276_s26 + $0xe58] sm:$0xff]  ;;  %v649_v40 = vld [vmem:[%s5276_s26 + $0xe80] sm:$0xff] }
  0x85   : > { %646 = vst [vmem:[%s5281_s27 + $0x730] sm:$0xff] %v645_v38  ;;  %v651_v41 = vld [vmem:[%s5276_s26 + $0xe88] sm:$0xff]  ;;  %648 = vst [vmem:[%s5281_s27 + $0x738] sm:$0xff] %v647_v39  ;;  %v653_v42 = vld [vmem:[%s5276_s26 + $0xe90] sm:$0xff] }
  0x86   : > { %650 = vst [vmem:[%s5281_s27 + $0x740] sm:$0xff] %v649_v40  ;;  %652 = vst [vmem:[%s5281_s27 + $0x748] sm:$0xff] %v651_v41  ;;  %v655_v43 = vld [vmem:[%s5276_s26 + $0xe98] sm:$0xff]  ;;  %v657_v44 = vld [vmem:[%s5276_s26 + $0xec0] sm:$0xff] }
  0x87   : > { %654 = vst [vmem:[%s5281_s27 + $0x750] sm:$0xff] %v653_v42  ;;  %656 = vst [vmem:[%s5281_s27 + $0x758] sm:$0xff] %v655_v43  ;;  %v659_v45 = vld [vmem:[%s5276_s26 + $0xec8] sm:$0xff]  ;;  %v661_v46 = vld [vmem:[%s5276_s26 + $0xed0] sm:$0xff] }
  0x88   : > { %658 = vst [vmem:[%s5281_s27 + $0x760] sm:$0xff] %v657_v44  ;;  %v663_v47 = vld [vmem:[%s5276_s26 + $0xed8] sm:$0xff]  ;;  %660 = vst [vmem:[%s5281_s27 + $0x768] sm:$0xff] %v659_v45  ;;  %v665_v48 = vld [vmem:[%s5276_s26 + $0xf00] sm:$0xff] }
  0x89   : > { %662 = vst [vmem:[%s5281_s27 + $0x770] sm:$0xff] %v661_v46  ;;  %664 = vst [vmem:[%s5281_s27 + $0x778] sm:$0xff] %v663_v47  ;;  %v667_v49 = vld [vmem:[%s5276_s26 + $0xf08] sm:$0xff]  ;;  %v669_v50 = vld [vmem:[%s5276_s26 + $0xf10] sm:$0xff] }
  0x8a   : > { %666 = vst [vmem:[%s5281_s27 + $0x780] sm:$0xff] %v665_v48  ;;  %668 = vst [vmem:[%s5281_s27 + $0x788] sm:$0xff] %v667_v49  ;;  %v671_v51 = vld [vmem:[%s5276_s26 + $0xf18] sm:$0xff]  ;;  %v673_v52 = vld [vmem:[%s5276_s26 + $0xf40] sm:$0xff] }
  0x8b   : > { %670 = vst [vmem:[%s5281_s27 + $0x790] sm:$0xff] %v669_v50  ;;  %v675_v53 = vld [vmem:[%s5276_s26 + $0xf48] sm:$0xff]  ;;  %672 = vst [vmem:[%s5281_s27 + $0x798] sm:$0xff] %v671_v51  ;;  %v677_v54 = vld [vmem:[%s5276_s26 + $0xf50] sm:$0xff] }
  0x8c   : > { %674 = vst [vmem:[%s5281_s27 + $0x7a0] sm:$0xff] %v673_v52  ;;  %676 = vst [vmem:[%s5281_s27 + $0x7a8] sm:$0xff] %v675_v53  ;;  %v679_v55 = vld [vmem:[%s5276_s26 + $0xf58] sm:$0xff]  ;;  %v681_v56 = vld [vmem:[%s5276_s26 + $0xf80] sm:$0xff] }
  0x8d   : > { %678 = vst [vmem:[%s5281_s27 + $0x7b0] sm:$0xff] %v677_v54  ;;  %680 = vst [vmem:[%s5281_s27 + $0x7b8] sm:$0xff] %v679_v55  ;;  %v683_v57 = vld [vmem:[%s5276_s26 + $0xf88] sm:$0xff]  ;;  %v685_v58 = vld [vmem:[%s5276_s26 + $0xf90] sm:$0xff] }
  0x8e   : > { %682 = vst [vmem:[%s5281_s27 + $0x7c0] sm:$0xff] %v681_v56  ;;  %v687_v59 = vld [vmem:[%s5276_s26 + $0xf98] sm:$0xff]  ;;  %684 = vst [vmem:[%s5281_s27 + $0x7c8] sm:$0xff] %v683_v57  ;;  %v689_v60 = vld [vmem:[%s5276_s26 + $0xfc0] sm:$0xff] }
  0x8f   : > { %686 = vst [vmem:[%s5281_s27 + $0x7d0] sm:$0xff] %v685_v58  ;;  %688 = vst [vmem:[%s5281_s27 + $0x7d8] sm:$0xff] %v687_v59  ;;  %v691_v61 = vld [vmem:[%s5276_s26 + $0xfc8] sm:$0xff]  ;;  %v693_v62 = vld [vmem:[%s5276_s26 + $0xfd0] sm:$0xff] }
  0x90   : > { %690 = vst [vmem:[%s5281_s27 + $0x7e0] sm:$0xff] %v689_v60  ;;  %692 = vst [vmem:[%s5281_s27 + $0x7e8] sm:$0xff] %v691_v61  ;;  %v695_v63 = vld [vmem:[%s5276_s26 + $0xfd8] sm:$0xff] }
  0x91   : > { %694 = vst [vmem:[%s5281_s27 + $0x7f0] sm:$0xff] %v693_v62  ;;  %696 = vst [vmem:[%s5281_s27 + $0x7f8] sm:$0xff] %v695_v63 }
  0x92 PF: > { %p4733_p6 = scmp.ge.s32.totalorder %s5209_s16, 1  ;;  %p713_p7 = scmp.lt.s32.totalorder %s5209_s16, 3 }
  0x94   : > { %p714_p8 = pnand %p4733_p6, %p713_p7 }
  0x96   : > { %717 = sbr.rel (%p714_p8) target bundleno = 1130 (0x46a), region = 47 }
  0x9d   : > { %s720_s28 = sand.u32 1, %s5193_s12   ;;  %s4735_s29 = sshll.u32 %s5201_s14, 7 }
  0x9e   : > { %s4734_s30 = sshll.u32 %s720_s28, 11  ;;  %p764_p9 = scmp.lt.s32.totalorder %s4735_s29, 255 }
  0x9f   : > { %s5801_s8 = scalar_lea.vmem [#allocation3], %s4734_s30  ;;  %p4737_p10 = scmp.ne.s32.totalorder %s5201_s14, 0 }
  0xa0   : > { %s7086_s29 = smov (!%p764_p9, %s4735_s29), 255  ;;  %v5211_v0 = vmov (!%p4737_p10), 0.0  }
  0xa1   : > { %s4736_s4 = sshll.u32 %s7086_s29, 2  ;;  %792 = sbr.rel (%p4737_p10) target bundleno = 193 (0xc1), region = 55  ;;  %793 = vst [vmem:[#allocation2] sm:$0xff] (!%p4737_p10), %v5211_v0  ;;  %794 = vst [vmem:[#allocation2 + $0x8] sm:$0xff] (!%p4737_p10), %v5211_v0 }
  0xa2   : > { %s5799_s7 = scalar_lea.vmem %s7020_s1, %s4736_s4  ;;  %795 = vst [vmem:[#allocation2 + $0x10] sm:$0xff] (!%p4737_p10), %v5211_v0  ;;  %796 = vst [vmem:[#allocation2 + $0x18] sm:$0xff] (!%p4737_p10), %v5211_v0 }
  0xa3   : > { %797 = vst [vmem:[#allocation2 + $0x20] sm:$0xff] (!%p4737_p10), %v5211_v0  ;;  %798 = vst [vmem:[#allocation2 + $0x28] sm:$0xff] (!%p4737_p10), %v5211_v0 }
  0xa4   : > { %799 = vst [vmem:[#allocation2 + $0x30] sm:$0xff] (!%p4737_p10), %v5211_v0  ;;  %800 = vst [vmem:[#allocation2 + $0x38] sm:$0xff] (!%p4737_p10), %v5211_v0 }
  0xa5   : > { %801 = vst [vmem:[#allocation2 + $0x40] sm:$0xff] (!%p4737_p10), %v5211_v0  ;;  %802 = vst [vmem:[#allocation2 + $0x48] sm:$0xff] (!%p4737_p10), %v5211_v0 }
  0xa6   : > { %803 = vst [vmem:[#allocation2 + $0x50] sm:$0xff] (!%p4737_p10), %v5211_v0  ;;  %804 = vst [vmem:[#allocation2 + $0x58] sm:$0xff] (!%p4737_p10), %v5211_v0 }
  0xa7   : > { %805 = vst [vmem:[#allocation2 + $0x60] sm:$0xff] (!%p4737_p10), %v5211_v0  ;;  %806 = vst [vmem:[#allocation2 + $0x68] sm:$0xff] (!%p4737_p10), %v5211_v0 }
  0xa8   : > { %807 = vst [vmem:[#allocation2 + $0x70] sm:$0xff] %v5211_v0  ;;  %808 = vst [vmem:[#allocation2 + $0x78] sm:$0xff] %v5211_v0 }
  0xa9   : > { %809 = vst [vmem:[#allocation2 + $0x80] sm:$0xff] %v5211_v0  ;;  %810 = vst [vmem:[#allocation2 + $0x88] sm:$0xff] %v5211_v0 }
  0xaa   : > { %811 = vst [vmem:[#allocation2 + $0x90] sm:$0xff] %v5211_v0  ;;  %812 = vst [vmem:[#allocation2 + $0x98] sm:$0xff] %v5211_v0 }
  0xab   : > { %813 = vst [vmem:[#allocation2 + $0xa0] sm:$0xff] %v5211_v0  ;;  %814 = vst [vmem:[#allocation2 + $0xa8] sm:$0xff] %v5211_v0 }
  0xac   : > { %815 = vst [vmem:[#allocation2 + $0xb0] sm:$0xff] %v5211_v0  ;;  %816 = vst [vmem:[#allocation2 + $0xb8] sm:$0xff] %v5211_v0 }
  0xad   : > { %817 = vst [vmem:[#allocation2 + $0xc0] sm:$0xff] %v5211_v0  ;;  %818 = vst [vmem:[#allocation2 + $0xc8] sm:$0xff] %v5211_v0 }
  0xae   : > { %819 = vst [vmem:[#allocation2 + $0xd0] sm:$0xff] %v5211_v0  ;;  %820 = vst [vmem:[#allocation2 + $0xd8] sm:$0xff] %v5211_v0 }
  0xaf   : > { %821 = vst [vmem:[#allocation2 + $0xe0] sm:$0xff] %v5211_v0  ;;  %822 = vst [vmem:[#allocation2 + $0xe8] sm:$0xff] %v5211_v0 }
  0xb0   : > { %823 = vst [vmem:[#allocation2 + $0xf0] sm:$0xff] %v5211_v0  ;;  %824 = vst [vmem:[#allocation2 + $0xf8] sm:$0xff] %v5211_v0 }
  0xb1   : > { %825 = vst [vmem:[#allocation2 + $0x100] sm:$0xff] %v5211_v0  ;;  %826 = vst [vmem:[#allocation2 + $0x108] sm:$0xff] %v5211_v0 }
  0xb2   : > { %827 = vst [vmem:[#allocation2 + $0x110] sm:$0xff] %v5211_v0  ;;  %828 = vst [vmem:[#allocation2 + $0x118] sm:$0xff] %v5211_v0 }
  0xb3   : > { %829 = vst [vmem:[#allocation2 + $0x120] sm:$0xff] %v5211_v0  ;;  %830 = vst [vmem:[#allocation2 + $0x128] sm:$0xff] %v5211_v0 }
  0xb4   : > { %831 = vst [vmem:[#allocation2 + $0x130] sm:$0xff] %v5211_v0  ;;  %832 = vst [vmem:[#allocation2 + $0x138] sm:$0xff] %v5211_v0 }
  0xb5   : > { %833 = vst [vmem:[#allocation2 + $0x140] sm:$0xff] %v5211_v0  ;;  %834 = vst [vmem:[#allocation2 + $0x148] sm:$0xff] %v5211_v0 }
  0xb6   : > { %835 = vst [vmem:[#allocation2 + $0x150] sm:$0xff] %v5211_v0  ;;  %836 = vst [vmem:[#allocation2 + $0x158] sm:$0xff] %v5211_v0 }
  0xb7   : > { %837 = vst [vmem:[#allocation2 + $0x160] sm:$0xff] %v5211_v0  ;;  %838 = vst [vmem:[#allocation2 + $0x168] sm:$0xff] %v5211_v0 }
  0xb8   : > { %839 = vst [vmem:[#allocation2 + $0x170] sm:$0xff] %v5211_v0  ;;  %840 = vst [vmem:[#allocation2 + $0x178] sm:$0xff] %v5211_v0 }
  0xb9   : > { %841 = vst [vmem:[#allocation2 + $0x180] sm:$0xff] %v5211_v0  ;;  %842 = vst [vmem:[#allocation2 + $0x188] sm:$0xff] %v5211_v0 }
  0xba   : > { %843 = vst [vmem:[#allocation2 + $0x190] sm:$0xff] %v5211_v0  ;;  %844 = vst [vmem:[#allocation2 + $0x198] sm:$0xff] %v5211_v0 }
  0xbb   : > { %845 = vst [vmem:[#allocation2 + $0x1a0] sm:$0xff] %v5211_v0  ;;  %846 = vst [vmem:[#allocation2 + $0x1a8] sm:$0xff] %v5211_v0 }
  0xbc   : > { %847 = vst [vmem:[#allocation2 + $0x1b0] sm:$0xff] %v5211_v0  ;;  %848 = vst [vmem:[#allocation2 + $0x1b8] sm:$0xff] %v5211_v0 }
  0xbd   : > { %849 = vst [vmem:[#allocation2 + $0x1c0] sm:$0xff] %v5211_v0  ;;  %850 = vst [vmem:[#allocation2 + $0x1c8] sm:$0xff] %v5211_v0 }
  0xbe   : > { %851 = vst [vmem:[#allocation2 + $0x1d0] sm:$0xff] %v5211_v0  ;;  %852 = vst [vmem:[#allocation2 + $0x1d8] sm:$0xff] %v5211_v0 }
  0xbf   : > { %853 = vst [vmem:[#allocation2 + $0x1e0] sm:$0xff] %v5211_v0  ;;  %854 = vst [vmem:[#allocation2 + $0x1e8] sm:$0xff] %v5211_v0 }
  0xc0   : > { %855 = vst [vmem:[#allocation2 + $0x1f0] sm:$0xff] %v5211_v0  ;;  %856 = vst [vmem:[#allocation2 + $0x1f8] sm:$0xff] %v5211_v0 }
  0xc1 PF: > { %v5107_v1 = vld [vmem:[%s5799_s7] sm:$0xff]   ;;  %v5212_v2 = vmov 0   ;;  %v5109_v4 = vld [vmem:[%s5799_s7 + $0x8] sm:$0xff]   ;;  %v5111_v6 = vld [vmem:[%s5799_s7 + $0x10] sm:$0xff]   ;;  %p5058_p11 = scmp.ne.s32.totalorder %s5201_s14, 1 }
  0xc2   : > { %2969 = vmatprep.subr.bf16.mxu0 %v5212_v2  ;;  %3258 = vmatprep.subr.bf16.mxu1 %v5212_v2  ;;  %v5108_v3 = vld [vmem:[%s5799_s7 + $0x80] sm:$0xff]   ;;  %v5110_v5 = vld [vmem:[%s5799_s7 + $0x88] sm:$0xff]   ;;  %v5112_v7 = vld [vmem:[%s5799_s7 + $0x90] sm:$0xff]  }
  0xc3   : > { %2970 = vmatpush1.bf16.msra.mxu0 %v5107_v1  ;;  %3259 = vmatpush1.bf16.msra.mxu1 %v5108_v3  ;;  %v5113_v8 = vld [vmem:[%s5799_s7 + $0x18] sm:$0xff]   ;;  %v5115_v10 = vld [vmem:[%s5799_s7 + $0x20] sm:$0xff]   ;;  %v5117_v12 = vld [vmem:[%s5799_s7 + $0x28] sm:$0xff]  }
  0xc4   : > { %2971 = vmatprep.subr.bf16.mxu0 %v5212_v2  ;;  %3260 = vmatprep.subr.bf16.mxu1 %v5212_v2  ;;  %v5114_v9 = vld [vmem:[%s5799_s7 + $0x98] sm:$0xff]   ;;  %v5116_v11 = vld [vmem:[%s5799_s7 + $0xa0] sm:$0xff]   ;;  %v5118_v13 = vld [vmem:[%s5799_s7 + $0xa8] sm:$0xff]  }
  0xc5   : > { %v5119_v14 = vld [vmem:[%s5799_s7 + $0x30] sm:$0xff]   ;;  %v5121_v16 = vld [vmem:[%s5799_s7 + $0x38] sm:$0xff]   ;;  %v5123_v18 = vld [vmem:[%s5799_s7 + $0x40] sm:$0xff]  }
  0xc6   : > { %v5120_v15 = vld [vmem:[%s5799_s7 + $0xb0] sm:$0xff]   ;;  %v5122_v17 = vld [vmem:[%s5799_s7 + $0xb8] sm:$0xff]   ;;  %v5124_v19 = vld [vmem:[%s5799_s7 + $0xc0] sm:$0xff]  }
  0xc7   : > { %2972 = vmatpush1.bf16.msra.mxu0 %v5109_v4  ;;  %3261 = vmatpush1.bf16.msra.mxu1 %v5110_v5  ;;  %v5905_v20 = vld [vmem:[%s5801_s8] sm:$0xff]  ;;  %v5911_v22 = vld [vmem:[%s5801_s8 + $0x8] sm:$0xff]  ;;  %v5127_v28 = vld [vmem:[%s5799_s7 + $0x50] sm:$0xff]  }
  0xc8   : > { %2973 = vmatprep.subr.bf16.mxu0 %v5212_v2  ;;  %3262 = vmatprep.subr.bf16.mxu1 %v5212_v2  ;;  %v5908_v21 = vld [vmem:[%s5801_s8 + $0x20] sm:$0xff]  ;;  %v5916_v24 = vld [vmem:[%s5801_s8 + $0x28] sm:$0xff]  ;;  %v5128_v29 = vld [vmem:[%s5799_s7 + $0xd0] sm:$0xff]  }
  0xc9   : > { %v4739_v23 = vcombine.high %v5905_v20, %v5908_v21  ;;  %v5125_v25 = vld [vmem:[%s5799_s7 + $0x48] sm:$0xff]   ;;  %v4741_v26 = vcombine.high %v5911_v22, %v5916_v24  ;;  %v5129_v30 = vld [vmem:[%s5799_s7 + $0x58] sm:$0xff]   ;;  %v5131_v32 = vld [vmem:[%s5799_s7 + $0x60] sm:$0xff]   ;;  %v4738_v43 = vcombine.low %v5905_v20, %v5908_v21  ;;  %v4740_v45 = vcombine.low %v5911_v22, %v5916_v24 }
  0xca   : > { %v5126_v27 = vld [vmem:[%s5799_s7 + $0xc8] sm:$0xff]   ;;  %v5130_v31 = vld [vmem:[%s5799_s7 + $0xd8] sm:$0xff]   ;;  %v5132_v33 = vld [vmem:[%s5799_s7 + $0xe0] sm:$0xff]  }
  0xcb   : > { %2974 = vmatpush1.bf16.msra.mxu0 %v5111_v6  ;;  %3263 = vmatpush1.bf16.msra.mxu1 %v5112_v7  ;;  %v5133_v34 = vld [vmem:[%s5799_s7 + $0x68] sm:$0xff]   ;;  %v5135_v36 = vld [vmem:[%s5799_s7 + $0x70] sm:$0xff]   ;;  %v5137_v38 = vld [vmem:[%s5799_s7 + $0x78] sm:$0xff]  }
  0xcc   : > { %2975 = vmatprep.subr.bf16.mxu0 %v5212_v2  ;;  %3264 = vmatprep.subr.bf16.mxu1 %v5212_v2  ;;  %v5134_v35 = vld [vmem:[%s5799_s7 + $0xe8] sm:$0xff]   ;;  %v5136_v37 = vld [vmem:[%s5799_s7 + $0xf0] sm:$0xff]   ;;  %v5138_v39 = vld [vmem:[%s5799_s7 + $0xf8] sm:$0xff]  }
  0xcd   : > { %3001 = vmatprep.mubr.bf16.mxu0 %v4739_v23  ;;  %3290 = vmatprep.mubr.bf16.mxu1 %v4741_v26  ;;  %v929_v40 = vld [vmem:[%s5801_s8 + $0x40] sm:$0xff]  ;;  %v930_v42 = vld [vmem:[%s5801_s8 + $0x48] sm:$0xff]  ;;  %v5143_v60 = vld [vmem:[%s5799_s7 + $0x110] sm:$0xff]  }
  0xce   : > { %v933_v41 = vld [vmem:[%s5801_s8 + $0x60] sm:$0xff]  ;;  %v934_v44 = vld [vmem:[%s5801_s8 + $0x68] sm:$0xff]  ;;  %v5144_v61 = vld [vmem:[%s5799_s7 + $0x190] sm:$0xff]  }
  0xcf   : > { %2976 = vmatpush1.bf16.msra.mxu0 %v5113_v8  ;;  %3265 = vmatpush1.bf16.msra.mxu1 %v5114_v9  ;;  %v5139_v46 = vld [vmem:[%s5799_s7 + $0x100] sm:$0xff]   ;;  %v4747_v48 = vcombine.high %v929_v40, %v933_v41  ;;  %v4749_v49 = vcombine.high %v930_v42, %v934_v44  ;;  %v5141_v52 = vld [vmem:[%s5799_s7 + $0x108] sm:$0xff]   ;;  %v4746_v56 = vcombine.low %v929_v40, %v933_v41  ;;  %v5145_v3 = vld [vmem:[%s5799_s7 + $0x118] sm:$0xff]  }
  0xd0   : > { %2977 = vmatprep.subr.bf16.mxu0 %v5212_v2  ;;  %3266 = vmatprep.subr.bf16.mxu1 %v5212_v2  ;;  %v5140_v47 = vld [vmem:[%s5799_s7 + $0x180] sm:$0xff]   ;;  %v5142_v53 = vld [vmem:[%s5799_s7 + $0x188] sm:$0xff]   ;;  %v4748_v57 = vcombine.low %v930_v42, %v934_v44  ;;  %v5146_v4 = vld [vmem:[%s5799_s7 + $0x198] sm:$0xff]  }
  0xd1   : > { %v937_v50 = vld [vmem:[%s5801_s8 + $0x80] sm:$0xff]  ;;  %v938_v54 = vld [vmem:[%s5801_s8 + $0x88] sm:$0xff]  ;;  %v5151_v21 = vld [vmem:[%s5799_s7 + $0x130] sm:$0xff]  }
  0xd2   : > { %v941_v51 = vld [vmem:[%s5801_s8 + $0xa0] sm:$0xff]  ;;  %v942_v55 = vld [vmem:[%s5801_s8 + $0xa8] sm:$0xff]  ;;  %v5152_v22 = vld [vmem:[%s5799_s7 + $0x1b0] sm:$0xff]  }
  0xd3   : > { %2978 = vmatpush1.bf16.msra.mxu0 %v5115_v10  ;;  %3267 = vmatpush1.bf16.msra.mxu1 %v5116_v11  ;;  %v4755_v58 = vcombine.high %v937_v50, %v941_v51  ;;  %v4757_v59 = vcombine.high %v938_v54, %v942_v55  ;;  %v945_v62 = vld [vmem:[%s5801_s8 + $0xc0] sm:$0xff]  ;;  %v946_v0 = vld [vmem:[%s5801_s8 + $0xc8] sm:$0xff]  ;;  %v4754_v5 = vcombine.low %v937_v50, %v941_v51 }
  0xd4   : > { %2979 = vmatprep.subr.bf16.mxu0 %v5212_v2  ;;  %3268 = vmatprep.subr.bf16.mxu1 %v5212_v2  ;;  %v949_v63 = vld [vmem:[%s5801_s8 + $0xe0] sm:$0xff]  ;;  %v950_v1 = vld [vmem:[%s5801_s8 + $0xe8] sm:$0xff]  ;;  %v4756_v7 = vcombine.low %v938_v54, %v942_v55  ;;  %v5161_v55 = vld [vmem:[%s5799_s7 + $0x158] sm:$0xff]  }
  0xd5   : > { %v5147_v6 = vld [vmem:[%s5799_s7 + $0x120] sm:$0xff]   ;;  %v4763_v8 = vcombine.high %v945_v62, %v949_v63  ;;  %v4765_v10 = vcombine.high %v946_v0, %v950_v1  ;;  %v962_v26 = vld [vmem:[%s5801_s8 + $0x148] sm:$0xff] }
  0xd6   : > { %v5148_v9 = vld [vmem:[%s5799_s7 + $0x1a0] sm:$0xff]   ;;  %v5158_v40 = vld [vmem:[%s5799_s7 + $0x1c8] sm:$0xff]  }
  0xd7   : > { %2980 = vmatpush1.bf16.msra.mxu0 %v5117_v12  ;;  %3269 = vmatpush1.bf16.msra.mxu1 %v5118_v13  ;;  %v953_v11 = vld [vmem:[%s5801_s8 + $0x100] sm:$0xff]  ;;  %v954_v13 = vld [vmem:[%s5801_s8 + $0x108] sm:$0xff] }
  0xd8   : > { %2981 = vmatprep.subr.bf16.mxu0 %v5212_v2  ;;  %3270 = vmatprep.subr.bf16.mxu1 %v5212_v2  ;;  %v957_v12 = vld [vmem:[%s5801_s8 + $0x120] sm:$0xff]  ;;  %v982_v50 = vld [vmem:[%s5801_s8 + $0x1e8] sm:$0xff] }
  0xd9   : > { %v961_v23 = vld [vmem:[%s5801_s8 + $0x140] sm:$0xff] }
  0xda   : > { %v965_v24 = vld [vmem:[%s5801_s8 + $0x160] sm:$0xff] }
  0xdb   : > { %2982 = vmatpush1.bf16.msra.mxu0 %v5119_v14  ;;  %3271 = vmatpush1.bf16.msra.mxu1 %v5120_v15  ;;  %v958_v14 = vld [vmem:[%s5801_s8 + $0x128] sm:$0xff]  ;;  %v4778_v41 = vcombine.low %v961_v23, %v965_v24 }
  0xdc   : > { %2983 = vmatprep.subr.bf16.mxu0 %v5212_v2  ;;  %3272 = vmatprep.subr.bf16.mxu1 %v5212_v2  ;;  %v5149_v15 = vld [vmem:[%s5799_s7 + $0x128] sm:$0xff]   ;;  %v4773_v20 = vcombine.high %v954_v13, %v958_v14 }
  0xdf   : > { %2984 = vmatpush1.bf16.msra.mxu0 %v5121_v16  ;;  %3273 = vmatpush1.bf16.msra.mxu1 %v5122_v17  ;;  %v5150_v16 = vld [vmem:[%s5799_s7 + $0x1a8] sm:$0xff]   ;;  %v4762_v17 = vcombine.low %v945_v62, %v949_v63 }
  0xe0   : > { %2985 = vmatprep.subr.bf16.mxu0 %v5212_v2  ;;  %3274 = vmatprep.subr.bf16.mxu1 %v5212_v2 }
  0xe3   : > { %2986 = vmatpush1.bf16.msra.mxu0 %v5123_v18  ;;  %3275 = vmatpush1.bf16.msra.mxu1 %v5124_v19  ;;  %v4764_v18 = vcombine.low %v946_v0, %v950_v1  ;;  %v4771_v19 = vcombine.high %v953_v11, %v957_v12  ;;  %v993_v1 = vld [vmem:[%s5801_s8 + $0x240] sm:$0xff] }
  0xe4   : > { %2987 = vmatprep.subr.bf16.mxu0 %v5212_v2  ;;  %3276 = vmatprep.subr.bf16.mxu1 %v5212_v2 }
  0xe7   : > { %2988 = vmatpush1.bf16.msra.mxu0 %v5125_v25  ;;  %3277 = vmatpush1.bf16.msra.mxu1 %v5126_v27  ;;  %v5153_v25 = vld [vmem:[%s5799_s7 + $0x138] sm:$0xff]   ;;  %v966_v27 = vld [vmem:[%s5801_s8 + $0x168] sm:$0xff] }
  0xe8   : > { %2989 = vmatprep.subr.bf16.mxu0 %v5212_v2  ;;  %3278 = vmatprep.subr.bf16.mxu1 %v5212_v2  ;;  %v4780_v42 = vcombine.low %v962_v26, %v966_v27 }
  0xeb   : > { %2990 = vmatpush1.bf16.msra.mxu0 %v5127_v28  ;;  %3279 = vmatpush1.bf16.msra.mxu1 %v5128_v29  ;;  %v5154_v28 = vld [vmem:[%s5799_s7 + $0x1b8] sm:$0xff]   ;;  %v4770_v29 = vcombine.low %v953_v11, %v957_v12  ;;  %v5164_v11 = vld [vmem:[%s5799_s7 + $0x1e0] sm:$0xff]  }
  0xec   : > { %2991 = vmatprep.subr.bf16.mxu0 %v5212_v2  ;;  %3280 = vmatprep.subr.bf16.mxu1 %v5212_v2  ;;  %v1001_v12 = vld [vmem:[%s5801_s8 + $0x280] sm:$0xff] }
  0xef   : > { %2992 = vmatpush1.bf16.msra.mxu0 %v5129_v30  ;;  %3281 = vmatpush1.bf16.msra.mxu1 %v5130_v31  ;;  %v4772_v30 = vcombine.low %v954_v13, %v958_v14  ;;  %v4779_v31 = vcombine.high %v961_v23, %v965_v24  ;;  %v1005_v13 = vld [vmem:[%s5801_s8 + $0x2a0] sm:$0xff]  ;;  %v1002_v14 = vld [vmem:[%s5801_s8 + $0x288] sm:$0xff] }
  0xf0   : > { %2993 = vmatprep.subr.bf16.mxu0 %v5212_v2  ;;  %3282 = vmatprep.subr.bf16.mxu1 %v5212_v2  ;;  %v1014_v23 = vld [vmem:[%s5801_s8 + $0x2e8] sm:$0xff]  ;;  %v4818_v24 = vcombine.low %v1001_v12, %v1005_v13 }
  0xf3   : > { %2994 = vmatpush1.bf16.msra.mxu0 %v5131_v32  ;;  %3283 = vmatpush1.bf16.msra.mxu1 %v5132_v33  ;;  %v4781_v32 = vcombine.high %v962_v26, %v966_v27  ;;  %v5155_v33 = vld [vmem:[%s5799_s7 + $0x140] sm:$0xff]  }
  0xf4   : > { %2995 = vmatprep.subr.bf16.mxu0 %v5212_v2  ;;  %3284 = vmatprep.subr.bf16.mxu1 %v5212_v2 }
  0xf7   : > { %2996 = vmatpush1.bf16.msra.mxu0 %v5133_v34  ;;  %3285 = vmatpush1.bf16.msra.mxu1 %v5134_v35  ;;  %v5156_v34 = vld [vmem:[%s5799_s7 + $0x1c0] sm:$0xff]  }
  0xf8   : > { %2997 = vmatprep.subr.bf16.mxu0 %v5212_v2  ;;  %3286 = vmatprep.subr.bf16.mxu1 %v5212_v2  ;;  %v969_v35 = vld [vmem:[%s5801_s8 + $0x180] sm:$0xff] }
  0xfb   : > { %2998 = vmatpush1.bf16.msra.mxu0 %v5135_v36  ;;  %3287 = vmatpush1.bf16.msra.mxu1 %v5136_v37  ;;  %v973_v36 = vld [vmem:[%s5801_s8 + $0x1a0] sm:$0xff]  ;;  %v5157_v37 = vld [vmem:[%s5799_s7 + $0x148] sm:$0xff]  }
  0xfc   : > { %2999 = vmatprep.subr.bf16.mxu0 %v5212_v2  ;;  %3288 = vmatprep.subr.bf16.mxu1 %v5212_v2  ;;  %v4786_v51 = vcombine.low %v969_v35, %v973_v36 }
  0xff   : > { %3000 = vmatpush1.bf16.msra.mxu0 %v5137_v38  ;;  %3289 = vmatpush1.bf16.msra.mxu1 %v5138_v39  ;;  %v970_v38 = vld [vmem:[%s5801_s8 + $0x188] sm:$0xff] }
 0x100   : > { %3547 = vmatprep.subr.bf16.mxu0 %v5212_v2  ;;  %3836 = vmatprep.subr.bf16.mxu1 %v5212_v2  ;;  %v974_v39 = vld [vmem:[%s5801_s8 + $0x1a8] sm:$0xff] }
 0x101   : > { %v4789_v44 = vcombine.high %v970_v38, %v974_v39 }
 0x102   : > { %3002 = vmatmul.mubr.bf16.vlgmr.msra.gmra.mrb[0].mxu0 %v4738_v43  ;;  %3291 = vmatmul.mubr.bf16.vlgmr.msra.gmra.mrb[0].mxu1 %v4740_v45  ;;  %v4787_v43 = vcombine.high %v969_v35, %v973_v36  ;;  %v5159_v45 = vld [vmem:[%s5799_s7 + $0x150] sm:$0xff]   ;;  %v5166_v36 = vld [vmem:[%s5799_s7 + $0x1e8] sm:$0xff]  }
 0x103   : > { %3548 = vmatpush1.bf16.msra.mxu0 %v5139_v46  ;;  %3837 = vmatpush1.bf16.msra.mxu1 %v5140_v47  ;;  %v5160_v46 = vld [vmem:[%s5799_s7 + $0x1d0] sm:$0xff]   ;;  %v977_v47 = vld [vmem:[%s5801_s8 + $0x1c0] sm:$0xff] }
 0x104   : > { %3009 = vmatprep.mubr.bf16.mxu0 %v4747_v48  ;;  %3298 = vmatprep.mubr.bf16.mxu1 %v4749_v49  ;;  %v981_v48 = vld [vmem:[%s5801_s8 + $0x1e0] sm:$0xff]  ;;  %v978_v49 = vld [vmem:[%s5801_s8 + $0x1c8] sm:$0xff] }
 0x105   : > { %3549 = vmatprep.subr.bf16.mxu0 %v5212_v2  ;;  %3838 = vmatprep.subr.bf16.mxu1 %v5212_v2  ;;  %v4797_v54 = vcombine.high %v978_v49, %v982_v50  ;;  %v4796_v62 = vcombine.low %v978_v49, %v982_v50  ;;  %v1034_v49 = vld [vmem:[%s5801_s8 + $0x388] sm:$0xff] }
 0x106   : > { %v1038_v50 = vld [vmem:[%s5801_s8 + $0x3a8] sm:$0xff] }
 0x107   : > { %3550 = vmatpush1.bf16.msra.mxu0 %v5141_v52  ;;  %3839 = vmatpush1.bf16.msra.mxu1 %v5142_v53  ;;  %v4788_v52 = vcombine.low %v970_v38, %v974_v39  ;;  %v4795_v53 = vcombine.high %v977_v47, %v981_v48  ;;  %v1025_v38 = vld [vmem:[%s5801_s8 + $0x340] sm:$0xff] }
 0x108   : > { %3551 = vmatprep.subr.bf16.mxu0 %v5212_v2  ;;  %3840 = vmatprep.subr.bf16.mxu1 %v5212_v2  ;;  %v1029_v39 = vld [vmem:[%s5801_s8 + $0x360] sm:$0xff] }
 0x10a   : > { %3010 = vmatmul.mubr.bf16.gmra.mrb[4].mxu0 %v4746_v56  ;;  %3299 = vmatmul.mubr.bf16.gmra.mrb[4].mxu1 %v4748_v57  ;;  %v5162_v56 = vld [vmem:[%s5799_s7 + $0x1d8] sm:$0xff]   ;;  %v985_v57 = vld [vmem:[%s5801_s8 + $0x200] sm:$0xff] }
 0x10b   : > { %3017 = vmatprep.mubr.bf16.mxu0 %v4755_v58  ;;  %3306 = vmatprep.mubr.bf16.mxu1 %v4757_v59  ;;  %v989_v58 = vld [vmem:[%s5801_s8 + $0x220] sm:$0xff]  ;;  %v986_v59 = vld [vmem:[%s5801_s8 + $0x208] sm:$0xff] }
 0x10c   : > { %3552 = vmatpush1.bf16.msra.mxu0 %v5143_v60  ;;  %3841 = vmatpush1.bf16.msra.mxu1 %v5144_v61  ;;  %v990_v60 = vld [vmem:[%s5801_s8 + $0x228] sm:$0xff]  ;;  %v4794_v61 = vcombine.low %v977_v47, %v981_v48  ;;  %v4803_v63 = vcombine.high %v985_v57, %v989_v58  ;;  %v1033_v47 = vld [vmem:[%s5801_s8 + $0x380] sm:$0xff] }
 0x10d   : > { %3553 = vmatprep.subr.bf16.mxu0 %v5212_v2  ;;  %3842 = vmatprep.subr.bf16.mxu1 %v5212_v2  ;;  %v4805_v0 = vcombine.high %v986_v59, %v990_v60  ;;  %v1037_v48 = vld [vmem:[%s5801_s8 + $0x3a0] sm:$0xff] }
 0x110   : > { %3554 = vmatpush1.bf16.msra.mxu0 %v5145_v3  ;;  %3843 = vmatpush1.bf16.msra.mxu1 %v5146_v4  ;;  %v997_v3 = vld [vmem:[%s5801_s8 + $0x260] sm:$0xff]  ;;  %v994_v4 = vld [vmem:[%s5801_s8 + $0x248] sm:$0xff] }
 0x111   : > { %3555 = vmatprep.subr.bf16.mxu0 %v5212_v2  ;;  %3844 = vmatprep.subr.bf16.mxu1 %v5212_v2 }
 0x112   : > { %3018 = vmatmul.mubr.bf16.gmra.mrb[8].mxu0 %v4754_v5  ;;  %3307 = vmatmul.mubr.bf16.gmra.mrb[8].mxu1 %v4756_v7  ;;  %v998_v5 = vld [vmem:[%s5801_s8 + $0x268] sm:$0xff]  ;;  %v4804_v7 = vcombine.low %v986_v59, %v990_v60  ;;  %v4850_v60 = vcombine.low %v1033_v47, %v1037_v48 }
 0x113   : > { %3025 = vmatprep.mubr.bf16.mxu0 %v4763_v8  ;;  %3314 = vmatprep.mubr.bf16.mxu1 %v4765_v10  ;;  %v4811_v8 = vcombine.high %v993_v1, %v997_v3  ;;  %v5163_v10 = vld [vmem:[%s5799_s7 + $0x160] sm:$0xff]   ;;  %v1046_v59 = vld [vmem:[%s5801_s8 + $0x3e8] sm:$0xff] }
 0x114   : > { %3556 = vmatpush1.bf16.msra.mxu0 %v5147_v6  ;;  %3845 = vmatpush1.bf16.msra.mxu1 %v5148_v9  ;;  %v4802_v6 = vcombine.low %v985_v57, %v989_v58  ;;  %v4813_v9 = vcombine.high %v994_v4, %v998_v5  ;;  %v1045_v57 = vld [vmem:[%s5801_s8 + $0x3e0] sm:$0xff]  ;;  %v1042_v58 = vld [vmem:[%s5801_s8 + $0x3c8] sm:$0xff] }
 0x115   : > { %3557 = vmatprep.subr.bf16.mxu0 %v5212_v2  ;;  %3846 = vmatprep.subr.bf16.mxu1 %v5212_v2 }
 0x118   : > { %3558 = vmatpush1.bf16.msra.mxu0 %v5149_v15  ;;  %3847 = vmatpush1.bf16.msra.mxu1 %v5150_v16  ;;  %v1006_v15 = vld [vmem:[%s5801_s8 + $0x2a8] sm:$0xff]  ;;  %v4810_v16 = vcombine.low %v993_v1, %v997_v3  ;;  %v1053_v1 = vld [vmem:[%s5801_s8 + $0x420] sm:$0xff] }
 0x119   : > { %3559 = vmatprep.subr.bf16.mxu0 %v5212_v2  ;;  %3848 = vmatprep.subr.bf16.mxu1 %v5212_v2  ;;  %v1050_v3 = vld [vmem:[%s5801_s8 + $0x408] sm:$0xff] }
 0x11a   : > { %3026 = vmatmul.mubr.bf16.gmra.mrb[12].mxu0 %v4762_v17  ;;  %3315 = vmatmul.mubr.bf16.gmra.mrb[12].mxu1 %v4764_v18  ;;  %v4812_v17 = vcombine.low %v994_v4, %v998_v5  ;;  %v4819_v18 = vcombine.high %v1001_v12, %v1005_v13  ;;  %v1054_v4 = vld [vmem:[%s5801_s8 + $0x428] sm:$0xff] }
 0x11b   : > { %3033 = vmatprep.mubr.bf16.mxu0 %v4771_v19  ;;  %3322 = vmatprep.mubr.bf16.mxu1 %v4773_v20  ;;  %v4821_v19 = vcombine.high %v1002_v14, %v1006_v15  ;;  %v1009_v20 = vld [vmem:[%s5801_s8 + $0x2c0] sm:$0xff]  ;;  %v1058_v12 = vld [vmem:[%s5801_s8 + $0x448] sm:$0xff] }
 0x11c   : > { %3560 = vmatpush1.bf16.msra.mxu0 %v5151_v21  ;;  %3849 = vmatpush1.bf16.msra.mxu1 %v5152_v22  ;;  %v1013_v21 = vld [vmem:[%s5801_s8 + $0x2e0] sm:$0xff]  ;;  %v1010_v22 = vld [vmem:[%s5801_s8 + $0x2c8] sm:$0xff] }
 0x11d   : > { %3561 = vmatprep.subr.bf16.mxu0 %v5212_v2  ;;  %3850 = vmatprep.subr.bf16.mxu1 %v5212_v2  ;;  %v4827_v26 = vcombine.high %v1009_v20, %v1013_v21  ;;  %v4829_v27 = vcombine.high %v1010_v22, %v1014_v23  ;;  %v1062_v13 = vld [vmem:[%s5801_s8 + $0x468] sm:$0xff] }
 0x120   : > { %3562 = vmatpush1.bf16.msra.mxu0 %v5153_v25  ;;  %3851 = vmatpush1.bf16.msra.mxu1 %v5154_v28  ;;  %v4820_v25 = vcombine.low %v1002_v14, %v1006_v15  ;;  %v5165_v28 = vld [vmem:[%s5799_s7 + $0x168] sm:$0xff]   ;;  %v4868_v15 = vcombine.low %v1050_v3, %v1054_v4 }
 0x121   : > { %3563 = vmatprep.subr.bf16.mxu0 %v5212_v2  ;;  %3852 = vmatprep.subr.bf16.mxu1 %v5212_v2 }
 0x122   : > { %3034 = vmatmul.mubr.bf16.gmra.mrb[16].mxu0 %v4770_v29  ;;  %3323 = vmatmul.mubr.bf16.gmra.mrb[16].mxu1 %v4772_v30  ;;  %v1017_v29 = vld [vmem:[%s5801_s8 + $0x300] sm:$0xff] }
 0x123   : > { %3041 = vmatprep.mubr.bf16.mxu0 %v4779_v31  ;;  %3330 = vmatprep.mubr.bf16.mxu1 %v4781_v32  ;;  %v1021_v30 = vld [vmem:[%s5801_s8 + $0x320] sm:$0xff]  ;;  %v1018_v31 = vld [vmem:[%s5801_s8 + $0x308] sm:$0xff] }
 0x124   : > { %3564 = vmatpush1.bf16.msra.mxu0 %v5155_v33  ;;  %3853 = vmatpush1.bf16.msra.mxu1 %v5156_v34  ;;  %v1022_v32 = vld [vmem:[%s5801_s8 + $0x328] sm:$0xff]  ;;  %v4826_v33 = vcombine.low %v1009_v20, %v1013_v21  ;;  %v4828_v34 = vcombine.low %v1010_v22, %v1014_v23  ;;  %v4835_v35 = vcombine.high %v1017_v29, %v1021_v30 }
 0x125   : > { %3565 = vmatprep.subr.bf16.mxu0 %v5212_v2  ;;  %3854 = vmatprep.subr.bf16.mxu1 %v5212_v2  ;;  %v1066_v20 = vld [vmem:[%s5801_s8 + $0x488] sm:$0xff]  ;;  %v4876_v23 = vcombine.low %v1058_v12, %v1062_v13 }
 0x126   : > { %v1070_v21 = vld [vmem:[%s5801_s8 + $0x4a8] sm:$0xff] }
 0x128   : > { %3566 = vmatpush1.bf16.msra.mxu0 %v5157_v37  ;;  %3855 = vmatpush1.bf16.msra.mxu1 %v5158_v40  ;;  %v4837_v37 = vcombine.high %v1018_v31, %v1022_v32  ;;  %v1026_v40 = vld [vmem:[%s5801_s8 + $0x348] sm:$0xff] }
 0x129   : > { %3567 = vmatprep.subr.bf16.mxu0 %v5212_v2  ;;  %3856 = vmatprep.subr.bf16.mxu1 %v5212_v2 }
 0x12a   : > { %3042 = vmatmul.mubr.bf16.gmra.mrb[20].mxu0 %v4778_v41  ;;  %3331 = vmatmul.mubr.bf16.gmra.mrb[20].mxu1 %v4780_v42  ;;  %v1030_v41 = vld [vmem:[%s5801_s8 + $0x368] sm:$0xff]  ;;  %v4834_v42 = vcombine.low %v1017_v29, %v1021_v30 }
 0x12b   : > { %3049 = vmatprep.mubr.bf16.mxu0 %v4787_v43  ;;  %3338 = vmatprep.mubr.bf16.mxu1 %v4789_v44  ;;  %v4836_v43 = vcombine.low %v1018_v31, %v1022_v32  ;;  %v4843_v44 = vcombine.high %v1025_v38, %v1029_v39  ;;  %v1078_v29 = vld [vmem:[%s5801_s8 + $0x4e8] sm:$0xff]  ;;  %v4884_v31 = vcombine.low %v1066_v20, %v1070_v21 }
 0x12c   : > { %3568 = vmatpush1.bf16.msra.mxu0 %v5159_v45  ;;  %3857 = vmatpush1.bf16.msra.mxu1 %v5160_v46  ;;  %v4845_v45 = vcombine.high %v1026_v40, %v1030_v41  ;;  %v5167_v46 = vld [vmem:[%s5799_s7 + $0x170] sm:$0xff]  }
 0x12d   : > { %3569 = vmatprep.subr.bf16.mxu0 %v5212_v2  ;;  %3858 = vmatprep.subr.bf16.mxu1 %v5212_v2 }
 0x130   : > { %3570 = vmatpush1.bf16.msra.mxu0 %v5161_v55  ;;  %3859 = vmatpush1.bf16.msra.mxu1 %v5162_v56  ;;  %v4853_v55 = vcombine.high %v1034_v49, %v1038_v50  ;;  %v1041_v56 = vld [vmem:[%s5801_s8 + $0x3c0] sm:$0xff] }
 0x131   : > { %3571 = vmatprep.subr.bf16.mxu0 %v5212_v2  ;;  %3860 = vmatprep.subr.bf16.mxu1 %v5212_v2  ;;  %v4858_v5 = vcombine.low %v1041_v56, %v1045_v57 }
 0x132   : > { %3050 = vmatmul.mubr.bf16.gmra.mrb[24].mxu0 %v4786_v51  ;;  %3339 = vmatmul.mubr.bf16.gmra.mrb[24].mxu1 %v4788_v52  ;;  %v4842_v51 = vcombine.low %v1025_v38, %v1029_v39  ;;  %v4844_v52 = vcombine.low %v1026_v40, %v1030_v41 }
 0x133   : > { %3057 = vmatprep.mubr.bf16.mxu0 %v4795_v53  ;;  %3346 = vmatprep.mubr.bf16.mxu1 %v4797_v54  ;;  %v4851_v53 = vcombine.high %v1033_v47, %v1037_v48  ;;  %v5168_v54 = vld [vmem:[%s5799_s7 + $0x1f0] sm:$0xff]  }
 0x134   : > { %3572 = vmatpush1.bf16.msra.mxu0 %v5163_v10  ;;  %3861 = vmatpush1.bf16.msra.mxu1 %v5164_v11  ;;  %v1057_v10 = vld [vmem:[%s5801_s8 + $0x440] sm:$0xff] }
 0x135   : > { %3573 = vmatprep.subr.bf16.mxu0 %v5212_v2  ;;  %3862 = vmatprep.subr.bf16.mxu1 %v5212_v2  ;;  %v1061_v11 = vld [vmem:[%s5801_s8 + $0x460] sm:$0xff] }
 0x136   : > { %v4874_v22 = vcombine.low %v1057_v10, %v1061_v11 }
 0x138   : > { %3574 = vmatpush1.bf16.msra.mxu0 %v5165_v28  ;;  %3863 = vmatpush1.bf16.msra.mxu1 %v5166_v36  ;;  %v1074_v28 = vld [vmem:[%s5801_s8 + $0x4c8] sm:$0xff] }
 0x139   : > { %3575 = vmatprep.subr.bf16.mxu0 %v5212_v2  ;;  %3864 = vmatprep.subr.bf16.mxu1 %v5212_v2  ;;  %v1082_v36 = vld [vmem:[%s5801_s8 + $0x508] sm:$0xff]  ;;  %v4892_v39 = vcombine.low %v1074_v28, %v1078_v29 }
 0x13a   : > { %3058 = vmatmul.mubr.bf16.gmra.mrb[28].mxu0 %v4794_v61  ;;  %3347 = vmatmul.mubr.bf16.gmra.mrb[28].mxu1 %v4796_v62  ;;  %v4852_v61 = vcombine.low %v1034_v49, %v1038_v50  ;;  %v4859_v62 = vcombine.high %v1041_v56, %v1045_v57  ;;  %v1097_v50 = vld [vmem:[%s5801_s8 + $0x580] sm:$0xff] }
 0x13b   : > { %3065 = vmatprep.mubr.bf16.mxu0 %v4803_v63  ;;  %3354 = vmatprep.mubr.bf16.mxu1 %v4805_v0  ;;  %v4861_v63 = vcombine.high %v1042_v58, %v1046_v59  ;;  %v1049_v0 = vld [vmem:[%s5801_s8 + $0x400] sm:$0xff] }
 0x13c   : > { %3576 = vmatpush1.bf16.msra.mxu0 %v5167_v46  ;;  %3865 = vmatpush1.bf16.msra.mxu1 %v5168_v54  ;;  %v4866_v14 = vcombine.low %v1049_v0, %v1053_v1 }
 0x13d   : > { %3577 = vmatprep.subr.bf16.mxu0 %v5212_v2  ;;  %3866 = vmatprep.subr.bf16.mxu1 %v5212_v2  ;;  %v5169_v2 = vld [vmem:[%s5799_s7 + $0x178] sm:$0xff]  }
 0x140   : > { %3578 = vmatpush1.bf16.msra.mxu0 %v5169_v2 }
 0x142   : > { %3066 = vmatmul.mubr.bf16.gmra.mrb[32].mxu0 %v4802_v6  ;;  %3355 = vmatmul.mubr.bf16.gmra.mrb[32].mxu1 %v4804_v7  ;;  %v4860_v6 = vcombine.low %v1042_v58, %v1046_v59  ;;  %v4867_v7 = vcombine.high %v1049_v0, %v1053_v1  ;;  %v1105_v58 = vld [vmem:[%s5801_s8 + $0x5c0] sm:$0xff] }
 0x143   : > { %3073 = vmatprep.mubr.bf16.mxu0 %v4811_v8  ;;  %3362 = vmatprep.mubr.bf16.mxu1 %v4813_v9  ;;  %v5170_v8 = vld [vmem:[%s5799_s7 + $0x1f8] sm:$0xff]   ;;  %v4869_v9 = vcombine.high %v1050_v3, %v1054_v4  ;;  %v1109_v59 = vld [vmem:[%s5801_s8 + $0x5e0] sm:$0xff]  ;;  %v1114_v4 = vld [vmem:[%s5801_s8 + $0x608] sm:$0xff] }
 0x144   : > { %3867 = vmatpush1.bf16.msra.mxu1 %v5170_v8  ;;  %v4923_v2 = vcombine.high %v1105_v58, %v1109_v59  ;;  %v1113_v1 = vld [vmem:[%s5801_s8 + $0x600] sm:$0xff] }
 0x145   : > { %v1117_v3 = vld [vmem:[%s5801_s8 + $0x620] sm:$0xff] }
 0x146   : > { %v4931_v8 = vcombine.high %v1113_v1, %v1117_v3 }
 0x14a   : > { %3074 = vmatmul.mubr.bf16.gmra.mrb[36].mxu0 %v4810_v16  ;;  %3363 = vmatmul.mubr.bf16.gmra.mrb[36].mxu1 %v4812_v17  ;;  %v4875_v16 = vcombine.high %v1057_v10, %v1061_v11  ;;  %v4877_v17 = vcombine.high %v1058_v12, %v1062_v13  ;;  %v1121_v10 = vld [vmem:[%s5801_s8 + $0x640] sm:$0xff]  ;;  %v1122_v12 = vld [vmem:[%s5801_s8 + $0x648] sm:$0xff] }
 0x14b   : > { %3081 = vmatprep.mubr.bf16.mxu0 %v4819_v18  ;;  %3370 = vmatprep.mubr.bf16.mxu1 %v4821_v19  ;;  %v1065_v18 = vld [vmem:[%s5801_s8 + $0x480] sm:$0xff]  ;;  %v1126_v13 = vld [vmem:[%s5801_s8 + $0x668] sm:$0xff] }
 0x14c   : > { %v1069_v19 = vld [vmem:[%s5801_s8 + $0x4a0] sm:$0xff] }
 0x14d   : > { %v4882_v30 = vcombine.low %v1065_v18, %v1069_v19  ;;  %v1125_v11 = vld [vmem:[%s5801_s8 + $0x660] sm:$0xff] }
 0x152   : > { %3082 = vmatmul.mubr.bf16.gmra.mrb[40].mxu0 %v4818_v24  ;;  %3371 = vmatmul.mubr.bf16.gmra.mrb[40].mxu1 %v4820_v25  ;;  %v4883_v24 = vcombine.high %v1065_v18, %v1069_v19  ;;  %v4885_v25 = vcombine.high %v1066_v20, %v1070_v21  ;;  %v1129_v18 = vld [vmem:[%s5801_s8 + $0x680] sm:$0xff]  ;;  %v1130_v20 = vld [vmem:[%s5801_s8 + $0x688] sm:$0xff] }
 0x153   : > { %3089 = vmatprep.mubr.bf16.mxu0 %v4827_v26  ;;  %3378 = vmatprep.mubr.bf16.mxu1 %v4829_v27  ;;  %v1073_v26 = vld [vmem:[%s5801_s8 + $0x4c0] sm:$0xff]  ;;  %v1134_v21 = vld [vmem:[%s5801_s8 + $0x6a8] sm:$0xff] }
 0x154   : > { %v1077_v27 = vld [vmem:[%s5801_s8 + $0x4e0] sm:$0xff] }
 0x155   : > { %v4891_v32 = vcombine.high %v1073_v26, %v1077_v27  ;;  %v4890_v38 = vcombine.low %v1073_v26, %v1077_v27  ;;  %v1133_v19 = vld [vmem:[%s5801_s8 + $0x6a0] sm:$0xff] }
 0x156   : > { %v1137_v26 = vld [vmem:[%s5801_s8 + $0x6c0] sm:$0xff] }
 0x157   : > { %v1141_v27 = vld [vmem:[%s5801_s8 + $0x6e0] sm:$0xff] }
 0x15a   : > { %3090 = vmatmul.mubr.bf16.gmra.mrb[44].mxu0 %v4826_v33  ;;  %3379 = vmatmul.mubr.bf16.gmra.mrb[44].mxu1 %v4828_v34  ;;  %v4893_v33 = vcombine.high %v1074_v28, %v1078_v29  ;;  %v1081_v34 = vld [vmem:[%s5801_s8 + $0x500] sm:$0xff]  ;;  %v1138_v28 = vld [vmem:[%s5801_s8 + $0x6c8] sm:$0xff] }
 0x15b   : > { %3097 = vmatprep.mubr.bf16.mxu0 %v4835_v35  ;;  %3386 = vmatprep.mubr.bf16.mxu1 %v4837_v37  ;;  %v1085_v35 = vld [vmem:[%s5801_s8 + $0x520] sm:$0xff]  ;;  %v1086_v37 = vld [vmem:[%s5801_s8 + $0x528] sm:$0xff] }
 0x15c   : > { %v4899_v40 = vcombine.high %v1081_v34, %v1085_v35  ;;  %v4901_v41 = vcombine.high %v1082_v36, %v1086_v37  ;;  %v4898_v46 = vcombine.low %v1081_v34, %v1085_v35  ;;  %v4900_v47 = vcombine.low %v1082_v36, %v1086_v37  ;;  %v1142_v29 = vld [vmem:[%s5801_s8 + $0x6e8] sm:$0xff]  ;;  %v1145_v34 = vld [vmem:[%s5801_s8 + $0x700] sm:$0xff] }
 0x15d   : > { %v1149_v35 = vld [vmem:[%s5801_s8 + $0x720] sm:$0xff]  ;;  %v1146_v37 = vld [vmem:[%s5801_s8 + $0x708] sm:$0xff] }
 0x162   : > { %3098 = vmatmul.mubr.bf16.gmra.mrb[48].mxu0 %v4834_v42  ;;  %3387 = vmatmul.mubr.bf16.gmra.mrb[48].mxu1 %v4836_v43  ;;  %v1089_v42 = vld [vmem:[%s5801_s8 + $0x540] sm:$0xff] }
 0x163   : > { %3105 = vmatprep.mubr.bf16.mxu0 %v4843_v44  ;;  %3394 = vmatprep.mubr.bf16.mxu1 %v4845_v45  ;;  %v1093_v43 = vld [vmem:[%s5801_s8 + $0x560] sm:$0xff]  ;;  %v1090_v44 = vld [vmem:[%s5801_s8 + $0x548] sm:$0xff] }
 0x164   : > { %v1094_v45 = vld [vmem:[%s5801_s8 + $0x568] sm:$0xff]  ;;  %v4907_v48 = vcombine.high %v1089_v42, %v1093_v43  ;;  %v4906_v54 = vcombine.low %v1089_v42, %v1093_v43 }
 0x165   : > { %v4909_v49 = vcombine.high %v1090_v44, %v1094_v45 }
 0x16a   : > { %3106 = vmatmul.mubr.bf16.gmra.mrb[52].mxu0 %v4842_v51  ;;  %3395 = vmatmul.mubr.bf16.gmra.mrb[52].mxu1 %v4844_v52  ;;  %v1101_v51 = vld [vmem:[%s5801_s8 + $0x5a0] sm:$0xff]  ;;  %v1098_v52 = vld [vmem:[%s5801_s8 + $0x588] sm:$0xff] }
 0x16b   : > { %3113 = vmatprep.mubr.bf16.mxu0 %v4851_v53  ;;  %3402 = vmatprep.mubr.bf16.mxu1 %v4853_v55  ;;  %v1102_v53 = vld [vmem:[%s5801_s8 + $0x5a8] sm:$0xff]  ;;  %v4908_v55 = vcombine.low %v1090_v44, %v1094_v45  ;;  %v4915_v56 = vcombine.high %v1097_v50, %v1101_v51  ;;  %v4956_v45 = vcombine.low %v1138_v28, %v1142_v29 }
 0x16c   : > { %v4917_v57 = vcombine.high %v1098_v52, %v1102_v53 }
 0x172   : > { %3114 = vmatmul.mubr.bf16.gmra.mrb[56].mxu0 %v4850_v60  ;;  %3403 = vmatmul.mubr.bf16.gmra.mrb[56].mxu1 %v4852_v61  ;;  %v1106_v60 = vld [vmem:[%s5801_s8 + $0x5c8] sm:$0xff] }
 0x173   : > { %3121 = vmatprep.mubr.bf16.mxu0 %v4859_v62  ;;  %3410 = vmatprep.mubr.bf16.mxu1 %v4861_v63  ;;  %v1110_v61 = vld [vmem:[%s5801_s8 + $0x5e8] sm:$0xff]  ;;  %v4914_v62 = vcombine.low %v1097_v50, %v1101_v51  ;;  %v4916_v63 = vcombine.low %v1098_v52, %v1102_v53  ;;  %v1153_v52 = vld [vmem:[%s5801_s8 + $0x740] sm:$0xff] }
 0x174   : > { %v4925_v0 = vcombine.high %v1106_v60, %v1110_v61  ;;  %v1157_v53 = vld [vmem:[%s5801_s8 + $0x760] sm:$0xff] }
 0x17a   : > { %3122 = vmatmul.mubr.bf16.gmra.mrb[60].mxu0 %v4858_v5  ;;  %3411 = vmatmul.mubr.bf16.gmra.mrb[60].mxu1 %v4860_v6  ;;  %v1118_v5 = vld [vmem:[%s5801_s8 + $0x628] sm:$0xff]  ;;  %v4922_v6 = vcombine.low %v1105_v58, %v1109_v59  ;;  %v4962_v59 = vcombine.low %v1145_v34, %v1149_v35 }
 0x17b   : > { %3129 = vmatprep.mubr.bf16.mxu0 %v4867_v7  ;;  %3418 = vmatprep.mubr.bf16.mxu1 %v4869_v9  ;;  %v4924_v7 = vcombine.low %v1106_v60, %v1110_v61  ;;  %v4933_v9 = vcombine.high %v1114_v4, %v1118_v5 }
 0x182   : > { %3130 = vmatmul.mubr.bf16.gmra.mrb[64].mxu0 %v4866_v14  ;;  %3419 = vmatmul.mubr.bf16.gmra.mrb[64].mxu1 %v4868_v15  ;;  %v4930_v14 = vcombine.low %v1113_v1, %v1117_v3  ;;  %v4932_v15 = vcombine.low %v1114_v4, %v1118_v5 }
 0x183   : > { %3137 = vmatprep.mubr.bf16.mxu0 %v4875_v16  ;;  %3426 = vmatprep.mubr.bf16.mxu1 %v4877_v17  ;;  %v4939_v16 = vcombine.high %v1121_v10, %v1125_v11  ;;  %v4941_v17 = vcombine.high %v1122_v12, %v1126_v13 }
 0x18a   : > { %3138 = vmatmul.mubr.bf16.gmra.mrb[68].mxu0 %v4874_v22  ;;  %3427 = vmatmul.mubr.bf16.gmra.mrb[68].mxu1 %v4876_v23  ;;  %v4938_v22 = vcombine.low %v1121_v10, %v1125_v11  ;;  %v4940_v23 = vcombine.low %v1122_v12, %v1126_v13  ;;  %v1166_v10 = vld [vmem:[%s5801_s8 + $0x7a8] sm:$0xff]  ;;  %v4970_v13 = vcombine.low %v1153_v52, %v1157_v53 }
 0x18b   : > { %3145 = vmatprep.mubr.bf16.mxu0 %v4883_v24  ;;  %3434 = vmatprep.mubr.bf16.mxu1 %v4885_v25  ;;  %v4947_v24 = vcombine.high %v1129_v18, %v1133_v19  ;;  %v4949_v25 = vcombine.high %v1130_v20, %v1134_v21 }
 0x192   : > { %3146 = vmatmul.mubr.bf16.gmra.mrb[72].mxu0 %v4882_v30  ;;  %3435 = vmatmul.mubr.bf16.gmra.mrb[72].mxu1 %v4884_v31  ;;  %v4946_v30 = vcombine.low %v1129_v18, %v1133_v19  ;;  %v4948_v31 = vcombine.low %v1130_v20, %v1134_v21 }
 0x193   : > { %3153 = vmatprep.mubr.bf16.mxu0 %v4891_v32  ;;  %3442 = vmatprep.mubr.bf16.mxu1 %v4893_v33  ;;  %v4955_v32 = vcombine.high %v1137_v26, %v1141_v27  ;;  %v4957_v33 = vcombine.high %v1138_v28, %v1142_v29  ;;  %v1174_v28 = vld [vmem:[%s5801_s8 + $0x7e8] sm:$0xff] }
 0x19a   : > { %3154 = vmatmul.mubr.bf16.gmra.mrb[76].mxu0 %v4890_v38  ;;  %3443 = vmatmul.mubr.bf16.gmra.mrb[76].mxu1 %v4892_v39  ;;  %v1150_v38 = vld [vmem:[%s5801_s8 + $0x728] sm:$0xff] }
 0x19b   : > { %3161 = vmatprep.mubr.bf16.mxu0 %v4899_v40  ;;  %3450 = vmatprep.mubr.bf16.mxu1 %v4901_v41  ;;  %v4954_v41 = vcombine.low %v1137_v26, %v1141_v27  ;;  %v1170_v27 = vld [vmem:[%s5801_s8 + $0x7c8] sm:$0xff] }
 0x1a2   : > { %3162 = vmatmul.mubr.bf16.gmra.mrb[80].mxu0 %v4898_v46  ;;  %3451 = vmatmul.mubr.bf16.gmra.mrb[80].mxu1 %v4900_v47  ;;  %v4963_v46 = vcombine.high %v1145_v34, %v1149_v35 }
 0x1a3   : > { %3169 = vmatprep.mubr.bf16.mxu0 %v4907_v48  ;;  %3458 = vmatprep.mubr.bf16.mxu1 %v4909_v49  ;;  %v4965_v49 = vcombine.high %v1146_v37, %v1150_v38 }
 0x1aa   : > { %3170 = vmatmul.mubr.bf16.gmra.mrb[84].mxu0 %v4906_v54  ;;  %3459 = vmatmul.mubr.bf16.gmra.mrb[84].mxu1 %v4908_v55  ;;  %v1154_v55 = vld [vmem:[%s5801_s8 + $0x748] sm:$0xff] }
 0x1ab   : > { %3177 = vmatprep.mubr.bf16.mxu0 %v4915_v56  ;;  %3466 = vmatprep.mubr.bf16.mxu1 %v4917_v57  ;;  %v1158_v56 = vld [vmem:[%s5801_s8 + $0x768] sm:$0xff] }
 0x1ac   : > { %v4973_v3 = vcombine.high %v1154_v55, %v1158_v56 }
 0x1b2   : > { %3178 = vmatmul.mubr.bf16.gmra.mrb[88].mxu0 %v4914_v62  ;;  %3467 = vmatmul.mubr.bf16.gmra.mrb[88].mxu1 %v4916_v63  ;;  %v4964_v63 = vcombine.low %v1146_v37, %v1150_v38 }
 0x1b3   : > { %3185 = vmatprep.mubr.bf16.mxu0 %v4923_v2  ;;  %3474 = vmatprep.mubr.bf16.mxu1 %v4925_v0  ;;  %v4971_v2 = vcombine.high %v1153_v52, %v1157_v53 }
 0x1ba   : > { %3186 = vmatmul.mubr.bf16.gmra.mrb[92].mxu0 %v4922_v6  ;;  %3475 = vmatmul.mubr.bf16.gmra.mrb[92].mxu1 %v4924_v7  ;;  %v1161_v6 = vld [vmem:[%s5801_s8 + $0x780] sm:$0xff] }
 0x1bb   : > { %3193 = vmatprep.mubr.bf16.mxu0 %v4931_v8  ;;  %3482 = vmatprep.mubr.bf16.mxu1 %v4933_v9  ;;  %v1165_v7 = vld [vmem:[%s5801_s8 + $0x7a0] sm:$0xff]  ;;  %v1162_v9 = vld [vmem:[%s5801_s8 + $0x788] sm:$0xff] }
 0x1bc   : > { %v4979_v18 = vcombine.high %v1161_v6, %v1165_v7  ;;  %v4981_v21 = vcombine.high %v1162_v9, %v1166_v10  ;;  %v4980_v35 = vcombine.low %v1162_v9, %v1166_v10 }
 0x1c2   : > { %3194 = vmatmul.mubr.bf16.gmra.mrb[96].mxu0 %v4930_v14  ;;  %3483 = vmatmul.mubr.bf16.gmra.mrb[96].mxu1 %v4932_v15 }
 0x1c3   : > { %3201 = vmatprep.mubr.bf16.mxu0 %v4939_v16  ;;  %3490 = vmatprep.mubr.bf16.mxu1 %v4941_v17  ;;  %v4972_v17 = vcombine.low %v1154_v55, %v1158_v56  ;;  %v4988_v55 = vcombine.low %v1170_v27, %v1174_v28 }
 0x1ca   : > { %3202 = vmatmul.mubr.bf16.gmra.mrb[100].mxu0 %v4938_v22  ;;  %3491 = vmatmul.mubr.bf16.gmra.mrb[100].mxu1 %v4940_v23 }
 0x1cb   : > { %3209 = vmatprep.mubr.bf16.mxu0 %v4947_v24  ;;  %3498 = vmatprep.mubr.bf16.mxu1 %v4949_v25  ;;  %v1169_v24 = vld [vmem:[%s5801_s8 + $0x7c0] sm:$0xff] }
 0x1cc   : > { %v1173_v25 = vld [vmem:[%s5801_s8 + $0x7e0] sm:$0xff] }
 0x1d2   : > { %3210 = vmatmul.mubr.bf16.gmra.mrb[104].mxu0 %v4946_v30  ;;  %3499 = vmatmul.mubr.bf16.gmra.mrb[104].mxu1 %v4948_v31  ;;  %v4978_v31 = vcombine.low %v1161_v6, %v1165_v7 }
 0x1d3   : > { %3217 = vmatprep.mubr.bf16.mxu0 %v4955_v32  ;;  %3506 = vmatprep.mubr.bf16.mxu1 %v4957_v33 }
 0x1d5   : > { %v3003_v36 = vpop.f32.mrb[0].mxu0  ;;  %v3292_v39 = vpop.f32.mrb[0].mxu1 }
 0x1d6   : > { %v3005_v40 = vpop.f32.mrb[1].mxu0  ;;  %v6128_v42 = vadd.f32 %v3292_v39, %v3003_v36  ;;  %v3294_v43 = vpop.f32.mrb[1].mxu1  ;;  %v4987_v36 = vcombine.high %v1169_v24, %v1173_v25  ;;  %v4989_v39 = vcombine.high %v1170_v27, %v1174_v28 }
 0x1d7   : > { %v3006_v44 = vpop.f32.mrb[2].mxu0  ;;  %v3295_v47 = vpop.f32.mrb[2].mxu1  ;;  %v923_v43 = vld [vmem:[%s5801_s8 + $0x10] sm:$0xff] }
 0x1d8   : > { %v3008_v48 = vpop.f32.mrb[3].mxu0  ;;  %v6130_v50 = vadd.f32 %v3295_v47, %v3006_v44  ;;  %v3297_v51 = vpop.f32.mrb[3].mxu1  ;;  %v927_v44 = vld [vmem:[%s5801_s8 + $0x30] sm:$0xff]  ;;  %v928_v47 = vld [vmem:[%s5801_s8 + $0x38] sm:$0xff] }
 0x1d9   : > { %v4986_v51 = vcombine.low %v1169_v24, %v1173_v25  ;;  %v4743_v56 = vcombine.high %v923_v43, %v927_v44  ;;  %v4742_v7 = vcombine.low %v923_v43, %v927_v44  ;;  %v944_v24 = vld [vmem:[%s5801_s8 + $0xb8] sm:$0xff] }
 0x1da   : > { %3218 = vmatmul.mubr.bf16.gmra.mrb[108].mxu0 %v4954_v41  ;;  %3507 = vmatmul.mubr.bf16.gmra.mrb[108].mxu1 %v4956_v45  ;;  %v948_v44 = vld [vmem:[%s5801_s8 + $0xd8] sm:$0xff] }
 0x1db   : > { %3225 = vmatprep.mubr.bf16.mxu0 %v4963_v46  ;;  %3514 = vmatprep.mubr.bf16.mxu1 %v4965_v49  ;;  %v924_v46 = vld [vmem:[%s5801_s8 + $0x18] sm:$0xff] }
 0x1dd   : > { %v3011_v54 = vpop.f32.mrb[4].mxu0  ;;  %v3300_v57 = vpop.f32.mrb[4].mxu1 }
 0x1de   : > { %v3013_v58 = vpop.f32.mrb[5].mxu0  ;;  %v6136_v60 = vadd.f32 %v3300_v57, %v3011_v54  ;;  %v3302_v61 = vpop.f32.mrb[5].mxu1 }
 0x1df   : > { %v3014_v62 = vpop.f32.mrb[6].mxu0  ;;  %v3303_v0 = vpop.f32.mrb[6].mxu1 }
 0x1e0   : > { %v3016_v1 = vpop.f32.mrb[7].mxu0  ;;  %v6138_v4 = vadd.f32 %v3303_v0, %v3014_v62  ;;  %v3305_v5 = vpop.f32.mrb[7].mxu1 }
 0x1e1   : > { %v932_v1 = vld [vmem:[%s5801_s8 + $0x58] sm:$0xff] }
 0x1e2   : > { %3226 = vmatmul.mubr.bf16.gmra.mrb[112].mxu0 %v4962_v59  ;;  %3515 = vmatmul.mubr.bf16.gmra.mrb[112].mxu1 %v4964_v63  ;;  %v4745_v59 = vcombine.high %v924_v46, %v928_v47  ;;  %v931_v63 = vld [vmem:[%s5801_s8 + $0x50] sm:$0xff] }
 0x1e3   : > { %3233 = vmatprep.mubr.bf16.mxu0 %v4971_v2  ;;  %3522 = vmatprep.mubr.bf16.mxu1 %v4973_v3  ;;  %v935_v2 = vld [vmem:[%s5801_s8 + $0x70] sm:$0xff]  ;;  %v936_v3 = vld [vmem:[%s5801_s8 + $0x78] sm:$0xff] }
 0x1e4   : > { %v4750_v27 = vcombine.low %v931_v63, %v935_v2 }
 0x1e5   : > { %v3019_v8 = vpop.f32.mrb[8].mxu0  ;;  %v3308_v11 = vpop.f32.mrb[8].mxu1 }
 0x1e6   : > { %v3021_v12 = vpop.f32.mrb[9].mxu0  ;;  %v6144_v14 = vadd.f32 %v3308_v11, %v3019_v8  ;;  %v3310_v15 = vpop.f32.mrb[9].mxu1  ;;  %v4744_v11 = vcombine.low %v924_v46, %v928_v47 }
 0x1e7   : > { %v3022_v16 = vpop.f32.mrb[10].mxu0  ;;  %v3311_v19 = vpop.f32.mrb[10].mxu1  ;;  %v4751_v12 = vcombine.high %v931_v63, %v935_v2  ;;  %v955_v63 = vld [vmem:[%s5801_s8 + $0x110] sm:$0xff] }
 0x1e8   : > { %v3024_v20 = vpop.f32.mrb[11].mxu0  ;;  %v6146_v22 = vadd.f32 %v3311_v19, %v3022_v16  ;;  %v3313_v23 = vpop.f32.mrb[11].mxu1  ;;  %v4753_v16 = vcombine.high %v932_v1, %v936_v3  ;;  %v939_v19 = vld [vmem:[%s5801_s8 + $0x90] sm:$0xff] }
 0x1e9   : > { %v943_v20 = vld [vmem:[%s5801_s8 + $0xb0] sm:$0xff]  ;;  %v940_v23 = vld [vmem:[%s5801_s8 + $0x98] sm:$0xff] }
 0x1ea   : > { %3234 = vmatmul.mubr.bf16.gmra.mrb[116].mxu0 %v4970_v13  ;;  %3523 = vmatmul.mubr.bf16.gmra.mrb[116].mxu1 %v4972_v17  ;;  %v959_v2 = vld [vmem:[%s5801_s8 + $0x130] sm:$0xff] }
 0x1eb   : > { %3241 = vmatprep.mubr.bf16.mxu0 %v4979_v18  ;;  %3530 = vmatprep.mubr.bf16.mxu1 %v4981_v21 }
 0x1ed   : > { %v3027_v26 = vpop.f32.mrb[12].mxu0  ;;  %v3316_v29 = vpop.f32.mrb[12].mxu1 }
 0x1ee   : > { %v3029_v30 = vpop.f32.mrb[13].mxu0  ;;  %v6152_v32 = vadd.f32 %v3316_v29, %v3027_v26  ;;  %v3318_v33 = vpop.f32.mrb[13].mxu1 }
 0x1ef   : > { %v3030_v34 = vpop.f32.mrb[14].mxu0  ;;  %v3319_v37 = vpop.f32.mrb[14].mxu1  ;;  %v4759_v33 = vcombine.high %v939_v19, %v943_v20 }
 0x1f0   : > { %v3032_v38 = vpop.f32.mrb[15].mxu0  ;;  %v6154_v40 = vadd.f32 %v3319_v37, %v3030_v34  ;;  %v3321_v41 = vpop.f32.mrb[15].mxu1 }
 0x1f1   : > { %v951_v41 = vld [vmem:[%s5801_s8 + $0xf0] sm:$0xff] }
 0x1f2   : > { %3242 = vmatmul.mubr.bf16.gmra.mrb[120].mxu0 %v4978_v31  ;;  %3531 = vmatmul.mubr.bf16.gmra.mrb[120].mxu1 %v4980_v35  ;;  %v4752_v31 = vcombine.low %v932_v1, %v936_v3  ;;  %v956_v1 = vld [vmem:[%s5801_s8 + $0x118] sm:$0xff] }
 0x1f3   : > { %3249 = vmatprep.mubr.bf16.mxu0 %v4987_v36  ;;  %3538 = vmatprep.mubr.bf16.mxu1 %v4989_v39  ;;  %v4761_v36 = vcombine.high %v940_v23, %v944_v24  ;;  %v947_v39 = vld [vmem:[%s5801_s8 + $0xd0] sm:$0xff]  ;;  %v960_v3 = vld [vmem:[%s5801_s8 + $0x138] sm:$0xff] }
 0x1f5   : > { %v3035_v45 = vpop.f32.mrb[16].mxu0  ;;  %v3324_v48 = vpop.f32.mrb[16].mxu1 }
 0x1f6   : > { %v3037_v49 = vpop.f32.mrb[17].mxu0  ;;  %v6160_v52 = vadd.f32 %v3324_v48, %v3035_v45  ;;  %v3326_v53 = vpop.f32.mrb[17].mxu1  ;;  %v952_v45 = vld [vmem:[%s5801_s8 + $0xf8] sm:$0xff]  ;;  %v4758_v48 = vcombine.low %v939_v19, %v943_v20 }
 0x1f7   : > { %v3038_v54 = vpop.f32.mrb[18].mxu0  ;;  %v3327_v57 = vpop.f32.mrb[18].mxu1 }
 0x1f8   : > { %v3040_v58 = vpop.f32.mrb[19].mxu0  ;;  %v6162_v61 = vadd.f32 %v3327_v57, %v3038_v54  ;;  %v3329_v62 = vpop.f32.mrb[19].mxu1  ;;  %v4760_v54 = vcombine.low %v940_v23, %v944_v24  ;;  %v967_v23 = vld [vmem:[%s5801_s8 + $0x170] sm:$0xff] }
 0x1f9   : > { %v4769_v58 = vcombine.high %v948_v44, %v952_v45 }
 0x1fa   : > { %3250 = vmatmul.mubr.bf16.gmra.mrb[124].mxu0 %v4986_v51  ;;  %3539 = vmatmul.mubr.bf16.gmra.mrb[124].mxu1 %v4988_v55  ;;  %v4767_v55 = vcombine.high %v947_v39, %v951_v41 }
 0x1fb   : > { %3579 = vmatprep.mubr.bf16.mxu0 %v4743_v56  ;;  %3868 = vmatprep.mubr.bf16.mxu1 %v4745_v59 }
 0x1fd   : > { %v3043_v0 = vpop.f32.mrb[20].mxu0  ;;  %v3332_v5 = vpop.f32.mrb[20].mxu1 }
 0x1fe   : > { %v3045_v6 = vpop.f32.mrb[21].mxu0  ;;  %v6168_v8 = vadd.f32 %v3332_v5, %v3043_v0  ;;  %v3334_v9 = vpop.f32.mrb[21].mxu1 }
 0x1ff   : > { %v3046_v10 = vpop.f32.mrb[22].mxu0  ;;  %v3335_v13 = vpop.f32.mrb[22].mxu1 }
 0x200   : > { %v3048_v15 = vpop.f32.mrb[23].mxu0  ;;  %v6170_v17 = vadd.f32 %v3335_v13, %v3046_v10  ;;  %v3337_v18 = vpop.f32.mrb[23].mxu1  ;;  %v4775_v13 = vcombine.high %v955_v63, %v959_v2 }
 0x201   : > { %v4777_v18 = vcombine.high %v956_v1, %v960_v3 }
 0x202   : > { %3580 = vmatmul.mubr.bf16.vlgmr.msra.gmra.mrb[128].mxu0 %v4742_v7  ;;  %3869 = vmatmul.mubr.bf16.vlgmr.msra.gmra.mrb[128].mxu1 %v4744_v11  ;;  %v4766_v7 = vcombine.low %v947_v39, %v951_v41 }
 0x203   : > { %3587 = vmatprep.mubr.bf16.mxu0 %v4751_v12  ;;  %3876 = vmatprep.mubr.bf16.mxu1 %v4753_v16  ;;  %v4768_v12 = vcombine.low %v948_v44, %v952_v45  ;;  %v971_v45 = vld [vmem:[%s5801_s8 + $0x190] sm:$0xff] }
 0x205   : > { %v3051_v21 = vpop.f32.mrb[24].mxu0  ;;  %v3340_v25 = vpop.f32.mrb[24].mxu1 }
 0x206   : > { %v3053_v26 = vpop.f32.mrb[25].mxu0  ;;  %v6176_v28 = vadd.f32 %v3340_v25, %v3051_v21  ;;  %v3342_v29 = vpop.f32.mrb[25].mxu1  ;;  %v963_v21 = vld [vmem:[%s5801_s8 + $0x150] sm:$0xff]  ;;  %v964_v25 = vld [vmem:[%s5801_s8 + $0x158] sm:$0xff] }
 0x207   : > { %v3054_v30 = vpop.f32.mrb[26].mxu0  ;;  %v3343_v34 = vpop.f32.mrb[26].mxu1  ;;  %v968_v26 = vld [vmem:[%s5801_s8 + $0x178] sm:$0xff] }
 0x208   : > { %v3056_v35 = vpop.f32.mrb[27].mxu0  ;;  %v6178_v37 = vadd.f32 %v3343_v34, %v3054_v30  ;;  %v3345_v38 = vpop.f32.mrb[27].mxu1  ;;  %v4774_v30 = vcombine.low %v955_v63, %v959_v2  ;;  %v4785_v41 = vcombine.high %v964_v25, %v968_v26 }
 0x209   : > { %v4776_v35 = vcombine.low %v956_v1, %v960_v3 }
 0x20a   : > { %3588 = vmatmul.mubr.bf16.gmra.mrb[132].mxu0 %v4750_v27  ;;  %3877 = vmatmul.mubr.bf16.gmra.mrb[132].mxu1 %v4752_v31 }
 0x20b   : > { %3595 = vmatprep.mubr.bf16.mxu0 %v4759_v33  ;;  %3884 = vmatprep.mubr.bf16.mxu1 %v4761_v36  ;;  %v4783_v36 = vcombine.high %v963_v21, %v967_v23 }
 0x20d   : > { %v3059_v43 = vpop.f32.mrb[28].mxu0  ;;  %v3348_v46 = vpop.f32.mrb[28].mxu1 }
 0x20e   : > { %v3061_v47 = vpop.f32.mrb[29].mxu0  ;;  %v6184_v49 = vadd.f32 %v3348_v46, %v3059_v43  ;;  %v3350_v51 = vpop.f32.mrb[29].mxu1  ;;  %v975_v46 = vld [vmem:[%s5801_s8 + $0x1b0] sm:$0xff] }
 0x20f   : > { %v3062_v53 = vpop.f32.mrb[30].mxu0  ;;  %v3351_v56 = vpop.f32.mrb[30].mxu1  ;;  %v976_v51 = vld [vmem:[%s5801_s8 + $0x1b8] sm:$0xff]  ;;  %v4791_v63 = vcombine.high %v971_v45, %v975_v46 }
 0x210   : > { %v3064_v57 = vpop.f32.mrb[31].mxu0  ;;  %v6186_v59 = vadd.f32 %v3351_v56, %v3062_v53  ;;  %v3353_v62 = vpop.f32.mrb[31].mxu1 }
 0x211   : > { %v4784_v62 = vcombine.low %v964_v25, %v968_v26 }
 0x212   : > { %3596 = vmatmul.mubr.bf16.gmra.mrb[136].mxu0 %v4758_v48  ;;  %3885 = vmatmul.mubr.bf16.gmra.mrb[136].mxu1 %v4760_v54  ;;  %v972_v48 = vld [vmem:[%s5801_s8 + $0x198] sm:$0xff] }
 0x213   : > { %3603 = vmatprep.mubr.bf16.mxu0 %v4767_v55  ;;  %3892 = vmatprep.mubr.bf16.mxu1 %v4769_v58  ;;  %v4782_v55 = vcombine.low %v963_v21, %v967_v23  ;;  %v4793_v1 = vcombine.high %v972_v48, %v976_v51  ;;  %v4792_v23 = vcombine.low %v972_v48, %v976_v51 }
 0x215   : > { %v3067_v0 = vpop.f32.mrb[32].mxu0  ;;  %v3356_v5 = vpop.f32.mrb[32].mxu1 }
 0x216   : > { %v3069_v6 = vpop.f32.mrb[33].mxu0  ;;  %v6192_v9 = vadd.f32 %v3356_v5, %v3067_v0  ;;  %v3358_v10 = vpop.f32.mrb[33].mxu1 }
 0x217   : > { %v3070_v11 = vpop.f32.mrb[34].mxu0  ;;  %v3359_v15 = vpop.f32.mrb[34].mxu1  ;;  %v979_v6 = vld [vmem:[%s5801_s8 + $0x1d0] sm:$0xff] }
 0x218   : > { %v3072_v16 = vpop.f32.mrb[35].mxu0  ;;  %v6194_v19 = vadd.f32 %v3359_v15, %v3070_v11  ;;  %v3361_v20 = vpop.f32.mrb[35].mxu1  ;;  %v980_v11 = vld [vmem:[%s5801_s8 + $0x1d8] sm:$0xff] }
 0x219   : > { %v4790_v16 = vcombine.low %v971_v45, %v975_v46 }
 0x21a   : > { %3604 = vmatmul.mubr.bf16.gmra.mrb[140].mxu0 %v4766_v7  ;;  %3893 = vmatmul.mubr.bf16.gmra.mrb[140].mxu1 %v4768_v12  ;;  %v983_v7 = vld [vmem:[%s5801_s8 + $0x1f0] sm:$0xff]  ;;  %v984_v12 = vld [vmem:[%s5801_s8 + $0x1f8] sm:$0xff] }
 0x21b   : > { %3611 = vmatprep.mubr.bf16.mxu0 %v4775_v13  ;;  %3900 = vmatprep.mubr.bf16.mxu1 %v4777_v18  ;;  %v4800_v48 = vcombine.low %v980_v11, %v984_v12 }
 0x21d   : > { %v3075_v24 = vpop.f32.mrb[36].mxu0  ;;  %v3364_v27 = vpop.f32.mrb[36].mxu1 }
 0x21e   : > { %v3077_v29 = vpop.f32.mrb[37].mxu0  ;;  %v6200_v31 = vadd.f32 %v3364_v27, %v3075_v24  ;;  %v3366_v33 = vpop.f32.mrb[37].mxu1  ;;  %v4799_v24 = vcombine.high %v979_v6, %v983_v7  ;;  %v4801_v27 = vcombine.high %v980_v11, %v984_v12 }
 0x21f   : > { %v3078_v34 = vpop.f32.mrb[38].mxu0  ;;  %v3367_v38 = vpop.f32.mrb[38].mxu1  ;;  %v987_v33 = vld [vmem:[%s5801_s8 + $0x210] sm:$0xff] }
 0x220   : > { %v3080_v39 = vpop.f32.mrb[39].mxu0  ;;  %v6202_v43 = vadd.f32 %v3367_v38, %v3078_v34  ;;  %v3369_v44 = vpop.f32.mrb[39].mxu1  ;;  %v991_v34 = vld [vmem:[%s5801_s8 + $0x230] sm:$0xff]  ;;  %v992_v38 = vld [vmem:[%s5801_s8 + $0x238] sm:$0xff] }
 0x221   : > { %v4798_v44 = vcombine.low %v979_v6, %v983_v7  ;;  %v4807_v51 = vcombine.high %v987_v33, %v991_v34  ;;  %v4806_v7 = vcombine.low %v987_v33, %v991_v34  ;;  %v1008_v33 = vld [vmem:[%s5801_s8 + $0x2b8] sm:$0xff] }
 0x222   : > { %3612 = vmatmul.mubr.bf16.gmra.mrb[144].mxu0 %v4774_v30  ;;  %3901 = vmatmul.mubr.bf16.gmra.mrb[144].mxu1 %v4776_v35 }
 0x223   : > { %3619 = vmatprep.mubr.bf16.mxu0 %v4783_v36  ;;  %3908 = vmatprep.mubr.bf16.mxu1 %v4785_v41  ;;  %v988_v36 = vld [vmem:[%s5801_s8 + $0x218] sm:$0xff] }
 0x225   : > { %v3083_v47 = vpop.f32.mrb[40].mxu0  ;;  %v3372_v53 = vpop.f32.mrb[40].mxu1 }
 0x226   : > { %v3085_v54 = vpop.f32.mrb[41].mxu0  ;;  %v6208_v56 = vadd.f32 %v3372_v53, %v3083_v47  ;;  %v3374_v57 = vpop.f32.mrb[41].mxu1 }
 0x227   : > { %v3086_v58 = vpop.f32.mrb[42].mxu0  ;;  %v3375_v2 = vpop.f32.mrb[42].mxu1 }
 0x228   : > { %v3088_v0 = vpop.f32.mrb[43].mxu0  ;;  %v6210_v3 = vadd.f32 %v3375_v2, %v3086_v58  ;;  %v3377_v5 = vpop.f32.mrb[43].mxu1 }
 0x229   : > { %v996_v0 = vld [vmem:[%s5801_s8 + $0x258] sm:$0xff] }
 0x22a   : > { %3620 = vmatmul.mubr.bf16.gmra.mrb[148].mxu0 %v4782_v55  ;;  %3909 = vmatmul.mubr.bf16.gmra.mrb[148].mxu1 %v4784_v62  ;;  %v4809_v55 = vcombine.high %v988_v36, %v992_v38  ;;  %v995_v62 = vld [vmem:[%s5801_s8 + $0x250] sm:$0xff] }
 0x22b   : > { %3627 = vmatprep.mubr.bf16.mxu0 %v4791_v63  ;;  %3916 = vmatprep.mubr.bf16.mxu1 %v4793_v1  ;;  %v999_v63 = vld [vmem:[%s5801_s8 + $0x270] sm:$0xff]  ;;  %v1000_v1 = vld [vmem:[%s5801_s8 + $0x278] sm:$0xff] }
 0x22d   : > { %v3091_v10 = vpop.f32.mrb[44].mxu0  ;;  %v3380_v13 = vpop.f32.mrb[44].mxu1 }
 0x22e   : > { %v3093_v15 = vpop.f32.mrb[45].mxu0  ;;  %v6216_v18 = vadd.f32 %v3380_v13, %v3091_v10  ;;  %v3382_v20 = vpop.f32.mrb[45].mxu1  ;;  %v4808_v13 = vcombine.low %v988_v36, %v992_v38  ;;  %v4814_v36 = vcombine.low %v995_v62, %v999_v63 }
 0x22f   : > { %v3094_v21 = vpop.f32.mrb[46].mxu0  ;;  %v3383_v25 = vpop.f32.mrb[46].mxu1  ;;  %v4815_v15 = vcombine.high %v995_v62, %v999_v63  ;;  %v1012_v63 = vld [vmem:[%s5801_s8 + $0x2d8] sm:$0xff] }
 0x230   : > { %v3096_v26 = vpop.f32.mrb[47].mxu0  ;;  %v6218_v29 = vadd.f32 %v3383_v25, %v3094_v21  ;;  %v3385_v30 = vpop.f32.mrb[47].mxu1  ;;  %v4817_v21 = vcombine.high %v996_v0, %v1000_v1  ;;  %v1003_v25 = vld [vmem:[%s5801_s8 + $0x290] sm:$0xff] }
 0x231   : > { %v1007_v26 = vld [vmem:[%s5801_s8 + $0x2b0] sm:$0xff]  ;;  %v1004_v30 = vld [vmem:[%s5801_s8 + $0x298] sm:$0xff] }
 0x232   : > { %3628 = vmatmul.mubr.bf16.gmra.mrb[152].mxu0 %v4790_v16  ;;  %3917 = vmatmul.mubr.bf16.gmra.mrb[152].mxu1 %v4792_v23 }
 0x233   : > { %3635 = vmatprep.mubr.bf16.mxu0 %v4799_v24  ;;  %3924 = vmatprep.mubr.bf16.mxu1 %v4801_v27 }
 0x235   : > { %v3099_v35 = vpop.f32.mrb[48].mxu0  ;;  %v3388_v39 = vpop.f32.mrb[48].mxu1 }
 0x236   : > { %v3101_v41 = vpop.f32.mrb[49].mxu0  ;;  %v6224_v45 = vadd.f32 %v3388_v39, %v3099_v35  ;;  %v3390_v46 = vpop.f32.mrb[49].mxu1 }
 0x237   : > { %v3102_v47 = vpop.f32.mrb[50].mxu0  ;;  %v3391_v53 = vpop.f32.mrb[50].mxu1  ;;  %v4823_v46 = vcombine.high %v1003_v25, %v1007_v26 }
 0x238   : > { %v3104_v54 = vpop.f32.mrb[51].mxu0  ;;  %v6226_v57 = vadd.f32 %v3391_v53, %v3102_v47  ;;  %v3393_v58 = vpop.f32.mrb[51].mxu1 }
 0x239   : > { %v1015_v58 = vld [vmem:[%s5801_s8 + $0x2f0] sm:$0xff] }
 0x23a   : > { %3636 = vmatmul.mubr.bf16.gmra.mrb[156].mxu0 %v4798_v44  ;;  %3925 = vmatmul.mubr.bf16.gmra.mrb[156].mxu1 %v4800_v48  ;;  %v4816_v44 = vcombine.low %v996_v0, %v1000_v1  ;;  %v4822_v0 = vcombine.low %v1003_v25, %v1007_v26  ;;  %v1019_v25 = vld [vmem:[%s5801_s8 + $0x310] sm:$0xff] }
 0x23b   : > { %3643 = vmatprep.mubr.bf16.mxu0 %v4807_v51  ;;  %3932 = vmatprep.mubr.bf16.mxu1 %v4809_v55  ;;  %v4825_v51 = vcombine.high %v1004_v30, %v1008_v33  ;;  %v1011_v55 = vld [vmem:[%s5801_s8 + $0x2d0] sm:$0xff] }
 0x23c   : > { %v1023_v26 = vld [vmem:[%s5801_s8 + $0x330] sm:$0xff] }
 0x23d   : > { %v3107_v2 = vpop.f32.mrb[52].mxu0  ;;  %v3396_v5 = vpop.f32.mrb[52].mxu1 }
 0x23e   : > { %v3109_v6 = vpop.f32.mrb[53].mxu0  ;;  %v6232_v10 = vadd.f32 %v3396_v5, %v3107_v2  ;;  %v3398_v11 = vpop.f32.mrb[53].mxu1  ;;  %v1016_v2 = vld [vmem:[%s5801_s8 + $0x2f8] sm:$0xff] }
 0x23f   : > { %v3110_v12 = vpop.f32.mrb[54].mxu0  ;;  %v3399_v16 = vpop.f32.mrb[54].mxu1 }
 0x240   : > { %v3112_v20 = vpop.f32.mrb[55].mxu0  ;;  %v6234_v23 = vadd.f32 %v3399_v16, %v3110_v12  ;;  %v3401_v24 = vpop.f32.mrb[55].mxu1  ;;  %v4824_v12 = vcombine.low %v1004_v30, %v1008_v33  ;;  %v4830_v30 = vcombine.low %v1011_v55, %v1015_v58 }
 0x241   : > { %v4833_v20 = vcombine.high %v1012_v63, %v1016_v2 }
 0x242   : > { %3644 = vmatmul.mubr.bf16.gmra.mrb[160].mxu0 %v4806_v7  ;;  %3933 = vmatmul.mubr.bf16.gmra.mrb[160].mxu1 %v4808_v13  ;;  %v4831_v13 = vcombine.high %v1011_v55, %v1015_v58  ;;  %v1027_v55 = vld [vmem:[%s5801_s8 + $0x350] sm:$0xff] }
 0x243   : > { %3651 = vmatprep.mubr.bf16.mxu0 %v4815_v15  ;;  %3940 = vmatprep.mubr.bf16.mxu1 %v4817_v21  ;;  %v1031_v58 = vld [vmem:[%s5801_s8 + $0x370] sm:$0xff] }
 0x245   : > { %v3115_v27 = vpop.f32.mrb[56].mxu0  ;;  %v3404_v34 = vpop.f32.mrb[56].mxu1 }
 0x246   : > { %v3117_v35 = vpop.f32.mrb[57].mxu0  ;;  %v6240_v38 = vadd.f32 %v3404_v34, %v3115_v27  ;;  %v3406_v39 = vpop.f32.mrb[57].mxu1  ;;  %v1020_v34 = vld [vmem:[%s5801_s8 + $0x318] sm:$0xff] }
 0x247   : > { %v3118_v41 = vpop.f32.mrb[58].mxu0  ;;  %v3407_v47 = vpop.f32.mrb[58].mxu1  ;;  %v1024_v35 = vld [vmem:[%s5801_s8 + $0x338] sm:$0xff] }
 0x248   : > { %v3120_v48 = vpop.f32.mrb[59].mxu0  ;;  %v6242_v53 = vadd.f32 %v3407_v47, %v3118_v41  ;;  %v3409_v54 = vpop.f32.mrb[59].mxu1  ;;  %v4839_v47 = vcombine.high %v1019_v25, %v1023_v26 }
 0x249   : > { %v4841_v54 = vcombine.high %v1020_v34, %v1024_v35 }
 0x24a   : > { %3652 = vmatmul.mubr.bf16.gmra.mrb[164].mxu0 %v4814_v36  ;;  %3941 = vmatmul.mubr.bf16.gmra.mrb[164].mxu1 %v4816_v44 }
 0x24b   : > { %3659 = vmatprep.mubr.bf16.mxu0 %v4823_v46  ;;  %3948 = vmatprep.mubr.bf16.mxu1 %v4825_v51  ;;  %v4832_v46 = vcombine.low %v1012_v63, %v1016_v2  ;;  %v4838_v63 = vcombine.low %v1019_v25, %v1023_v26  ;;  %v1035_v25 = vld [vmem:[%s5801_s8 + $0x390] sm:$0xff] }
 0x24c   : > { %v1039_v26 = vld [vmem:[%s5801_s8 + $0x3b0] sm:$0xff] }
 0x24d   : > { %v3123_v62 = vpop.f32.mrb[60].mxu0  ;;  %v3412_v5 = vpop.f32.mrb[60].mxu1 }
 0x24e   : > { %v3125_v6 = vpop.f32.mrb[61].mxu0  ;;  %v6248_v1 = vadd.f32 %v3412_v5, %v3123_v62  ;;  %v3414_v7 = vpop.f32.mrb[61].mxu1 }
 0x24f   : > { %v3126_v11 = vpop.f32.mrb[62].mxu0  ;;  %v3415_v15 = vpop.f32.mrb[62].mxu1  ;;  %v1032_v7 = vld [vmem:[%s5801_s8 + $0x378] sm:$0xff] }
 0x250   : > { %v3128_v16 = vpop.f32.mrb[63].mxu0  ;;  %v6250_v21 = vadd.f32 %v3415_v15, %v3126_v11  ;;  %v3417_v24 = vpop.f32.mrb[63].mxu1 }
 0x251   : > { %v4840_v16 = vcombine.low %v1020_v34, %v1024_v35  ;;  %v4846_v34 = vcombine.low %v1027_v55, %v1031_v58 }
 0x252   : > { %3660 = vmatmul.mubr.bf16.gmra.mrb[168].mxu0 %v4822_v0  ;;  %3949 = vmatmul.mubr.bf16.gmra.mrb[168].mxu1 %v4824_v12  ;;  %v1028_v0 = vld [vmem:[%s5801_s8 + $0x358] sm:$0xff] }
 0x253   : > { %3667 = vmatprep.mubr.bf16.mxu0 %v4831_v13  ;;  %3956 = vmatprep.mubr.bf16.mxu1 %v4833_v20  ;;  %v4847_v20 = vcombine.high %v1027_v55, %v1031_v58  ;;  %v1043_v55 = vld [vmem:[%s5801_s8 + $0x3d0] sm:$0xff] }
 0x254   : > { %v1047_v58 = vld [vmem:[%s5801_s8 + $0x3f0] sm:$0xff] }
 0x255   : > { %v3131_v27 = vpop.f32.mrb[64].mxu0  ;;  %v3420_v36 = vpop.f32.mrb[64].mxu1 }
 0x256   : > { %v3133_v39 = vpop.f32.mrb[65].mxu0  ;;  %v6256_v33 = vadd.f32 %v3420_v36, %v3131_v27  ;;  %v3422_v41 = vpop.f32.mrb[65].mxu1  ;;  %v4849_v36 = vcombine.high %v1028_v0, %v1032_v7 }
 0x257   : > { %v3134_v44 = vpop.f32.mrb[66].mxu0  ;;  %v3423_v48 = vpop.f32.mrb[66].mxu1 }
 0x258   : > { %v3136_v51 = vpop.f32.mrb[67].mxu0  ;;  %v6258_v62 = vadd.f32 %v3423_v48, %v3134_v44  ;;  %v3425_v5 = vpop.f32.mrb[67].mxu1  ;;  %v1036_v44 = vld [vmem:[%s5801_s8 + $0x398] sm:$0xff] }
 0x259   : > { %v4848_v5 = vcombine.low %v1028_v0, %v1032_v7  ;;  %v4854_v0 = vcombine.low %v1035_v25, %v1039_v26 }
 0x25a   : > { %3668 = vmatmul.mubr.bf16.gmra.mrb[172].mxu0 %v4830_v30  ;;  %3957 = vmatmul.mubr.bf16.gmra.mrb[172].mxu1 %v4832_v46  ;;  %v1040_v46 = vld [vmem:[%s5801_s8 + $0x3b8] sm:$0xff] }
 0x25b   : > { %3675 = vmatprep.mubr.bf16.mxu0 %v4839_v47  ;;  %3964 = vmatprep.mubr.bf16.mxu1 %v4841_v54 }
 0x25d   : > { %v3139_v6 = vpop.f32.mrb[68].mxu0  ;;  %v3428_v11 = vpop.f32.mrb[68].mxu1 }
 0x25e   : > { %v3141_v12 = vpop.f32.mrb[69].mxu0  ;;  %v6264_v2 = vadd.f32 %v3428_v11, %v3139_v6  ;;  %v3430_v13 = vpop.f32.mrb[69].mxu1  ;;  %v4855_v6 = vcombine.high %v1035_v25, %v1039_v26  ;;  %v1051_v25 = vld [vmem:[%s5801_s8 + $0x410] sm:$0xff] }
 0x25f   : > { %v3142_v15 = vpop.f32.mrb[70].mxu0  ;;  %v3431_v24 = vpop.f32.mrb[70].mxu1  ;;  %v1055_v26 = vld [vmem:[%s5801_s8 + $0x430] sm:$0xff] }
 0x260   : > { %v3144_v27 = vpop.f32.mrb[71].mxu0  ;;  %v6266_v39 = vadd.f32 %v3431_v24, %v3142_v15  ;;  %v3433_v30 = vpop.f32.mrb[71].mxu1  ;;  %v1048_v24 = vld [vmem:[%s5801_s8 + $0x3f8] sm:$0xff] }
 0x262   : > { %3676 = vmatmul.mubr.bf16.gmra.mrb[176].mxu0 %v4838_v63  ;;  %3965 = vmatmul.mubr.bf16.gmra.mrb[176].mxu1 %v4840_v16  ;;  %v4857_v63 = vcombine.high %v1036_v44, %v1040_v46 }
 0x263   : > { %3683 = vmatprep.mubr.bf16.mxu0 %v4847_v20  ;;  %3972 = vmatprep.mubr.bf16.mxu1 %v4849_v36  ;;  %v1044_v20 = vld [vmem:[%s5801_s8 + $0x3d8] sm:$0xff] }
 0x265   : > { %v3147_v41 = vpop.f32.mrb[72].mxu0  ;;  %v3436_v47 = vpop.f32.mrb[72].mxu1 }
 0x266   : > { %v3149_v48 = vpop.f32.mrb[73].mxu0  ;;  %v6272_v35 = vadd.f32 %v3436_v47, %v3147_v41  ;;  %v3438_v51 = vpop.f32.mrb[73].mxu1  ;;  %v4856_v47 = vcombine.low %v1036_v44, %v1040_v46  ;;  %v4862_v44 = vcombine.low %v1043_v55, %v1047_v58 }
 0x267   : > { %v3150_v54 = vpop.f32.mrb[74].mxu0  ;;  %v3439_v11 = vpop.f32.mrb[74].mxu1  ;;  %v4863_v48 = vcombine.high %v1043_v55, %v1047_v58  ;;  %v1059_v55 = vld [vmem:[%s5801_s8 + $0x450] sm:$0xff] }
 0x268   : > { %v3152_v12 = vpop.f32.mrb[75].mxu0  ;;  %v6274_v13 = vadd.f32 %v3439_v11, %v3150_v54  ;;  %v3441_v15 = vpop.f32.mrb[75].mxu1  ;;  %v4865_v54 = vcombine.high %v1044_v20, %v1048_v24  ;;  %v1063_v58 = vld [vmem:[%s5801_s8 + $0x470] sm:$0xff] }
 0x269   : > { %v1052_v12 = vld [vmem:[%s5801_s8 + $0x418] sm:$0xff] }
 0x26a   : > { %3684 = vmatmul.mubr.bf16.gmra.mrb[180].mxu0 %v4846_v34  ;;  %3973 = vmatmul.mubr.bf16.gmra.mrb[180].mxu1 %v4848_v5 }
 0x26b   : > { %3691 = vmatprep.mubr.bf16.mxu0 %v4855_v6  ;;  %3980 = vmatprep.mubr.bf16.mxu1 %v4857_v63  ;;  %v1056_v63 = vld [vmem:[%s5801_s8 + $0x438] sm:$0xff] }
 0x26d   : > { %v3155_v16 = vpop.f32.mrb[76].mxu0  ;;  %v3444_v27 = vpop.f32.mrb[76].mxu1 }
 0x26e   : > { %v3157_v36 = vpop.f32.mrb[77].mxu0  ;;  %v6280_v7 = vadd.f32 %v3444_v27, %v3155_v16  ;;  %v3446_v30 = vpop.f32.mrb[77].mxu1 }
 0x26f   : > { %v3158_v41 = vpop.f32.mrb[78].mxu0  ;;  %v3447_v34 = vpop.f32.mrb[78].mxu1  ;;  %v4871_v30 = vcombine.high %v1051_v25, %v1055_v26 }
 0x270   : > { %v3160_v51 = vpop.f32.mrb[79].mxu0  ;;  %v6282_v5 = vadd.f32 %v3447_v34, %v3158_v41  ;;  %v3449_v6 = vpop.f32.mrb[79].mxu1 }
 0x271   : > { %v1060_v6 = vld [vmem:[%s5801_s8 + $0x458] sm:$0xff] }
 0x272   : > { %3692 = vmatmul.mubr.bf16.gmra.mrb[184].mxu0 %v4854_v0  ;;  %3981 = vmatmul.mubr.bf16.gmra.mrb[184].mxu1 %v4856_v47  ;;  %v4864_v0 = vcombine.low %v1044_v20, %v1048_v24  ;;  %v4870_v20 = vcombine.low %v1051_v25, %v1055_v26  ;;  %v1067_v25 = vld [vmem:[%s5801_s8 + $0x490] sm:$0xff] }
 0x273   : > { %3699 = vmatprep.mubr.bf16.mxu0 %v4863_v48  ;;  %3988 = vmatprep.mubr.bf16.mxu1 %v4865_v54  ;;  %v4873_v48 = vcombine.high %v1052_v12, %v1056_v63  ;;  %v1071_v26 = vld [vmem:[%s5801_s8 + $0x4b0] sm:$0xff] }
 0x275   : > { %v3163_v11 = vpop.f32.mrb[80].mxu0  ;;  %v3452_v15 = vpop.f32.mrb[80].mxu1 }
 0x276   : > { %v3165_v16 = vpop.f32.mrb[81].mxu0  ;;  %v6288_v46 = vadd.f32 %v3452_v15, %v3163_v11  ;;  %v3454_v27 = vpop.f32.mrb[81].mxu1  ;;  %v1064_v11 = vld [vmem:[%s5801_s8 + $0x478] sm:$0xff] }
 0x277   : > { %v3166_v36 = vpop.f32.mrb[82].mxu0  ;;  %v3455_v41 = vpop.f32.mrb[82].mxu1 }
 0x278   : > { %7027 = vst [vmem:[#allocation4_spill] sm:$0xff] %v6288_v46  ;;  %v3168_v47 = vpop.f32.mrb[83].mxu0  ;;  %v6290_v34 = vadd.f32 %v3455_v41, %v3166_v36  ;;  %v3457_v51 = vpop.f32.mrb[83].mxu1 }
 0x279   : > { %v4881_v47 = vcombine.high %v1060_v6, %v1064_v11 }
 0x27a   : > { %7028 = vst [vmem:[#allocation5_spill] sm:$0xff] %v6290_v34  ;;  %3700 = vmatmul.mubr.bf16.gmra.mrb[188].mxu0 %v4862_v44  ;;  %3989 = vmatmul.mubr.bf16.gmra.mrb[188].mxu1 %v4864_v0  ;;  %v4872_v44 = vcombine.low %v1052_v12, %v1056_v63  ;;  %v4879_v0 = vcombine.high %v1059_v55, %v1063_v58  ;;  %v857_v34 = vld [vmem:[#allocation2] sm:$0xff] }
 0x27b   : > { %3707 = vmatprep.mubr.bf16.mxu0 %v4871_v30  ;;  %3996 = vmatprep.mubr.bf16.mxu1 %v4873_v48  ;;  %v4878_v12 = vcombine.low %v1059_v55, %v1063_v58  ;;  %v1075_v55 = vld [vmem:[%s5801_s8 + $0x4d0] sm:$0xff] }
 0x27c   : > { %v1079_v58 = vld [vmem:[%s5801_s8 + $0x4f0] sm:$0xff] }
 0x27d   : > { %v3171_v54 = vpop.f32.mrb[84].mxu0  ;;  %v3460_v15 = vpop.f32.mrb[84].mxu1 }
 0x27e   : > { %v3173_v16 = vpop.f32.mrb[85].mxu0  ;;  %v6296_v24 = vadd.f32 %v3460_v15, %v3171_v54  ;;  %v3462_v27 = vpop.f32.mrb[85].mxu1  ;;  %v1068_v15 = vld [vmem:[%s5801_s8 + $0x498] sm:$0xff] }
 0x27f   : > { %v3174_v36 = vpop.f32.mrb[86].mxu0  ;;  %v3463_v30 = vpop.f32.mrb[86].mxu1  ;;  %v1072_v16 = vld [vmem:[%s5801_s8 + $0x4b8] sm:$0xff] }
 0x280   : > { %7029 = vst [vmem:[#allocation6_spill] sm:$0xff] %v6296_v24  ;;  %v3176_v41 = vpop.f32.mrb[87].mxu0  ;;  %v6298_v48 = vadd.f32 %v3463_v30, %v3174_v36  ;;  %v3465_v51 = vpop.f32.mrb[87].mxu1 }
 0x282   : > { %7030 = vst [vmem:[#allocation7_spill] sm:$0xff] %v6298_v48  ;;  %3708 = vmatmul.mubr.bf16.gmra.mrb[192].mxu0 %v4870_v20  ;;  %3997 = vmatmul.mubr.bf16.gmra.mrb[192].mxu1 %v4872_v44  ;;  %v4880_v20 = vcombine.low %v1060_v6, %v1064_v11  ;;  %v4887_v44 = vcombine.high %v1067_v25, %v1071_v26 }
 0x283   : > { %3715 = vmatprep.mubr.bf16.mxu0 %v4879_v0  ;;  %4004 = vmatprep.mubr.bf16.mxu1 %v4881_v47  ;;  %v4889_v47 = vcombine.high %v1068_v15, %v1072_v16  ;;  %v4886_v6 = vcombine.low %v1067_v25, %v1071_v26  ;;  %v1083_v25 = vld [vmem:[%s5801_s8 + $0x510] sm:$0xff] }
 0x284   : > { %v1087_v26 = vld [vmem:[%s5801_s8 + $0x530] sm:$0xff] }
 0x285   : > { %v3179_v54 = vpop.f32.mrb[88].mxu0  ;;  %v3468_v27 = vpop.f32.mrb[88].mxu1 }
 0x286   : > { %v3181_v24 = vpop.f32.mrb[89].mxu0  ;;  %v6304_v63 = vadd.f32 %v3468_v27, %v3179_v54  ;;  %v3470_v41 = vpop.f32.mrb[89].mxu1  ;;  %v1076_v54 = vld [vmem:[%s5801_s8 + $0x4d8] sm:$0xff] }
 0x287   : > { %v3182_v36 = vpop.f32.mrb[90].mxu0  ;;  %v3471_v0 = vpop.f32.mrb[90].mxu1  ;;  %v1080_v27 = vld [vmem:[%s5801_s8 + $0x4f8] sm:$0xff] }
 0x288   : > { %7031 = vst [vmem:[#allocation8_spill] sm:$0xff] %v6304_v63  ;;  %v3184_v30 = vpop.f32.mrb[91].mxu0  ;;  %v6306_v51 = vadd.f32 %v3471_v0, %v3182_v36  ;;  %v3473_v48 = vpop.f32.mrb[91].mxu1  ;;  %v4897_v0 = vcombine.high %v1076_v54, %v1080_v27 }
 0x289   : > { %v4888_v48 = vcombine.low %v1068_v15, %v1072_v16  ;;  %v4894_v15 = vcombine.low %v1075_v55, %v1079_v58 }
 0x28a   : > { %7032 = vst [vmem:[#allocation9_spill] sm:$0xff] %v6306_v51  ;;  %3716 = vmatmul.mubr.bf16.gmra.mrb[196].mxu0 %v4878_v12  ;;  %4005 = vmatmul.mubr.bf16.gmra.mrb[196].mxu1 %v4880_v20  ;;  %v4895_v12 = vcombine.high %v1075_v55, %v1079_v58  ;;  %v1091_v55 = vld [vmem:[%s5801_s8 + $0x550] sm:$0xff] }
 0x28b   : > { %3723 = vmatprep.mubr.bf16.mxu0 %v4887_v44  ;;  %4012 = vmatprep.mubr.bf16.mxu1 %v4889_v47  ;;  %v1095_v58 = vld [vmem:[%s5801_s8 + $0x570] sm:$0xff] }
 0x28d   : > { %v3187_v24 = vpop.f32.mrb[92].mxu0  ;;  %v3476_v41 = vpop.f32.mrb[92].mxu1 }
 0x28e   : > { %v3189_v63 = vpop.f32.mrb[93].mxu0  ;;  %v6312_v11 = vadd.f32 %v3476_v41, %v3187_v24  ;;  %v3478_v30 = vpop.f32.mrb[93].mxu1  ;;  %v1084_v24 = vld [vmem:[%s5801_s8 + $0x518] sm:$0xff] }
 0x28f   : > { %v3190_v36 = vpop.f32.mrb[94].mxu0  ;;  %v3479_v20 = vpop.f32.mrb[94].mxu1  ;;  %v1088_v41 = vld [vmem:[%s5801_s8 + $0x538] sm:$0xff] }
 0x290   : > { %7033 = vst [vmem:[#allocation10_spill] sm:$0xff] %v6312_v11  ;;  %v3192_v44 = vpop.f32.mrb[95].mxu0  ;;  %v6314_v47 = vadd.f32 %v3479_v20, %v3190_v36  ;;  %v3481_v51 = vpop.f32.mrb[95].mxu1  ;;  %v4905_v20 = vcombine.high %v1084_v24, %v1088_v41 }
 0x291   : > { %v4896_v51 = vcombine.low %v1076_v54, %v1080_v27  ;;  %v4902_v54 = vcombine.low %v1083_v25, %v1087_v26 }
 0x292   : > { %7034 = vst [vmem:[#allocation11_spill] sm:$0xff] %v6314_v47  ;;  %3724 = vmatmul.mubr.bf16.gmra.mrb[200].mxu0 %v4886_v6  ;;  %4013 = vmatmul.mubr.bf16.gmra.mrb[200].mxu1 %v4888_v48  ;;  %v4903_v6 = vcombine.high %v1083_v25, %v1087_v26  ;;  %v1099_v25 = vld [vmem:[%s5801_s8 + $0x590] sm:$0xff] }
 0x293   : > { %3731 = vmatprep.mubr.bf16.mxu0 %v4895_v12  ;;  %4020 = vmatprep.mubr.bf16.mxu1 %v4897_v0  ;;  %v1103_v26 = vld [vmem:[%s5801_s8 + $0x5b0] sm:$0xff] }
 0x295   : > { %v3195_v63 = vpop.f32.mrb[96].mxu0  ;;  %v3484_v30 = vpop.f32.mrb[96].mxu1 }
 0x296   : > { %v3197_v11 = vpop.f32.mrb[97].mxu0  ;;  %v6320_v16 = vadd.f32 %v3484_v30, %v3195_v63  ;;  %v3486_v44 = vpop.f32.mrb[97].mxu1  ;;  %v1092_v63 = vld [vmem:[%s5801_s8 + $0x558] sm:$0xff] }
 0x297   : > { %v3198_v36 = vpop.f32.mrb[98].mxu0  ;;  %v3487_v48 = vpop.f32.mrb[98].mxu1  ;;  %v1096_v30 = vld [vmem:[%s5801_s8 + $0x578] sm:$0xff] }
 0x298   : > { %7035 = vst [vmem:[#allocation12_spill] sm:$0xff] %v6320_v16  ;;  %v3200_v12 = vpop.f32.mrb[99].mxu0  ;;  %v6322_v0 = vadd.f32 %v3487_v48, %v3198_v36  ;;  %v3489_v47 = vpop.f32.mrb[99].mxu1  ;;  %v4913_v48 = vcombine.high %v1092_v63, %v1096_v30 }
 0x299   : > { %v4904_v47 = vcombine.low %v1084_v24, %v1088_v41  ;;  %v4910_v24 = vcombine.low %v1091_v55, %v1095_v58 }
 0x29a   : > { %7036 = vst [vmem:[#allocation13_spill] sm:$0xff] %v6322_v0  ;;  %3732 = vmatmul.mubr.bf16.gmra.mrb[204].mxu0 %v4894_v15  ;;  %4021 = vmatmul.mubr.bf16.gmra.mrb[204].mxu1 %v4896_v51  ;;  %v4911_v15 = vcombine.high %v1091_v55, %v1095_v58  ;;  %v1107_v55 = vld [vmem:[%s5801_s8 + $0x5d0] sm:$0xff] }
 0x29b   : > { %3739 = vmatprep.mubr.bf16.mxu0 %v4903_v6  ;;  %4028 = vmatprep.mubr.bf16.mxu1 %v4905_v20  ;;  %v1111_v58 = vld [vmem:[%s5801_s8 + $0x5f0] sm:$0xff] }
 0x29d   : > { %v3203_v11 = vpop.f32.mrb[100].mxu0  ;;  %v3492_v44 = vpop.f32.mrb[100].mxu1 }
 0x29e   : > { %v3205_v16 = vpop.f32.mrb[101].mxu0  ;;  %v6328_v27 = vadd.f32 %v3492_v44, %v3203_v11  ;;  %v3494_v12 = vpop.f32.mrb[101].mxu1  ;;  %v1100_v11 = vld [vmem:[%s5801_s8 + $0x598] sm:$0xff] }
 0x29f   : > { %v3206_v36 = vpop.f32.mrb[102].mxu0  ;;  %v3495_v51 = vpop.f32.mrb[102].mxu1  ;;  %v1104_v44 = vld [vmem:[%s5801_s8 + $0x5b8] sm:$0xff] }
 0x2a0   : > { %7037 = vst [vmem:[#allocation14_spill] sm:$0xff] %v6328_v27  ;;  %v3208_v6 = vpop.f32.mrb[103].mxu0  ;;  %v6330_v20 = vadd.f32 %v3495_v51, %v3206_v36  ;;  %v3497_v0 = vpop.f32.mrb[103].mxu1  ;;  %v4921_v51 = vcombine.high %v1100_v11, %v1104_v44 }
 0x2a1   : > { %v4912_v0 = vcombine.low %v1092_v63, %v1096_v30  ;;  %v4918_v63 = vcombine.low %v1099_v25, %v1103_v26 }
 0x2a2   : > { %7038 = vst [vmem:[#allocation15_spill] sm:$0xff] %v6330_v20  ;;  %3740 = vmatmul.mubr.bf16.gmra.mrb[208].mxu0 %v4902_v54  ;;  %4029 = vmatmul.mubr.bf16.gmra.mrb[208].mxu1 %v4904_v47  ;;  %v4919_v54 = vcombine.high %v1099_v25, %v1103_v26  ;;  %v1115_v25 = vld [vmem:[%s5801_s8 + $0x610] sm:$0xff] }
 0x2a3   : > { %3747 = vmatprep.mubr.bf16.mxu0 %v4911_v15  ;;  %4036 = vmatprep.mubr.bf16.mxu1 %v4913_v48  ;;  %v1119_v26 = vld [vmem:[%s5801_s8 + $0x630] sm:$0xff] }
 0x2a5   : > { %v3211_v16 = vpop.f32.mrb[104].mxu0  ;;  %v3500_v12 = vpop.f32.mrb[104].mxu1 }
 0x2a6   : > { %v3213_v27 = vpop.f32.mrb[105].mxu0  ;;  %v6336_v41 = vadd.f32 %v3500_v12, %v3211_v16  ;;  %v3502_v6 = vpop.f32.mrb[105].mxu1  ;;  %v1108_v16 = vld [vmem:[%s5801_s8 + $0x5d8] sm:$0xff] }
 0x2a7   : > { %v3214_v36 = vpop.f32.mrb[106].mxu0  ;;  %v3503_v47 = vpop.f32.mrb[106].mxu1  ;;  %v1112_v12 = vld [vmem:[%s5801_s8 + $0x5f8] sm:$0xff] }
 0x2a8   : > { %7039 = vst [vmem:[#allocation16_spill] sm:$0xff] %v6336_v41  ;;  %v3216_v15 = vpop.f32.mrb[107].mxu0  ;;  %v6338_v48 = vadd.f32 %v3503_v47, %v3214_v36  ;;  %v3505_v20 = vpop.f32.mrb[107].mxu1  ;;  %v4929_v47 = vcombine.high %v1108_v16, %v1112_v12 }
 0x2a9   : > { %v4920_v20 = vcombine.low %v1100_v11, %v1104_v44  ;;  %v4926_v11 = vcombine.low %v1107_v55, %v1111_v58 }
 0x2aa   : > { %7040 = vst [vmem:[#allocation17_spill] sm:$0xff] %v6338_v48  ;;  %3748 = vmatmul.mubr.bf16.gmra.mrb[212].mxu0 %v4910_v24  ;;  %4037 = vmatmul.mubr.bf16.gmra.mrb[212].mxu1 %v4912_v0  ;;  %v4927_v24 = vcombine.high %v1107_v55, %v1111_v58  ;;  %v1123_v55 = vld [vmem:[%s5801_s8 + $0x650] sm:$0xff] }
 0x2ab   : > { %3755 = vmatprep.mubr.bf16.mxu0 %v4919_v54  ;;  %4044 = vmatprep.mubr.bf16.mxu1 %v4921_v51  ;;  %v1127_v58 = vld [vmem:[%s5801_s8 + $0x670] sm:$0xff] }
 0x2ad   : > { %v3219_v27 = vpop.f32.mrb[108].mxu0  ;;  %v3508_v6 = vpop.f32.mrb[108].mxu1 }
 0x2ae   : > { %v3221_v41 = vpop.f32.mrb[109].mxu0  ;;  %v6344_v30 = vadd.f32 %v3508_v6, %v3219_v27  ;;  %v3510_v15 = vpop.f32.mrb[109].mxu1  ;;  %v1116_v27 = vld [vmem:[%s5801_s8 + $0x618] sm:$0xff] }
 0x2af   : > { %v3222_v36 = vpop.f32.mrb[110].mxu0  ;;  %v3511_v0 = vpop.f32.mrb[110].mxu1  ;;  %v1120_v6 = vld [vmem:[%s5801_s8 + $0x638] sm:$0xff] }
 0x2b0   : > { %7041 = vst [vmem:[#allocation18_spill] sm:$0xff] %v6344_v30  ;;  %v3224_v54 = vpop.f32.mrb[111].mxu0  ;;  %v6346_v51 = vadd.f32 %v3511_v0, %v3222_v36  ;;  %v3513_v48 = vpop.f32.mrb[111].mxu1  ;;  %v4937_v0 = vcombine.high %v1116_v27, %v1120_v6 }
 0x2b1   : > { %v4928_v48 = vcombine.low %v1108_v16, %v1112_v12  ;;  %v4934_v16 = vcombine.low %v1115_v25, %v1119_v26 }
 0x2b2   : > { %7042 = vst [vmem:[#allocation19_spill] sm:$0xff] %v6346_v51  ;;  %3756 = vmatmul.mubr.bf16.gmra.mrb[216].mxu0 %v4918_v63  ;;  %4045 = vmatmul.mubr.bf16.gmra.mrb[216].mxu1 %v4920_v20  ;;  %v4935_v63 = vcombine.high %v1115_v25, %v1119_v26  ;;  %v1131_v25 = vld [vmem:[%s5801_s8 + $0x690] sm:$0xff] }
 0x2b3   : > { %3763 = vmatprep.mubr.bf16.mxu0 %v4927_v24  ;;  %4052 = vmatprep.mubr.bf16.mxu1 %v4929_v47  ;;  %v1135_v26 = vld [vmem:[%s5801_s8 + $0x6b0] sm:$0xff] }
 0x2b5   : > { %v3227_v41 = vpop.f32.mrb[112].mxu0  ;;  %v3516_v15 = vpop.f32.mrb[112].mxu1 }
 0x2b6   : > { %v3229_v30 = vpop.f32.mrb[113].mxu0  ;;  %v6352_v44 = vadd.f32 %v3516_v15, %v3227_v41  ;;  %v3518_v54 = vpop.f32.mrb[113].mxu1  ;;  %v1124_v41 = vld [vmem:[%s5801_s8 + $0x658] sm:$0xff] }
 0x2b7   : > { %v3230_v36 = vpop.f32.mrb[114].mxu0  ;;  %v3519_v20 = vpop.f32.mrb[114].mxu1  ;;  %v1128_v15 = vld [vmem:[%s5801_s8 + $0x678] sm:$0xff] }
 0x2b8   : > { %7043 = vst [vmem:[#allocation20_spill] sm:$0xff] %v6352_v44  ;;  %v3232_v24 = vpop.f32.mrb[115].mxu0  ;;  %v6354_v47 = vadd.f32 %v3519_v20, %v3230_v36  ;;  %v3521_v51 = vpop.f32.mrb[115].mxu1  ;;  %v4945_v20 = vcombine.high %v1124_v41, %v1128_v15 }
 0x2b9   : > { %v4936_v51 = vcombine.low %v1116_v27, %v1120_v6  ;;  %v4942_v27 = vcombine.low %v1123_v55, %v1127_v58 }
 0x2ba   : > { %7044 = vst [vmem:[#allocation21_spill] sm:$0xff] %v6354_v47  ;;  %3764 = vmatmul.mubr.bf16.gmra.mrb[220].mxu0 %v4926_v11  ;;  %4053 = vmatmul.mubr.bf16.gmra.mrb[220].mxu1 %v4928_v48  ;;  %v4943_v11 = vcombine.high %v1123_v55, %v1127_v58  ;;  %v1139_v55 = vld [vmem:[%s5801_s8 + $0x6d0] sm:$0xff] }
 0x2bb   : > { %3771 = vmatprep.mubr.bf16.mxu0 %v4935_v63  ;;  %4060 = vmatprep.mubr.bf16.mxu1 %v4937_v0  ;;  %v1143_v58 = vld [vmem:[%s5801_s8 + $0x6f0] sm:$0xff] }
 0x2bd   : > { %v3235_v30 = vpop.f32.mrb[116].mxu0  ;;  %v3524_v54 = vpop.f32.mrb[116].mxu1 }
 0x2be   : > { %v3237_v44 = vpop.f32.mrb[117].mxu0  ;;  %v6360_v12 = vadd.f32 %v3524_v54, %v3235_v30  ;;  %v3526_v24 = vpop.f32.mrb[117].mxu1  ;;  %v1132_v30 = vld [vmem:[%s5801_s8 + $0x698] sm:$0xff] }
 0x2bf   : > { %v3238_v36 = vpop.f32.mrb[118].mxu0  ;;  %v3527_v48 = vpop.f32.mrb[118].mxu1  ;;  %v1136_v54 = vld [vmem:[%s5801_s8 + $0x6b8] sm:$0xff] }
 0x2c0   : > { %7045 = vst [vmem:[#allocation22_spill] sm:$0xff] %v6360_v12  ;;  %v3240_v63 = vpop.f32.mrb[119].mxu0  ;;  %v6362_v0 = vadd.f32 %v3527_v48, %v3238_v36  ;;  %v3529_v47 = vpop.f32.mrb[119].mxu1  ;;  %v4953_v48 = vcombine.high %v1132_v30, %v1136_v54 }
 0x2c1   : > { %v4944_v47 = vcombine.low %v1124_v41, %v1128_v15  ;;  %v4950_v41 = vcombine.low %v1131_v25, %v1135_v26 }
 0x2c2   : > { %7046 = vst [vmem:[#allocation23_spill] sm:$0xff] %v6362_v0  ;;  %3772 = vmatmul.mubr.bf16.gmra.mrb[224].mxu0 %v4934_v16  ;;  %4061 = vmatmul.mubr.bf16.gmra.mrb[224].mxu1 %v4936_v51  ;;  %v4951_v16 = vcombine.high %v1131_v25, %v1135_v26  ;;  %v1147_v25 = vld [vmem:[%s5801_s8 + $0x710] sm:$0xff] }
 0x2c3   : > { %3779 = vmatprep.mubr.bf16.mxu0 %v4943_v11  ;;  %4068 = vmatprep.mubr.bf16.mxu1 %v4945_v20  ;;  %v1151_v26 = vld [vmem:[%s5801_s8 + $0x730] sm:$0xff] }
 0x2c5   : > { %v3243_v44 = vpop.f32.mrb[120].mxu0  ;;  %v3532_v24 = vpop.f32.mrb[120].mxu1 }
 0x2c6   : > { %v3245_v12 = vpop.f32.mrb[121].mxu0  ;;  %v6368_v6 = vadd.f32 %v3532_v24, %v3243_v44  ;;  %v3534_v63 = vpop.f32.mrb[121].mxu1  ;;  %v1140_v44 = vld [vmem:[%s5801_s8 + $0x6d8] sm:$0xff] }
 0x2c7   : > { %v3246_v36 = vpop.f32.mrb[122].mxu0  ;;  %v3535_v51 = vpop.f32.mrb[122].mxu1  ;;  %v1144_v24 = vld [vmem:[%s5801_s8 + $0x6f8] sm:$0xff] }
 0x2c8   : > { %7047 = vst [vmem:[#allocation24_spill] sm:$0xff] %v6368_v6  ;;  %v3248_v11 = vpop.f32.mrb[123].mxu0  ;;  %v6370_v20 = vadd.f32 %v3535_v51, %v3246_v36  ;;  %v3537_v0 = vpop.f32.mrb[123].mxu1  ;;  %v4961_v51 = vcombine.high %v1140_v44, %v1144_v24 }
 0x2c9   : > { %v4952_v0 = vcombine.low %v1132_v30, %v1136_v54  ;;  %v4958_v54 = vcombine.low %v1139_v55, %v1143_v58 }
 0x2ca   : > { %7048 = vst [vmem:[#allocation25_spill] sm:$0xff] %v6370_v20  ;;  %3780 = vmatmul.mubr.bf16.gmra.mrb[228].mxu0 %v4942_v27  ;;  %4069 = vmatmul.mubr.bf16.gmra.mrb[228].mxu1 %v4944_v47  ;;  %v4959_v27 = vcombine.high %v1139_v55, %v1143_v58  ;;  %v1155_v58 = vld [vmem:[%s5801_s8 + $0x750] sm:$0xff] }
 0x2cb   : > { %3787 = vmatprep.mubr.bf16.mxu0 %v4951_v16  ;;  %4076 = vmatprep.mubr.bf16.mxu1 %v4953_v48 }
 0x2cd   : > { %v3251_v12 = vpop.f32.mrb[124].mxu0  ;;  %v3540_v63 = vpop.f32.mrb[124].mxu1 }
 0x2ce   : > { %v3253_v6 = vpop.f32.mrb[125].mxu0  ;;  %v6376_v15 = vadd.f32 %v3540_v63, %v3251_v12  ;;  %v3542_v11 = vpop.f32.mrb[125].mxu1  ;;  %v1148_v12 = vld [vmem:[%s5801_s8 + $0x718] sm:$0xff] }
 0x2cf   : > { %v3254_v36 = vpop.f32.mrb[126].mxu0  ;;  %v3543_v47 = vpop.f32.mrb[126].mxu1  ;;  %v1152_v63 = vld [vmem:[%s5801_s8 + $0x738] sm:$0xff] }
 0x2d0   : > { %7049 = vst [vmem:[#allocation26_spill] sm:$0xff] %v6376_v15  ;;  %v3256_v16 = vpop.f32.mrb[127].mxu0  ;;  %v6378_v48 = vadd.f32 %v3543_v47, %v3254_v36  ;;  %v3545_v20 = vpop.f32.mrb[127].mxu1  ;;  %v4960_v36 = vcombine.low %v1140_v44, %v1144_v24  ;;  %v4967_v47 = vcombine.high %v1147_v25, %v1151_v26  ;;  %v1159_v44 = vld [vmem:[%s5801_s8 + $0x770] sm:$0xff] }
 0x2d2   : > { %7050 = vst [vmem:[#allocation27_spill] sm:$0xff] %v6378_v48  ;;  %3788 = vmatmul.mubr.bf16.gmra.mrb[232].mxu0 %v4950_v41  ;;  %4077 = vmatmul.mubr.bf16.gmra.mrb[232].mxu1 %v4952_v0  ;;  %v858_v48 = vld [vmem:[#allocation2 + $0x8] sm:$0xff] }
 0x2d3   : > { %3795 = vmatprep.mubr.bf16.mxu0 %v4959_v27  ;;  %4084 = vmatprep.mubr.bf16.mxu1 %v4961_v51  ;;  %v4969_v51 = vcombine.high %v1148_v12, %v1152_v63 }
 0x2d5   : > { %v3581_v6 = vpop.f32.mrb[128].mxu0  ;;  %v3870_v15 = vpop.f32.mrb[128].mxu1 }
 0x2d6   : > { %v3582_v11 = vadd.f32 %v3581_v6, %v6128_v42  ;;  %v3583_v30 = vpop.f32.mrb[129].mxu0  ;;  %v3872_v16 = vpop.f32.mrb[129].mxu1 }
 0x2d7   : > { %v3584_v46 = vpop.f32.mrb[130].mxu0  ;;  %v3873_v0 = vpop.f32.mrb[130].mxu1 }
 0x2d8   : > { %v3871_v20 = vadd.f32 %v3870_v15, %v3582_v11  ;;  %v3585_v41 = vadd.f32 %v3584_v46, %v6130_v50  ;;  %v3586_v27 = vpop.f32.mrb[131].mxu0  ;;  %v3875_v42 = vpop.f32.mrb[131].mxu1  ;;  %v1156_v15 = vld [vmem:[%s5801_s8 + $0x758] sm:$0xff] }
 0x2d9   : > { %v1160_v50 = vld [vmem:[%s5801_s8 + $0x778] sm:$0xff]  ;;  %v4966_v27 = vcombine.low %v1147_v25, %v1151_v26  ;;  %v859_v42 = vld [vmem:[#allocation2 + $0x10] sm:$0xff] }
 0x2da   : > { %v4125_v6 = vadd.f32 %v3871_v20, %v857_v34  ;;  %v3874_v30 = vadd.f32 %v3873_v0, %v3585_v41  ;;  %3796 = vmatmul.mubr.bf16.gmra.mrb[236].mxu0 %v4958_v54  ;;  %4085 = vmatmul.mubr.bf16.gmra.mrb[236].mxu1 %v4960_v36  ;;  %v4968_v54 = vcombine.low %v1148_v12, %v1152_v63  ;;  %v1163_v26 = vld [vmem:[%s5801_s8 + $0x790] sm:$0xff] }
 0x2db   : > { %3803 = vmatprep.mubr.bf16.mxu0 %v4967_v47  ;;  %4092 = vmatprep.mubr.bf16.mxu1 %v4969_v51  ;;  %v4975_v36 = vcombine.high %v1155_v58, %v1159_v44  ;;  %v4977_v51 = vcombine.high %v1156_v15, %v1160_v50  ;;  %v1167_v12 = vld [vmem:[%s5801_s8 + $0x7b0] sm:$0xff] }
 0x2dc   : > { %4189 = vst [vmem:[#allocation2] sm:$0xff] %v4125_v6  ;;  %v4126_v55 = vadd.f32 %v3874_v30, %v858_v48  ;;  %v860_v6 = vld [vmem:[#allocation2 + $0x18] sm:$0xff] }
 0x2dd   : > { %v3589_v24 = vpop.f32.mrb[132].mxu0  ;;  %v3878_v11 = vpop.f32.mrb[132].mxu1 }
 0x2de   : > { %4190 = vst [vmem:[#allocation2 + $0x8] sm:$0xff] %v4126_v55  ;;  %v3590_v46 = vadd.f32 %v3589_v24, %v6136_v60  ;;  %v3591_v16 = vpop.f32.mrb[133].mxu0  ;;  %v3880_v34 = vpop.f32.mrb[133].mxu1  ;;  %v1164_v24 = vld [vmem:[%s5801_s8 + $0x798] sm:$0xff] }
 0x2df   : > { %v3592_v20 = vpop.f32.mrb[134].mxu0  ;;  %v3881_v41 = vpop.f32.mrb[134].mxu1  ;;  %v4974_v34 = vcombine.low %v1155_v58, %v1159_v44  ;;  %v1171_v44 = vld [vmem:[%s5801_s8 + $0x7d0] sm:$0xff] }
 0x2e0   : > { %v3879_v47 = vadd.f32 %v3878_v11, %v3590_v46  ;;  %v3593_v48 = vadd.f32 %v3592_v20, %v6138_v4  ;;  %v3594_v0 = vpop.f32.mrb[135].mxu0  ;;  %v3883_v60 = vpop.f32.mrb[135].mxu1  ;;  %v1168_v4 = vld [vmem:[%s5801_s8 + $0x7b8] sm:$0xff]  ;;  %v861_v20 = vld [vmem:[#allocation2 + $0x20] sm:$0xff] }
 0x2e2   : > { %v4127_v30 = vadd.f32 %v3879_v47, %v859_v42  ;;  %v3882_v55 = vadd.f32 %v3881_v41, %v3593_v48  ;;  %3804 = vmatmul.mubr.bf16.gmra.mrb[240].mxu0 %v4966_v27  ;;  %4093 = vmatmul.mubr.bf16.gmra.mrb[240].mxu1 %v4968_v54  ;;  %v4976_v27 = vcombine.low %v1156_v15, %v1160_v50  ;;  %v1175_v15 = vld [vmem:[%s5801_s8 + $0x7f0] sm:$0xff] }
 0x2e3   : > { %3811 = vmatprep.mubr.bf16.mxu0 %v4975_v36  ;;  %4100 = vmatprep.mubr.bf16.mxu1 %v4977_v51  ;;  %v4983_v54 = vcombine.high %v1163_v26, %v1167_v12  ;;  %v4985_v51 = vcombine.high %v1164_v24, %v1168_v4 }
 0x2e4   : > { %4191 = vst [vmem:[#allocation2 + $0x10] sm:$0xff] %v4127_v30  ;;  %v4128_v25 = vadd.f32 %v3882_v55, %v860_v6  ;;  %v862_v6 = vld [vmem:[#allocation2 + $0x28] sm:$0xff]  ;;  %v1172_v55 = vld [vmem:[%s5801_s8 + $0x7d8] sm:$0xff] }
 0x2e5   : > { %v3597_v63 = vpop.f32.mrb[136].mxu0  ;;  %v3886_v11 = vpop.f32.mrb[136].mxu1 }
 0x2e6   : > { %4192 = vst [vmem:[#allocation2 + $0x18] sm:$0xff] %v4128_v25  ;;  %v3598_v46 = vadd.f32 %v3597_v63, %v6144_v14  ;;  %v3599_v16 = vpop.f32.mrb[137].mxu0  ;;  %v3888_v42 = vpop.f32.mrb[137].mxu1 }
 0x2e7   : > { %v3600_v47 = vpop.f32.mrb[138].mxu0  ;;  %v3889_v41 = vpop.f32.mrb[138].mxu1  ;;  %v863_v16 = vld [vmem:[#allocation2 + $0x30] sm:$0xff] }
 0x2e8   : > { %v3887_v36 = vadd.f32 %v3886_v11, %v3598_v46  ;;  %v3601_v48 = vadd.f32 %v3600_v47, %v6146_v22  ;;  %v3602_v0 = vpop.f32.mrb[139].mxu0  ;;  %v3891_v14 = vpop.f32.mrb[139].mxu1  ;;  %v1176_v22 = vld [vmem:[%s5801_s8 + $0x7f8] sm:$0xff]  ;;  %v4982_v11 = vcombine.low %v1163_v26, %v1167_v12  ;;  %v4991_v47 = vcombine.high %v1171_v44, %v1175_v15 }
 0x2e9   : > { %v864_v0 = vld [vmem:[#allocation2 + $0x38] sm:$0xff] }
 0x2ea   : > { %v4129_v60 = vadd.f32 %v3887_v36, %v861_v20  ;;  %v3890_v30 = vadd.f32 %v3889_v41, %v3601_v48  ;;  %3812 = vmatmul.mubr.bf16.gmra.mrb[244].mxu0 %v4974_v34  ;;  %4101 = vmatmul.mubr.bf16.gmra.mrb[244].mxu1 %v4976_v27  ;;  %v4984_v34 = vcombine.low %v1164_v24, %v1168_v4 }
 0x2eb   : > { %3819 = vmatprep.mubr.bf16.mxu0 %v4983_v54  ;;  %4108 = vmatprep.mubr.bf16.mxu1 %v4985_v51  ;;  %v4993_v41 = vcombine.high %v1172_v55, %v1176_v22 }
 0x2ec   : > { %4193 = vst [vmem:[#allocation2 + $0x20] sm:$0xff] %v4129_v60  ;;  %v4130_v58 = vadd.f32 %v3890_v30, %v862_v6  ;;  %v865_v60 = vld [vmem:[#allocation2 + $0x40] sm:$0xff] }
 0x2ed   : > { %v3605_v50 = vpop.f32.mrb[140].mxu0  ;;  %v3894_v63 = vpop.f32.mrb[140].mxu1 }
 0x2ee   : > { %4194 = vst [vmem:[#allocation2 + $0x28] sm:$0xff] %v4130_v58  ;;  %v3606_v25 = vadd.f32 %v3605_v50, %v6152_v32  ;;  %v3607_v46 = vpop.f32.mrb[141].mxu0  ;;  %v3896_v20 = vpop.f32.mrb[141].mxu1  ;;  %v4992_v50 = vcombine.low %v1172_v55, %v1176_v22  ;;  %v867_v55 = vld [vmem:[#allocation2 + $0x50] sm:$0xff] }
 0x2ef   : > { %v3608_v42 = vpop.f32.mrb[142].mxu0  ;;  %v3897_v36 = vpop.f32.mrb[142].mxu1 }
 0x2f0   : > { %v3895_v27 = vadd.f32 %v3894_v63, %v3606_v25  ;;  %v3609_v54 = vadd.f32 %v3608_v42, %v6154_v40  ;;  %v3610_v48 = vpop.f32.mrb[143].mxu0  ;;  %v3899_v51 = vpop.f32.mrb[143].mxu1  ;;  %v4990_v40 = vcombine.low %v1171_v44, %v1175_v15 }
 0x2f2   : > { %v4131_v6 = vadd.f32 %v3895_v27, %v863_v16  ;;  %v3898_v14 = vadd.f32 %v3897_v36, %v3609_v54  ;;  %3820 = vmatmul.mubr.bf16.gmra.mrb[248].mxu0 %v4982_v11  ;;  %4109 = vmatmul.mubr.bf16.gmra.mrb[248].mxu1 %v4984_v34  ;;  %v866_v16 = vld [vmem:[#allocation2 + $0x48] sm:$0xff] }
 0x2f3   : > { %3827 = vmatprep.mubr.bf16.mxu0 %v4991_v47  ;;  %4116 = vmatprep.mubr.bf16.mxu1 %v4993_v41 }
 0x2f4   : > { %4195 = vst [vmem:[#allocation2 + $0x30] sm:$0xff] %v4131_v6  ;;  %v4132_v32 = vadd.f32 %v3898_v14, %v864_v0  ;;  %v868_v0 = vld [vmem:[#allocation2 + $0x58] sm:$0xff] }
 0x2f5   : > { %v3613_v26 = vpop.f32.mrb[144].mxu0  ;;  %v3902_v24 = vpop.f32.mrb[144].mxu1 }
 0x2f6   : > { %4196 = vst [vmem:[#allocation2 + $0x38] sm:$0xff] %v4132_v32  ;;  %v3614_v12 = vadd.f32 %v3613_v26, %v6160_v52  ;;  %v3615_v4 = vpop.f32.mrb[145].mxu0  ;;  %v3904_v30 = vpop.f32.mrb[145].mxu1 }
 0x2f7   : > { %v3616_v58 = vpop.f32.mrb[146].mxu0  ;;  %v3905_v46 = vpop.f32.mrb[146].mxu1  ;;  %v869_v4 = vld [vmem:[#allocation2 + $0x60] sm:$0xff] }
 0x2f8   : > { %v3903_v25 = vadd.f32 %v3902_v24, %v3614_v12  ;;  %v3617_v63 = vadd.f32 %v3616_v58, %v6162_v61  ;;  %v3618_v11 = vpop.f32.mrb[147].mxu0  ;;  %v3907_v20 = vpop.f32.mrb[147].mxu1 }
 0x2fa   : > { %v4133_v42 = vadd.f32 %v3903_v25, %v865_v60  ;;  %v3906_v34 = vadd.f32 %v3905_v46, %v3617_v63  ;;  %3828 = vmatmul.mubr.bf16.gmra.mrb[252].mxu0 %v4990_v40  ;;  %4117 = vmatmul.mubr.bf16.gmra.mrb[252].mxu1 %v4992_v50  ;;  %v870_v25 = vld [vmem:[#allocation2 + $0x68] sm:$0xff] }
 0x2fc   : > { %4197 = vst [vmem:[#allocation2 + $0x40] sm:$0xff] %v4133_v42  ;;  %v4134_v52 = vadd.f32 %v3906_v34, %v866_v16 }
 0x2fd   : > { %v3621_v47 = vpop.f32.mrb[148].mxu0  ;;  %v3910_v15 = vpop.f32.mrb[148].mxu1 }
 0x2fe   : > { %4198 = vst [vmem:[#allocation2 + $0x48] sm:$0xff] %v4134_v52  ;;  %v3622_v44 = vadd.f32 %v3621_v47, %v6168_v8  ;;  %v3623_v27 = vpop.f32.mrb[149].mxu0  ;;  %v3912_v22 = vpop.f32.mrb[149].mxu1  ;;  %v871_v52 = vld [vmem:[#allocation2 + $0x70] sm:$0xff] }
 0x2ff   : > { %v3624_v54 = vpop.f32.mrb[150].mxu0  ;;  %v3913_v48 = vpop.f32.mrb[150].mxu1  ;;  %v872_v22 = vld [vmem:[#allocation2 + $0x78] sm:$0xff] }
 0x300   : > { %v3911_v61 = vadd.f32 %v3910_v15, %v3622_v44  ;;  %v3625_v36 = vadd.f32 %v3624_v54, %v6170_v17  ;;  %v3626_v41 = vpop.f32.mrb[151].mxu0  ;;  %v3915_v51 = vpop.f32.mrb[151].mxu1 }
 0x302   : > { %v4135_v6 = vadd.f32 %v3911_v61, %v867_v55  ;;  %v3914_v14 = vadd.f32 %v3913_v48, %v3625_v36 }
 0x304   : > { %4199 = vst [vmem:[#allocation2 + $0x50] sm:$0xff] %v4135_v6  ;;  %v4136_v32 = vadd.f32 %v3914_v14, %v868_v0  ;;  %v873_v6 = vld [vmem:[#allocation2 + $0x80] sm:$0xff] }
 0x305   : > { %v3629_v26 = vpop.f32.mrb[152].mxu0  ;;  %v3918_v12 = vpop.f32.mrb[152].mxu1 }
 0x306   : > { %4200 = vst [vmem:[#allocation2 + $0x58] sm:$0xff] %v4136_v32  ;;  %v3630_v8 = vadd.f32 %v3629_v26, %v6176_v28  ;;  %v3631_v24 = vpop.f32.mrb[153].mxu0  ;;  %v3920_v40 = vpop.f32.mrb[153].mxu1 }
 0x307   : > { %v3632_v60 = vpop.f32.mrb[154].mxu0  ;;  %v3921_v58 = vpop.f32.mrb[154].mxu1  ;;  %v874_v24 = vld [vmem:[#allocation2 + $0x88] sm:$0xff] }
 0x308   : > { %v3919_v30 = vadd.f32 %v3918_v12, %v3630_v8  ;;  %v3633_v17 = vadd.f32 %v3632_v60, %v6178_v37  ;;  %v3634_v50 = vpop.f32.mrb[155].mxu0  ;;  %v3923_v63 = vpop.f32.mrb[155].mxu1 }
 0x30a   : > { %v4137_v46 = vadd.f32 %v3919_v30, %v869_v4  ;;  %v3922_v11 = vadd.f32 %v3921_v58, %v3633_v17 }
 0x30c   : > { %4201 = vst [vmem:[#allocation2 + $0x60] sm:$0xff] %v4137_v46  ;;  %v4138_v16 = vadd.f32 %v3922_v11, %v870_v25  ;;  %v875_v25 = vld [vmem:[#allocation2 + $0x90] sm:$0xff] }
 0x30d   : > { %v3637_v20 = vpop.f32.mrb[156].mxu0  ;;  %v3926_v42 = vpop.f32.mrb[156].mxu1 }
 0x30e   : > { %4202 = vst [vmem:[#allocation2 + $0x68] sm:$0xff] %v4138_v16  ;;  %v3638_v28 = vadd.f32 %v3637_v20, %v6184_v49  ;;  %v3639_v34 = vpop.f32.mrb[157].mxu0  ;;  %v3928_v47 = vpop.f32.mrb[157].mxu1 }
 0x30f   : > { %v3640_v44 = vpop.f32.mrb[158].mxu0  ;;  %v3929_v27 = vpop.f32.mrb[158].mxu1 }
 0x310   : > { %v3927_v15 = vadd.f32 %v3926_v42, %v3638_v28  ;;  %v3641_v37 = vadd.f32 %v3640_v44, %v6186_v59  ;;  %v3642_v55 = vpop.f32.mrb[159].mxu0  ;;  %v3931_v54 = vpop.f32.mrb[159].mxu1  ;;  %v876_v28 = vld [vmem:[#allocation2 + $0x98] sm:$0xff] }
 0x312   : > { %v4139_v61 = vadd.f32 %v3927_v15, %v871_v52  ;;  %v3930_v36 = vadd.f32 %v3929_v27, %v3641_v37  ;;  %v877_v27 = vld [vmem:[#allocation2 + $0xa0] sm:$0xff] }
 0x314   : > { %4203 = vst [vmem:[#allocation2 + $0x70] sm:$0xff] %v4139_v61  ;;  %v4140_v48 = vadd.f32 %v3930_v36, %v872_v22 }
 0x315   : > { %v3645_v41 = vpop.f32.mrb[160].mxu0  ;;  %v3934_v0 = vpop.f32.mrb[160].mxu1 }
 0x316   : > { %4204 = vst [vmem:[#allocation2 + $0x78] sm:$0xff] %v4140_v48  ;;  %v3646_v49 = vadd.f32 %v3645_v41, %v6192_v9  ;;  %v3647_v51 = vpop.f32.mrb[161].mxu0  ;;  %v3936_v14 = vpop.f32.mrb[161].mxu1  ;;  %v878_v48 = vld [vmem:[#allocation2 + $0xa8] sm:$0xff] }
 0x317   : > { %v3648_v32 = vpop.f32.mrb[162].mxu0  ;;  %v3937_v8 = vpop.f32.mrb[162].mxu1 }
 0x318   : > { %v3935_v26 = vadd.f32 %v3934_v0, %v3646_v49  ;;  %v3649_v59 = vadd.f32 %v3648_v32, %v6194_v19  ;;  %v3650_v12 = vpop.f32.mrb[163].mxu0  ;;  %v3939_v4 = vpop.f32.mrb[163].mxu1 }
 0x31a   : > { %v4141_v40 = vadd.f32 %v3935_v26, %v873_v6  ;;  %v3938_v60 = vadd.f32 %v3937_v8, %v3649_v59  ;;  %v879_v26 = vld [vmem:[#allocation2 + $0xb0] sm:$0xff] }
 0x31c   : > { %4205 = vst [vmem:[#allocation2 + $0x80] sm:$0xff] %v4141_v40  ;;  %v4142_v30 = vadd.f32 %v3938_v60, %v874_v24  ;;  %v880_v40 = vld [vmem:[#allocation2 + $0xb8] sm:$0xff] }
 0x31d   : > { %v3653_v17 = vpop.f32.mrb[164].mxu0  ;;  %v3942_v58 = vpop.f32.mrb[164].mxu1 }
 0x31e   : > { %4206 = vst [vmem:[#allocation2 + $0x88] sm:$0xff] %v4142_v30  ;;  %v3654_v9 = vadd.f32 %v3653_v17, %v6200_v31  ;;  %v3655_v50 = vpop.f32.mrb[165].mxu0  ;;  %v3944_v63 = vpop.f32.mrb[165].mxu1 }
 0x31f   : > { %v3656_v46 = vpop.f32.mrb[166].mxu0  ;;  %v3945_v16 = vpop.f32.mrb[166].mxu1  ;;  %v881_v63 = vld [vmem:[#allocation2 + $0xc0] sm:$0xff] }
 0x320   : > { %v3943_v11 = vadd.f32 %v3942_v58, %v3654_v9  ;;  %v3657_v19 = vadd.f32 %v3656_v46, %v6202_v43  ;;  %v3658_v20 = vpop.f32.mrb[167].mxu0  ;;  %v3947_v42 = vpop.f32.mrb[167].mxu1 }
 0x322   : > { %v4143_v34 = vadd.f32 %v3943_v11, %v875_v25  ;;  %v3946_v52 = vadd.f32 %v3945_v16, %v3657_v19 }
 0x324   : > { %4207 = vst [vmem:[#allocation2 + $0x90] sm:$0xff] %v4143_v34  ;;  %v4144_v47 = vadd.f32 %v3946_v52, %v876_v28  ;;  %v882_v28 = vld [vmem:[#allocation2 + $0xc8] sm:$0xff] }
 0x325   : > { %v3661_v44 = vpop.f32.mrb[168].mxu0  ;;  %v3950_v15 = vpop.f32.mrb[168].mxu1 }
 0x326   : > { %4208 = vst [vmem:[#allocation2 + $0x98] sm:$0xff] %v4144_v47  ;;  %v3662_v31 = vadd.f32 %v3661_v44, %v6208_v56  ;;  %v3663_v37 = vpop.f32.mrb[169].mxu0  ;;  %v3952_v55 = vpop.f32.mrb[169].mxu1 }
 0x327   : > { %v3664_v22 = vpop.f32.mrb[170].mxu0  ;;  %v3953_v61 = vpop.f32.mrb[170].mxu1  ;;  %v883_v37 = vld [vmem:[#allocation2 + $0xd0] sm:$0xff] }
 0x328   : > { %v3951_v54 = vadd.f32 %v3950_v15, %v3662_v31  ;;  %v3665_v43 = vadd.f32 %v3664_v22, %v6210_v3  ;;  %v3666_v36 = vpop.f32.mrb[171].mxu0  ;;  %v3955_v41 = vpop.f32.mrb[171].mxu1 }
 0x32a   : > { %v4145_v49 = vadd.f32 %v3951_v54, %v877_v27  ;;  %v3954_v0 = vadd.f32 %v3953_v61, %v3665_v43  ;;  %v884_v61 = vld [vmem:[#allocation2 + $0xd8] sm:$0xff] }
 0x32c   : > { %4209 = vst [vmem:[#allocation2 + $0xa0] sm:$0xff] %v4145_v49  ;;  %v4146_v51 = vadd.f32 %v3954_v0, %v878_v48 }
 0x32d   : > { %v3669_v6 = vpop.f32.mrb[172].mxu0  ;;  %v3958_v14 = vpop.f32.mrb[172].mxu1 }
 0x32e   : > { %4210 = vst [vmem:[#allocation2 + $0xa8] sm:$0xff] %v4146_v51  ;;  %v3670_v56 = vadd.f32 %v3669_v6, %v6216_v18  ;;  %v3671_v32 = vpop.f32.mrb[173].mxu0  ;;  %v3960_v59 = vpop.f32.mrb[173].mxu1 }
 0x32f   : > { %v3672_v8 = vpop.f32.mrb[174].mxu0  ;;  %v3961_v24 = vpop.f32.mrb[174].mxu1 }
 0x330   : > { %v3959_v12 = vadd.f32 %v3958_v14, %v3670_v56  ;;  %v3673_v3 = vadd.f32 %v3672_v8, %v6218_v29  ;;  %v3674_v4 = vpop.f32.mrb[175].mxu0  ;;  %v3963_v60 = vpop.f32.mrb[175].mxu1  ;;  %v885_v56 = vld [vmem:[#allocation2 + $0xe0] sm:$0xff] }
 0x332   : > { %v4147_v30 = vadd.f32 %v3959_v12, %v879_v26  ;;  %v3962_v17 = vadd.f32 %v3961_v24, %v3673_v3  ;;  %v886_v12 = vld [vmem:[#allocation2 + $0xe8] sm:$0xff] }
 0x334   : > { %4211 = vst [vmem:[#allocation2 + $0xb0] sm:$0xff] %v4147_v30  ;;  %v4148_v9 = vadd.f32 %v3962_v17, %v880_v40 }
 0x335   : > { %v3677_v58 = vpop.f32.mrb[176].mxu0  ;;  %v3966_v50 = vpop.f32.mrb[176].mxu1 }
 0x336   : > { %4212 = vst [vmem:[#allocation2 + $0xb8] sm:$0xff] %v4148_v9  ;;  %v3678_v18 = vadd.f32 %v3677_v58, %v6224_v45  ;;  %v3679_v25 = vpop.f32.mrb[177].mxu0  ;;  %v3968_v46 = vpop.f32.mrb[177].mxu1  ;;  %v887_v9 = vld [vmem:[#allocation2 + $0xf0] sm:$0xff] }
 0x337   : > { %v3680_v11 = vpop.f32.mrb[178].mxu0  ;;  %v3969_v16 = vpop.f32.mrb[178].mxu1  ;;  %v888_v46 = vld [vmem:[#allocation2 + $0xf8] sm:$0xff] }
 0x338   : > { %v3967_v19 = vadd.f32 %v3966_v50, %v3678_v18  ;;  %v3681_v29 = vadd.f32 %v3680_v11, %v6226_v57  ;;  %v3682_v20 = vpop.f32.mrb[179].mxu0  ;;  %v3971_v42 = vpop.f32.mrb[179].mxu1 }
 0x33a   : > { %v4149_v34 = vadd.f32 %v3967_v19, %v881_v63  ;;  %v3970_v52 = vadd.f32 %v3969_v16, %v3681_v29 }
 0x33c   : > { %4213 = vst [vmem:[#allocation2 + $0xc0] sm:$0xff] %v4149_v34  ;;  %v4150_v47 = vadd.f32 %v3970_v52, %v882_v28  ;;  %v889_v34 = vld [vmem:[#allocation2 + $0x100] sm:$0xff] }
 0x33d   : > { %v3685_v44 = vpop.f32.mrb[180].mxu0  ;;  %v3974_v31 = vpop.f32.mrb[180].mxu1 }
 0x33e   : > { %4214 = vst [vmem:[#allocation2 + $0xc8] sm:$0xff] %v4150_v47  ;;  %v3686_v45 = vadd.f32 %v3685_v44, %v6232_v10  ;;  %v3687_v15 = vpop.f32.mrb[181].mxu0  ;;  %v3976_v27 = vpop.f32.mrb[181].mxu1 }
 0x33f   : > { %v3688_v55 = vpop.f32.mrb[182].mxu0  ;;  %v3977_v54 = vpop.f32.mrb[182].mxu1  ;;  %v890_v15 = vld [vmem:[#allocation2 + $0x108] sm:$0xff] }
 0x340   : > { %v3975_v22 = vadd.f32 %v3974_v31, %v3686_v45  ;;  %v3689_v57 = vadd.f32 %v3688_v55, %v6234_v23  ;;  %v3690_v43 = vpop.f32.mrb[183].mxu0  ;;  %v3979_v36 = vpop.f32.mrb[183].mxu1 }
 0x342   : > { %v4151_v48 = vadd.f32 %v3975_v22, %v883_v37  ;;  %v3978_v41 = vadd.f32 %v3977_v54, %v3689_v57 }
 0x344   : > { %4215 = vst [vmem:[#allocation2 + $0xd0] sm:$0xff] %v4151_v48  ;;  %v4152_v49 = vadd.f32 %v3978_v41, %v884_v61  ;;  %v891_v61 = vld [vmem:[#allocation2 + $0x110] sm:$0xff] }
 0x345   : > { %v3693_v0 = vpop.f32.mrb[184].mxu0  ;;  %v3982_v51 = vpop.f32.mrb[184].mxu1 }
 0x346   : > { %4216 = vst [vmem:[#allocation2 + $0xd8] sm:$0xff] %v4152_v49  ;;  %v3694_v10 = vadd.f32 %v3693_v0, %v6240_v38  ;;  %v3695_v6 = vpop.f32.mrb[185].mxu0  ;;  %v3984_v14 = vpop.f32.mrb[185].mxu1 }
 0x347   : > { %v3696_v32 = vpop.f32.mrb[186].mxu0  ;;  %v3985_v59 = vpop.f32.mrb[186].mxu1 }
 0x348   : > { %v3983_v26 = vadd.f32 %v3982_v51, %v3694_v10  ;;  %v3697_v23 = vadd.f32 %v3696_v32, %v6242_v53  ;;  %v3698_v8 = vpop.f32.mrb[187].mxu0  ;;  %v3987_v3 = vpop.f32.mrb[187].mxu1  ;;  %v892_v10 = vld [vmem:[#allocation2 + $0x118] sm:$0xff] }
 0x34a   : > { %v4153_v24 = vadd.f32 %v3983_v26, %v885_v56  ;;  %v3986_v4 = vadd.f32 %v3985_v59, %v3697_v23  ;;  %v893_v59 = vld [vmem:[#allocation2 + $0x120] sm:$0xff] }
 0x34c   : > { %4217 = vst [vmem:[#allocation2 + $0xe0] sm:$0xff] %v4153_v24  ;;  %v4154_v40 = vadd.f32 %v3986_v4, %v886_v12 }
 0x34d   : > { %v3701_v60 = vpop.f32.mrb[188].mxu0  ;;  %v3990_v30 = vpop.f32.mrb[188].mxu1 }
 0x34e   : > { %4218 = vst [vmem:[#allocation2 + $0xe8] sm:$0xff] %v4154_v40  ;;  %v3702_v38 = vadd.f32 %v3701_v60, %v6248_v1  ;;  %v3703_v17 = vpop.f32.mrb[189].mxu0  ;;  %v3992_v58 = vpop.f32.mrb[189].mxu1  ;;  %v894_v40 = vld [vmem:[#allocation2 + $0x128] sm:$0xff] }
 0x34f   : > { %v3704_v18 = vpop.f32.mrb[190].mxu0  ;;  %v3993_v25 = vpop.f32.mrb[190].mxu1 }
 0x350   : > { %v3991_v50 = vadd.f32 %v3990_v30, %v3702_v38  ;;  %v3705_v53 = vadd.f32 %v3704_v18, %v6250_v21  ;;  %v3706_v63 = vpop.f32.mrb[191].mxu0  ;;  %v3995_v11 = vpop.f32.mrb[191].mxu1 }
 0x352   : > { %v4155_v19 = vadd.f32 %v3991_v50, %v887_v9  ;;  %v3994_v29 = vadd.f32 %v3993_v25, %v3705_v53  ;;  %v895_v50 = vld [vmem:[#allocation2 + $0x130] sm:$0xff] }
 0x354   : > { %4219 = vst [vmem:[#allocation2 + $0xf0] sm:$0xff] %v4155_v19  ;;  %v4156_v16 = vadd.f32 %v3994_v29, %v888_v46  ;;  %v896_v19 = vld [vmem:[#allocation2 + $0x138] sm:$0xff] }
 0x355   : > { %v3709_v20 = vpop.f32.mrb[192].mxu0  ;;  %v3998_v28 = vpop.f32.mrb[192].mxu1 }
 0x356   : > { %4220 = vst [vmem:[#allocation2 + $0xf8] sm:$0xff] %v4156_v16  ;;  %v3710_v1 = vadd.f32 %v3709_v20, %v6256_v33  ;;  %v3711_v42 = vpop.f32.mrb[193].mxu0  ;;  %v4000_v52 = vpop.f32.mrb[193].mxu1 }
 0x357   : > { %v3712_v47 = vpop.f32.mrb[194].mxu0  ;;  %v4001_v45 = vpop.f32.mrb[194].mxu1  ;;  %v7051_v42 = vld [vmem:[#allocation4_spill] sm:$0xff] }
 0x358   : > { %v3999_v44 = vadd.f32 %v3998_v28, %v3710_v1  ;;  %v3713_v21 = vadd.f32 %v3712_v47, %v6258_v62  ;;  %v3714_v31 = vpop.f32.mrb[195].mxu0  ;;  %v4003_v37 = vpop.f32.mrb[195].mxu1  ;;  %v897_v47 = vld [vmem:[#allocation2 + $0x140] sm:$0xff] }
 0x359   : > { %v7052_v31 = vld [vmem:[#allocation5_spill] sm:$0xff] }
 0x35a   : > { %v4157_v27 = vadd.f32 %v3999_v44, %v889_v34  ;;  %v4002_v55 = vadd.f32 %v4001_v45, %v3713_v21 }
 0x35c   : > { %4221 = vst [vmem:[#allocation2 + $0x100] sm:$0xff] %v4157_v27  ;;  %v4158_v22 = vadd.f32 %v4002_v55, %v890_v15  ;;  %v898_v27 = vld [vmem:[#allocation2 + $0x148] sm:$0xff] }
 0x35d   : > { %v3717_v57 = vpop.f32.mrb[196].mxu0  ;;  %v4006_v54 = vpop.f32.mrb[196].mxu1 }
 0x35e   : > { %4222 = vst [vmem:[#allocation2 + $0x108] sm:$0xff] %v4158_v22  ;;  %v3718_v33 = vadd.f32 %v3717_v57, %v6264_v2  ;;  %v3719_v43 = vpop.f32.mrb[197].mxu0  ;;  %v4008_v36 = vpop.f32.mrb[197].mxu1 }
 0x35f   : > { %v3720_v48 = vpop.f32.mrb[198].mxu0  ;;  %v4009_v49 = vpop.f32.mrb[198].mxu1  ;;  %v7053_v43 = vld [vmem:[#allocation6_spill] sm:$0xff] }
 0x360   : > { %v4007_v41 = vadd.f32 %v4006_v54, %v3718_v33  ;;  %v3721_v62 = vadd.f32 %v3720_v48, %v6266_v39  ;;  %v3722_v0 = vpop.f32.mrb[199].mxu0  ;;  %v4011_v51 = vpop.f32.mrb[199].mxu1 }
 0x362   : > { %v4159_v6 = vadd.f32 %v4007_v41, %v891_v61  ;;  %v4010_v56 = vadd.f32 %v4009_v49, %v3721_v62  ;;  %v899_v41 = vld [vmem:[#allocation2 + $0x150] sm:$0xff] }
 0x364   : > { %4223 = vst [vmem:[#allocation2 + $0x110] sm:$0xff] %v4159_v6  ;;  %v4160_v14 = vadd.f32 %v4010_v56, %v892_v10  ;;  %v7054_v10 = vld [vmem:[#allocation7_spill] sm:$0xff] }
 0x365   : > { %v3725_v32 = vpop.f32.mrb[200].mxu0  ;;  %v4014_v26 = vpop.f32.mrb[200].mxu1 }
 0x366   : > { %4224 = vst [vmem:[#allocation2 + $0x118] sm:$0xff] %v4160_v14  ;;  %v3726_v2 = vadd.f32 %v3725_v32, %v6272_v35  ;;  %v3727_v23 = vpop.f32.mrb[201].mxu0  ;;  %v4016_v8 = vpop.f32.mrb[201].mxu1  ;;  %v900_v14 = vld [vmem:[#allocation2 + $0x158] sm:$0xff] }
 0x367   : > { %v3728_v12 = vpop.f32.mrb[202].mxu0  ;;  %v4017_v24 = vpop.f32.mrb[202].mxu1  ;;  %v7055_v8 = vld [vmem:[#allocation8_spill] sm:$0xff] }
 0x368   : > { %v4015_v3 = vadd.f32 %v4014_v26, %v3726_v2  ;;  %v3729_v39 = vadd.f32 %v3728_v12, %v6274_v13  ;;  %v3730_v4 = vpop.f32.mrb[203].mxu0  ;;  %v4019_v60 = vpop.f32.mrb[203].mxu1 }
 0x36a   : > { %v4161_v38 = vadd.f32 %v4015_v3, %v893_v59  ;;  %v4018_v30 = vadd.f32 %v4017_v24, %v3729_v39  ;;  %v901_v24 = vld [vmem:[#allocation2 + $0x160] sm:$0xff] }
 0x36c   : > { %4225 = vst [vmem:[#allocation2 + $0x120] sm:$0xff] %v4161_v38  ;;  %v4162_v17 = vadd.f32 %v4018_v30, %v894_v40  ;;  %v7056_v38 = vld [vmem:[#allocation9_spill] sm:$0xff] }
 0x36d   : > { %v3733_v9 = vpop.f32.mrb[204].mxu0  ;;  %v4022_v58 = vpop.f32.mrb[204].mxu1 }
 0x36e   : > { %4226 = vst [vmem:[#allocation2 + $0x128] sm:$0xff] %v4162_v17  ;;  %v3734_v35 = vadd.f32 %v3733_v9, %v6280_v7  ;;  %v3735_v18 = vpop.f32.mrb[205].mxu0  ;;  %v4024_v53 = vpop.f32.mrb[205].mxu1 }
 0x36f   : > { %v3736_v25 = vpop.f32.mrb[206].mxu0  ;;  %v4025_v46 = vpop.f32.mrb[206].mxu1 }
 0x370   : > { %v4023_v63 = vadd.f32 %v4022_v58, %v3734_v35  ;;  %v3737_v13 = vadd.f32 %v3736_v25, %v6282_v5  ;;  %v3738_v11 = vpop.f32.mrb[207].mxu0  ;;  %v4027_v29 = vpop.f32.mrb[207].mxu1  ;;  %v902_v35 = vld [vmem:[#allocation2 + $0x168] sm:$0xff] }
 0x372   : > { %v4163_v16 = vadd.f32 %v4023_v63, %v895_v50  ;;  %v4026_v20 = vadd.f32 %v4025_v46, %v3737_v13  ;;  %v7057_v63 = vld [vmem:[#allocation10_spill] sm:$0xff] }
 0x374   : > { %4227 = vst [vmem:[#allocation2 + $0x130] sm:$0xff] %v4163_v16  ;;  %v4164_v1 = vadd.f32 %v4026_v20, %v896_v19  ;;  %v903_v19 = vld [vmem:[#allocation2 + $0x170] sm:$0xff] }
 0x375   : > { %v3741_v28 = vpop.f32.mrb[208].mxu0  ;;  %v4030_v34 = vpop.f32.mrb[208].mxu1 }
 0x376   : > { %4228 = vst [vmem:[#allocation2 + $0x138] sm:$0xff] %v4164_v1  ;;  %v3742_v7 = vadd.f32 %v3741_v28, %v7051_v42  ;;  %v3743_v52 = vpop.f32.mrb[209].mxu0  ;;  %v4032_v44 = vpop.f32.mrb[209].mxu1  ;;  %v7058_v1 = vld [vmem:[#allocation11_spill] sm:$0xff] }
 0x377   : > { %v3744_v21 = vpop.f32.mrb[210].mxu0  ;;  %v4033_v15 = vpop.f32.mrb[210].mxu1 }
 0x378   : > { %v4031_v45 = vadd.f32 %v4030_v34, %v3742_v7  ;;  %v3745_v5 = vadd.f32 %v3744_v21, %v7052_v31  ;;  %v3746_v37 = vpop.f32.mrb[211].mxu0  ;;  %v4035_v55 = vpop.f32.mrb[211].mxu1  ;;  %v904_v34 = vld [vmem:[#allocation2 + $0x178] sm:$0xff]  ;;  %v7059_v31 = vld [vmem:[#allocation12_spill] sm:$0xff] }
 0x37a   : > { %v4165_v22 = vadd.f32 %v4031_v45, %v897_v47  ;;  %v4034_v57 = vadd.f32 %v4033_v15, %v3745_v5 }
 0x37c   : > { %4229 = vst [vmem:[#allocation2 + $0x140] sm:$0xff] %v4165_v22  ;;  %v4166_v33 = vadd.f32 %v4034_v57, %v898_v27  ;;  %v905_v27 = vld [vmem:[#allocation2 + $0x180] sm:$0xff] }
 0x37d   : > { %v3749_v54 = vpop.f32.mrb[212].mxu0  ;;  %v4038_v36 = vpop.f32.mrb[212].mxu1 }
 0x37e   : > { %4230 = vst [vmem:[#allocation2 + $0x148] sm:$0xff] %v4166_v33  ;;  %v3750_v61 = vadd.f32 %v3749_v54, %v7053_v43  ;;  %v3751_v48 = vpop.f32.mrb[213].mxu0  ;;  %v4040_v62 = vpop.f32.mrb[213].mxu1  ;;  %v7060_v33 = vld [vmem:[#allocation13_spill] sm:$0xff] }
 0x37f   : > { %v3752_v49 = vpop.f32.mrb[214].mxu0  ;;  %v4041_v6 = vpop.f32.mrb[214].mxu1 }
 0x380   : > { %v4039_v0 = vadd.f32 %v4038_v36, %v3750_v61  ;;  %v3753_v51 = vadd.f32 %v3752_v49, %v7054_v10  ;;  %v3754_v56 = vpop.f32.mrb[215].mxu0  ;;  %v4043_v32 = vpop.f32.mrb[215].mxu1  ;;  %v906_v36 = vld [vmem:[#allocation2 + $0x188] sm:$0xff]  ;;  %v7061_v10 = vld [vmem:[#allocation14_spill] sm:$0xff] }
 0x382   : > { %v4167_v2 = vadd.f32 %v4039_v0, %v899_v41  ;;  %v4042_v26 = vadd.f32 %v4041_v6, %v3753_v51 }
 0x384   : > { %4231 = vst [vmem:[#allocation2 + $0x150] sm:$0xff] %v4167_v2  ;;  %v4168_v23 = vadd.f32 %v4042_v26, %v900_v14  ;;  %v907_v14 = vld [vmem:[#allocation2 + $0x190] sm:$0xff] }
 0x385   : > { %v3757_v59 = vpop.f32.mrb[216].mxu0  ;;  %v4046_v3 = vpop.f32.mrb[216].mxu1 }
 0x386   : > { %4232 = vst [vmem:[#allocation2 + $0x158] sm:$0xff] %v4168_v23  ;;  %v3758_v12 = vadd.f32 %v3757_v59, %v7055_v8  ;;  %v3759_v39 = vpop.f32.mrb[217].mxu0  ;;  %v4048_v4 = vpop.f32.mrb[217].mxu1  ;;  %v7062_v23 = vld [vmem:[#allocation15_spill] sm:$0xff] }
 0x387   : > { %v3760_v40 = vpop.f32.mrb[218].mxu0  ;;  %v4049_v17 = vpop.f32.mrb[218].mxu1 }
 0x388   : > { %v4047_v60 = vadd.f32 %v4046_v3, %v3758_v12  ;;  %v3761_v30 = vadd.f32 %v3760_v40, %v7056_v38  ;;  %v3762_v9 = vpop.f32.mrb[219].mxu0  ;;  %v4051_v58 = vpop.f32.mrb[219].mxu1  ;;  %v908_v3 = vld [vmem:[#allocation2 + $0x198] sm:$0xff]  ;;  %v7063_v38 = vld [vmem:[#allocation16_spill] sm:$0xff] }
 0x38a   : > { %v4169_v18 = vadd.f32 %v4047_v60, %v901_v24  ;;  %v4050_v50 = vadd.f32 %v4049_v17, %v3761_v30 }
 0x38c   : > { %4233 = vst [vmem:[#allocation2 + $0x160] sm:$0xff] %v4169_v18  ;;  %v4170_v53 = vadd.f32 %v4050_v50, %v902_v35  ;;  %v909_v35 = vld [vmem:[#allocation2 + $0x1a0] sm:$0xff] }
 0x38d   : > { %v3765_v25 = vpop.f32.mrb[220].mxu0  ;;  %v4054_v46 = vpop.f32.mrb[220].mxu1 }
 0x38e   : > { %4234 = vst [vmem:[#allocation2 + $0x168] sm:$0xff] %v4170_v53  ;;  %v3766_v13 = vadd.f32 %v3765_v25, %v7057_v63  ;;  %v3767_v11 = vpop.f32.mrb[221].mxu0  ;;  %v4056_v29 = vpop.f32.mrb[221].mxu1  ;;  %v7064_v53 = vld [vmem:[#allocation17_spill] sm:$0xff] }
 0x38f   : > { %v3768_v16 = vpop.f32.mrb[222].mxu0  ;;  %v4057_v42 = vpop.f32.mrb[222].mxu1 }
 0x390   : > { %v4055_v20 = vadd.f32 %v4054_v46, %v3766_v13  ;;  %v3769_v28 = vadd.f32 %v3768_v16, %v7058_v1  ;;  %v3770_v7 = vpop.f32.mrb[223].mxu0  ;;  %v4059_v52 = vpop.f32.mrb[223].mxu1  ;;  %v910_v46 = vld [vmem:[#allocation2 + $0x1a8] sm:$0xff]  ;;  %v7065_v1 = vld [vmem:[#allocation18_spill] sm:$0xff] }
 0x392   : > { %v4171_v47 = vadd.f32 %v4055_v20, %v903_v19  ;;  %v4058_v44 = vadd.f32 %v4057_v42, %v3769_v28 }
 0x394   : > { %4235 = vst [vmem:[#allocation2 + $0x170] sm:$0xff] %v4171_v47  ;;  %v4172_v21 = vadd.f32 %v4058_v44, %v904_v34  ;;  %v911_v34 = vld [vmem:[#allocation2 + $0x1b0] sm:$0xff] }
 0x395   : > { %v3773_v45 = vpop.f32.mrb[224].mxu0  ;;  %v4062_v15 = vpop.f32.mrb[224].mxu1 }
 0x396   : > { %4236 = vst [vmem:[#allocation2 + $0x178] sm:$0xff] %v4172_v21  ;;  %v3774_v5 = vadd.f32 %v3773_v45, %v7059_v31  ;;  %v3775_v37 = vpop.f32.mrb[225].mxu0  ;;  %v4064_v55 = vpop.f32.mrb[225].mxu1  ;;  %v7066_v21 = vld [vmem:[#allocation19_spill] sm:$0xff] }
 0x397   : > { %v3776_v22 = vpop.f32.mrb[226].mxu0  ;;  %v4065_v43 = vpop.f32.mrb[226].mxu1 }
 0x398   : > { %v4063_v57 = vadd.f32 %v4062_v15, %v3774_v5  ;;  %v3777_v54 = vadd.f32 %v3776_v22, %v7060_v33  ;;  %v3778_v61 = vpop.f32.mrb[227].mxu0  ;;  %v4067_v48 = vpop.f32.mrb[227].mxu1  ;;  %v912_v15 = vld [vmem:[#allocation2 + $0x1b8] sm:$0xff]  ;;  %v7067_v33 = vld [vmem:[#allocation20_spill] sm:$0xff] }
 0x39a   : > { %v4173_v41 = vadd.f32 %v4063_v57, %v905_v27  ;;  %v4066_v62 = vadd.f32 %v4065_v43, %v3777_v54 }
 0x39c   : > { %4237 = vst [vmem:[#allocation2 + $0x180] sm:$0xff] %v4173_v41  ;;  %v4174_v49 = vadd.f32 %v4066_v62, %v906_v36  ;;  %v913_v36 = vld [vmem:[#allocation2 + $0x1c0] sm:$0xff] }
 0x39d   : > { %v3781_v0 = vpop.f32.mrb[228].mxu0  ;;  %v4070_v6 = vpop.f32.mrb[228].mxu1 }
 0x39e   : > { %4238 = vst [vmem:[#allocation2 + $0x188] sm:$0xff] %v4174_v49  ;;  %v3782_v51 = vadd.f32 %v3781_v0, %v7061_v10  ;;  %v3783_v56 = vpop.f32.mrb[229].mxu0  ;;  %v4072_v32 = vpop.f32.mrb[229].mxu1  ;;  %v7068_v49 = vld [vmem:[#allocation21_spill] sm:$0xff] }
 0x39f   : > { %v3784_v2 = vpop.f32.mrb[230].mxu0  ;;  %v4073_v8 = vpop.f32.mrb[230].mxu1 }
 0x3a0   : > { %v4071_v26 = vadd.f32 %v4070_v6, %v3782_v51  ;;  %v3785_v59 = vadd.f32 %v3784_v2, %v7062_v23  ;;  %v3786_v12 = vpop.f32.mrb[231].mxu0  ;;  %v4075_v39 = vpop.f32.mrb[231].mxu1  ;;  %v914_v6 = vld [vmem:[#allocation2 + $0x1c8] sm:$0xff]  ;;  %v7069_v23 = vld [vmem:[#allocation22_spill] sm:$0xff] }
 0x3a2   : > { %v4175_v24 = vadd.f32 %v4071_v26, %v907_v14  ;;  %v4074_v4 = vadd.f32 %v4073_v8, %v3785_v59 }
 0x3a4   : > { %4239 = vst [vmem:[#allocation2 + $0x190] sm:$0xff] %v4175_v24  ;;  %v4176_v40 = vadd.f32 %v4074_v4, %v908_v3  ;;  %v915_v3 = vld [vmem:[#allocation2 + $0x1d0] sm:$0xff] }
 0x3a5   : > { %v3789_v60 = vpop.f32.mrb[232].mxu0  ;;  %v4078_v17 = vpop.f32.mrb[232].mxu1 }
 0x3a6   : > { %4240 = vst [vmem:[#allocation2 + $0x198] sm:$0xff] %v4176_v40  ;;  %v3790_v30 = vadd.f32 %v3789_v60, %v7063_v38  ;;  %v3791_v9 = vpop.f32.mrb[233].mxu0  ;;  %v4080_v58 = vpop.f32.mrb[233].mxu1  ;;  %v7070_v40 = vld [vmem:[#allocation23_spill] sm:$0xff] }
 0x3a7   : > { %v3792_v18 = vpop.f32.mrb[234].mxu0  ;;  %v4081_v63 = vpop.f32.mrb[234].mxu1 }
 0x3a8   : > { %v4079_v50 = vadd.f32 %v4078_v17, %v3790_v30  ;;  %v3793_v25 = vadd.f32 %v3792_v18, %v7064_v53  ;;  %v3794_v13 = vpop.f32.mrb[235].mxu0  ;;  %v4083_v11 = vpop.f32.mrb[235].mxu1  ;;  %v916_v17 = vld [vmem:[#allocation2 + $0x1d8] sm:$0xff]  ;;  %v7071_v53 = vld [vmem:[#allocation24_spill] sm:$0xff] }
 0x3aa   : > { %v4177_v19 = vadd.f32 %v4079_v50, %v909_v35  ;;  %v4082_v29 = vadd.f32 %v4081_v63, %v3793_v25 }
 0x3ac   : > { %4241 = vst [vmem:[#allocation2 + $0x1a0] sm:$0xff] %v4177_v19  ;;  %v4178_v16 = vadd.f32 %v4082_v29, %v910_v46  ;;  %v917_v46 = vld [vmem:[#allocation2 + $0x1e0] sm:$0xff] }
 0x3ad   : > { %v3797_v20 = vpop.f32.mrb[236].mxu0  ;;  %v4086_v42 = vpop.f32.mrb[236].mxu1 }
 0x3ae   : > { %4242 = vst [vmem:[#allocation2 + $0x1a8] sm:$0xff] %v4178_v16  ;;  %v3798_v28 = vadd.f32 %v3797_v20, %v7065_v1  ;;  %v3799_v7 = vpop.f32.mrb[237].mxu0  ;;  %v4088_v52 = vpop.f32.mrb[237].mxu1  ;;  %v7072_v16 = vld [vmem:[#allocation25_spill] sm:$0xff] }
 0x3af   : > { %v3800_v47 = vpop.f32.mrb[238].mxu0  ;;  %v4089_v31 = vpop.f32.mrb[238].mxu1 }
 0x3b0   : > { %v4087_v44 = vadd.f32 %v4086_v42, %v3798_v28  ;;  %v3801_v45 = vadd.f32 %v3800_v47, %v7066_v21  ;;  %v3802_v5 = vpop.f32.mrb[239].mxu0  ;;  %v4091_v37 = vpop.f32.mrb[239].mxu1  ;;  %v918_v42 = vld [vmem:[#allocation2 + $0x1e8] sm:$0xff]  ;;  %v7073_v21 = vld [vmem:[#allocation26_spill] sm:$0xff] }
 0x3b2   : > { %v4179_v27 = vadd.f32 %v4087_v44, %v911_v34  ;;  %v4090_v55 = vadd.f32 %v4089_v31, %v3801_v45 }
 0x3b4   : > { %4243 = vst [vmem:[#allocation2 + $0x1b0] sm:$0xff] %v4179_v27  ;;  %v4180_v22 = vadd.f32 %v4090_v55, %v912_v15  ;;  %v919_v15 = vld [vmem:[#allocation2 + $0x1f0] sm:$0xff] }
 0x3b5   : > { %v3805_v57 = vpop.f32.mrb[240].mxu0  ;;  %v4094_v43 = vpop.f32.mrb[240].mxu1 }
 0x3b6   : > { %4244 = vst [vmem:[#allocation2 + $0x1b8] sm:$0xff] %v4180_v22  ;;  %v3806_v54 = vadd.f32 %v3805_v57, %v7067_v33  ;;  %v3807_v61 = vpop.f32.mrb[241].mxu0  ;;  %v4096_v48 = vpop.f32.mrb[241].mxu1  ;;  %v7074_v22 = vld [vmem:[#allocation27_spill] sm:$0xff] }
 0x3b7   : > { %v3808_v41 = vpop.f32.mrb[242].mxu0  ;;  %v4097_v10 = vpop.f32.mrb[242].mxu1 }
 0x3b8   : > { %v4095_v62 = vadd.f32 %v4094_v43, %v3806_v54  ;;  %v3809_v0 = vadd.f32 %v3808_v41, %v7068_v49  ;;  %v3810_v51 = vpop.f32.mrb[243].mxu0  ;;  %v4099_v56 = vpop.f32.mrb[243].mxu1  ;;  %v920_v43 = vld [vmem:[#allocation2 + $0x1f8] sm:$0xff] }
 0x3ba   : > { %v4181_v14 = vadd.f32 %v4095_v62, %v913_v36  ;;  %v4098_v32 = vadd.f32 %v4097_v10, %v3809_v0 }
 0x3bc   : > { %4245 = vst [vmem:[#allocation2 + $0x1c0] sm:$0xff] %v4181_v14  ;;  %v4182_v2 = vadd.f32 %v4098_v32, %v914_v6 }
 0x3bd   : > { %v3813_v26 = vpop.f32.mrb[244].mxu0  ;;  %v4102_v8 = vpop.f32.mrb[244].mxu1 }
 0x3be   : > { %4246 = vst [vmem:[#allocation2 + $0x1c8] sm:$0xff] %v4182_v2  ;;  %v3814_v59 = vadd.f32 %v3813_v26, %v7069_v23  ;;  %v3815_v12 = vpop.f32.mrb[245].mxu0  ;;  %v4104_v39 = vpop.f32.mrb[245].mxu1 }
 0x3bf   : > { %v3816_v24 = vpop.f32.mrb[246].mxu0  ;;  %v4105_v38 = vpop.f32.mrb[246].mxu1 }
 0x3c0   : > { %v4103_v4 = vadd.f32 %v4102_v8, %v3814_v59  ;;  %v3817_v60 = vadd.f32 %v3816_v24, %v7070_v40  ;;  %v3818_v30 = vpop.f32.mrb[247].mxu0  ;;  %v4107_v9 = vpop.f32.mrb[247].mxu1 }
 0x3c2   : > { %v4183_v35 = vadd.f32 %v4103_v4, %v915_v3  ;;  %v4106_v58 = vadd.f32 %v4105_v38, %v3817_v60 }
 0x3c4   : > { %4247 = vst [vmem:[#allocation2 + $0x1d0] sm:$0xff] %v4183_v35  ;;  %v4184_v18 = vadd.f32 %v4106_v58, %v916_v17 }
 0x3c5   : > { %v3821_v50 = vpop.f32.mrb[248].mxu0  ;;  %v4110_v63 = vpop.f32.mrb[248].mxu1 }
 0x3c6   : > { %4248 = vst [vmem:[#allocation2 + $0x1d8] sm:$0xff] %v4184_v18  ;;  %v3822_v25 = vadd.f32 %v3821_v50, %v7071_v53  ;;  %v3823_v13 = vpop.f32.mrb[249].mxu0  ;;  %v4112_v11 = vpop.f32.mrb[249].mxu1 }
 0x3c7   : > { %v3824_v19 = vpop.f32.mrb[250].mxu0  ;;  %v4113_v1 = vpop.f32.mrb[250].mxu1 }
 0x3c8   : > { %v4111_v29 = vadd.f32 %v4110_v63, %v3822_v25  ;;  %v3825_v20 = vadd.f32 %v3824_v19, %v7072_v16  ;;  %v3826_v28 = vpop.f32.mrb[251].mxu0  ;;  %v4115_v7 = vpop.f32.mrb[251].mxu1 }
 0x3ca   : > { %v4185_v34 = vadd.f32 %v4111_v29, %v917_v46  ;;  %v4114_v52 = vadd.f32 %v4113_v1, %v3825_v20 }
 0x3cc   : > { %4249 = vst [vmem:[#allocation2 + $0x1e0] sm:$0xff] %v4185_v34  ;;  %v4186_v47 = vadd.f32 %v4114_v52, %v918_v42 }
 0x3cd   : > { %v3829_v44 = vpop.f32.mrb[252].mxu0  ;;  %v4118_v31 = vpop.f32.mrb[252].mxu1 }
 0x3ce   : > { %4250 = vst [vmem:[#allocation2 + $0x1e8] sm:$0xff] %v4186_v47  ;;  %v3830_v45 = vadd.f32 %v3829_v44, %v7073_v21  ;;  %v3831_v5 = vpop.f32.mrb[253].mxu0  ;;  %v4120_v37 = vpop.f32.mrb[253].mxu1 }
 0x3cf   : > { %v3832_v27 = vpop.f32.mrb[254].mxu0  ;;  %v4121_v33 = vpop.f32.mrb[254].mxu1 }
 0x3d0   : > { %v4119_v55 = vadd.f32 %v4118_v31, %v3830_v45  ;;  %v3833_v57 = vadd.f32 %v3832_v27, %v7074_v22  ;;  %v3834_v54 = vpop.f32.mrb[255].mxu0  ;;  %v4123_v61 = vpop.f32.mrb[255].mxu1  ;;  %4256 = sbr.rel (%p5058_p11) target bundleno = 1130 (0x46a), region = 59 }
 0x3d2   : > { %v4187_v36 = vadd.f32 %v4119_v55, %v919_v15  ;;  %v4122_v48 = vadd.f32 %v4121_v33, %v3833_v57 }
 0x3d4   : > { %4251 = vst [vmem:[#allocation2 + $0x1f0] sm:$0xff] %v4187_v36  ;;  %v4188_v41 = vadd.f32 %v4122_v48, %v920_v43 }
 0x3d6   : > { %4252 = vst [vmem:[#allocation2 + $0x1f8] sm:$0xff] %v4188_v41 }
 0x3d7   : > { %v4257_v62 = vld [vmem:[#allocation2] sm:$0xff]  ;;  %v4258_v49 = vld [vmem:[#allocation2 + $0x8] sm:$0xff]  ;;  %v4259_v0 = vld [vmem:[#allocation2 + $0x10] sm:$0xff]  ;;  %vm4587_vm0 = vcmask 1040384  }
 0x3d8   : > { %4321 = vst [vmem:[%s7021_s2] sm:$0xff] %v4257_v62  ;;  %v4454_v10 = vmul.f32 %v4257_v62, %v4257_v62  ;;  %4322 = vst [vmem:[%s7021_s2 + $0x8] sm:$0xff] %v4258_v49  ;;  %v4385_v51 = vadd.f32 %v4258_v49, %v4257_v62  ;;  %v4455_v6 = vmul.f32 %v4258_v49, %v4258_v49  ;;  %v4260_v14 = vld [vmem:[#allocation2 + $0x18] sm:$0xff]  ;;  %v4261_v32 = vld [vmem:[#allocation2 + $0x20] sm:$0xff] }
 0x3d9   : > { %4323 = vst [vmem:[%s7021_s2 + $0x10] sm:$0xff] %v4259_v0  ;;  %v4456_v56 = vmul.f32 %v4259_v0, %v4259_v0  ;;  %v4262_v2 = vld [vmem:[#allocation2 + $0x28] sm:$0xff]  ;;  %4324 = vst [vmem:[%s7021_s2 + $0x18] sm:$0xff] %v4260_v14  ;;  %v6479_v26 = vld [vmem:[#allocation2 + $0x30] sm:$0xff]  ;;  %v4457_v3 = vmul.f32 %v4260_v14, %v4260_v14  ;;  %v4458_v9 = vmul.f32 %v4261_v32, %v4261_v32 }
 0x3da   : > { %4325 = vst [vmem:[%s7021_s2 + $0x20] sm:$0xff] %v4261_v32  ;;  %4326 = vst [vmem:[%s7021_s2 + $0x28] sm:$0xff] %v4262_v2  ;;  %v6481_v23 = vld [vmem:[#allocation2 + $0x38] sm:$0xff]  ;;  %v6483_v59 = vld [vmem:[#allocation2 + $0x40] sm:$0xff]  ;;  %v4518_v8 = vadd.f32 %v4455_v6, %v4454_v10  ;;  %v4386_v12 = vadd.f32 %v4385_v51, %v4259_v0  ;;  %v4459_v46 = vmul.f32 %v4262_v2, %v4262_v2 }
 0x3db   : > { %4327 = vst [vmem:[%s7021_s2 + $0x30] sm:$0xff] %v6479_v26  ;;  %4328 = vst [vmem:[%s7021_s2 + $0x38] sm:$0xff] %v6481_v23  ;;  %v6497_v39 = vld [vmem:[#allocation2 + $0x48] sm:$0xff]  ;;  %v6499_v24 = vld [vmem:[#allocation2 + $0x50] sm:$0xff]  ;;  %v4460_v7 = vmul.f32 %v6479_v26, %v6479_v26  ;;  %v4461_v15 = vmul.f32 %v6481_v23, %v6481_v23  ;;  %v4462_v61 = vmul.f32 %v6483_v59, %v6483_v59 }
 0x3dc   : > { %4329 = vst [vmem:[%s7021_s2 + $0x40] sm:$0xff] %v6483_v59  ;;  %v6501_v4 = vld [vmem:[#allocation2 + $0x58] sm:$0xff]  ;;  %4330 = vst [vmem:[%s7021_s2 + $0x48] sm:$0xff] %v6497_v39  ;;  %v6515_v40 = vld [vmem:[#allocation2 + $0x60] sm:$0xff]  ;;  %v4519_v30 = vadd.f32 %v4518_v8, %v4456_v56  ;;  %v4387_v17 = vadd.f32 %v4386_v12, %v4260_v14  ;;  %v4463_v6 = vmul.f32 %v6497_v39, %v6497_v39 }
 0x3dd   : > { %4331 = vst [vmem:[%s7021_s2 + $0x50] sm:$0xff] %v6499_v24  ;;  %4332 = vst [vmem:[%s7021_s2 + $0x58] sm:$0xff] %v6501_v4  ;;  %v6517_v60 = vld [vmem:[#allocation2 + $0x68] sm:$0xff]  ;;  %v6519_v38 = vld [vmem:[#allocation2 + $0x70] sm:$0xff]  ;;  %v4464_v12 = vmul.f32 %v6499_v24, %v6499_v24 }
 0x3de   : > { %4333 = vst [vmem:[%s7021_s2 + $0x60] sm:$0xff] %v6515_v40  ;;  %4334 = vst [vmem:[%s7021_s2 + $0x68] sm:$0xff] %v6517_v60  ;;  %v6533_v35 = vld [vmem:[#allocation2 + $0x78] sm:$0xff]  ;;  %v6535_v58 = vld [vmem:[#allocation2 + $0x80] sm:$0xff]  ;;  %v4520_v63 = vadd.f32 %v4519_v30, %v4457_v3  ;;  %v4388_v13 = vadd.f32 %v4387_v17, %v4261_v32 }
 0x3df   : > { %4335 = vst [vmem:[%s7021_s2 + $0x70] sm:$0xff] %v6519_v38  ;;  %v6537_v18 = vld [vmem:[#allocation2 + $0x88] sm:$0xff]  ;;  %4336 = vst [vmem:[%s7021_s2 + $0x78] sm:$0xff] %v6533_v35  ;;  %v6551_v50 = vld [vmem:[#allocation2 + $0x90] sm:$0xff] }
 0x3e0   : > { %4337 = vst [vmem:[%s7021_s2 + $0x80] sm:$0xff] %v6535_v58  ;;  %4338 = vst [vmem:[%s7021_s2 + $0x88] sm:$0xff] %v6537_v18  ;;  %v6553_v53 = vld [vmem:[#allocation2 + $0x98] sm:$0xff]  ;;  %v6555_v25 = vld [vmem:[#allocation2 + $0xa0] sm:$0xff]  ;;  %v4521_v28 = vadd.f32 %v4520_v63, %v4458_v9  ;;  %v4389_v42 = vadd.f32 %v4388_v13, %v4262_v2 }
 0x3e1   : > { %4339 = vst [vmem:[%s7021_s2 + $0x90] sm:$0xff] %v6551_v50  ;;  %4340 = vst [vmem:[%s7021_s2 + $0x98] sm:$0xff] %v6553_v53  ;;  %v6569_v11 = vld [vmem:[#allocation2 + $0xa8] sm:$0xff]  ;;  %v6571_v19 = vld [vmem:[#allocation2 + $0xb0] sm:$0xff] }
 0x3e2   : > { %4341 = vst [vmem:[%s7021_s2 + $0xa0] sm:$0xff] %v6555_v25  ;;  %v6573_v29 = vld [vmem:[#allocation2 + $0xb8] sm:$0xff]  ;;  %4342 = vst [vmem:[%s7021_s2 + $0xa8] sm:$0xff] %v6569_v11  ;;  %v6587_v16 = vld [vmem:[#allocation2 + $0xc0] sm:$0xff]  ;;  %v4522_v31 = vadd.f32 %v4521_v28, %v4459_v46  ;;  %v4390_v5 = vadd.f32 %v4389_v42, %v6479_v26  ;;  %v4465_v28 = vmul.f32 %v6501_v4, %v6501_v4 }
 0x3e3   : > { %4343 = vst [vmem:[%s7021_s2 + $0xb0] sm:$0xff] %v6571_v19  ;;  %4344 = vst [vmem:[%s7021_s2 + $0xb8] sm:$0xff] %v6573_v29  ;;  %v6589_v20 = vld [vmem:[#allocation2 + $0xc8] sm:$0xff]  ;;  %v6591_v1 = vld [vmem:[#allocation2 + $0xd0] sm:$0xff] }
 0x3e4   : > { %4345 = vst [vmem:[%s7021_s2 + $0xc0] sm:$0xff] %v6587_v16  ;;  %4346 = vst [vmem:[%s7021_s2 + $0xc8] sm:$0xff] %v6589_v20  ;;  %v6607_v34 = vld [vmem:[#allocation2 + $0xd8] sm:$0xff]  ;;  %v6609_v52 = vld [vmem:[#allocation2 + $0xe0] sm:$0xff]  ;;  %v4523_v54 = vadd.f32 %v4522_v31, %v4460_v7  ;;  %v4391_v43 = vadd.f32 %v4390_v5, %v6481_v23 }
 0x3e5   : > { %4347 = vst [vmem:[%s7021_s2 + $0xd0] sm:$0xff] %v6591_v1  ;;  %v6611_v47 = vld [vmem:[#allocation2 + $0xe8] sm:$0xff]  ;;  %4348 = vst [vmem:[%s7021_s2 + $0xd8] sm:$0xff] %v6607_v34  ;;  %v6625_v44 = vld [vmem:[#allocation2 + $0xf0] sm:$0xff] }
 0x3e6   : > { %4349 = vst [vmem:[%s7021_s2 + $0xe0] sm:$0xff] %v6609_v52  ;;  %4350 = vst [vmem:[%s7021_s2 + $0xe8] sm:$0xff] %v6611_v47  ;;  %v6627_v21 = vld [vmem:[#allocation2 + $0xf8] sm:$0xff]  ;;  %v6629_v45 = vld [vmem:[#allocation2 + $0x100] sm:$0xff]  ;;  %v4524_v10 = vadd.f32 %v4523_v54, %v4461_v15  ;;  %v4392_v51 = vadd.f32 %v4391_v43, %v6483_v59 }
 0x3e7   : > { %4351 = vst [vmem:[%s7021_s2 + $0xf0] sm:$0xff] %v6625_v44  ;;  %4352 = vst [vmem:[%s7021_s2 + $0xf8] sm:$0xff] %v6627_v21  ;;  %v6646_v37 = vld [vmem:[#allocation2 + $0x108] sm:$0xff]  ;;  %v6648_v27 = vld [vmem:[#allocation2 + $0x110] sm:$0xff] }
 0x3e8   : > { %4353 = vst [vmem:[%s7021_s2 + $0x100] sm:$0xff] %v6629_v45  ;;  %v6650_v55 = vld [vmem:[#allocation2 + $0x118] sm:$0xff]  ;;  %4354 = vst [vmem:[%s7021_s2 + $0x108] sm:$0xff] %v6646_v37  ;;  %v6664_v22 = vld [vmem:[#allocation2 + $0x120] sm:$0xff]  ;;  %v4525_v59 = vadd.f32 %v4524_v10, %v4462_v61  ;;  %v4393_v8 = vadd.f32 %v4392_v51, %v6497_v39  ;;  %v4466_v61 = vmul.f32 %v6515_v40, %v6515_v40 }
 0x3e9   : > { %4355 = vst [vmem:[%s7021_s2 + $0x110] sm:$0xff] %v6648_v27  ;;  %4356 = vst [vmem:[%s7021_s2 + $0x118] sm:$0xff] %v6650_v55  ;;  %v6666_v57 = vld [vmem:[#allocation2 + $0x128] sm:$0xff]  ;;  %v6668_v33 = vld [vmem:[#allocation2 + $0x130] sm:$0xff] }
 0x3ea   : > { %4357 = vst [vmem:[%s7021_s2 + $0x120] sm:$0xff] %v6664_v22  ;;  %4358 = vst [vmem:[%s7021_s2 + $0x128] sm:$0xff] %v6666_v57  ;;  %v6685_v36 = vld [vmem:[#allocation2 + $0x138] sm:$0xff]  ;;  %v6687_v48 = vld [vmem:[#allocation2 + $0x140] sm:$0xff]  ;;  %v4526_v13 = vadd.f32 %v4525_v59, %v4463_v6  ;;  %v4394_v46 = vadd.f32 %v4393_v8, %v6499_v24  ;;  %v4467_v6 = vmul.f32 %v6517_v60, %v6517_v60 }
 0x3eb   : > { %4359 = vst [vmem:[%s7021_s2 + $0x130] sm:$0xff] %v6668_v33  ;;  %v6689_v41 = vld [vmem:[#allocation2 + $0x148] sm:$0xff]  ;;  %4360 = vst [vmem:[%s7021_s2 + $0x138] sm:$0xff] %v6685_v36  ;;  %v6703_v62 = vld [vmem:[#allocation2 + $0x150] sm:$0xff] }
 0x3ec   : > { %4361 = vst [vmem:[%s7021_s2 + $0x140] sm:$0xff] %v6687_v48  ;;  %4362 = vst [vmem:[%s7021_s2 + $0x148] sm:$0xff] %v6689_v41  ;;  %v6705_v49 = vld [vmem:[#allocation2 + $0x158] sm:$0xff]  ;;  %v6707_v0 = vld [vmem:[#allocation2 + $0x160] sm:$0xff]  ;;  %v4527_v54 = vadd.f32 %v4526_v13, %v4464_v12  ;;  %v4395_v43 = vadd.f32 %v4394_v46, %v6501_v4  ;;  %v4468_v12 = vmul.f32 %v6519_v38, %v6519_v38 }
 0x3ed   : > { %4363 = vst [vmem:[%s7021_s2 + $0x150] sm:$0xff] %v6703_v62  ;;  %4364 = vst [vmem:[%s7021_s2 + $0x158] sm:$0xff] %v6705_v49  ;;  %v6724_v56 = vld [vmem:[#allocation2 + $0x168] sm:$0xff]  ;;  %v6726_v14 = vld [vmem:[#allocation2 + $0x170] sm:$0xff] }
 0x3ee   : > { %4365 = vst [vmem:[%s7021_s2 + $0x160] sm:$0xff] %v6707_v0  ;;  %v6728_v32 = vld [vmem:[#allocation2 + $0x178] sm:$0xff]  ;;  %4366 = vst [vmem:[%s7021_s2 + $0x168] sm:$0xff] %v6724_v56  ;;  %v6742_v2 = vld [vmem:[#allocation2 + $0x180] sm:$0xff]  ;;  %v4528_v4 = vadd.f32 %v4527_v54, %v4465_v28  ;;  %v4396_v51 = vadd.f32 %v4395_v43, %v6515_v40  ;;  %v4470_v40 = vmul.f32 %v6535_v58, %v6535_v58 }
 0x3ef   : > { %4367 = vst [vmem:[%s7021_s2 + $0x170] sm:$0xff] %v6726_v14  ;;  %4368 = vst [vmem:[%s7021_s2 + $0x178] sm:$0xff] %v6728_v32  ;;  %v6744_v26 = vld [vmem:[#allocation2 + $0x188] sm:$0xff]  ;;  %v6746_v23 = vld [vmem:[#allocation2 + $0x190] sm:$0xff] }
 0x3f0   : > { %4369 = vst [vmem:[%s7021_s2 + $0x180] sm:$0xff] %v6742_v2  ;;  %4370 = vst [vmem:[%s7021_s2 + $0x188] sm:$0xff] %v6744_v26  ;;  %v6763_v3 = vld [vmem:[#allocation2 + $0x198] sm:$0xff]  ;;  %v6765_v39 = vld [vmem:[#allocation2 + $0x1a0] sm:$0xff]  ;;  %v4529_v59 = vadd.f32 %v4528_v4, %v4466_v61  ;;  %v4397_v8 = vadd.f32 %v4396_v51, %v6517_v60  ;;  %v4471_v60 = vmul.f32 %v6537_v18, %v6537_v18 }
 0x3f1   : > { %4371 = vst [vmem:[%s7021_s2 + $0x190] sm:$0xff] %v6746_v23  ;;  %v6767_v30 = vld [vmem:[#allocation2 + $0x1a8] sm:$0xff]  ;;  %4372 = vst [vmem:[%s7021_s2 + $0x198] sm:$0xff] %v6763_v3  ;;  %v6781_v17 = vld [vmem:[#allocation2 + $0x1b0] sm:$0xff] }
 0x3f2   : > { %4373 = vst [vmem:[%s7021_s2 + $0x1a0] sm:$0xff] %v6765_v39  ;;  %4374 = vst [vmem:[%s7021_s2 + $0x1a8] sm:$0xff] %v6767_v30  ;;  %v6783_v9 = vld [vmem:[#allocation2 + $0x1b8] sm:$0xff]  ;;  %v6785_v63 = vld [vmem:[#allocation2 + $0x1c0] sm:$0xff]  ;;  %v4530_v13 = vadd.f32 %v4529_v59, %v4467_v6  ;;  %v4398_v46 = vadd.f32 %v4397_v8, %v6519_v38  ;;  %v4472_v38 = vmul.f32 %v6551_v50, %v6551_v50 }
 0x3f3   : > { %4375 = vst [vmem:[%s7021_s2 + $0x1b0] sm:$0xff] %v6781_v17  ;;  %4376 = vst [vmem:[%s7021_s2 + $0x1b8] sm:$0xff] %v6783_v9  ;;  %v6802_v42 = vld [vmem:[#allocation2 + $0x1c8] sm:$0xff]  ;;  %v6804_v24 = vld [vmem:[#allocation2 + $0x1d0] sm:$0xff] }
 0x3f4   : > { %4377 = vst [vmem:[%s7021_s2 + $0x1c0] sm:$0xff] %v6785_v63  ;;  %v6806_v7 = vld [vmem:[#allocation2 + $0x1d8] sm:$0xff]  ;;  %4378 = vst [vmem:[%s7021_s2 + $0x1c8] sm:$0xff] %v6802_v42  ;;  %v6820_v31 = vld [vmem:[#allocation2 + $0x1e0] sm:$0xff]  ;;  %v4399_v28 = vadd.f32 %v4398_v46, %v6533_v35 }
 0x3f5   : > { %4379 = vst [vmem:[%s7021_s2 + $0x1d0] sm:$0xff] %v6804_v24  ;;  %4380 = vst [vmem:[%s7021_s2 + $0x1d8] sm:$0xff] %v6806_v7  ;;  %v6822_v5 = vld [vmem:[#allocation2 + $0x1e8] sm:$0xff]  ;;  %v6824_v15 = vld [vmem:[#allocation2 + $0x1f0] sm:$0xff] }
 0x3f6   : > { %7075 = vst [vmem:[#allocation28_spill] sm:$0xff] %v6822_v5  ;;  %7076 = vst [vmem:[#allocation29_spill] sm:$0xff] %v6824_v15  ;;  %v6841_v10 = vld [vmem:[#allocation2 + $0x1f8] sm:$0xff]  ;;  %v4400_v43 = vadd.f32 %v4399_v28, %v6535_v58  ;;  %v4474_v58 = vmul.f32 %v6555_v25, %v6555_v25 }
 0x3f7   : > { %4381 = vst [vmem:[%s7021_s2 + $0x1e0] sm:$0xff] %v6820_v31  ;;  %4382 = vst [vmem:[%s7021_s2 + $0x1e8] sm:$0xff] %v6822_v5  ;;  %v4531_v5 = vadd.f32 %v4530_v13, %v4468_v12 }
 0x3f8   : > { %4383 = vst [vmem:[%s7021_s2 + $0x1f0] sm:$0xff] %v6824_v15  ;;  %4384 = vst [vmem:[%s7021_s2 + $0x1f8] sm:$0xff] %v6841_v10  ;;  %v4469_v15 = vmul.f32 %v6533_v35, %v6533_v35  ;;  %v4401_v4 = vadd.f32 %v4400_v43, %v6537_v18  ;;  %v4473_v35 = vmul.f32 %v6553_v53, %v6553_v53 }
 0x3f9   : > { %v4475_v18 = vmul.f32 %v6569_v11, %v6569_v11 }
 0x3fa   : > { %v4532_v54 = vadd.f32 %v4531_v5, %v4469_v15  ;;  %v4402_v6 = vadd.f32 %v4401_v4, %v6551_v50  ;;  %v4476_v50 = vmul.f32 %v6571_v19, %v6571_v19 }
 0x3fc   : > { %v4533_v61 = vadd.f32 %v4532_v54, %v4470_v40  ;;  %v4403_v5 = vadd.f32 %v4402_v6, %v6553_v53  ;;  %v4477_v53 = vmul.f32 %v6573_v29, %v6573_v29 }
 0x3fe   : > { %v4534_v51 = vadd.f32 %v4533_v61, %v4471_v60  ;;  %v4404_v8 = vadd.f32 %v4403_v5, %v6555_v25  ;;  %v4478_v25 = vmul.f32 %v6587_v16, %v6587_v16 }
 0x400   : > { %v4535_v59 = vadd.f32 %v4534_v51, %v4472_v38  ;;  %v4405_v13 = vadd.f32 %v4404_v8, %v6569_v11  ;;  %v4479_v11 = vmul.f32 %v6589_v20, %v6589_v20 }
 0x402   : > { %v4536_v15 = vadd.f32 %v4535_v59, %v4473_v35  ;;  %v4406_v28 = vadd.f32 %v4405_v13, %v6571_v19  ;;  %v4480_v19 = vmul.f32 %v6591_v1, %v6591_v1 }
 0x404   : > { %v4537_v12 = vadd.f32 %v4536_v15, %v4474_v58  ;;  %v4407_v54 = vadd.f32 %v4406_v28, %v6573_v29  ;;  %v4481_v29 = vmul.f32 %v6607_v34, %v6607_v34 }
 0x406   : > { %v4538_v46 = vadd.f32 %v4537_v12, %v4475_v18  ;;  %v4408_v60 = vadd.f32 %v4407_v54, %v6587_v16  ;;  %v4482_v16 = vmul.f32 %v6609_v52, %v6609_v52 }
 0x408   : > { %v4539_v40 = vadd.f32 %v4538_v46, %v4476_v50  ;;  %v4409_v4 = vadd.f32 %v4408_v60, %v6589_v20  ;;  %v4483_v20 = vmul.f32 %v6611_v47, %v6611_v47 }
 0x40a   : > { %v4540_v43 = vadd.f32 %v4539_v40, %v4477_v53  ;;  %v4410_v51 = vadd.f32 %v4409_v4, %v6591_v1  ;;  %v4484_v1 = vmul.f32 %v6625_v44, %v6625_v44 }
 0x40c   : > { %v4541_v61 = vadd.f32 %v4540_v43, %v4478_v25  ;;  %v4411_v35 = vadd.f32 %v4410_v51, %v6607_v34  ;;  %v4485_v34 = vmul.f32 %v6627_v21, %v6627_v21 }
 0x40e   : > { %v4542_v38 = vadd.f32 %v4541_v61, %v4479_v11  ;;  %v4412_v5 = vadd.f32 %v4411_v35, %v6609_v52  ;;  %v4486_v52 = vmul.f32 %v6629_v45, %v6629_v45 }
 0x410   : > { %v4543_v6 = vadd.f32 %v4542_v38, %v4480_v19  ;;  %v4413_v15 = vadd.f32 %v4412_v5, %v6611_v47  ;;  %v4487_v47 = vmul.f32 %v6646_v37, %v6646_v37 }
 0x412   : > { %v4544_v59 = vadd.f32 %v4543_v6, %v4481_v29  ;;  %v4414_v18 = vadd.f32 %v4413_v15, %v6625_v44  ;;  %v4488_v44 = vmul.f32 %v6648_v27, %v6648_v27 }
 0x414   : > { %v4545_v58 = vadd.f32 %v4544_v59, %v4482_v16  ;;  %v4415_v13 = vadd.f32 %v4414_v18, %v6627_v21  ;;  %v4489_v21 = vmul.f32 %v6650_v55, %v6650_v55 }
 0x416   : > { %v4546_v8 = vadd.f32 %v4545_v58, %v4483_v20  ;;  %v4416_v46 = vadd.f32 %v4415_v13, %v6629_v45  ;;  %v4490_v45 = vmul.f32 %v6664_v22, %v6664_v22 }
 0x418   : > { %v4547_v12 = vadd.f32 %v4546_v8, %v4484_v1  ;;  %v4417_v53 = vadd.f32 %v4416_v46, %v6646_v37  ;;  %v4491_v37 = vmul.f32 %v6666_v57, %v6666_v57 }
 0x41a   : > { %v4548_v50 = vadd.f32 %v4547_v12, %v4485_v34  ;;  %v4418_v54 = vadd.f32 %v4417_v53, %v6648_v27  ;;  %v4492_v27 = vmul.f32 %v6668_v33, %v6668_v33 }
 0x41c   : > { %v4549_v28 = vadd.f32 %v4548_v50, %v4486_v52  ;;  %v4419_v43 = vadd.f32 %v4418_v54, %v6650_v55  ;;  %v4493_v55 = vmul.f32 %v6685_v36, %v6685_v36 }
 0x41e   : > { %v4550_v40 = vadd.f32 %v4549_v28, %v4487_v47  ;;  %v4420_v11 = vadd.f32 %v4419_v43, %v6664_v22  ;;  %v4494_v22 = vmul.f32 %v6687_v48, %v6687_v48 }
 0x420   : > { %v4551_v25 = vadd.f32 %v4550_v40, %v4488_v44  ;;  %v4421_v4 = vadd.f32 %v4420_v11, %v6666_v57  ;;  %v4495_v57 = vmul.f32 %v6689_v41, %v6689_v41 }
 0x422   : > { %v4552_v60 = vadd.f32 %v4551_v25, %v4489_v21  ;;  %v4422_v38 = vadd.f32 %v4421_v4, %v6668_v33  ;;  %v4496_v33 = vmul.f32 %v6703_v62, %v6703_v62 }
 0x424   : > { %v4553_v61 = vadd.f32 %v4552_v60, %v4490_v45  ;;  %v4423_v29 = vadd.f32 %v4422_v38, %v6685_v36  ;;  %v4497_v36 = vmul.f32 %v6705_v49, %v6705_v49 }
 0x426   : > { %v4554_v19 = vadd.f32 %v4553_v61, %v4491_v37  ;;  %v4424_v35 = vadd.f32 %v4423_v29, %v6687_v48  ;;  %v4498_v48 = vmul.f32 %v6707_v0, %v6707_v0 }
 0x428   : > { %v4555_v51 = vadd.f32 %v4554_v19, %v4492_v27  ;;  %v4425_v59 = vadd.f32 %v4424_v35, %v6689_v41  ;;  %v4499_v41 = vmul.f32 %v6724_v56, %v6724_v56 }
 0x42a   : > { %v4556_v6 = vadd.f32 %v4555_v51, %v4493_v55  ;;  %v4426_v20 = vadd.f32 %v4425_v59, %v6703_v62  ;;  %v4500_v62 = vmul.f32 %v6726_v14, %v6726_v14 }
 0x42c   : > { %v4557_v16 = vadd.f32 %v4556_v6, %v4494_v22  ;;  %v4427_v15 = vadd.f32 %v4426_v20, %v6705_v49  ;;  %v4501_v49 = vmul.f32 %v6728_v32, %v6728_v32 }
 0x42e   : > { %v4558_v5 = vadd.f32 %v4557_v16, %v4495_v57  ;;  %v4428_v8 = vadd.f32 %v4427_v15, %v6707_v0  ;;  %v4502_v0 = vmul.f32 %v6742_v2, %v6742_v2  ;;  %v7077_v16 = vld [vmem:[#allocation28_spill] sm:$0xff] }
 0x430   : > { %v4559_v58 = vadd.f32 %v4558_v5, %v4496_v33  ;;  %v4429_v34 = vadd.f32 %v4428_v8, %v6724_v56  ;;  %v4503_v56 = vmul.f32 %v6744_v26, %v6744_v26  ;;  %v7078_v5 = vld [vmem:[#allocation29_spill] sm:$0xff] }
 0x432   : > { %v4560_v1 = vadd.f32 %v4559_v58, %v4497_v36  ;;  %v4430_v13 = vadd.f32 %v4429_v34, %v6726_v14  ;;  %v4504_v14 = vmul.f32 %v6746_v23, %v6746_v23 }
 0x434   : > { %v4561_v18 = vadd.f32 %v4560_v1, %v4498_v48  ;;  %v4431_v50 = vadd.f32 %v4430_v13, %v6728_v32  ;;  %v4505_v32 = vmul.f32 %v6763_v3, %v6763_v3 }
 0x436   : > { %v4562_v12 = vadd.f32 %v4561_v18, %v4499_v41  ;;  %v4432_v47 = vadd.f32 %v4431_v50, %v6742_v2  ;;  %v4506_v2 = vmul.f32 %v6765_v39, %v6765_v39 }
 0x438   : > { %v4563_v52 = vadd.f32 %v4562_v12, %v4500_v62  ;;  %v4433_v53 = vadd.f32 %v4432_v47, %v6744_v26  ;;  %v4507_v26 = vmul.f32 %v6767_v30, %v6767_v30 }
 0x43a   : > { %v4564_v46 = vadd.f32 %v4563_v52, %v4501_v49  ;;  %v4434_v40 = vadd.f32 %v4433_v53, %v6746_v23  ;;  %v4508_v23 = vmul.f32 %v6781_v17, %v6781_v17 }
 0x43c   : > { %v4565_v28 = vadd.f32 %v4564_v46, %v4502_v0  ;;  %v4435_v21 = vadd.f32 %v4434_v40, %v6763_v3  ;;  %v4509_v3 = vmul.f32 %v6783_v9, %v6783_v9 }
 0x43e   : > { %v4566_v44 = vadd.f32 %v4565_v28, %v4503_v56  ;;  %v4436_v43 = vadd.f32 %v4435_v21, %v6765_v39  ;;  %v4510_v39 = vmul.f32 %v6785_v63, %v6785_v63 }
 0x440   : > { %v4567_v54 = vadd.f32 %v4566_v44, %v4504_v14  ;;  %v4437_v60 = vadd.f32 %v4436_v43, %v6767_v30  ;;  %v4511_v30 = vmul.f32 %v6802_v42, %v6802_v42 }
 0x442   : > { %v4568_v25 = vadd.f32 %v4567_v54, %v4505_v32  ;;  %v4438_v37 = vadd.f32 %v4437_v60, %v6781_v17  ;;  %v4512_v17 = vmul.f32 %v6804_v24, %v6804_v24 }
 0x444   : > { %v4569_v45 = vadd.f32 %v4568_v25, %v4506_v2  ;;  %v4439_v4 = vadd.f32 %v4438_v37, %v6783_v9  ;;  %v4513_v9 = vmul.f32 %v6806_v7, %v6806_v7 }
 0x446   : > { %v4570_v11 = vadd.f32 %v4569_v45, %v4507_v26  ;;  %v4440_v19 = vadd.f32 %v4439_v4, %v6785_v63  ;;  %v4514_v63 = vmul.f32 %v6820_v31, %v6820_v31 }
 0x448   : > { %v4571_v61 = vadd.f32 %v4570_v11, %v4508_v23  ;;  %v4441_v55 = vadd.f32 %v4440_v19, %v6802_v42  ;;  %v4515_v42 = vmul.f32 %v7077_v16, %v7077_v16 }
 0x44a   : > { %v4572_v27 = vadd.f32 %v4571_v61, %v4509_v3  ;;  %v4442_v29 = vadd.f32 %v4441_v55, %v6804_v24  ;;  %v4516_v24 = vmul.f32 %v7078_v5, %v7078_v5 }
 0x44c   : > { %v4573_v38 = vadd.f32 %v4572_v27, %v4510_v39  ;;  %v4443_v6 = vadd.f32 %v4442_v29, %v6806_v7  ;;  %v4517_v7 = vmul.f32 %v6841_v10, %v6841_v10 }
 0x44e   : > { %v4574_v51 = vadd.f32 %v4573_v38, %v4511_v30  ;;  %v4444_v57 = vadd.f32 %v4443_v6, %v6820_v31 }
 0x450   : > { %v4575_v22 = vadd.f32 %v4574_v51, %v4512_v17  ;;  %v4445_v33 = vadd.f32 %v4444_v57, %v7077_v16 }
 0x452   : > { %v4576_v35 = vadd.f32 %v4575_v22, %v4513_v9  ;;  %v4446_v36 = vadd.f32 %v4445_v33, %v7078_v5 }
 0x454   : > { %v4577_v59 = vadd.f32 %v4576_v35, %v4514_v63  ;;  %v4447_v15 = vadd.f32 %v4446_v36, %v6841_v10 }
 0x456   : > { %v4578_v20 = vadd.f32 %v4577_v59, %v4515_v42  ;;  %v4448_v48 = vrot.slane %v4447_v15, 4 }
 0x458   : > { %v4579_v58 = vadd.f32 %v4578_v20, %v4516_v24  ;;  %v4449_v1 = vadd.f32 %v4448_v48, %v4447_v15 }
 0x45a   : > { %v4580_v31 = vadd.f32 %v4579_v58, %v4517_v7  ;;  %v4450_v41 = vrot.slane %v4449_v1, 2 }
 0x45c   : > { %v4581_v8 = vrot.slane %v4580_v31, 4  ;;  %v4451_v34 = vadd.f32 %v4450_v41, %v4449_v1 }
 0x45e   : > { %v4582_v18 = vadd.f32 %v4581_v8, %v4580_v31  ;;  %v4452_v12 = vrot.slane %v4451_v34, 1 }
 0x460   : > { %v4583_v62 = vrot.slane %v4582_v18, 2  ;;  %v4453_v49 = vadd.f32 %v4452_v12, %v4451_v34 }
 0x462   : > { %v4584_v13 = vadd.f32 %v4583_v62, %v4582_v18 }
 0x464   : > { %v4585_v52 = vrot.slane %v4584_v13, 1 }
 0x466   : > { %v4586_v50 = vadd.f32 %v4585_v52, %v4584_v13 }
 0x468   : > { %v4588_v0 = vsel %vm4587_vm0, %v4453_v49, %v4586_v50 }
 0x469   : > { %4589 = vst [vmem:[%s7022_s3] sm:$0x3] %v4588_v0 }
 0x46a PF: > { %s14_s16 = sadd.s32 1, %s5209_s16   ;;  %s7079_s12 = smov %s5197_s13 }
 0x46b   : > { %p11_p12 = scmp.ge.s32.totalorder %s14_s16, 4   ;;  %s7080_s13 = smov %s5268_s20 }
 0x46c   : > { %s7081_s14 = smov %s5205_s15  ;;  %s7082_s15 = smov %s7084_s17 }
 0x46d   :  { %13 = sbr.rel (!%p11_p12) target bundleno = 3 (0x3), region = 109 }

// kernel: discriminator_critic_forward.10
= control target key start
LH: loop header
LB: loop body
LE: loop exit
PB: predicated region body
PF: predicated region fallthrough
CT: control target
= control target key end

     0   :  { %s1491_s0 = inlined_call_operand.vmem [shape: f32[512,128], index: 0, kind: input, shape index: {}]   ;;  %s1492_s1 = inlined_call_operand.vmem [shape: f32[2,128], index: 1, kind: input, shape index: {}]   ;;  %s1493_s2 = inlined_call_operand.vmem [shape: bf16[512,128], index: 2, kind: output, shape index: {}]  }
   0x1   :  { %v11_v0 = vld [vmem:[%s1491_s0] sm:$0xff]  ;;  %v12_v1 = vld [vmem:[%s1491_s0 + $0x8] sm:$0xff]  ;;  %v13_v6 = vld [vmem:[%s1491_s0 + $0x10] sm:$0xff] }
   0x2   :  { %v1074_v2 = vld [vmem:[%s1492_s1] ss:$0 sm:$0xff]  ;;  %v1081_v5 = vld [vmem:[%s1492_s1 + $0x1] ss:$0 sm:$0xff]  ;;  %v14_v7 = vld [vmem:[%s1491_s0 + $0x18] sm:$0xff] }
   0x3   :  { %v80_v3 = vmul.f32 %v1074_v2, %v11_v0  ;;  %v81_v4 = vmul.f32 %v1074_v2, %v12_v1  ;;  %v82_v8 = vmul.f32 %v1074_v2, %v13_v6  ;;  %v83_v9 = vmul.f32 %v1074_v2, %v14_v7  ;;  %v15_v10 = vld [vmem:[%s1491_s0 + $0x20] sm:$0xff]  ;;  %v16_v11 = vld [vmem:[%s1491_s0 + $0x28] sm:$0xff]  ;;  %v17_v12 = vld [vmem:[%s1491_s0 + $0x30] sm:$0xff] }
   0x4   :  { %v84_v15 = vmul.f32 %v1074_v2, %v15_v10  ;;  %v85_v16 = vmul.f32 %v1074_v2, %v16_v11  ;;  %v18_v17 = vld [vmem:[%s1491_s0 + $0x38] sm:$0xff]  ;;  %v86_v20 = vmul.f32 %v1074_v2, %v17_v12  ;;  %v19_v34 = vld [vmem:[%s1491_s0 + $0x40] sm:$0xff]  ;;  %v20_v35 = vld [vmem:[%s1491_s0 + $0x48] sm:$0xff] }
   0x5   :  { %v149_v13 = vadd.f32 %v1081_v5, %v80_v3  ;;  %v150_v14 = vadd.f32 %v1081_v5, %v81_v4  ;;  %v151_v18 = vadd.f32 %v1081_v5, %v82_v8  ;;  %v152_v19 = vadd.f32 %v1081_v5, %v83_v9  ;;  %v21_v36 = vld [vmem:[%s1491_s0 + $0x50] sm:$0xff]  ;;  %v22_v42 = vld [vmem:[%s1491_s0 + $0x58] sm:$0xff]  ;;  %v23_v47 = vld [vmem:[%s1491_s0 + $0x60] sm:$0xff] }
   0x6   :  { %v87_v21 = vmul.f32 %v1074_v2, %v18_v17  ;;  %v153_v28 = vadd.f32 %v1081_v5, %v84_v15  ;;  %v154_v29 = vadd.f32 %v1081_v5, %v85_v16  ;;  %v155_v33 = vadd.f32 %v1081_v5, %v86_v20  ;;  %v24_v48 = vld [vmem:[%s1491_s0 + $0x68] sm:$0xff]  ;;  %v25_v60 = vld [vmem:[%s1491_s0 + $0x70] sm:$0xff]  ;;  %v26_v7 = vld [vmem:[%s1491_s0 + $0x78] sm:$0xff] }
   0x7   :  { %vm213_vm0 = vcmp.ge.f32.partialorder %v149_v13, 0.0  ;;  %vm214_vm1 = vcmp.ge.f32.partialorder %v150_v14, 0.0  ;;  %v277_v22 = vmul.f32 0.2, %v149_v13  ;;  %v278_v23 = vmul.f32 0.2, %v150_v14 }
   0x8   :  { %vm215_vm2 = vcmp.ge.f32.partialorder %v151_v18, 0.0  ;;  %vm216_vm3 = vcmp.ge.f32.partialorder %v152_v19, 0.0  ;;  %v279_v24 = vmul.f32 0.2, %v151_v18  ;;  %v280_v25 = vmul.f32 0.2, %v152_v19 }
   0x9   :  { %v341_v26 = vsel %vm213_vm0, %v149_v13, %v277_v22  ;;  %v342_v27 = vsel %vm214_vm1, %v150_v14, %v278_v23  ;;  %vm217_vm4 = vcmp.ge.f32.partialorder %v153_v28, 0.0  ;;  %vm218_vm5 = vcmp.ge.f32.partialorder %v154_v29, 0.0  ;;  %v27_v12 = vld [vmem:[%s1491_s0 + $0x80] sm:$0xff]  ;;  %v28_v13 = vld [vmem:[%s1491_s0 + $0x88] sm:$0xff]  ;;  %v29_v20 = vld [vmem:[%s1491_s0 + $0x90] sm:$0xff] }
   0xa   :  { %v862_v30 = vpack.c.bf16 %v342_v27, %v341_v26  ;;  %v343_v31 = vsel %vm215_vm2, %v151_v18, %v279_v24  ;;  %v344_v32 = vsel %vm216_vm3, %v152_v19, %v280_v25  ;;  %v281_v38 = vmul.f32 0.2, %v153_v28  ;;  %v30_v25 = vld [vmem:[%s1491_s0 + $0x98] sm:$0xff] }
   0xb   :  { %v867_v37 = vpack.c.bf16 %v344_v32, %v343_v31  ;;  %v282_v39 = vmul.f32 0.2, %v154_v29  ;;  %v156_v40 = vadd.f32 %v1081_v5, %v87_v21  ;;  %vm219_vm6 = vcmp.ge.f32.partialorder %v155_v33, 0.0 }
   0xc   :  { %863 = vst [vmem:[%s1493_s2] sm:$0xff] %v862_v30   ;;  %v283_v41 = vmul.f32 0.2, %v155_v33  ;;  %v345_v43 = vsel %vm217_vm4, %v153_v28, %v281_v38  ;;  %v88_v44 = vmul.f32 %v1074_v2, %v19_v34  ;;  %v89_v45 = vmul.f32 %v1074_v2, %v20_v35 }
   0xd   :  { %1019 = vst [vmem:[%s1493_s2 + $0x8] sm:$0xff] %v867_v37   ;;  %v90_v46 = vmul.f32 %v1074_v2, %v21_v36  ;;  %v346_v49 = vsel %vm218_vm5, %v154_v29, %v282_v39  ;;  %vm220_vm7 = vcmp.ge.f32.partialorder %v156_v40, 0.0  ;;  %v284_v50 = vmul.f32 0.2, %v156_v40  ;;  %v32_v37 = vld [vmem:[%s1491_s0 + $0xa8] sm:$0xff] }
   0xe   :  { %v347_v51 = vsel %vm219_vm6, %v155_v33, %v283_v41  ;;  %v872_v52 = vpack.c.bf16 %v346_v49, %v345_v43  ;;  %v157_v53 = vadd.f32 %v1081_v5, %v88_v44  ;;  %v158_v54 = vadd.f32 %v1081_v5, %v89_v45  ;;  %v31_v33 = vld [vmem:[%s1491_s0 + $0xa0] sm:$0xff]  ;;  %v33_v44 = vld [vmem:[%s1491_s0 + $0xb0] sm:$0xff]  ;;  %v34_v49 = vld [vmem:[%s1491_s0 + $0xb8] sm:$0xff] }
   0xf   :  { %v91_v55 = vmul.f32 %v1074_v2, %v22_v42  ;;  %v348_v56 = vsel %vm220_vm7, %v156_v40, %v284_v50  ;;  %v159_v57 = vadd.f32 %v1081_v5, %v90_v46  ;;  %v92_v58 = vmul.f32 %v1074_v2, %v23_v47  ;;  %v35_v50 = vld [vmem:[%s1491_s0 + $0xc0] sm:$0xff] }
  0x10   :  { %v93_v59 = vmul.f32 %v1074_v2, %v24_v48  ;;  %1020 = vst [vmem:[%s1493_s2 + $0x10] sm:$0xff] %v872_v52   ;;  %v877_v61 = vpack.c.bf16 %v348_v56, %v347_v51  ;;  %vm221_vm8 = vcmp.ge.f32.partialorder %v157_v53, 0.0  ;;  %vm222_vm9 = vcmp.ge.f32.partialorder %v158_v54, 0.0  ;;  %v36_v51 = vld [vmem:[%s1491_s0 + $0xc8] sm:$0xff] }
  0x11   :  { %v285_v62 = vmul.f32 0.2, %v157_v53  ;;  %v286_v63 = vmul.f32 0.2, %v158_v54  ;;  %v160_v0 = vadd.f32 %v1081_v5, %v91_v55  ;;  %vm223_vm10 = vcmp.ge.f32.partialorder %v159_v57, 0.0 }
  0x12   :  { %v287_v1 = vmul.f32 0.2, %v159_v57  ;;  %1021 = vst [vmem:[%s1493_s2 + $0x18] sm:$0xff] %v877_v61   ;;  %v161_v4 = vadd.f32 %v1081_v5, %v92_v58  ;;  %v162_v6 = vadd.f32 %v1081_v5, %v93_v59  ;;  %v94_v8 = vmul.f32 %v1074_v2, %v25_v60 }
  0x13   :  { %v349_v3 = vsel %vm221_vm8, %v157_v53, %v285_v62  ;;  %v350_v9 = vsel %vm222_vm9, %v158_v54, %v286_v63  ;;  %vm224_vm11 = vcmp.ge.f32.partialorder %v160_v0, 0.0  ;;  %v288_v10 = vmul.f32 0.2, %v160_v0  ;;  %v37_v62 = vld [vmem:[%s1491_s0 + $0xd0] sm:$0xff] }
  0x14   :  { %v351_v11 = vsel %vm223_vm10, %v159_v57, %v287_v1  ;;  %v882_v14 = vpack.c.bf16 %v350_v9, %v349_v3  ;;  %vm225_vm12 = vcmp.ge.f32.partialorder %v161_v4, 0.0  ;;  %vm226_vm13 = vcmp.ge.f32.partialorder %v162_v6, 0.0 }
  0x15   :  { %v289_v15 = vmul.f32 0.2, %v161_v4  ;;  %v352_v16 = vsel %vm224_vm11, %v160_v0, %v288_v10  ;;  %v290_v17 = vmul.f32 0.2, %v162_v6  ;;  %v95_v18 = vmul.f32 %v1074_v2, %v26_v7  ;;  %v38_v10 = vld [vmem:[%s1491_s0 + $0xd8] sm:$0xff] }
  0x16   :  { %v163_v19 = vadd.f32 %v1081_v5, %v94_v8  ;;  %1022 = vst [vmem:[%s1493_s2 + $0x20] sm:$0xff] %v882_v14   ;;  %v887_v21 = vpack.c.bf16 %v352_v16, %v351_v11  ;;  %v96_v23 = vmul.f32 %v1074_v2, %v27_v12  ;;  %v97_v24 = vmul.f32 %v1074_v2, %v28_v13  ;;  %v39_v14 = vld [vmem:[%s1491_s0 + $0xe0] sm:$0xff] }
  0x17   :  { %v353_v22 = vsel %vm225_vm12, %v161_v4, %v289_v15  ;;  %v354_v26 = vsel %vm226_vm13, %v162_v6, %v290_v17  ;;  %v164_v27 = vadd.f32 %v1081_v5, %v95_v18  ;;  %v98_v32 = vmul.f32 %v1074_v2, %v29_v20  ;;  %v40_v15 = vld [vmem:[%s1491_s0 + $0xe8] sm:$0xff] }
  0x18   :  { %vm227_vm14 = vcmp.ge.f32.partialorder %v163_v19, 0.0  ;;  %v291_v28 = vmul.f32 0.2, %v163_v19  ;;  %1023 = vst [vmem:[%s1493_s2 + $0x28] sm:$0xff] %v887_v21   ;;  %v892_v29 = vpack.c.bf16 %v354_v26, %v353_v22  ;;  %v165_v30 = vadd.f32 %v1081_v5, %v96_v23  ;;  %v41_v26 = vld [vmem:[%s1491_s0 + $0xf0] sm:$0xff] }
  0x19   :  { %v166_v31 = vadd.f32 %v1081_v5, %v97_v24  ;;  %vm228_vm15 = vcmp.ge.f32.partialorder %v164_v27, 0.0  ;;  %v292_v34 = vmul.f32 0.2, %v164_v27  ;;  %v99_v36 = vmul.f32 %v1074_v2, %v30_v25 }
  0x1a   :  { %v355_v35 = vsel %vm227_vm14, %v163_v19, %v291_v28  ;;  %1024 = vst [vmem:[%s1493_s2 + $0x30] sm:$0xff] %v892_v29   ;;  %vm229_vm0 = vcmp.ge.f32.partialorder %v165_v30, 0.0  ;;  %v293_v38 = vmul.f32 0.2, %v165_v30  ;;  %v167_v41 = vadd.f32 %v1081_v5, %v98_v32 }
  0x1b   :  { %vm230_vm1 = vcmp.ge.f32.partialorder %v166_v31, 0.0  ;;  %v294_v39 = vmul.f32 0.2, %v166_v31  ;;  %v356_v40 = vsel %vm228_vm15, %v164_v27, %v292_v34  ;;  %v168_v42 = vadd.f32 %v1081_v5, %v99_v36 }
  0x1c   :  { %v100_v43 = vmul.f32 %v1074_v2, %v31_v33  ;;  %v897_v45 = vpack.c.bf16 %v356_v40, %v355_v35  ;;  %v357_v46 = vsel %vm229_vm0, %v165_v30, %v293_v38  ;;  %v101_v48 = vmul.f32 %v1074_v2, %v32_v37  ;;  %v43_v38 = vld [vmem:[%s1491_s0 + $0x100] sm:$0xff] }
  0x1d   :  { %v358_v47 = vsel %vm230_vm1, %v166_v31, %v294_v39  ;;  %vm231_vm2 = vcmp.ge.f32.partialorder %v167_v41, 0.0  ;;  %vm232_vm3 = vcmp.ge.f32.partialorder %v168_v42, 0.0  ;;  %v295_v53 = vmul.f32 0.2, %v167_v41  ;;  %v42_v31 = vld [vmem:[%s1491_s0 + $0xf8] sm:$0xff] }
  0x1e   :  { %v902_v52 = vpack.c.bf16 %v358_v47, %v357_v46  ;;  %1025 = vst [vmem:[%s1493_s2 + $0x38] sm:$0xff] %v897_v45   ;;  %v296_v54 = vmul.f32 0.2, %v168_v42  ;;  %v169_v55 = vadd.f32 %v1081_v5, %v100_v43  ;;  %v170_v56 = vadd.f32 %v1081_v5, %v101_v48 }
  0x1f   :  { %v102_v57 = vmul.f32 %v1074_v2, %v33_v44  ;;  %v359_v58 = vsel %vm231_vm2, %v167_v41, %v295_v53  ;;  %v103_v59 = vmul.f32 %v1074_v2, %v34_v49  ;;  %v104_v60 = vmul.f32 %v1074_v2, %v35_v50  ;;  %v45_v50 = vld [vmem:[%s1491_s0 + $0x110] sm:$0xff] }
  0x20   :  { %1026 = vst [vmem:[%s1493_s2 + $0x40] sm:$0xff] %v902_v52   ;;  %v105_v61 = vmul.f32 %v1074_v2, %v36_v51  ;;  %v360_v63 = vsel %vm232_vm3, %v168_v42, %v296_v54  ;;  %vm233_vm4 = vcmp.ge.f32.partialorder %v169_v55, 0.0  ;;  %vm234_vm5 = vcmp.ge.f32.partialorder %v170_v56, 0.0  ;;  %v44_v42 = vld [vmem:[%s1491_s0 + $0x108] sm:$0xff]  ;;  %v46_v51 = vld [vmem:[%s1491_s0 + $0x118] sm:$0xff] }
  0x21   :  { %v297_v0 = vmul.f32 0.2, %v169_v55  ;;  %v907_v1 = vpack.c.bf16 %v360_v63, %v359_v58  ;;  %v298_v3 = vmul.f32 0.2, %v170_v56  ;;  %v171_v4 = vadd.f32 %v1081_v5, %v102_v57  ;;  %v48_v63 = vld [vmem:[%s1491_s0 + $0x128] sm:$0xff] }
  0x22   :  { %v172_v6 = vadd.f32 %v1081_v5, %v103_v59  ;;  %v173_v8 = vadd.f32 %v1081_v5, %v104_v60  ;;  %v174_v9 = vadd.f32 %v1081_v5, %v105_v61  ;;  %v106_v11 = vmul.f32 %v1074_v2, %v37_v62 }
  0x23   :  { %v361_v7 = vsel %vm233_vm4, %v169_v55, %v297_v0  ;;  %1027 = vst [vmem:[%s1493_s2 + $0x48] sm:$0xff] %v907_v1   ;;  %v362_v12 = vsel %vm234_vm5, %v170_v56, %v298_v3  ;;  %vm235_vm6 = vcmp.ge.f32.partialorder %v171_v4, 0.0  ;;  %v299_v13 = vmul.f32 0.2, %v171_v4  ;;  %v47_v55 = vld [vmem:[%s1491_s0 + $0x120] sm:$0xff] }
  0x24   :  { %vm236_vm7 = vcmp.ge.f32.partialorder %v172_v6, 0.0  ;;  %v912_v16 = vpack.c.bf16 %v362_v12, %v361_v7  ;;  %v300_v17 = vmul.f32 0.2, %v172_v6  ;;  %vm237_vm8 = vcmp.ge.f32.partialorder %v173_v8, 0.0 }
  0x25   :  { %vm238_vm9 = vcmp.ge.f32.partialorder %v174_v9, 0.0  ;;  %v363_v18 = vsel %vm235_vm6, %v171_v4, %v299_v13  ;;  %v301_v19 = vmul.f32 0.2, %v173_v8  ;;  %v302_v20 = vmul.f32 0.2, %v174_v9  ;;  %v49_v4 = vld [vmem:[%s1491_s0 + $0x130] sm:$0xff] }
  0x26   :  { %v107_v21 = vmul.f32 %v1074_v2, %v38_v10  ;;  %1028 = vst [vmem:[%s1493_s2 + $0x50] sm:$0xff] %v912_v16   ;;  %v364_v22 = vsel %vm236_vm7, %v172_v6, %v300_v17  ;;  %v175_v23 = vadd.f32 %v1081_v5, %v106_v11  ;;  %v108_v24 = vmul.f32 %v1074_v2, %v39_v14  ;;  %v50_v13 = vld [vmem:[%s1491_s0 + $0x138] sm:$0xff] }
  0x27   :  { %v109_v25 = vmul.f32 %v1074_v2, %v40_v15  ;;  %v917_v27 = vpack.c.bf16 %v364_v22, %v363_v18  ;;  %v365_v28 = vsel %vm237_vm8, %v173_v8, %v301_v19  ;;  %v366_v29 = vsel %vm238_vm9, %v174_v9, %v302_v20  ;;  %v51_v20 = vld [vmem:[%s1491_s0 + $0x140] sm:$0xff] }
  0x28   :  { %v176_v30 = vadd.f32 %v1081_v5, %v107_v21  ;;  %v922_v32 = vpack.c.bf16 %v366_v29, %v365_v28  ;;  %vm239_vm10 = vcmp.ge.f32.partialorder %v175_v23, 0.0  ;;  %v303_v33 = vmul.f32 0.2, %v175_v23 }
  0x29   :  { %v177_v34 = vadd.f32 %v1081_v5, %v108_v24  ;;  %1029 = vst [vmem:[%s1493_s2 + $0x58] sm:$0xff] %v917_v27   ;;  %v178_v36 = vadd.f32 %v1081_v5, %v109_v25  ;;  %v110_v37 = vmul.f32 %v1074_v2, %v41_v26  ;;  %v111_v41 = vmul.f32 %v1074_v2, %v42_v31  ;;  %v52_v24 = vld [vmem:[%s1491_s0 + $0x148] sm:$0xff] }
  0x2a   :  { %vm240_vm11 = vcmp.ge.f32.partialorder %v176_v30, 0.0  ;;  %v304_v35 = vmul.f32 0.2, %v176_v30  ;;  %1030 = vst [vmem:[%s1493_s2 + $0x60] sm:$0xff] %v922_v32   ;;  %v367_v39 = vsel %vm239_vm10, %v175_v23, %v303_v33  ;;  %v112_v49 = vmul.f32 %v1074_v2, %v43_v38  ;;  %v53_v32 = vld [vmem:[%s1491_s0 + $0x150] sm:$0xff]  ;;  %v54_v33 = vld [vmem:[%s1491_s0 + $0x158] sm:$0xff] }
  0x2b   :  { %vm241_vm12 = vcmp.ge.f32.partialorder %v177_v34, 0.0  ;;  %v305_v40 = vmul.f32 0.2, %v177_v34  ;;  %vm242_vm13 = vcmp.ge.f32.partialorder %v178_v36, 0.0  ;;  %v306_v44 = vmul.f32 0.2, %v178_v36 }
  0x2c   :  { %v368_v43 = vsel %vm240_vm11, %v176_v30, %v304_v35  ;;  %v179_v45 = vadd.f32 %v1081_v5, %v110_v37  ;;  %v180_v48 = vadd.f32 %v1081_v5, %v111_v41  ;;  %v113_v54 = vmul.f32 %v1074_v2, %v44_v42  ;;  %v55_v37 = vld [vmem:[%s1491_s0 + $0x160] sm:$0xff] }
  0x2d   :  { %v927_v46 = vpack.c.bf16 %v368_v43, %v367_v39  ;;  %v369_v47 = vsel %vm241_vm12, %v177_v34, %v305_v40  ;;  %v370_v52 = vsel %vm242_vm13, %v178_v36, %v306_v44  ;;  %v181_v58 = vadd.f32 %v1081_v5, %v112_v49  ;;  %v57_v49 = vld [vmem:[%s1491_s0 + $0x170] sm:$0xff] }
  0x2e   :  { %vm243_vm14 = vcmp.ge.f32.partialorder %v179_v45, 0.0  ;;  %v307_v53 = vmul.f32 0.2, %v179_v45  ;;  %v932_v56 = vpack.c.bf16 %v370_v52, %v369_v47  ;;  %vm244_vm15 = vcmp.ge.f32.partialorder %v180_v48, 0.0 }
  0x2f   :  { %1031 = vst [vmem:[%s1493_s2 + $0x68] sm:$0xff] %v927_v46   ;;  %v308_v57 = vmul.f32 0.2, %v180_v48  ;;  %v182_v60 = vadd.f32 %v1081_v5, %v113_v54  ;;  %v114_v61 = vmul.f32 %v1074_v2, %v45_v50  ;;  %v115_v62 = vmul.f32 %v1074_v2, %v46_v51 }
  0x30   :  { %v371_v59 = vsel %vm243_vm14, %v179_v45, %v307_v53  ;;  %1032 = vst [vmem:[%s1493_s2 + $0x70] sm:$0xff] %v932_v56   ;;  %vm245_vm0 = vcmp.ge.f32.partialorder %v181_v58, 0.0  ;;  %v309_v1 = vmul.f32 0.2, %v181_v58  ;;  %v116_v3 = vmul.f32 %v1074_v2, %v47_v55  ;;  %v56_v45 = vld [vmem:[%s1491_s0 + $0x168] sm:$0xff] }
  0x31   :  { %v372_v0 = vsel %vm244_vm15, %v180_v48, %v308_v57  ;;  %vm246_vm1 = vcmp.ge.f32.partialorder %v182_v60, 0.0  ;;  %v310_v7 = vmul.f32 0.2, %v182_v60  ;;  %v183_v8 = vadd.f32 %v1081_v5, %v114_v61  ;;  %v58_v57 = vld [vmem:[%s1491_s0 + $0x178] sm:$0xff] }
  0x32   :  { %v937_v6 = vpack.c.bf16 %v372_v0, %v371_v59  ;;  %v373_v9 = vsel %vm245_vm0, %v181_v58, %v309_v1  ;;  %v184_v10 = vadd.f32 %v1081_v5, %v115_v62  ;;  %v117_v11 = vmul.f32 %v1074_v2, %v48_v63  ;;  %v59_v0 = vld [vmem:[%s1491_s0 + $0x180] sm:$0xff] }
  0x33   :  { %v185_v12 = vadd.f32 %v1081_v5, %v116_v3  ;;  %v374_v14 = vsel %vm246_vm1, %v182_v60, %v310_v7  ;;  %vm247_vm2 = vcmp.ge.f32.partialorder %v183_v8, 0.0  ;;  %v311_v15 = vmul.f32 0.2, %v183_v8 }
  0x34   :  { %1033 = vst [vmem:[%s1493_s2 + $0x78] sm:$0xff] %v937_v6   ;;  %v118_v16 = vmul.f32 %v1074_v2, %v49_v4  ;;  %v942_v17 = vpack.c.bf16 %v374_v14, %v373_v9  ;;  %vm248_vm3 = vcmp.ge.f32.partialorder %v184_v10, 0.0  ;;  %v312_v18 = vmul.f32 0.2, %v184_v10  ;;  %v60_v6 = vld [vmem:[%s1491_s0 + $0x188] sm:$0xff]  ;;  %v61_v14 = vld [vmem:[%s1491_s0 + $0x190] sm:$0xff] }
  0x35   :  { %v186_v19 = vadd.f32 %v1081_v5, %v117_v11  ;;  %v375_v21 = vsel %vm247_vm2, %v183_v8, %v311_v15  ;;  %vm249_vm4 = vcmp.ge.f32.partialorder %v185_v12, 0.0  ;;  %v313_v22 = vmul.f32 0.2, %v185_v12  ;;  %v62_v15 = vld [vmem:[%s1491_s0 + $0x198] sm:$0xff] }
  0x36   :  { %v119_v23 = vmul.f32 %v1074_v2, %v50_v13  ;;  %1034 = vst [vmem:[%s1493_s2 + $0x80] sm:$0xff] %v942_v17   ;;  %v376_v25 = vsel %vm248_vm3, %v184_v10, %v312_v18  ;;  %v187_v27 = vadd.f32 %v1081_v5, %v118_v16  ;;  %v120_v31 = vmul.f32 %v1074_v2, %v51_v20 }
  0x37   :  { %vm250_vm5 = vcmp.ge.f32.partialorder %v186_v19, 0.0  ;;  %v314_v26 = vmul.f32 0.2, %v186_v19  ;;  %v947_v28 = vpack.c.bf16 %v376_v25, %v375_v21  ;;  %v377_v29 = vsel %vm249_vm4, %v185_v12, %v313_v22 }
  0x38   :  { %v188_v30 = vadd.f32 %v1081_v5, %v119_v23  ;;  %vm251_vm6 = vcmp.ge.f32.partialorder %v187_v27, 0.0  ;;  %v315_v35 = vmul.f32 0.2, %v187_v27  ;;  %v121_v36 = vmul.f32 %v1074_v2, %v52_v24 }
  0x39   :  { %v378_v34 = vsel %vm250_vm5, %v186_v19, %v314_v26  ;;  %1035 = vst [vmem:[%s1493_s2 + $0x88] sm:$0xff] %v947_v28   ;;  %v189_v40 = vadd.f32 %v1081_v5, %v120_v31  ;;  %v122_v43 = vmul.f32 %v1074_v2, %v53_v32  ;;  %v123_v44 = vmul.f32 %v1074_v2, %v54_v33  ;;  %v63_v19 = vld [vmem:[%s1491_s0 + $0x1a0] sm:$0xff]  ;;  %v65_v31 = vld [vmem:[%s1491_s0 + $0x1b0] sm:$0xff] }
  0x3a   :  { %v952_v38 = vpack.c.bf16 %v378_v34, %v377_v29  ;;  %vm252_vm7 = vcmp.ge.f32.partialorder %v188_v30, 0.0  ;;  %v316_v39 = vmul.f32 0.2, %v188_v30  ;;  %v379_v41 = vsel %vm251_vm6, %v187_v27, %v315_v35  ;;  %v64_v27 = vld [vmem:[%s1491_s0 + $0x1a8] sm:$0xff] }
  0x3b   :  { %v190_v42 = vadd.f32 %v1081_v5, %v121_v36  ;;  %vm253_vm8 = vcmp.ge.f32.partialorder %v189_v40, 0.0  ;;  %v317_v47 = vmul.f32 0.2, %v189_v40  ;;  %v124_v48 = vmul.f32 %v1074_v2, %v55_v37 }
  0x3c   :  { %1036 = vst [vmem:[%s1493_s2 + $0x90] sm:$0xff] %v952_v38   ;;  %v380_v46 = vsel %vm252_vm7, %v188_v30, %v316_v39  ;;  %v191_v52 = vadd.f32 %v1081_v5, %v122_v43  ;;  %v192_v54 = vadd.f32 %v1081_v5, %v123_v44  ;;  %v125_v55 = vmul.f32 %v1074_v2, %v56_v45  ;;  %v66_v39 = vld [vmem:[%s1491_s0 + $0x1b8] sm:$0xff] }
  0x3d   :  { %v957_v50 = vpack.c.bf16 %v380_v46, %v379_v41  ;;  %vm254_vm9 = vcmp.ge.f32.partialorder %v190_v42, 0.0  ;;  %v318_v51 = vmul.f32 0.2, %v190_v42  ;;  %v381_v53 = vsel %vm253_vm8, %v189_v40, %v317_v47  ;;  %v67_v46 = vld [vmem:[%s1491_s0 + $0x1c0] sm:$0xff] }
  0x3e   :  { %v193_v56 = vadd.f32 %v1081_v5, %v124_v48  ;;  %vm255_vm10 = vcmp.ge.f32.partialorder %v191_v52, 0.0  ;;  %v319_v59 = vmul.f32 0.2, %v191_v52  ;;  %v126_v60 = vmul.f32 %v1074_v2, %v57_v49 }
  0x3f   :  { %1037 = vst [vmem:[%s1493_s2 + $0x98] sm:$0xff] %v957_v50   ;;  %v382_v58 = vsel %vm254_vm9, %v190_v42, %v318_v51  ;;  %vm256_vm11 = vcmp.ge.f32.partialorder %v192_v54, 0.0  ;;  %v320_v62 = vmul.f32 0.2, %v192_v54  ;;  %v194_v63 = vadd.f32 %v1081_v5, %v125_v55  ;;  %v68_v50 = vld [vmem:[%s1491_s0 + $0x1c8] sm:$0xff] }
  0x40   :  { %v962_v61 = vpack.c.bf16 %v382_v58, %v381_v53  ;;  %v383_v1 = vsel %vm255_vm10, %v191_v52, %v319_v59  ;;  %vm257_vm12 = vcmp.ge.f32.partialorder %v193_v56, 0.0  ;;  %v321_v3 = vmul.f32 0.2, %v193_v56  ;;  %v69_v58 = vld [vmem:[%s1491_s0 + $0x1d0] sm:$0xff]  ;;  %v70_v59 = vld [vmem:[%s1491_s0 + $0x1d8] sm:$0xff] }
  0x41   :  { %v127_v4 = vmul.f32 %v1074_v2, %v58_v57  ;;  %v384_v7 = vsel %vm256_vm11, %v192_v54, %v320_v62  ;;  %vm258_vm13 = vcmp.ge.f32.partialorder %v194_v63, 0.0  ;;  %v322_v8 = vmul.f32 0.2, %v194_v63 }
  0x42   :  { %1038 = vst [vmem:[%s1493_s2 + $0xa0] sm:$0xff] %v962_v61   ;;  %v195_v9 = vadd.f32 %v1081_v5, %v126_v60  ;;  %v967_v10 = vpack.c.bf16 %v384_v7, %v383_v1  ;;  %v385_v11 = vsel %vm257_vm12, %v193_v56, %v321_v3  ;;  %v128_v13 = vmul.f32 %v1074_v2, %v59_v0 }
  0x43   :  { %v196_v12 = vadd.f32 %v1081_v5, %v127_v4  ;;  %v386_v16 = vsel %vm258_vm13, %v194_v63, %v322_v8  ;;  %v129_v18 = vmul.f32 %v1074_v2, %v60_v6  ;;  %v130_v25 = vmul.f32 %v1074_v2, %v61_v14  ;;  %v71_v63 = vld [vmem:[%s1491_s0 + $0x1e0] sm:$0xff] }
  0x44   :  { %vm259_vm14 = vcmp.ge.f32.partialorder %v195_v9, 0.0  ;;  %v323_v17 = vmul.f32 0.2, %v195_v9  ;;  %1039 = vst [vmem:[%s1493_s2 + $0xa8] sm:$0xff] %v967_v10   ;;  %v972_v20 = vpack.c.bf16 %v386_v16, %v385_v11  ;;  %v197_v22 = vadd.f32 %v1081_v5, %v128_v13  ;;  %v73_v13 = vld [vmem:[%s1491_s0 + $0x1f0] sm:$0xff] }
  0x45   :  { %vm260_vm15 = vcmp.ge.f32.partialorder %v196_v12, 0.0  ;;  %v324_v21 = vmul.f32 0.2, %v196_v12  ;;  %v198_v24 = vadd.f32 %v1081_v5, %v129_v18  ;;  %v131_v26 = vmul.f32 %v1074_v2, %v62_v15 }
  0x46   :  { %v387_v23 = vsel %vm259_vm14, %v195_v9, %v323_v17  ;;  %1040 = vst [vmem:[%s1493_s2 + $0xb0] sm:$0xff] %v972_v20   ;;  %vm261_vm0 = vcmp.ge.f32.partialorder %v197_v22, 0.0  ;;  %v325_v29 = vmul.f32 0.2, %v197_v22  ;;  %v132_v30 = vmul.f32 %v1074_v2, %v63_v19  ;;  %v72_v9 = vld [vmem:[%s1491_s0 + $0x1e8] sm:$0xff] }
  0x47   :  { %v388_v28 = vsel %vm260_vm15, %v196_v12, %v324_v21  ;;  %vm262_vm1 = vcmp.ge.f32.partialorder %v198_v24, 0.0  ;;  %v326_v33 = vmul.f32 0.2, %v198_v24  ;;  %v199_v34 = vadd.f32 %v1081_v5, %v130_v25  ;;  %v74_v21 = vld [vmem:[%s1491_s0 + $0x1f8] sm:$0xff] }
  0x48   :  { %v977_v32 = vpack.c.bf16 %v388_v28, %v387_v23  ;;  %v389_v35 = vsel %vm261_vm0, %v197_v22, %v325_v29  ;;  %v200_v36 = vadd.f32 %v1081_v5, %v131_v26  ;;  %v133_v37 = vmul.f32 %v1074_v2, %v64_v27 }
  0x49   :  { %v201_v38 = vadd.f32 %v1081_v5, %v132_v30  ;;  %v390_v40 = vsel %vm262_vm1, %v198_v24, %v326_v33  ;;  %vm263_vm2 = vcmp.ge.f32.partialorder %v199_v34, 0.0  ;;  %v327_v41 = vmul.f32 0.2, %v199_v34 }
  0x4a   :  { %1041 = vst [vmem:[%s1493_s2 + $0xb8] sm:$0xff] %v977_v32   ;;  %v134_v42 = vmul.f32 %v1074_v2, %v65_v31  ;;  %v982_v43 = vpack.c.bf16 %v390_v40, %v389_v35  ;;  %vm264_vm3 = vcmp.ge.f32.partialorder %v200_v36, 0.0  ;;  %v328_v44 = vmul.f32 0.2, %v200_v36 }
  0x4b   :  { %v202_v45 = vadd.f32 %v1081_v5, %v133_v37  ;;  %v391_v47 = vsel %vm263_vm2, %v199_v34, %v327_v41  ;;  %vm265_vm4 = vcmp.ge.f32.partialorder %v201_v38, 0.0  ;;  %v329_v48 = vmul.f32 0.2, %v201_v38 }
  0x4c   :  { %v135_v49 = vmul.f32 %v1074_v2, %v66_v39  ;;  %1042 = vst [vmem:[%s1493_s2 + $0xc0] sm:$0xff] %v982_v43   ;;  %v392_v51 = vsel %vm264_vm3, %v200_v36, %v328_v44  ;;  %v203_v53 = vadd.f32 %v1081_v5, %v134_v42  ;;  %v136_v57 = vmul.f32 %v1074_v2, %v67_v46 }
  0x4d   :  { %vm266_vm5 = vcmp.ge.f32.partialorder %v202_v45, 0.0  ;;  %v330_v52 = vmul.f32 0.2, %v202_v45  ;;  %v987_v54 = vpack.c.bf16 %v392_v51, %v391_v47  ;;  %v393_v55 = vsel %vm265_vm4, %v201_v38, %v329_v48 }
  0x4e   :  { %v204_v56 = vadd.f32 %v1081_v5, %v135_v49  ;;  %vm267_vm6 = vcmp.ge.f32.partialorder %v203_v53, 0.0  ;;  %v331_v61 = vmul.f32 0.2, %v203_v53  ;;  %v137_v62 = vmul.f32 %v1074_v2, %v68_v50 }
  0x4f   :  { %v394_v60 = vsel %vm266_vm5, %v202_v45, %v330_v52  ;;  %1043 = vst [vmem:[%s1493_s2 + $0xc8] sm:$0xff] %v987_v54   ;;  %v205_v3 = vadd.f32 %v1081_v5, %v136_v57  ;;  %v138_v7 = vmul.f32 %v1074_v2, %v69_v58  ;;  %v139_v8 = vmul.f32 %v1074_v2, %v70_v59 }
  0x50   :  { %v992_v0 = vpack.c.bf16 %v394_v60, %v393_v55  ;;  %vm268_vm7 = vcmp.ge.f32.partialorder %v204_v56, 0.0  ;;  %v332_v1 = vmul.f32 0.2, %v204_v56  ;;  %v395_v4 = vsel %vm267_vm6, %v203_v53, %v331_v61 }
  0x51   :  { %v206_v6 = vadd.f32 %v1081_v5, %v137_v62  ;;  %vm269_vm8 = vcmp.ge.f32.partialorder %v205_v3, 0.0  ;;  %v333_v11 = vmul.f32 0.2, %v205_v3  ;;  %v140_v12 = vmul.f32 %v1074_v2, %v71_v63 }
  0x52   :  { %1044 = vst [vmem:[%s1493_s2 + $0xd0] sm:$0xff] %v992_v0   ;;  %v396_v10 = vsel %vm268_vm7, %v204_v56, %v332_v1  ;;  %v207_v16 = vadd.f32 %v1081_v5, %v138_v7  ;;  %v208_v18 = vadd.f32 %v1081_v5, %v139_v8  ;;  %v141_v19 = vmul.f32 %v1074_v2, %v72_v9 }
  0x53   :  { %v997_v14 = vpack.c.bf16 %v396_v10, %v395_v4  ;;  %vm270_vm9 = vcmp.ge.f32.partialorder %v206_v6, 0.0  ;;  %v334_v15 = vmul.f32 0.2, %v206_v6  ;;  %v397_v17 = vsel %vm269_vm8, %v205_v3, %v333_v11 }
  0x54   :  { %v209_v20 = vadd.f32 %v1081_v5, %v140_v12  ;;  %vm271_vm10 = vcmp.ge.f32.partialorder %v207_v16, 0.0  ;;  %v335_v23 = vmul.f32 0.2, %v207_v16  ;;  %v142_v24 = vmul.f32 %v1074_v2, %v73_v13 }
  0x55   :  { %1045 = vst [vmem:[%s1493_s2 + $0xd8] sm:$0xff] %v997_v14   ;;  %v398_v22 = vsel %vm270_vm9, %v206_v6, %v334_v15  ;;  %vm272_vm11 = vcmp.ge.f32.partialorder %v208_v18, 0.0  ;;  %v336_v26 = vmul.f32 0.2, %v208_v18  ;;  %v210_v27 = vadd.f32 %v1081_v5, %v141_v19 }
  0x56   :  { %v1002_v25 = vpack.c.bf16 %v398_v22, %v397_v17  ;;  %v399_v28 = vsel %vm271_vm10, %v207_v16, %v335_v23  ;;  %vm273_vm12 = vcmp.ge.f32.partialorder %v209_v20, 0.0  ;;  %v337_v29 = vmul.f32 0.2, %v209_v20 }
  0x57   :  { %v143_v30 = vmul.f32 %v1074_v2, %v74_v21  ;;  %v400_v31 = vsel %vm272_vm11, %v208_v18, %v336_v26  ;;  %vm274_vm13 = vcmp.ge.f32.partialorder %v210_v27, 0.0  ;;  %v338_v32 = vmul.f32 0.2, %v210_v27 }
  0x58   :  { %1046 = vst [vmem:[%s1493_s2 + $0xe0] sm:$0xff] %v1002_v25   ;;  %v211_v33 = vadd.f32 %v1081_v5, %v142_v24  ;;  %v1007_v34 = vpack.c.bf16 %v400_v31, %v399_v28  ;;  %v401_v35 = vsel %vm273_vm12, %v209_v20, %v337_v29 }
  0x59   :  { %v212_v36 = vadd.f32 %v1081_v5, %v143_v30  ;;  %v402_v37 = vsel %vm274_vm13, %v210_v27, %v338_v32 }
  0x5a   :  { %vm275_vm14 = vcmp.ge.f32.partialorder %v211_v33, 0.0  ;;  %v339_v38 = vmul.f32 0.2, %v211_v33  ;;  %1047 = vst [vmem:[%s1493_s2 + $0xe8] sm:$0xff] %v1007_v34   ;;  %v1012_v2 = vpack.c.bf16 %v402_v37, %v401_v35 }
  0x5b   :  { %vm276_vm15 = vcmp.ge.f32.partialorder %v212_v36, 0.0  ;;  %v340_v39 = vmul.f32 0.2, %v212_v36 }
  0x5c   :  { %v403_v40 = vsel %vm275_vm14, %v211_v33, %v339_v38  ;;  %1048 = vst [vmem:[%s1493_s2 + $0xf0] sm:$0xff] %v1012_v2  }
  0x5d   :  { %v404_v41 = vsel %vm276_vm15, %v212_v36, %v340_v39 }
  0x5e   :  { %v1017_v42 = vpack.c.bf16 %v404_v41, %v403_v40 }
  0x60   :  { %1049 = vst [vmem:[%s1493_s2 + $0xf8] sm:$0xff] %v1017_v42  }

// kernel: discriminator_critic_forward.12
= control target key start
LH: loop header
LB: loop body
LE: loop exit
PB: predicated region body
PF: predicated region fallthrough
CT: control target
= control target key end

     0   :  { %s411_s0 = inlined_call_operand.vmem [shape: f32[128,128], index: 0, kind: input, shape index: {}]   ;;  %s412_s1 = inlined_call_operand.vmem [shape: f32[2,128], index: 1, kind: input, shape index: {}]   ;;  %s413_s2 = inlined_call_operand.vmem [shape: bf16[128,128], index: 2, kind: output, shape index: {}]  }
   0x1   :  { %v11_v0 = vld [vmem:[%s411_s0] sm:$0xff]  ;;  %v12_v1 = vld [vmem:[%s411_s0 + $0x8] sm:$0xff]  ;;  %v13_v6 = vld [vmem:[%s411_s0 + $0x10] sm:$0xff] }
   0x2   :  { %v306_v2 = vld [vmem:[%s412_s1] ss:$0 sm:$0xff]  ;;  %v313_v5 = vld [vmem:[%s412_s1 + $0x1] ss:$0 sm:$0xff]  ;;  %v14_v7 = vld [vmem:[%s411_s0 + $0x18] sm:$0xff] }
   0x3   :  { %v32_v3 = vmul.f32 %v306_v2, %v11_v0  ;;  %v33_v4 = vmul.f32 %v306_v2, %v12_v1  ;;  %v34_v8 = vmul.f32 %v306_v2, %v13_v6  ;;  %v35_v9 = vmul.f32 %v306_v2, %v14_v7  ;;  %v15_v10 = vld [vmem:[%s411_s0 + $0x20] sm:$0xff]  ;;  %v16_v11 = vld [vmem:[%s411_s0 + $0x28] sm:$0xff]  ;;  %v17_v12 = vld [vmem:[%s411_s0 + $0x30] sm:$0xff] }
   0x4   :  { %v36_v15 = vmul.f32 %v306_v2, %v15_v10  ;;  %v37_v16 = vmul.f32 %v306_v2, %v16_v11  ;;  %v18_v17 = vld [vmem:[%s411_s0 + $0x38] sm:$0xff]  ;;  %v38_v20 = vmul.f32 %v306_v2, %v17_v12  ;;  %v19_v34 = vld [vmem:[%s411_s0 + $0x40] sm:$0xff]  ;;  %v20_v35 = vld [vmem:[%s411_s0 + $0x48] sm:$0xff] }
   0x5   :  { %v53_v13 = vadd.f32 %v313_v5, %v32_v3  ;;  %v54_v14 = vadd.f32 %v313_v5, %v33_v4  ;;  %v55_v18 = vadd.f32 %v313_v5, %v34_v8  ;;  %v56_v19 = vadd.f32 %v313_v5, %v35_v9  ;;  %v21_v36 = vld [vmem:[%s411_s0 + $0x50] sm:$0xff]  ;;  %v22_v42 = vld [vmem:[%s411_s0 + $0x58] sm:$0xff]  ;;  %v23_v47 = vld [vmem:[%s411_s0 + $0x60] sm:$0xff] }
   0x6   :  { %v39_v21 = vmul.f32 %v306_v2, %v18_v17  ;;  %v57_v28 = vadd.f32 %v313_v5, %v36_v15  ;;  %v58_v29 = vadd.f32 %v313_v5, %v37_v16  ;;  %v59_v33 = vadd.f32 %v313_v5, %v38_v20  ;;  %v24_v48 = vld [vmem:[%s411_s0 + $0x68] sm:$0xff]  ;;  %v25_v60 = vld [vmem:[%s411_s0 + $0x70] sm:$0xff]  ;;  %v26_v7 = vld [vmem:[%s411_s0 + $0x78] sm:$0xff] }
   0x7   :  { %vm69_vm0 = vcmp.ge.f32.partialorder %v53_v13, 0.0  ;;  %vm70_vm1 = vcmp.ge.f32.partialorder %v54_v14, 0.0  ;;  %v85_v22 = vmul.f32 0.2, %v53_v13  ;;  %v86_v23 = vmul.f32 0.2, %v54_v14 }
   0x8   :  { %vm71_vm2 = vcmp.ge.f32.partialorder %v55_v18, 0.0  ;;  %vm72_vm3 = vcmp.ge.f32.partialorder %v56_v19, 0.0  ;;  %v87_v24 = vmul.f32 0.2, %v55_v18  ;;  %v88_v25 = vmul.f32 0.2, %v56_v19 }
   0x9   :  { %v101_v26 = vsel %vm69_vm0, %v53_v13, %v85_v22  ;;  %v102_v27 = vsel %vm70_vm1, %v54_v14, %v86_v23  ;;  %vm73_vm4 = vcmp.ge.f32.partialorder %v57_v28, 0.0  ;;  %vm74_vm5 = vcmp.ge.f32.partialorder %v58_v29, 0.0 }
   0xa   :  { %v238_v30 = vpack.c.bf16 %v102_v27, %v101_v26  ;;  %v103_v31 = vsel %vm71_vm2, %v55_v18, %v87_v24  ;;  %v104_v32 = vsel %vm72_vm3, %v56_v19, %v88_v25  ;;  %v89_v38 = vmul.f32 0.2, %v57_v28 }
   0xb   :  { %v243_v37 = vpack.c.bf16 %v104_v32, %v103_v31  ;;  %v90_v39 = vmul.f32 0.2, %v58_v29  ;;  %v60_v40 = vadd.f32 %v313_v5, %v39_v21  ;;  %vm75_vm6 = vcmp.ge.f32.partialorder %v59_v33, 0.0 }
   0xc   :  { %239 = vst [vmem:[%s413_s2] sm:$0xff] %v238_v30   ;;  %v91_v41 = vmul.f32 0.2, %v59_v33  ;;  %v105_v43 = vsel %vm73_vm4, %v57_v28, %v89_v38  ;;  %v40_v44 = vmul.f32 %v306_v2, %v19_v34  ;;  %v41_v45 = vmul.f32 %v306_v2, %v20_v35 }
   0xd   :  { %275 = vst [vmem:[%s413_s2 + $0x8] sm:$0xff] %v243_v37   ;;  %v42_v46 = vmul.f32 %v306_v2, %v21_v36  ;;  %v106_v49 = vsel %vm74_vm5, %v58_v29, %v90_v39  ;;  %vm76_vm7 = vcmp.ge.f32.partialorder %v60_v40, 0.0  ;;  %v92_v50 = vmul.f32 0.2, %v60_v40 }
   0xe   :  { %v107_v51 = vsel %vm75_vm6, %v59_v33, %v91_v41  ;;  %v248_v52 = vpack.c.bf16 %v106_v49, %v105_v43  ;;  %v61_v53 = vadd.f32 %v313_v5, %v40_v44  ;;  %v62_v54 = vadd.f32 %v313_v5, %v41_v45 }
   0xf   :  { %v43_v55 = vmul.f32 %v306_v2, %v22_v42  ;;  %v108_v56 = vsel %vm76_vm7, %v60_v40, %v92_v50  ;;  %v63_v57 = vadd.f32 %v313_v5, %v42_v46  ;;  %v44_v58 = vmul.f32 %v306_v2, %v23_v47 }
  0x10   :  { %v45_v59 = vmul.f32 %v306_v2, %v24_v48  ;;  %276 = vst [vmem:[%s413_s2 + $0x10] sm:$0xff] %v248_v52   ;;  %v253_v61 = vpack.c.bf16 %v108_v56, %v107_v51  ;;  %vm77_vm8 = vcmp.ge.f32.partialorder %v61_v53, 0.0  ;;  %vm78_vm9 = vcmp.ge.f32.partialorder %v62_v54, 0.0 }
  0x11   :  { %v93_v62 = vmul.f32 0.2, %v61_v53  ;;  %v94_v63 = vmul.f32 0.2, %v62_v54  ;;  %v64_v0 = vadd.f32 %v313_v5, %v43_v55  ;;  %vm79_vm10 = vcmp.ge.f32.partialorder %v63_v57, 0.0 }
  0x12   :  { %v95_v1 = vmul.f32 0.2, %v63_v57  ;;  %277 = vst [vmem:[%s413_s2 + $0x18] sm:$0xff] %v253_v61   ;;  %v65_v4 = vadd.f32 %v313_v5, %v44_v58  ;;  %v66_v6 = vadd.f32 %v313_v5, %v45_v59  ;;  %v46_v8 = vmul.f32 %v306_v2, %v25_v60 }
  0x13   :  { %v109_v3 = vsel %vm77_vm8, %v61_v53, %v93_v62  ;;  %v110_v9 = vsel %vm78_vm9, %v62_v54, %v94_v63  ;;  %vm80_vm11 = vcmp.ge.f32.partialorder %v64_v0, 0.0  ;;  %v96_v10 = vmul.f32 0.2, %v64_v0 }
  0x14   :  { %v111_v11 = vsel %vm79_vm10, %v63_v57, %v95_v1  ;;  %v258_v12 = vpack.c.bf16 %v110_v9, %v109_v3  ;;  %vm81_vm12 = vcmp.ge.f32.partialorder %v65_v4, 0.0  ;;  %vm82_vm13 = vcmp.ge.f32.partialorder %v66_v6, 0.0 }
  0x15   :  { %v97_v13 = vmul.f32 0.2, %v65_v4  ;;  %v112_v14 = vsel %vm80_vm11, %v64_v0, %v96_v10  ;;  %v98_v15 = vmul.f32 0.2, %v66_v6  ;;  %v47_v16 = vmul.f32 %v306_v2, %v26_v7 }
  0x16   :  { %v67_v17 = vadd.f32 %v313_v5, %v46_v8  ;;  %278 = vst [vmem:[%s413_s2 + $0x20] sm:$0xff] %v258_v12   ;;  %v263_v18 = vpack.c.bf16 %v112_v14, %v111_v11 }
  0x17   :  { %v113_v19 = vsel %vm81_vm12, %v65_v4, %v97_v13  ;;  %v114_v20 = vsel %vm82_vm13, %v66_v6, %v98_v15  ;;  %v68_v21 = vadd.f32 %v313_v5, %v47_v16 }
  0x18   :  { %vm83_vm14 = vcmp.ge.f32.partialorder %v67_v17, 0.0  ;;  %v99_v22 = vmul.f32 0.2, %v67_v17  ;;  %279 = vst [vmem:[%s413_s2 + $0x28] sm:$0xff] %v263_v18   ;;  %v268_v23 = vpack.c.bf16 %v114_v20, %v113_v19 }
  0x19   :  { %vm84_vm15 = vcmp.ge.f32.partialorder %v68_v21, 0.0  ;;  %v100_v2 = vmul.f32 0.2, %v68_v21 }
  0x1a   :  { %v115_v24 = vsel %vm83_vm14, %v67_v17, %v99_v22  ;;  %280 = vst [vmem:[%s413_s2 + $0x30] sm:$0xff] %v268_v23  }
  0x1b   :  { %v116_v25 = vsel %vm84_vm15, %v68_v21, %v100_v2 }
  0x1c   :  { %v273_v26 = vpack.c.bf16 %v116_v25, %v115_v24 }
  0x1e   :  { %281 = vst [vmem:[%s413_s2 + $0x38] sm:$0xff] %v273_v26  }

// kernel: discriminator_critic_forward.11
= control target key start
LH: loop header
LB: loop body
LE: loop exit
PB: predicated region body
PF: predicated region fallthrough
CT: control target
= control target key end

     0   :  { %s2559_s12 = smov 0   ;;  %s2561_s13 = smov 0   ;;  %s2989_s0 = inlined_call_operand.vmem [shape: bf16[128,2048], index: 0, kind: input, shape index: {}]   ;;  %s2990_s1 = inlined_call_operand.vmem [shape: bf16[2048,128], index: 1, kind: input, shape index: {}]   ;;  %s2991_s2 = inlined_call_operand.vmem [shape: f32[128,128], index: 2, kind: output, shape index: {0}]   ;;  %s2992_s3 = inlined_call_operand.vmem [shape: f32[1,2,128], index: 3, kind: output, shape index: {1}]  }
   0x1   :  { %s2563_s14 = smov 0   ;;  %s2565_s15 = smov 0  }
   0x2   :  { %s2567_s16 = smov 0  }
   0x3 LB: > { %s26_s17 = sadd.s32 1, %s2532_s15  ;;  %p49_p1 = scmp.ne.s32.totalorder %s2524_s13, %s2520_s12  ;;  %s2536_s16 = sphi %s2567_s16, %s14_s16   ;;  %s2532_s15 = sphi %s2565_s15, %s2996_s15   ;;  %s2528_s14 = sphi %s2563_s14, %s2995_s14   ;;  %s2524_s13 = sphi %s2561_s13, %s2994_s13   ;;  %s2520_s12 = sphi %s2559_s12, %s2993_s12  }
   0x4   : > { %p27_p0 = scmp.ge.s32.totalorder %s26_s17, 2  ;;  %p50_p2 = scmp.eq.s32.totalorder %s2536_s16, 0 }
   0x5   : > { %s42_s19 = sadd.s32 1, %s2524_s13  ;;  %p1993_p5 = scmp.ge.s32.totalorder %s2536_s16, 2 }
   0x6   : > { %s2998_s17 = smov (%p27_p0, %s26_s17), 0  ;;  %p51_p3 = por %p50_p2, %p49_p1 }
   0x7   : > { %s38_s18 = ssub.s32 %s2532_s15, %s2998_s17  ;;  %159 = sbr.rel (%p1993_p5) target bundleno = 50 (0x32), region = 16 }
   0x8   : > { %p40_p4 = scmp.eq.s32.totalorder %s38_s18, 0 }
   0xa   : > { %s2594_s20 = scalar_select %p40_p4, %s2524_s13, %s42_s19  }
   0xe   : > { %162 = sbr.rel (!%p51_p3) target bundleno = 50 (0x32), region = 20  ;;  %s164_s21 = sand.u32 (%p51_p3), 1, %s2524_s13  }
   0xf   : > { %s2136_s22 = sshll.u32 (%p51_p3), %s2532_s15, 5  ;;  %s1994_s23 = sshll.u32 (%p51_p3), %s164_s21, 9 }
  0x10   : > { %s2602_s26 = scalar_lea.vmem (%p51_p3), %s2989_s0, %s2136_s22  ;;  %s2607_s27 = scalar_lea.vmem (%p51_p3), [#allocation3], %s1994_s23 }
  0x11   : > { %v185_v0 = vld [vmem:[%s2602_s26] sm:$0xff] (%p51_p3)  ;;  %v187_v1 = vld [vmem:[%s2602_s26 + $0x8] sm:$0xff] (%p51_p3)  ;;  %v189_v2 = vld [vmem:[%s2602_s26 + $0x10] sm:$0xff] (%p51_p3) }
  0x12   : > { %186 = vst [vmem:[%s2607_s27] sm:$0xff] (%p51_p3), %v185_v0  ;;  %188 = vst [vmem:[%s2607_s27 + $0x8] sm:$0xff] (%p51_p3), %v187_v1  ;;  %v191_v3 = vld [vmem:[%s2602_s26 + $0x18] sm:$0xff] (%p51_p3)  ;;  %v193_v4 = vld [vmem:[%s2602_s26 + $0x40] sm:$0xff] (%p51_p3) }
  0x13   : > { %190 = vst [vmem:[%s2607_s27 + $0x10] sm:$0xff] (%p51_p3), %v189_v2  ;;  %v195_v5 = vld [vmem:[%s2602_s26 + $0x48] sm:$0xff] (%p51_p3)  ;;  %192 = vst [vmem:[%s2607_s27 + $0x18] sm:$0xff] (%p51_p3), %v191_v3  ;;  %v197_v6 = vld [vmem:[%s2602_s26 + $0x50] sm:$0xff] (%p51_p3) }
  0x14   : > { %194 = vst [vmem:[%s2607_s27 + $0x20] sm:$0xff] (%p51_p3), %v193_v4  ;;  %196 = vst [vmem:[%s2607_s27 + $0x28] sm:$0xff] (%p51_p3), %v195_v5  ;;  %v199_v7 = vld [vmem:[%s2602_s26 + $0x58] sm:$0xff] (%p51_p3)  ;;  %v201_v8 = vld [vmem:[%s2602_s26 + $0x80] sm:$0xff] (%p51_p3) }
  0x15   : > { %198 = vst [vmem:[%s2607_s27 + $0x30] sm:$0xff] %v197_v6  ;;  %200 = vst [vmem:[%s2607_s27 + $0x38] sm:$0xff] %v199_v7  ;;  %v203_v9 = vld [vmem:[%s2602_s26 + $0x88] sm:$0xff]  ;;  %v205_v10 = vld [vmem:[%s2602_s26 + $0x90] sm:$0xff] }
  0x16   : > { %202 = vst [vmem:[%s2607_s27 + $0x40] sm:$0xff] %v201_v8  ;;  %v207_v11 = vld [vmem:[%s2602_s26 + $0x98] sm:$0xff]  ;;  %204 = vst [vmem:[%s2607_s27 + $0x48] sm:$0xff] %v203_v9  ;;  %v209_v12 = vld [vmem:[%s2602_s26 + $0xc0] sm:$0xff] }
  0x17   : > { %206 = vst [vmem:[%s2607_s27 + $0x50] sm:$0xff] %v205_v10  ;;  %208 = vst [vmem:[%s2607_s27 + $0x58] sm:$0xff] %v207_v11  ;;  %v211_v13 = vld [vmem:[%s2602_s26 + $0xc8] sm:$0xff]  ;;  %v213_v14 = vld [vmem:[%s2602_s26 + $0xd0] sm:$0xff] }
  0x18   : > { %210 = vst [vmem:[%s2607_s27 + $0x60] sm:$0xff] %v209_v12  ;;  %212 = vst [vmem:[%s2607_s27 + $0x68] sm:$0xff] %v211_v13  ;;  %v215_v15 = vld [vmem:[%s2602_s26 + $0xd8] sm:$0xff]  ;;  %v217_v16 = vld [vmem:[%s2602_s26 + $0x100] sm:$0xff] }
  0x19   : > { %214 = vst [vmem:[%s2607_s27 + $0x70] sm:$0xff] %v213_v14  ;;  %v219_v17 = vld [vmem:[%s2602_s26 + $0x108] sm:$0xff]  ;;  %216 = vst [vmem:[%s2607_s27 + $0x78] sm:$0xff] %v215_v15  ;;  %v221_v18 = vld [vmem:[%s2602_s26 + $0x110] sm:$0xff] }
  0x1a   : > { %218 = vst [vmem:[%s2607_s27 + $0x80] sm:$0xff] %v217_v16  ;;  %220 = vst [vmem:[%s2607_s27 + $0x88] sm:$0xff] %v219_v17  ;;  %v223_v19 = vld [vmem:[%s2602_s26 + $0x118] sm:$0xff]  ;;  %v225_v20 = vld [vmem:[%s2602_s26 + $0x140] sm:$0xff] }
  0x1b   : > { %222 = vst [vmem:[%s2607_s27 + $0x90] sm:$0xff] %v221_v18  ;;  %224 = vst [vmem:[%s2607_s27 + $0x98] sm:$0xff] %v223_v19  ;;  %v227_v21 = vld [vmem:[%s2602_s26 + $0x148] sm:$0xff]  ;;  %v229_v22 = vld [vmem:[%s2602_s26 + $0x150] sm:$0xff] }
  0x1c   : > { %226 = vst [vmem:[%s2607_s27 + $0xa0] sm:$0xff] %v225_v20  ;;  %v231_v23 = vld [vmem:[%s2602_s26 + $0x158] sm:$0xff]  ;;  %228 = vst [vmem:[%s2607_s27 + $0xa8] sm:$0xff] %v227_v21  ;;  %v233_v24 = vld [vmem:[%s2602_s26 + $0x180] sm:$0xff] }
  0x1d   : > { %230 = vst [vmem:[%s2607_s27 + $0xb0] sm:$0xff] %v229_v22  ;;  %232 = vst [vmem:[%s2607_s27 + $0xb8] sm:$0xff] %v231_v23  ;;  %v235_v25 = vld [vmem:[%s2602_s26 + $0x188] sm:$0xff]  ;;  %v237_v26 = vld [vmem:[%s2602_s26 + $0x190] sm:$0xff] }
  0x1e   : > { %234 = vst [vmem:[%s2607_s27 + $0xc0] sm:$0xff] %v233_v24  ;;  %236 = vst [vmem:[%s2607_s27 + $0xc8] sm:$0xff] %v235_v25  ;;  %v239_v27 = vld [vmem:[%s2602_s26 + $0x198] sm:$0xff]  ;;  %v241_v28 = vld [vmem:[%s2602_s26 + $0x1c0] sm:$0xff] }
  0x1f   : > { %238 = vst [vmem:[%s2607_s27 + $0xd0] sm:$0xff] %v237_v26  ;;  %v243_v29 = vld [vmem:[%s2602_s26 + $0x1c8] sm:$0xff]  ;;  %240 = vst [vmem:[%s2607_s27 + $0xd8] sm:$0xff] %v239_v27  ;;  %v245_v30 = vld [vmem:[%s2602_s26 + $0x1d0] sm:$0xff] }
  0x20   : > { %242 = vst [vmem:[%s2607_s27 + $0xe0] sm:$0xff] %v241_v28  ;;  %244 = vst [vmem:[%s2607_s27 + $0xe8] sm:$0xff] %v243_v29  ;;  %v247_v31 = vld [vmem:[%s2602_s26 + $0x1d8] sm:$0xff]  ;;  %v249_v32 = vld [vmem:[%s2602_s26 + $0x200] sm:$0xff] }
  0x21   : > { %246 = vst [vmem:[%s2607_s27 + $0xf0] sm:$0xff] %v245_v30  ;;  %248 = vst [vmem:[%s2607_s27 + $0xf8] sm:$0xff] %v247_v31  ;;  %v251_v33 = vld [vmem:[%s2602_s26 + $0x208] sm:$0xff]  ;;  %v253_v34 = vld [vmem:[%s2602_s26 + $0x210] sm:$0xff] }
  0x22   : > { %250 = vst [vmem:[%s2607_s27 + $0x100] sm:$0xff] %v249_v32  ;;  %v255_v35 = vld [vmem:[%s2602_s26 + $0x218] sm:$0xff]  ;;  %252 = vst [vmem:[%s2607_s27 + $0x108] sm:$0xff] %v251_v33  ;;  %v257_v36 = vld [vmem:[%s2602_s26 + $0x240] sm:$0xff] }
  0x23   : > { %254 = vst [vmem:[%s2607_s27 + $0x110] sm:$0xff] %v253_v34  ;;  %256 = vst [vmem:[%s2607_s27 + $0x118] sm:$0xff] %v255_v35  ;;  %v259_v37 = vld [vmem:[%s2602_s26 + $0x248] sm:$0xff]  ;;  %v261_v38 = vld [vmem:[%s2602_s26 + $0x250] sm:$0xff] }
  0x24   : > { %258 = vst [vmem:[%s2607_s27 + $0x120] sm:$0xff] %v257_v36  ;;  %260 = vst [vmem:[%s2607_s27 + $0x128] sm:$0xff] %v259_v37  ;;  %v263_v39 = vld [vmem:[%s2602_s26 + $0x258] sm:$0xff]  ;;  %v265_v40 = vld [vmem:[%s2602_s26 + $0x280] sm:$0xff] }
  0x25   : > { %262 = vst [vmem:[%s2607_s27 + $0x130] sm:$0xff] %v261_v38  ;;  %v267_v41 = vld [vmem:[%s2602_s26 + $0x288] sm:$0xff]  ;;  %264 = vst [vmem:[%s2607_s27 + $0x138] sm:$0xff] %v263_v39  ;;  %v269_v42 = vld [vmem:[%s2602_s26 + $0x290] sm:$0xff] }
  0x26   : > { %266 = vst [vmem:[%s2607_s27 + $0x140] sm:$0xff] %v265_v40  ;;  %268 = vst [vmem:[%s2607_s27 + $0x148] sm:$0xff] %v267_v41  ;;  %v271_v43 = vld [vmem:[%s2602_s26 + $0x298] sm:$0xff]  ;;  %v273_v44 = vld [vmem:[%s2602_s26 + $0x2c0] sm:$0xff] }
  0x27   : > { %270 = vst [vmem:[%s2607_s27 + $0x150] sm:$0xff] %v269_v42  ;;  %272 = vst [vmem:[%s2607_s27 + $0x158] sm:$0xff] %v271_v43  ;;  %v275_v45 = vld [vmem:[%s2602_s26 + $0x2c8] sm:$0xff]  ;;  %v277_v46 = vld [vmem:[%s2602_s26 + $0x2d0] sm:$0xff] }
  0x28   : > { %274 = vst [vmem:[%s2607_s27 + $0x160] sm:$0xff] %v273_v44  ;;  %v279_v47 = vld [vmem:[%s2602_s26 + $0x2d8] sm:$0xff]  ;;  %276 = vst [vmem:[%s2607_s27 + $0x168] sm:$0xff] %v275_v45  ;;  %v281_v48 = vld [vmem:[%s2602_s26 + $0x300] sm:$0xff] }
  0x29   : > { %278 = vst [vmem:[%s2607_s27 + $0x170] sm:$0xff] %v277_v46  ;;  %280 = vst [vmem:[%s2607_s27 + $0x178] sm:$0xff] %v279_v47  ;;  %v283_v49 = vld [vmem:[%s2602_s26 + $0x308] sm:$0xff]  ;;  %v285_v50 = vld [vmem:[%s2602_s26 + $0x310] sm:$0xff] }
  0x2a   : > { %282 = vst [vmem:[%s2607_s27 + $0x180] sm:$0xff] %v281_v48  ;;  %284 = vst [vmem:[%s2607_s27 + $0x188] sm:$0xff] %v283_v49  ;;  %v287_v51 = vld [vmem:[%s2602_s26 + $0x318] sm:$0xff]  ;;  %v289_v52 = vld [vmem:[%s2602_s26 + $0x340] sm:$0xff] }
  0x2b   : > { %286 = vst [vmem:[%s2607_s27 + $0x190] sm:$0xff] %v285_v50  ;;  %v291_v53 = vld [vmem:[%s2602_s26 + $0x348] sm:$0xff]  ;;  %288 = vst [vmem:[%s2607_s27 + $0x198] sm:$0xff] %v287_v51  ;;  %v293_v54 = vld [vmem:[%s2602_s26 + $0x350] sm:$0xff] }
  0x2c   : > { %290 = vst [vmem:[%s2607_s27 + $0x1a0] sm:$0xff] %v289_v52  ;;  %292 = vst [vmem:[%s2607_s27 + $0x1a8] sm:$0xff] %v291_v53  ;;  %v295_v55 = vld [vmem:[%s2602_s26 + $0x358] sm:$0xff]  ;;  %v297_v56 = vld [vmem:[%s2602_s26 + $0x380] sm:$0xff] }
  0x2d   : > { %294 = vst [vmem:[%s2607_s27 + $0x1b0] sm:$0xff] %v293_v54  ;;  %296 = vst [vmem:[%s2607_s27 + $0x1b8] sm:$0xff] %v295_v55  ;;  %v299_v57 = vld [vmem:[%s2602_s26 + $0x388] sm:$0xff]  ;;  %v301_v58 = vld [vmem:[%s2602_s26 + $0x390] sm:$0xff] }
  0x2e   : > { %298 = vst [vmem:[%s2607_s27 + $0x1c0] sm:$0xff] %v297_v56  ;;  %v303_v59 = vld [vmem:[%s2602_s26 + $0x398] sm:$0xff]  ;;  %300 = vst [vmem:[%s2607_s27 + $0x1c8] sm:$0xff] %v299_v57  ;;  %v305_v60 = vld [vmem:[%s2602_s26 + $0x3c0] sm:$0xff] }
  0x2f   : > { %302 = vst [vmem:[%s2607_s27 + $0x1d0] sm:$0xff] %v301_v58  ;;  %304 = vst [vmem:[%s2607_s27 + $0x1d8] sm:$0xff] %v303_v59  ;;  %v307_v61 = vld [vmem:[%s2602_s26 + $0x3c8] sm:$0xff]  ;;  %v309_v62 = vld [vmem:[%s2602_s26 + $0x3d0] sm:$0xff] }
  0x30   : > { %306 = vst [vmem:[%s2607_s27 + $0x1e0] sm:$0xff] %v305_v60  ;;  %308 = vst [vmem:[%s2607_s27 + $0x1e8] sm:$0xff] %v307_v61  ;;  %v311_v63 = vld [vmem:[%s2602_s26 + $0x3d8] sm:$0xff] }
  0x31   : > { %310 = vst [vmem:[%s2607_s27 + $0x1f0] sm:$0xff] %v309_v62  ;;  %312 = vst [vmem:[%s2607_s27 + $0x1f8] sm:$0xff] %v311_v63 }
  0x32 PF: > { %p1997_p6 = scmp.ge.s32.totalorder %s2536_s16, 1  ;;  %p329_p7 = scmp.lt.s32.totalorder %s2536_s16, 3 }
  0x34   : > { %p330_p8 = pnand %p1997_p6, %p329_p7 }
  0x35   : > { %s336_s28 = sand.u32 (!%p330_p8), 1, %s2520_s12   ;;  %s1999_s29 = sshll.u32 (!%p330_p8), %s2528_s14, 7 }
  0x36   : > { %333 = sbr.rel (%p330_p8) target bundleno = 486 (0x1e6), region = 47  ;;  %s1998_s30 = sshll.u32 (!%p330_p8), %s336_s28, 9 }
  0x37   : > { %p380_p9 = scmp.lt.s32.totalorder (!%p330_p8), %s1999_s29, 255  ;;  %s2743_s8 = scalar_lea.vmem (!%p330_p8), [#allocation3], %s1998_s30 }
  0x38   : > { %p2001_p10 = scmp.ne.s32.totalorder (!%p330_p8), %s2528_s14, 0 }
  0x3d   : > { %s3000_s29 = smov (!%p380_p9, %s1999_s29), 255  ;;  %408 = sbr.rel (%p2001_p10) target bundleno = 71 (0x47), region = 55 }
  0x3e   : > { %s2000_s4 = sshll.u32 %s3000_s29, 2  ;;  %v2538_v0 = vmov (!%p2001_p10), 0.0  }
  0x3f   : > { %s2741_s7 = scalar_lea.vmem %s2990_s1, %s2000_s4  ;;  %409 = vst [vmem:[#allocation2] sm:$0xff] (!%p2001_p10), %v2538_v0  ;;  %410 = vst [vmem:[#allocation2 + $0x8] sm:$0xff] (!%p2001_p10), %v2538_v0 }
  0x40   : > { %411 = vst [vmem:[#allocation2 + $0x10] sm:$0xff] (!%p2001_p10), %v2538_v0  ;;  %412 = vst [vmem:[#allocation2 + $0x18] sm:$0xff] (!%p2001_p10), %v2538_v0 }
  0x41   : > { %413 = vst [vmem:[#allocation2 + $0x20] sm:$0xff] (!%p2001_p10), %v2538_v0  ;;  %414 = vst [vmem:[#allocation2 + $0x28] sm:$0xff] (!%p2001_p10), %v2538_v0 }
  0x42   : > { %415 = vst [vmem:[#allocation2 + $0x30] sm:$0xff] (!%p2001_p10), %v2538_v0  ;;  %416 = vst [vmem:[#allocation2 + $0x38] sm:$0xff] (!%p2001_p10), %v2538_v0 }
  0x43   : > { %417 = vst [vmem:[#allocation2 + $0x40] sm:$0xff] (!%p2001_p10), %v2538_v0  ;;  %418 = vst [vmem:[#allocation2 + $0x48] sm:$0xff] (!%p2001_p10), %v2538_v0 }
  0x44   : > { %419 = vst [vmem:[#allocation2 + $0x50] sm:$0xff] %v2538_v0  ;;  %420 = vst [vmem:[#allocation2 + $0x58] sm:$0xff] %v2538_v0 }
  0x45   : > { %421 = vst [vmem:[#allocation2 + $0x60] sm:$0xff] %v2538_v0  ;;  %422 = vst [vmem:[#allocation2 + $0x68] sm:$0xff] %v2538_v0 }
  0x46   : > { %423 = vst [vmem:[#allocation2 + $0x70] sm:$0xff] %v2538_v0  ;;  %424 = vst [vmem:[#allocation2 + $0x78] sm:$0xff] %v2538_v0 }
  0x47 PF: > { %v2434_v1 = vld [vmem:[%s2741_s7 + $0x40] sm:$0xff]   ;;  %v2438_v5 = vld [vmem:[%s2741_s7 + $0x48] sm:$0xff]   ;;  %v2442_v9 = vld [vmem:[%s2741_s7 + $0x50] sm:$0xff]   ;;  %p2130_p11 = scmp.ne.s32.totalorder %s2528_s14, 1 }
  0x48   : > { %v2435_v2 = vld [vmem:[%s2741_s7 + $0xc0] sm:$0xff]   ;;  %2137 = vmatprep.subr.bf16.mxu0 %v2434_v1  ;;  %v2439_v6 = vld [vmem:[%s2741_s7 + $0xc8] sm:$0xff]   ;;  %v2443_v10 = vld [vmem:[%s2741_s7 + $0xd0] sm:$0xff]   ;;  %vm1851_vm0 = vcmask (!%p2130_p11), 1040384  }
  0x49   : > { %v2436_v3 = vld [vmem:[%s2741_s7] sm:$0xff]   ;;  %2201 = vmatprep.subr.bf16.mxu1 %v2435_v2  ;;  %v2440_v7 = vld [vmem:[%s2741_s7 + $0x8] sm:$0xff]   ;;  %v2444_v11 = vld [vmem:[%s2741_s7 + $0x10] sm:$0xff]  }
  0x4a   : > { %v2437_v4 = vld [vmem:[%s2741_s7 + $0x80] sm:$0xff]   ;;  %2138 = vmatpush3.bf16.msra.mxu0 %v2436_v3  ;;  %v2441_v8 = vld [vmem:[%s2741_s7 + $0x88] sm:$0xff]   ;;  %v2445_v12 = vld [vmem:[%s2741_s7 + $0x90] sm:$0xff]  }
  0x4b   : > { %2202 = vmatpush3.bf16.msra.mxu1 %v2437_v4  ;;  %2139 = vmatprep.subr.bf16.mxu0 %v2438_v5  ;;  %v2446_v13 = vld [vmem:[%s2741_s7 + $0x58] sm:$0xff]   ;;  %v2450_v17 = vld [vmem:[%s2741_s7 + $0x60] sm:$0xff]   ;;  %v2454_v21 = vld [vmem:[%s2741_s7 + $0x68] sm:$0xff]  }
  0x4c   : > { %2203 = vmatprep.subr.bf16.mxu1 %v2439_v6  ;;  %v2447_v14 = vld [vmem:[%s2741_s7 + $0xd8] sm:$0xff]   ;;  %v2451_v18 = vld [vmem:[%s2741_s7 + $0xe0] sm:$0xff]   ;;  %v2455_v22 = vld [vmem:[%s2741_s7 + $0xe8] sm:$0xff]  }
  0x4d   : > { %v2448_v15 = vld [vmem:[%s2741_s7 + $0x18] sm:$0xff]   ;;  %v2452_v19 = vld [vmem:[%s2741_s7 + $0x20] sm:$0xff]   ;;  %v2456_v23 = vld [vmem:[%s2741_s7 + $0x28] sm:$0xff]  }
  0x4e   : > { %2140 = vmatpush3.bf16.msra.mxu0 %v2440_v7  ;;  %v2449_v16 = vld [vmem:[%s2741_s7 + $0x98] sm:$0xff]   ;;  %v2453_v20 = vld [vmem:[%s2741_s7 + $0xa0] sm:$0xff]   ;;  %v2457_v24 = vld [vmem:[%s2741_s7 + $0xa8] sm:$0xff]  }
  0x4f   : > { %2204 = vmatpush3.bf16.msra.mxu1 %v2441_v8  ;;  %2141 = vmatprep.subr.bf16.mxu0 %v2442_v9  ;;  %v2458_v25 = vld [vmem:[%s2741_s7 + $0x70] sm:$0xff]   ;;  %v2462_v29 = vld [vmem:[%s2741_s7 + $0x78] sm:$0xff]   ;;  %v441_v33 = vld [vmem:[%s2743_s8] sm:$0xff] }
  0x50   : > { %2205 = vmatprep.subr.bf16.mxu1 %v2443_v10  ;;  %v2459_v26 = vld [vmem:[%s2741_s7 + $0xf0] sm:$0xff]   ;;  %v2463_v30 = vld [vmem:[%s2741_s7 + $0xf8] sm:$0xff]   ;;  %v445_v34 = vld [vmem:[%s2743_s8 + $0x20] sm:$0xff] }
  0x51   : > { %v2460_v27 = vld [vmem:[%s2741_s7 + $0x30] sm:$0xff]   ;;  %v2464_v31 = vld [vmem:[%s2741_s7 + $0x38] sm:$0xff]   ;;  %v442_v35 = vld [vmem:[%s2743_s8 + $0x8] sm:$0xff]  ;;  %v2002_v36 = vcombine.low %v441_v33, %v445_v34  ;;  %v2003_v37 = vcombine.high %v441_v33, %v445_v34 }
  0x52   : > { %2142 = vmatpush3.bf16.msra.mxu0 %v2444_v11  ;;  %v2461_v28 = vld [vmem:[%s2741_s7 + $0xb0] sm:$0xff]   ;;  %v2465_v32 = vld [vmem:[%s2741_s7 + $0xb8] sm:$0xff]   ;;  %v446_v38 = vld [vmem:[%s2743_s8 + $0x28] sm:$0xff] }
  0x53   : > { %2206 = vmatpush3.bf16.msra.mxu1 %v2445_v12  ;;  %2143 = vmatprep.subr.bf16.mxu0 %v2446_v13  ;;  %v2004_v39 = vcombine.low %v442_v35, %v446_v38  ;;  %v2005_v40 = vcombine.high %v442_v35, %v446_v38  ;;  %v2466_v41 = vld [vmem:[%s2741_s7 + $0x140] sm:$0xff]   ;;  %v450_v48 = vld [vmem:[%s2743_s8 + $0x48] sm:$0xff]  ;;  %v2474_v63 = vld [vmem:[%s2741_s7 + $0x150] sm:$0xff]  }
  0x54   : > { %2207 = vmatprep.subr.bf16.mxu1 %v2447_v14  ;;  %1369 = vmatprep.mubr.bf16.mxu0 %v2003_v37  ;;  %v2467_v42 = vld [vmem:[%s2741_s7 + $0x100] sm:$0xff]   ;;  %v454_v49 = vld [vmem:[%s2743_s8 + $0x68] sm:$0xff]  ;;  %v2475_v0 = vld [vmem:[%s2741_s7 + $0x110] sm:$0xff]  }
  0x55   : > { %1466 = vmatprep.mubr.bf16.mxu1 %v2005_v40  ;;  %v2468_v43 = vld [vmem:[%s2741_s7 + $0x1c0] sm:$0xff]   ;;  %v2013_v50 = vcombine.high %v450_v48, %v454_v49  ;;  %v2470_v51 = vld [vmem:[%s2741_s7 + $0x148] sm:$0xff]   ;;  %v2012_v54 = vcombine.low %v450_v48, %v454_v49  ;;  %v2476_v1 = vld [vmem:[%s2741_s7 + $0x1d0] sm:$0xff]  }
  0x56   : > { %2144 = vmatpush3.bf16.msra.mxu0 %v2448_v15  ;;  %v2469_v44 = vld [vmem:[%s2741_s7 + $0x180] sm:$0xff]   ;;  %v2471_v53 = vld [vmem:[%s2741_s7 + $0x108] sm:$0xff]   ;;  %v2477_v2 = vld [vmem:[%s2741_s7 + $0x190] sm:$0xff]  }
  0x57   : > { %2208 = vmatpush3.bf16.msra.mxu1 %v2449_v16  ;;  %2145 = vmatprep.subr.bf16.mxu0 %v2450_v17  ;;  %v449_v45 = vld [vmem:[%s2743_s8 + $0x40] sm:$0xff]  ;;  %v2472_v55 = vld [vmem:[%s2741_s7 + $0x1c8] sm:$0xff]   ;;  %v2478_v11 = vld [vmem:[%s2741_s7 + $0x158] sm:$0xff]  }
  0x58   : > { %2209 = vmatprep.subr.bf16.mxu1 %v2451_v18  ;;  %v453_v46 = vld [vmem:[%s2743_s8 + $0x60] sm:$0xff]  ;;  %v2473_v56 = vld [vmem:[%s2741_s7 + $0x188] sm:$0xff]   ;;  %v2479_v12 = vld [vmem:[%s2741_s7 + $0x118] sm:$0xff]  }
  0x59   : > { %v2011_v47 = vcombine.high %v449_v45, %v453_v46  ;;  %v2010_v52 = vcombine.low %v449_v45, %v453_v46  ;;  %v457_v57 = vld [vmem:[%s2743_s8 + $0x80] sm:$0xff]  ;;  %v458_v59 = vld [vmem:[%s2743_s8 + $0x88] sm:$0xff]  ;;  %v2480_v13 = vld [vmem:[%s2741_s7 + $0x1d8] sm:$0xff]  }
  0x5a   : > { %2146 = vmatpush3.bf16.msra.mxu0 %v2452_v19  ;;  %v461_v58 = vld [vmem:[%s2743_s8 + $0xa0] sm:$0xff]  ;;  %v462_v60 = vld [vmem:[%s2743_s8 + $0xa8] sm:$0xff]  ;;  %v2481_v14 = vld [vmem:[%s2741_s7 + $0x198] sm:$0xff]  }
  0x5b   : > { %2210 = vmatpush3.bf16.msra.mxu1 %v2453_v20  ;;  %2147 = vmatprep.subr.bf16.mxu0 %v2454_v21  ;;  %v2019_v61 = vcombine.high %v457_v57, %v461_v58  ;;  %v2021_v62 = vcombine.high %v458_v59, %v462_v60  ;;  %v2018_v3 = vcombine.low %v457_v57, %v461_v58  ;;  %v465_v4 = vld [vmem:[%s2743_s8 + $0xc0] sm:$0xff]  ;;  %v466_v6 = vld [vmem:[%s2743_s8 + $0xc8] sm:$0xff]  ;;  %v2491_v40 = vld [vmem:[%s2741_s7 + $0x130] sm:$0xff]  }
  0x5c   : > { %2211 = vmatprep.subr.bf16.mxu1 %v2455_v22  ;;  %v469_v5 = vld [vmem:[%s2743_s8 + $0xe0] sm:$0xff]  ;;  %v2020_v7 = vcombine.low %v458_v59, %v462_v60  ;;  %v470_v9 = vld [vmem:[%s2743_s8 + $0xe8] sm:$0xff]  ;;  %v2495_v49 = vld [vmem:[%s2741_s7 + $0x138] sm:$0xff]  }
  0x5d   : > { %v2027_v8 = vcombine.high %v465_v4, %v469_v5  ;;  %v2029_v10 = vcombine.high %v466_v6, %v470_v9  ;;  %v473_v15 = vld [vmem:[%s2743_s8 + $0x100] sm:$0xff]  ;;  %v474_v17 = vld [vmem:[%s2743_s8 + $0x108] sm:$0xff]  ;;  %v2026_v20 = vcombine.low %v465_v4, %v469_v5  ;;  %v2028_v22 = vcombine.low %v466_v6, %v470_v9  ;;  %v452_v9 = vld [vmem:[%s2743_s8 + $0x58] sm:$0xff] }
  0x5e   : > { %2148 = vmatpush3.bf16.msra.mxu0 %v2456_v23  ;;  %v477_v16 = vld [vmem:[%s2743_s8 + $0x120] sm:$0xff]  ;;  %v478_v18 = vld [vmem:[%s2743_s8 + $0x128] sm:$0xff] }
  0x5f   : > { %2212 = vmatpush3.bf16.msra.mxu1 %v2457_v24  ;;  %2149 = vmatprep.subr.bf16.mxu0 %v2458_v25  ;;  %v2482_v19 = vld [vmem:[%s2741_s7 + $0x160] sm:$0xff]   ;;  %v2035_v23 = vcombine.high %v473_v15, %v477_v16  ;;  %v2037_v25 = vcombine.high %v474_v17, %v478_v18  ;;  %v2488_v33 = vld [vmem:[%s2741_s7 + $0x1e8] sm:$0xff]   ;;  %v2034_v35 = vcombine.low %v473_v15, %v477_v16  ;;  %v459_v15 = vld [vmem:[%s2743_s8 + $0x90] sm:$0xff] }
  0x60   : > { %2213 = vmatprep.subr.bf16.mxu1 %v2459_v26  ;;  %v2483_v21 = vld [vmem:[%s2741_s7 + $0x120] sm:$0xff]   ;;  %v2489_v34 = vld [vmem:[%s2741_s7 + $0x1a8] sm:$0xff]   ;;  %v463_v16 = vld [vmem:[%s2743_s8 + $0xb0] sm:$0xff] }
  0x61   : > { %v2484_v24 = vld [vmem:[%s2741_s7 + $0x1e0] sm:$0xff]   ;;  %v490_v45 = vld [vmem:[%s2743_s8 + $0x188] sm:$0xff] }
  0x62   : > { %2150 = vmatpush3.bf16.msra.mxu0 %v2460_v27  ;;  %v2485_v26 = vld [vmem:[%s2741_s7 + $0x1a0] sm:$0xff]   ;;  %v494_v46 = vld [vmem:[%s2743_s8 + $0x1a8] sm:$0xff] }
  0x63   : > { %2214 = vmatpush3.bf16.msra.mxu1 %v2461_v28  ;;  %2151 = vmatprep.subr.bf16.mxu0 %v2462_v29  ;;  %v481_v27 = vld [vmem:[%s2743_s8 + $0x140] sm:$0xff]  ;;  %v2486_v29 = vld [vmem:[%s2741_s7 + $0x168] sm:$0xff]   ;;  %v2052_v60 = vcombine.low %v490_v45, %v494_v46 }
  0x64   : > { %2215 = vmatprep.subr.bf16.mxu1 %v2463_v30  ;;  %v485_v28 = vld [vmem:[%s2743_s8 + $0x160] sm:$0xff]  ;;  %v482_v30 = vld [vmem:[%s2743_s8 + $0x148] sm:$0xff] }
  0x65   : > { %v2043_v37 = vcombine.high %v481_v27, %v485_v28  ;;  %v2042_v48 = vcombine.low %v481_v27, %v485_v28  ;;  %v498_v57 = vld [vmem:[%s2743_s8 + $0x1c8] sm:$0xff]  ;;  %v2022_v27 = vcombine.low %v459_v15, %v463_v16 }
  0x66   : > { %2152 = vmatpush3.bf16.msra.mxu0 %v2464_v31  ;;  %v486_v31 = vld [vmem:[%s2743_s8 + $0x168] sm:$0xff] }
  0x67   : > { %2216 = vmatpush3.bf16.msra.mxu1 %v2465_v32  ;;  %2265 = vmatprep.subr.bf16.mxu0 %v2466_v41  ;;  %v2487_v32 = vld [vmem:[%s2741_s7 + $0x128] sm:$0xff]   ;;  %v2045_v38 = vcombine.high %v482_v30, %v486_v31  ;;  %v2492_v41 = vld [vmem:[%s2741_s7 + $0x1f0] sm:$0xff]  }
  0x68   : > { %2329 = vmatprep.subr.bf16.mxu1 %v2468_v43  ;;  %v493_v43 = vld [vmem:[%s2743_s8 + $0x1a0] sm:$0xff]  ;;  %v502_v58 = vld [vmem:[%s2743_s8 + $0x1e8] sm:$0xff] }
  0x69   : > { %1370 = vmatmul.mubr.bf16.vlgmr.msra.gmra.mrb[0].mxu0 %v2002_v36  ;;  %v2036_v36 = vcombine.low %v474_v17, %v478_v18  ;;  %v2060_v4 = vcombine.low %v498_v57, %v502_v58  ;;  %v460_v17 = vld [vmem:[%s2743_s8 + $0x98] sm:$0xff] }
  0x6a   : > { %1467 = vmatmul.mubr.bf16.vlgmr.msra.gmra.mrb[0].mxu1 %v2004_v39  ;;  %2266 = vmatpush3.bf16.msra.mxu0 %v2467_v42  ;;  %v2490_v39 = vld [vmem:[%s2741_s7 + $0x170] sm:$0xff]   ;;  %v489_v42 = vld [vmem:[%s2743_s8 + $0x180] sm:$0xff]  ;;  %v464_v18 = vld [vmem:[%s2743_s8 + $0xb8] sm:$0xff] }
  0x6b   : > { %2330 = vmatpush3.bf16.msra.mxu1 %v2469_v44  ;;  %1377 = vmatprep.mubr.bf16.mxu0 %v2011_v47  ;;  %v2493_v44 = vld [vmem:[%s2741_s7 + $0x1b0] sm:$0xff]   ;;  %v2494_v47 = vld [vmem:[%s2741_s7 + $0x178] sm:$0xff]   ;;  %v2050_v59 = vcombine.low %v489_v42, %v493_v43  ;;  %v2024_v28 = vcombine.low %v460_v17, %v464_v18 }
  0x6c   : > { %1474 = vmatprep.mubr.bf16.mxu1 %v2013_v50  ;;  %2267 = vmatprep.subr.bf16.mxu0 %v2470_v51  ;;  %v2044_v50 = vcombine.low %v482_v30, %v486_v31  ;;  %v2051_v51 = vcombine.high %v489_v42, %v493_v43  ;;  %v475_v31 = vld [vmem:[%s2743_s8 + $0x110] sm:$0xff]  ;;  %v488_v42 = vld [vmem:[%s2743_s8 + $0x178] sm:$0xff] }
  0x6d   : > { %2331 = vmatprep.subr.bf16.mxu1 %v2472_v55  ;;  %v497_v55 = vld [vmem:[%s2743_s8 + $0x1c0] sm:$0xff] }
  0x6e   : > { %2268 = vmatpush3.bf16.msra.mxu0 %v2471_v53  ;;  %v2053_v53 = vcombine.high %v490_v45, %v494_v46 }
  0x6f   : > { %2332 = vmatpush3.bf16.msra.mxu1 %v2473_v56  ;;  %2269 = vmatprep.subr.bf16.mxu0 %v2474_v63  ;;  %v501_v56 = vld [vmem:[%s2743_s8 + $0x1e0] sm:$0xff]  ;;  %v443_v63 = vld [vmem:[%s2743_s8 + $0x10] sm:$0xff] }
  0x70   : > { %2333 = vmatprep.subr.bf16.mxu1 %v2476_v1  ;;  %v444_v1 = vld [vmem:[%s2743_s8 + $0x18] sm:$0xff] }
  0x71   : > { %1378 = vmatmul.mubr.bf16.gmra.mrb[4].mxu0 %v2010_v52  ;;  %v2496_v52 = vld [vmem:[%s2741_s7 + $0x1f8] sm:$0xff]  }
  0x72   : > { %1475 = vmatmul.mubr.bf16.gmra.mrb[4].mxu1 %v2012_v54  ;;  %1385 = vmatprep.mubr.bf16.mxu0 %v2019_v61  ;;  %v2497_v54 = vld [vmem:[%s2741_s7 + $0x1b8] sm:$0xff]   ;;  %v2059_v61 = vcombine.high %v497_v55, %v501_v56 }
  0x73   : > { %1482 = vmatprep.mubr.bf16.mxu1 %v2021_v62  ;;  %2270 = vmatpush3.bf16.msra.mxu0 %v2475_v0  ;;  %v2061_v62 = vcombine.high %v498_v57, %v502_v58  ;;  %v447_v0 = vld [vmem:[%s2743_s8 + $0x30] sm:$0xff]  ;;  %v500_v57 = vld [vmem:[%s2743_s8 + $0x1d8] sm:$0xff] }
  0x74   : > { %2334 = vmatpush3.bf16.msra.mxu1 %v2477_v2  ;;  %2271 = vmatprep.subr.bf16.mxu0 %v2478_v11  ;;  %v448_v2 = vld [vmem:[%s2743_s8 + $0x38] sm:$0xff]  ;;  %v2007_v5 = vcombine.high %v443_v63, %v447_v0  ;;  %v2006_v11 = vcombine.low %v443_v63, %v447_v0 }
  0x75   : > { %2335 = vmatprep.subr.bf16.mxu1 %v2480_v13  ;;  %v2009_v6 = vcombine.high %v444_v1, %v448_v2  ;;  %v504_v58 = vld [vmem:[%s2743_s8 + $0x1f8] sm:$0xff] }
  0x76   : > { %v2064_v0 = vcombine.low %v500_v57, %v504_v58 }
  0x77   : > { %2272 = vmatpush3.bf16.msra.mxu0 %v2479_v12  ;;  %v2008_v12 = vcombine.low %v444_v1, %v448_v2 }
  0x78   : > { %2336 = vmatpush3.bf16.msra.mxu1 %v2481_v14  ;;  %2273 = vmatprep.subr.bf16.mxu0 %v2482_v19 }
  0x79   : > { %1386 = vmatmul.mubr.bf16.gmra.mrb[8].mxu0 %v2018_v3  ;;  %2337 = vmatprep.subr.bf16.mxu1 %v2484_v24  ;;  %v2058_v3 = vcombine.low %v497_v55, %v501_v56  ;;  %v471_v24 = vld [vmem:[%s2743_s8 + $0xf0] sm:$0xff] }
  0x7a   : > { %1483 = vmatmul.mubr.bf16.gmra.mrb[8].mxu1 %v2020_v7  ;;  %1393 = vmatprep.mubr.bf16.mxu0 %v2027_v8  ;;  %v451_v7 = vld [vmem:[%s2743_s8 + $0x50] sm:$0xff] }
  0x7b   : > { %1490 = vmatprep.mubr.bf16.mxu1 %v2029_v10  ;;  %2274 = vmatpush3.bf16.msra.mxu0 %v2483_v21  ;;  %v455_v8 = vld [vmem:[%s2743_s8 + $0x70] sm:$0xff]  ;;  %v456_v10 = vld [vmem:[%s2743_s8 + $0x78] sm:$0xff]  ;;  %v2023_v21 = vcombine.high %v459_v15, %v463_v16 }
  0x7c   : > { %2338 = vmatpush3.bf16.msra.mxu1 %v2485_v26  ;;  %2275 = vmatprep.subr.bf16.mxu0 %v2486_v29  ;;  %v2015_v13 = vcombine.high %v451_v7, %v455_v8  ;;  %v2017_v14 = vcombine.high %v452_v9, %v456_v10  ;;  %v2014_v19 = vcombine.low %v451_v7, %v455_v8  ;;  %v472_v26 = vld [vmem:[%s2743_s8 + $0xf8] sm:$0xff]  ;;  %v499_v55 = vld [vmem:[%s2743_s8 + $0x1d0] sm:$0xff] }
  0x7d   : > { %2339 = vmatprep.subr.bf16.mxu1 %v2488_v33  ;;  %v476_v33 = vld [vmem:[%s2743_s8 + $0x118] sm:$0xff]  ;;  %v503_v56 = vld [vmem:[%s2743_s8 + $0x1f0] sm:$0xff] }
  0x7e   : > { %v2062_v63 = vcombine.low %v499_v55, %v503_v56 }
  0x7f   : > { %2276 = vmatpush3.bf16.msra.mxu0 %v2487_v32  ;;  %v479_v32 = vld [vmem:[%s2743_s8 + $0x130] sm:$0xff] }
  0x80   : > { %2340 = vmatpush3.bf16.msra.mxu1 %v2489_v34  ;;  %2277 = vmatprep.subr.bf16.mxu0 %v2490_v39  ;;  %v480_v34 = vld [vmem:[%s2743_s8 + $0x138] sm:$0xff]  ;;  %v483_v39 = vld [vmem:[%s2743_s8 + $0x150] sm:$0xff]  ;;  %v2038_v43 = vcombine.low %v475_v31, %v479_v32 }
  0x81   : > { %1394 = vmatmul.mubr.bf16.gmra.mrb[12].mxu0 %v2026_v20  ;;  %2341 = vmatprep.subr.bf16.mxu1 %v2492_v41  ;;  %v2016_v20 = vcombine.low %v452_v9, %v456_v10  ;;  %v484_v41 = vld [vmem:[%s2743_s8 + $0x158] sm:$0xff] }
  0x82   : > { %1491 = vmatmul.mubr.bf16.gmra.mrb[12].mxu1 %v2028_v22  ;;  %1401 = vmatprep.mubr.bf16.mxu0 %v2035_v23  ;;  %v2025_v22 = vcombine.high %v460_v17, %v464_v18  ;;  %v467_v23 = vld [vmem:[%s2743_s8 + $0xd0] sm:$0xff]  ;;  %v2049_v46 = vcombine.high %v484_v41, %v488_v42 }
  0x83   : > { %1498 = vmatprep.mubr.bf16.mxu1 %v2037_v25  ;;  %2278 = vmatpush3.bf16.msra.mxu0 %v2491_v40  ;;  %v468_v25 = vld [vmem:[%s2743_s8 + $0xd8] sm:$0xff]  ;;  %v2031_v29 = vcombine.high %v467_v23, %v471_v24  ;;  %v487_v40 = vld [vmem:[%s2743_s8 + $0x170] sm:$0xff] }
  0x84   : > { %2342 = vmatpush3.bf16.msra.mxu1 %v2493_v44  ;;  %2279 = vmatprep.subr.bf16.mxu0 %v2494_v47  ;;  %v2033_v30 = vcombine.high %v468_v25, %v472_v26  ;;  %v2040_v44 = vcombine.low %v476_v33, %v480_v34  ;;  %v2047_v45 = vcombine.high %v483_v39, %v487_v40  ;;  %v491_v47 = vld [vmem:[%s2743_s8 + $0x190] sm:$0xff] }
  0x85   : > { %2343 = vmatprep.subr.bf16.mxu1 %v2496_v52  ;;  %v2048_v52 = vcombine.low %v484_v41, %v488_v42 }
  0x87   : > { %2280 = vmatpush3.bf16.msra.mxu0 %v2495_v49  ;;  %v492_v49 = vld [vmem:[%s2743_s8 + $0x198] sm:$0xff] }
  0x88   : > { %2344 = vmatpush3.bf16.msra.mxu1 %v2497_v54 }
  0x89   : > { %1402 = vmatmul.mubr.bf16.gmra.mrb[16].mxu0 %v2034_v35  ;;  %v2030_v35 = vcombine.low %v467_v23, %v471_v24 }
  0x8a   : > { %1499 = vmatmul.mubr.bf16.gmra.mrb[16].mxu1 %v2036_v36  ;;  %1409 = vmatprep.mubr.bf16.mxu0 %v2043_v37  ;;  %v2032_v36 = vcombine.low %v468_v25, %v472_v26  ;;  %v2039_v37 = vcombine.high %v475_v31, %v479_v32 }
  0x8b   : > { %1506 = vmatprep.mubr.bf16.mxu1 %v2045_v38  ;;  %v2041_v38 = vcombine.high %v476_v33, %v480_v34 }
  0x91   : > { %1410 = vmatmul.mubr.bf16.gmra.mrb[20].mxu0 %v2042_v48  ;;  %v495_v48 = vld [vmem:[%s2743_s8 + $0x1b0] sm:$0xff] }
  0x92   : > { %1507 = vmatmul.mubr.bf16.gmra.mrb[20].mxu1 %v2044_v50  ;;  %1417 = vmatprep.mubr.bf16.mxu0 %v2051_v51  ;;  %v496_v50 = vld [vmem:[%s2743_s8 + $0x1b8] sm:$0xff]  ;;  %v2046_v51 = vcombine.low %v483_v39, %v487_v40 }
  0x93   : > { %1514 = vmatprep.mubr.bf16.mxu1 %v2053_v53  ;;  %v2055_v53 = vcombine.high %v491_v47, %v495_v48  ;;  %v2057_v54 = vcombine.high %v492_v49, %v496_v50 }
  0x99   : > { %1418 = vmatmul.mubr.bf16.gmra.mrb[24].mxu0 %v2050_v59  ;;  %v2054_v59 = vcombine.low %v491_v47, %v495_v48 }
  0x9a   : > { %1515 = vmatmul.mubr.bf16.gmra.mrb[24].mxu1 %v2052_v60  ;;  %1425 = vmatprep.mubr.bf16.mxu0 %v2059_v61  ;;  %v2056_v60 = vcombine.low %v492_v49, %v496_v50  ;;  %v2063_v61 = vcombine.high %v499_v55, %v503_v56 }
  0x9b   : > { %1522 = vmatprep.mubr.bf16.mxu1 %v2061_v62  ;;  %v2065_v62 = vcombine.high %v500_v57, %v504_v58 }
  0xa1   : > { %1426 = vmatmul.mubr.bf16.gmra.mrb[28].mxu0 %v2058_v3 }
  0xa2   : > { %1523 = vmatmul.mubr.bf16.gmra.mrb[28].mxu1 %v2060_v4  ;;  %1563 = vmatprep.mubr.bf16.mxu0 %v2007_v5 }
  0xa3   : > { %1660 = vmatprep.mubr.bf16.mxu1 %v2009_v6 }
  0xa9   : > { %1564 = vmatmul.mubr.bf16.vlgmr.msra.gmra.mrb[32].mxu0 %v2006_v11 }
  0xaa   : > { %1661 = vmatmul.mubr.bf16.vlgmr.msra.gmra.mrb[32].mxu1 %v2008_v12  ;;  %1571 = vmatprep.mubr.bf16.mxu0 %v2015_v13 }
  0xab   : > { %1668 = vmatprep.mubr.bf16.mxu1 %v2017_v14 }
  0xb1   : > { %1572 = vmatmul.mubr.bf16.gmra.mrb[36].mxu0 %v2014_v19 }
  0xb2   : > { %1669 = vmatmul.mubr.bf16.gmra.mrb[36].mxu1 %v2016_v20  ;;  %1579 = vmatprep.mubr.bf16.mxu0 %v2023_v21 }
  0xb3   : > { %1676 = vmatprep.mubr.bf16.mxu1 %v2025_v22 }
  0xb9   : > { %1580 = vmatmul.mubr.bf16.gmra.mrb[40].mxu0 %v2022_v27 }
  0xba   : > { %1677 = vmatmul.mubr.bf16.gmra.mrb[40].mxu1 %v2024_v28  ;;  %1587 = vmatprep.mubr.bf16.mxu0 %v2031_v29 }
  0xbb   : > { %1684 = vmatprep.mubr.bf16.mxu1 %v2033_v30 }
  0xc1   : > { %1588 = vmatmul.mubr.bf16.gmra.mrb[44].mxu0 %v2030_v35 }
  0xc2   : > { %1685 = vmatmul.mubr.bf16.gmra.mrb[44].mxu1 %v2032_v36  ;;  %1595 = vmatprep.mubr.bf16.mxu0 %v2039_v37 }
  0xc3   : > { %1692 = vmatprep.mubr.bf16.mxu1 %v2041_v38 }
  0xc9   : > { %1596 = vmatmul.mubr.bf16.gmra.mrb[48].mxu0 %v2038_v43 }
  0xca   : > { %1693 = vmatmul.mubr.bf16.gmra.mrb[48].mxu1 %v2040_v44  ;;  %1603 = vmatprep.mubr.bf16.mxu0 %v2047_v45 }
  0xcb   : > { %1700 = vmatprep.mubr.bf16.mxu1 %v2049_v46 }
  0xd1   : > { %1604 = vmatmul.mubr.bf16.gmra.mrb[52].mxu0 %v2046_v51 }
  0xd2   : > { %1701 = vmatmul.mubr.bf16.gmra.mrb[52].mxu1 %v2048_v52  ;;  %1611 = vmatprep.mubr.bf16.mxu0 %v2055_v53 }
  0xd3   : > { %1708 = vmatprep.mubr.bf16.mxu1 %v2057_v54 }
  0xd9   : > { %1612 = vmatmul.mubr.bf16.gmra.mrb[56].mxu0 %v2054_v59 }
  0xda   : > { %1709 = vmatmul.mubr.bf16.gmra.mrb[56].mxu1 %v2056_v60  ;;  %1619 = vmatprep.mubr.bf16.mxu0 %v2063_v61 }
  0xdb   : > { %1716 = vmatprep.mubr.bf16.mxu1 %v2065_v62 }
  0xe1   : > { %1620 = vmatmul.mubr.bf16.gmra.mrb[60].mxu0 %v2062_v63 }
  0xe2   : > { %1717 = vmatmul.mubr.bf16.gmra.mrb[60].mxu1 %v2064_v0 }
 0x13c   : > { %v2153_v1 = vpop.f32.mrb[0].mxu0 }
 0x13d   : > { %v2217_v2 = vpop.f32.mrb[0].mxu1  ;;  %v2154_v3 = vpop.f32.mrb[1].mxu0 }
 0x13e   : > { %v2155_v4 = vadd.f32 %v2154_v3, %v2153_v1  ;;  %v2218_v5 = vpop.f32.mrb[1].mxu1  ;;  %v2156_v6 = vpop.f32.mrb[2].mxu0 }
 0x13f   : > { %v2219_v7 = vadd.f32 %v2218_v5, %v2217_v2  ;;  %v2220_v8 = vpop.f32.mrb[2].mxu1  ;;  %v2157_v9 = vpop.f32.mrb[3].mxu0 }
 0x140   : > { %v2158_v10 = vadd.f32 %v2157_v9, %v2156_v6  ;;  %v2221_v11 = vpop.f32.mrb[3].mxu1 }
 0x141   : > { %v2874_v12 = vadd.f32 %v2219_v7, %v2155_v4  ;;  %v2222_v13 = vadd.f32 %v2221_v11, %v2220_v8 }
 0x143   : > { %v2876_v14 = vadd.f32 %v2222_v13, %v2158_v10 }
 0x144   : > { %v2159_v15 = vpop.f32.mrb[4].mxu0 }
 0x145   : > { %v2223_v16 = vpop.f32.mrb[4].mxu1  ;;  %v2160_v17 = vpop.f32.mrb[5].mxu0 }
 0x146   : > { %v2161_v18 = vadd.f32 %v2160_v17, %v2159_v15  ;;  %v2224_v19 = vpop.f32.mrb[5].mxu1  ;;  %v2162_v20 = vpop.f32.mrb[6].mxu0 }
 0x147   : > { %v2225_v21 = vadd.f32 %v2224_v19, %v2223_v16  ;;  %v2226_v22 = vpop.f32.mrb[6].mxu1  ;;  %v2163_v23 = vpop.f32.mrb[7].mxu0 }
 0x148   : > { %v2164_v24 = vadd.f32 %v2163_v23, %v2162_v20  ;;  %v2227_v25 = vpop.f32.mrb[7].mxu1 }
 0x149   : > { %v2878_v26 = vadd.f32 %v2225_v21, %v2161_v18  ;;  %v2228_v27 = vadd.f32 %v2227_v25, %v2226_v22 }
 0x14b   : > { %v2880_v28 = vadd.f32 %v2228_v27, %v2164_v24 }
 0x14c   : > { %v2165_v29 = vpop.f32.mrb[8].mxu0 }
 0x14d   : > { %v2229_v30 = vpop.f32.mrb[8].mxu1  ;;  %v2166_v31 = vpop.f32.mrb[9].mxu0 }
 0x14e   : > { %v2167_v32 = vadd.f32 %v2166_v31, %v2165_v29  ;;  %v2230_v33 = vpop.f32.mrb[9].mxu1  ;;  %v2168_v34 = vpop.f32.mrb[10].mxu0 }
 0x14f   : > { %v2231_v35 = vadd.f32 %v2230_v33, %v2229_v30  ;;  %v2232_v36 = vpop.f32.mrb[10].mxu1  ;;  %v2169_v37 = vpop.f32.mrb[11].mxu0 }
 0x150   : > { %v2170_v38 = vadd.f32 %v2169_v37, %v2168_v34  ;;  %v2233_v39 = vpop.f32.mrb[11].mxu1 }
 0x151   : > { %v2882_v40 = vadd.f32 %v2231_v35, %v2167_v32  ;;  %v2234_v41 = vadd.f32 %v2233_v39, %v2232_v36 }
 0x153   : > { %v2884_v42 = vadd.f32 %v2234_v41, %v2170_v38 }
 0x154   : > { %v2171_v43 = vpop.f32.mrb[12].mxu0 }
 0x155   : > { %v2235_v44 = vpop.f32.mrb[12].mxu1  ;;  %v2172_v45 = vpop.f32.mrb[13].mxu0 }
 0x156   : > { %v2173_v46 = vadd.f32 %v2172_v45, %v2171_v43  ;;  %v2236_v47 = vpop.f32.mrb[13].mxu1  ;;  %v2174_v48 = vpop.f32.mrb[14].mxu0 }
 0x157   : > { %v2237_v49 = vadd.f32 %v2236_v47, %v2235_v44  ;;  %v2238_v50 = vpop.f32.mrb[14].mxu1  ;;  %v2175_v51 = vpop.f32.mrb[15].mxu0 }
 0x158   : > { %v2176_v52 = vadd.f32 %v2175_v51, %v2174_v48  ;;  %v2239_v53 = vpop.f32.mrb[15].mxu1 }
 0x159   : > { %v2886_v54 = vadd.f32 %v2237_v49, %v2173_v46  ;;  %v2240_v55 = vadd.f32 %v2239_v53, %v2238_v50 }
 0x15b   : > { %v2888_v56 = vadd.f32 %v2240_v55, %v2176_v52 }
 0x15c   : > { %v2177_v57 = vpop.f32.mrb[16].mxu0 }
 0x15d   : > { %v2241_v58 = vpop.f32.mrb[16].mxu1  ;;  %v2178_v59 = vpop.f32.mrb[17].mxu0 }
 0x15e   : > { %v2179_v60 = vadd.f32 %v2178_v59, %v2177_v57  ;;  %v2242_v61 = vpop.f32.mrb[17].mxu1  ;;  %v2180_v62 = vpop.f32.mrb[18].mxu0 }
 0x15f   : > { %v2243_v63 = vadd.f32 %v2242_v61, %v2241_v58  ;;  %v2244_v0 = vpop.f32.mrb[18].mxu1  ;;  %v2181_v1 = vpop.f32.mrb[19].mxu0 }
 0x160   : > { %v2182_v2 = vadd.f32 %v2181_v1, %v2180_v62  ;;  %v2245_v3 = vpop.f32.mrb[19].mxu1 }
 0x161   : > { %v2890_v4 = vadd.f32 %v2243_v63, %v2179_v60  ;;  %v2246_v5 = vadd.f32 %v2245_v3, %v2244_v0 }
 0x163   : > { %v2892_v6 = vadd.f32 %v2246_v5, %v2182_v2 }
 0x164   : > { %v2183_v7 = vpop.f32.mrb[20].mxu0 }
 0x165   : > { %v2247_v8 = vpop.f32.mrb[20].mxu1  ;;  %v2184_v9 = vpop.f32.mrb[21].mxu0 }
 0x166   : > { %v2185_v10 = vadd.f32 %v2184_v9, %v2183_v7  ;;  %v2248_v11 = vpop.f32.mrb[21].mxu1  ;;  %v2186_v13 = vpop.f32.mrb[22].mxu0  ;;  %v425_v7 = vld [vmem:[#allocation2] sm:$0xff] }
 0x167   : > { %v2249_v15 = vadd.f32 %v2248_v11, %v2247_v8  ;;  %v2250_v16 = vpop.f32.mrb[22].mxu1  ;;  %v2187_v17 = vpop.f32.mrb[23].mxu0  ;;  %v426_v11 = vld [vmem:[#allocation2 + $0x8] sm:$0xff] }
 0x168   : > { %v2188_v18 = vadd.f32 %v2187_v17, %v2186_v13  ;;  %v2251_v19 = vpop.f32.mrb[23].mxu1 }
 0x169   : > { %v2894_v20 = vadd.f32 %v2249_v15, %v2185_v10  ;;  %v2252_v21 = vadd.f32 %v2251_v19, %v2250_v16 }
 0x16b   : > { %v2896_v22 = vadd.f32 %v2252_v21, %v2188_v18 }
 0x16c   : > { %v2189_v23 = vpop.f32.mrb[24].mxu0 }
 0x16d   : > { %v2253_v24 = vpop.f32.mrb[24].mxu1  ;;  %v2190_v25 = vpop.f32.mrb[25].mxu0 }
 0x16e   : > { %v2191_v27 = vadd.f32 %v2190_v25, %v2189_v23  ;;  %v2254_v29 = vpop.f32.mrb[25].mxu1  ;;  %v2192_v30 = vpop.f32.mrb[26].mxu0 }
 0x16f   : > { %v2255_v31 = vadd.f32 %v2254_v29, %v2253_v24  ;;  %v2256_v32 = vpop.f32.mrb[26].mxu1  ;;  %v2193_v33 = vpop.f32.mrb[27].mxu0 }
 0x170   : > { %v2194_v34 = vadd.f32 %v2193_v33, %v2192_v30  ;;  %v2257_v35 = vpop.f32.mrb[27].mxu1 }
 0x171   : > { %v2898_v36 = vadd.f32 %v2255_v31, %v2191_v27  ;;  %v2258_v37 = vadd.f32 %v2257_v35, %v2256_v32  ;;  %v428_v35 = vld [vmem:[#allocation2 + $0x18] sm:$0xff] }
 0x173   : > { %v2900_v38 = vadd.f32 %v2258_v37, %v2194_v34 }
 0x174   : > { %v2195_v39 = vpop.f32.mrb[28].mxu0 }
 0x175   : > { %v2259_v41 = vpop.f32.mrb[28].mxu1  ;;  %v2196_v43 = vpop.f32.mrb[29].mxu0 }
 0x176   : > { %v2197_v44 = vadd.f32 %v2196_v43, %v2195_v39  ;;  %v2260_v45 = vpop.f32.mrb[29].mxu1  ;;  %v2198_v46 = vpop.f32.mrb[30].mxu0 }
 0x177   : > { %v2261_v47 = vadd.f32 %v2260_v45, %v2259_v41  ;;  %v2262_v48 = vpop.f32.mrb[30].mxu1  ;;  %v2199_v49 = vpop.f32.mrb[31].mxu0 }
 0x178   : > { %v2200_v50 = vadd.f32 %v2199_v49, %v2198_v46  ;;  %v2263_v51 = vpop.f32.mrb[31].mxu1 }
 0x179   : > { %v2902_v52 = vadd.f32 %v2261_v47, %v2197_v44  ;;  %v2264_v53 = vadd.f32 %v2263_v51, %v2262_v48 }
 0x17b   : > { %v2904_v55 = vadd.f32 %v2264_v53, %v2200_v50 }
 0x17c   : > { %v2281_v57 = vpop.f32.mrb[32].mxu0 }
 0x17d   : > { %v2345_v58 = vpop.f32.mrb[32].mxu1  ;;  %v2282_v59 = vpop.f32.mrb[33].mxu0 }
 0x17e   : > { %v2283_v60 = vadd.f32 %v2282_v59, %v2281_v57  ;;  %v2346_v61 = vpop.f32.mrb[33].mxu1  ;;  %v2284_v62 = vpop.f32.mrb[34].mxu0 }
 0x17f   : > { %v2347_v63 = vadd.f32 %v2346_v61, %v2345_v58  ;;  %v2348_v0 = vpop.f32.mrb[34].mxu1  ;;  %v2285_v1 = vpop.f32.mrb[35].mxu0  ;;  %v430_v61 = vld [vmem:[#allocation2 + $0x28] sm:$0xff] }
 0x180   : > { %v1566_v2 = vadd.f32 %v2283_v60, %v2874_v12  ;;  %v2286_v3 = vadd.f32 %v2285_v1, %v2284_v62  ;;  %v2349_v5 = vpop.f32.mrb[35].mxu1 }
 0x181   : > { %v2350_v8 = vadd.f32 %v2349_v5, %v2348_v0 }
 0x182   : > { %v1663_v9 = vadd.f32 %v2347_v63, %v1566_v2  ;;  %v1569_v10 = vadd.f32 %v2286_v3, %v2876_v14  ;;  %v427_v14 = vld [vmem:[#allocation2 + $0x10] sm:$0xff] }
 0x184   : > { %v1725_v13 = vadd.f32 %v1663_v9, %v425_v7  ;;  %v1666_v15 = vadd.f32 %v2350_v8, %v1569_v10  ;;  %v2287_v16 = vpop.f32.mrb[36].mxu0 }
 0x185   : > { %v2351_v17 = vpop.f32.mrb[36].mxu1  ;;  %v2288_v18 = vpop.f32.mrb[37].mxu0 }
 0x186   : > { %1741 = vst [vmem:[#allocation2] sm:$0xff] %v1725_v13  ;;  %v1726_v19 = vadd.f32 %v1666_v15, %v426_v11  ;;  %v2289_v21 = vadd.f32 %v2288_v18, %v2287_v16  ;;  %v2352_v23 = vpop.f32.mrb[37].mxu1  ;;  %v2290_v24 = vpop.f32.mrb[38].mxu0 }
 0x187   : > { %v2353_v25 = vadd.f32 %v2352_v23, %v2351_v17  ;;  %v2354_v12 = vpop.f32.mrb[38].mxu1  ;;  %v2291_v27 = vpop.f32.mrb[39].mxu0 }
 0x188   : > { %1742 = vst [vmem:[#allocation2 + $0x8] sm:$0xff] %v1726_v19  ;;  %v1574_v29 = vadd.f32 %v2289_v21, %v2878_v26  ;;  %v2292_v30 = vadd.f32 %v2291_v27, %v2290_v24  ;;  %v2355_v31 = vpop.f32.mrb[39].mxu1  ;;  %v432_v19 = vld [vmem:[#allocation2 + $0x38] sm:$0xff] }
 0x189   : > { %v2356_v32 = vadd.f32 %v2355_v31, %v2354_v12 }
 0x18a   : > { %v1671_v33 = vadd.f32 %v2353_v25, %v1574_v29  ;;  %v1577_v34 = vadd.f32 %v2292_v30, %v2880_v28  ;;  %v429_v28 = vld [vmem:[#allocation2 + $0x20] sm:$0xff] }
 0x18c   : > { %v1727_v37 = vadd.f32 %v1671_v33, %v427_v14  ;;  %v1674_v39 = vadd.f32 %v2356_v32, %v1577_v34  ;;  %v2293_v41 = vpop.f32.mrb[40].mxu0 }
 0x18d   : > { %v2357_v43 = vpop.f32.mrb[40].mxu1  ;;  %v2294_v44 = vpop.f32.mrb[41].mxu0 }
 0x18e   : > { %1743 = vst [vmem:[#allocation2 + $0x10] sm:$0xff] %v1727_v37  ;;  %v1728_v45 = vadd.f32 %v1674_v39, %v428_v35  ;;  %v2295_v46 = vadd.f32 %v2294_v44, %v2293_v41  ;;  %v2358_v47 = vpop.f32.mrb[41].mxu1  ;;  %v2296_v48 = vpop.f32.mrb[42].mxu0 }
 0x18f   : > { %v2359_v49 = vadd.f32 %v2358_v47, %v2357_v43  ;;  %v2360_v26 = vpop.f32.mrb[42].mxu1  ;;  %v2297_v50 = vpop.f32.mrb[43].mxu0  ;;  %v434_v43 = vld [vmem:[#allocation2 + $0x48] sm:$0xff] }
 0x190   : > { %1744 = vst [vmem:[#allocation2 + $0x18] sm:$0xff] %v1728_v45  ;;  %v1582_v51 = vadd.f32 %v2295_v46, %v2882_v40  ;;  %v2298_v53 = vadd.f32 %v2297_v50, %v2296_v48  ;;  %v2361_v57 = vpop.f32.mrb[43].mxu1 }
 0x191   : > { %v2362_v58 = vadd.f32 %v2361_v57, %v2360_v26 }
 0x192   : > { %v1679_v59 = vadd.f32 %v2359_v49, %v1582_v51  ;;  %v1585_v60 = vadd.f32 %v2298_v53, %v2884_v42  ;;  %v431_v42 = vld [vmem:[#allocation2 + $0x30] sm:$0xff] }
 0x194   : > { %v1729_v62 = vadd.f32 %v1679_v59, %v429_v28  ;;  %v1682_v63 = vadd.f32 %v2362_v58, %v1585_v60  ;;  %v2299_v0 = vpop.f32.mrb[44].mxu0 }
 0x195   : > { %v2363_v1 = vpop.f32.mrb[44].mxu1  ;;  %v2300_v2 = vpop.f32.mrb[45].mxu0 }
 0x196   : > { %1745 = vst [vmem:[#allocation2 + $0x20] sm:$0xff] %v1729_v62  ;;  %v1730_v3 = vadd.f32 %v1682_v63, %v430_v61  ;;  %v2301_v5 = vadd.f32 %v2300_v2, %v2299_v0  ;;  %v2364_v7 = vpop.f32.mrb[45].mxu1  ;;  %v2302_v8 = vpop.f32.mrb[46].mxu0  ;;  %v436_v63 = vld [vmem:[#allocation2 + $0x58] sm:$0xff] }
 0x197   : > { %v2365_v9 = vadd.f32 %v2364_v7, %v2363_v1  ;;  %v2366_v40 = vpop.f32.mrb[46].mxu1  ;;  %v2303_v10 = vpop.f32.mrb[47].mxu0 }
 0x198   : > { %1746 = vst [vmem:[#allocation2 + $0x28] sm:$0xff] %v1730_v3  ;;  %v1590_v11 = vadd.f32 %v2301_v5, %v2886_v54  ;;  %v2304_v13 = vadd.f32 %v2303_v10, %v2302_v8  ;;  %v2367_v15 = vpop.f32.mrb[47].mxu1 }
 0x199   : > { %v2368_v16 = vadd.f32 %v2367_v15, %v2366_v40 }
 0x19a   : > { %v1687_v17 = vadd.f32 %v2365_v9, %v1590_v11  ;;  %v1593_v18 = vadd.f32 %v2304_v13, %v2888_v56  ;;  %v433_v56 = vld [vmem:[#allocation2 + $0x40] sm:$0xff] }
 0x19c   : > { %v1731_v21 = vadd.f32 %v1687_v17, %v431_v42  ;;  %v1690_v23 = vadd.f32 %v2368_v16, %v1593_v18  ;;  %v2305_v24 = vpop.f32.mrb[48].mxu0 }
 0x19d   : > { %v2369_v25 = vpop.f32.mrb[48].mxu1  ;;  %v2306_v12 = vpop.f32.mrb[49].mxu0 }
 0x19e   : > { %1747 = vst [vmem:[#allocation2 + $0x30] sm:$0xff] %v1731_v21  ;;  %v1732_v27 = vadd.f32 %v1690_v23, %v432_v19  ;;  %v2307_v29 = vadd.f32 %v2306_v12, %v2305_v24  ;;  %v2370_v30 = vpop.f32.mrb[49].mxu1  ;;  %v2308_v31 = vpop.f32.mrb[50].mxu0  ;;  %v438_v19 = vld [vmem:[#allocation2 + $0x68] sm:$0xff] }
 0x19f   : > { %v2371_v14 = vadd.f32 %v2370_v30, %v2369_v25  ;;  %v2372_v54 = vpop.f32.mrb[50].mxu1  ;;  %v2309_v32 = vpop.f32.mrb[51].mxu0 }
 0x1a0   : > { %1748 = vst [vmem:[#allocation2 + $0x38] sm:$0xff] %v1732_v27  ;;  %v1598_v33 = vadd.f32 %v2307_v29, %v2890_v4  ;;  %v2310_v34 = vadd.f32 %v2309_v32, %v2308_v31  ;;  %v2373_v35 = vpop.f32.mrb[51].mxu1 }
 0x1a1   : > { %v2374_v37 = vadd.f32 %v2373_v35, %v2372_v54 }
 0x1a2   : > { %v1695_v39 = vadd.f32 %v2371_v14, %v1598_v33  ;;  %v1601_v41 = vadd.f32 %v2310_v34, %v2892_v6  ;;  %v435_v6 = vld [vmem:[#allocation2 + $0x50] sm:$0xff] }
 0x1a4   : > { %v1733_v44 = vadd.f32 %v1695_v39, %v433_v56  ;;  %v1698_v45 = vadd.f32 %v2374_v37, %v1601_v41  ;;  %v2311_v46 = vpop.f32.mrb[52].mxu0  ;;  %v440_v39 = vld [vmem:[#allocation2 + $0x78] sm:$0xff] }
 0x1a5   : > { %v2375_v47 = vpop.f32.mrb[52].mxu1  ;;  %v2312_v48 = vpop.f32.mrb[53].mxu0 }
 0x1a6   : > { %1749 = vst [vmem:[#allocation2 + $0x40] sm:$0xff] %v1733_v44  ;;  %v1734_v49 = vadd.f32 %v1698_v45, %v434_v43  ;;  %v2313_v26 = vadd.f32 %v2312_v48, %v2311_v46  ;;  %v2376_v50 = vpop.f32.mrb[53].mxu1  ;;  %v2314_v51 = vpop.f32.mrb[54].mxu0  ;;  %v1761_v45 = vld [vmem:[#allocation2] sm:$0xff] (!%p2130_p11)  ;;  %v1762_v46 = vld [vmem:[#allocation2 + $0x8] sm:$0xff] (!%p2130_p11) }
 0x1a7   : > { %v2377_v53 = vadd.f32 %v2376_v50, %v2375_v47  ;;  %v2378_v4 = vpop.f32.mrb[54].mxu1  ;;  %v2315_v57 = vpop.f32.mrb[55].mxu0  ;;  %v1763_v47 = vld [vmem:[#allocation2 + $0x10] sm:$0xff] (!%p2130_p11)  ;;  %1777 = vst [vmem:[%s2991_s2] sm:$0xff] (!%p2130_p11), %v1761_v45  ;;  %1778 = vst [vmem:[%s2991_s2 + $0x8] sm:$0xff] (!%p2130_p11), %v1762_v46  ;;  %v1815_v48 = vmul.f32 (!%p2130_p11), %v1762_v46, %v1762_v46  ;;  %v1765_v50 = vld [vmem:[#allocation2 + $0x20] sm:$0xff] (!%p2130_p11) }
 0x1a8   : > { %1750 = vst [vmem:[#allocation2 + $0x48] sm:$0xff] %v1734_v49  ;;  %v1606_v28 = vadd.f32 %v2313_v26, %v2894_v20  ;;  %v2316_v58 = vadd.f32 %v2315_v57, %v2314_v51  ;;  %v2379_v59 = vpop.f32.mrb[55].mxu1  ;;  %1779 = vst [vmem:[%s2991_s2 + $0x10] sm:$0xff] (!%p2130_p11), %v1763_v47  ;;  %v1816_v49 = vmul.f32 (!%p2130_p11), %v1763_v47, %v1763_v47  ;;  %v1764_v26 = vld [vmem:[#allocation2 + $0x18] sm:$0xff] (!%p2130_p11)  ;;  %v1766_v51 = vld [vmem:[#allocation2 + $0x28] sm:$0xff] (!%p2130_p11) }
 0x1a9   : > { %v2380_v60 = vadd.f32 %v2379_v59, %v2378_v4  ;;  %1780 = vst [vmem:[%s2991_s2 + $0x18] sm:$0xff] (!%p2130_p11), %v1764_v26  ;;  %1781 = vst [vmem:[%s2991_s2 + $0x20] sm:$0xff] (!%p2130_p11), %v1765_v50  ;;  %v1768_v4 = vld [vmem:[#allocation2 + $0x38] sm:$0xff] (!%p2130_p11)  ;;  %v1817_v59 = vmul.f32 (!%p2130_p11), %v1764_v26, %v1764_v26 }
 0x1aa   : > { %v1703_v61 = vadd.f32 %v2377_v53, %v1606_v28  ;;  %v1609_v62 = vadd.f32 %v2316_v58, %v2896_v22  ;;  %v437_v22 = vld [vmem:[#allocation2 + $0x60] sm:$0xff]  ;;  %1782 = vst [vmem:[%s2991_s2 + $0x28] sm:$0xff] (!%p2130_p11), %v1766_v51  ;;  %v1767_v53 = vld [vmem:[#allocation2 + $0x30] sm:$0xff] (!%p2130_p11)  ;;  %1784 = vst [vmem:[%s2991_s2 + $0x38] sm:$0xff] (!%p2130_p11), %v1768_v4 }
 0x1ab   : > { %1783 = vst [vmem:[%s2991_s2 + $0x30] sm:$0xff] (!%p2130_p11), %v1767_v53 }
 0x1ac   : > { %v1735_v0 = vadd.f32 %v1703_v61, %v435_v6  ;;  %v1706_v1 = vadd.f32 %v2380_v60, %v1609_v62  ;;  %v2317_v2 = vpop.f32.mrb[56].mxu0 }
 0x1ad   : > { %v2381_v3 = vpop.f32.mrb[56].mxu1  ;;  %v2318_v5 = vpop.f32.mrb[57].mxu0  ;;  %v1769_v57 = vld [vmem:[#allocation2 + $0x40] sm:$0xff] (!%p2130_p11) }
 0x1ae   : > { %1751 = vst [vmem:[#allocation2 + $0x50] sm:$0xff] %v1735_v0  ;;  %v1736_v7 = vadd.f32 %v1706_v1, %v436_v63  ;;  %v2319_v8 = vadd.f32 %v2318_v5, %v2317_v2  ;;  %v2382_v9 = vpop.f32.mrb[57].mxu1  ;;  %v2320_v40 = vpop.f32.mrb[58].mxu0  ;;  %1785 = vst [vmem:[%s2991_s2 + $0x40] sm:$0xff] (!%p2130_p11), %v1769_v57 }
 0x1af   : > { %v2383_v10 = vadd.f32 %v2382_v9, %v2381_v3  ;;  %v2384_v20 = vpop.f32.mrb[58].mxu1  ;;  %v2321_v11 = vpop.f32.mrb[59].mxu0  ;;  %v1770_v6 = vld [vmem:[#allocation2 + $0x48] sm:$0xff] (!%p2130_p11)  ;;  %v1818_v3 = vmul.f32 (!%p2130_p11), %v1765_v50, %v1765_v50  ;;  %v1819_v9 = vmul.f32 (!%p2130_p11), %v1766_v51, %v1766_v51 }
 0x1b0   : > { %1752 = vst [vmem:[#allocation2 + $0x58] sm:$0xff] %v1736_v7  ;;  %v1614_v13 = vadd.f32 %v2319_v8, %v2898_v36  ;;  %v2322_v15 = vadd.f32 %v2321_v11, %v2320_v40  ;;  %v2385_v42 = vpop.f32.mrb[59].mxu1  ;;  %1786 = vst [vmem:[%s2991_s2 + $0x48] sm:$0xff] (!%p2130_p11), %v1770_v6 }
 0x1b1   : > { %v2386_v16 = vadd.f32 %v2385_v42, %v2384_v20  ;;  %v1820_v20 = vmul.f32 (!%p2130_p11), %v1767_v53, %v1767_v53 }
 0x1b2   : > { %v1711_v17 = vadd.f32 %v2383_v10, %v1614_v13  ;;  %v1617_v18 = vadd.f32 %v2322_v15, %v2900_v38  ;;  %v439_v38 = vld [vmem:[#allocation2 + $0x70] sm:$0xff]  ;;  %v1821_v15 = vmul.f32 (!%p2130_p11), %v1768_v4, %v1768_v4 }
 0x1b4   : > { %v1737_v21 = vadd.f32 %v1711_v17, %v437_v22  ;;  %v1714_v23 = vadd.f32 %v2386_v16, %v1617_v18  ;;  %v2323_v24 = vpop.f32.mrb[60].mxu0  ;;  %v1822_v16 = vmul.f32 (!%p2130_p11), %v1769_v57, %v1769_v57 }
 0x1b5   : > { %v2387_v25 = vpop.f32.mrb[60].mxu1  ;;  %v2324_v12 = vpop.f32.mrb[61].mxu0  ;;  %v1771_v60 = vld [vmem:[#allocation2 + $0x50] sm:$0xff] (!%p2130_p11) }
 0x1b6   : > { %1753 = vst [vmem:[#allocation2 + $0x60] sm:$0xff] %v1737_v21  ;;  %v1738_v27 = vadd.f32 %v1714_v23, %v438_v19  ;;  %v2325_v29 = vadd.f32 %v2324_v12, %v2323_v24  ;;  %v2388_v30 = vpop.f32.mrb[61].mxu1  ;;  %v2326_v31 = vpop.f32.mrb[62].mxu0  ;;  %1787 = vst [vmem:[%s2991_s2 + $0x50] sm:$0xff] (!%p2130_p11), %v1771_v60  ;;  %v1823_v19 = vmul.f32 (!%p2130_p11), %v1770_v6, %v1770_v6 }
 0x1b7   : > { %v2389_v14 = vadd.f32 %v2388_v30, %v2387_v25  ;;  %v2390_v36 = vpop.f32.mrb[62].mxu1  ;;  %v2327_v54 = vpop.f32.mrb[63].mxu0  ;;  %v1772_v61 = vld [vmem:[#allocation2 + $0x58] sm:$0xff] (!%p2130_p11)  ;;  %v1824_v24 = vmul.f32 (!%p2130_p11), %v1771_v60, %v1771_v60 }
 0x1b8   : > { %1754 = vst [vmem:[#allocation2 + $0x68] sm:$0xff] %v1738_v27  ;;  %v1622_v32 = vadd.f32 %v2325_v29, %v2902_v52  ;;  %v2328_v33 = vadd.f32 %v2327_v54, %v2326_v31  ;;  %v2391_v34 = vpop.f32.mrb[63].mxu1  ;;  %v1814_v52 = vmul.f32 (!%p2130_p11), %v1761_v45, %v1761_v45  ;;  %1788 = vst [vmem:[%s2991_s2 + $0x58] sm:$0xff] (!%p2130_p11), %v1772_v61 }
 0x1b9   : > { %v2392_v35 = vadd.f32 %v2391_v34, %v2390_v36  ;;  %v1825_v27 = vmul.f32 (!%p2130_p11), %v1772_v61, %v1772_v61 }
 0x1ba   : > { %v1719_v56 = vadd.f32 %v2389_v14, %v1622_v32  ;;  %v1625_v37 = vadd.f32 %v2328_v33, %v2904_v55  ;;  %1760 = sbr.rel (%p2130_p11) target bundleno = 486 (0x1e6), region = 59  ;;  %v1793_v55 = vadd.f32 (!%p2130_p11), %v1762_v46, %v1761_v45  ;;  %v1830_v28 = vadd.f32 (!%p2130_p11), %v1815_v48, %v1814_v52 }
 0x1bc   : > { %v1739_v41 = vadd.f32 %v1719_v56, %v439_v38  ;;  %v1722_v43 = vadd.f32 %v2392_v35, %v1625_v37  ;;  %v1794_v58 = vadd.f32 (!%p2130_p11), %v1793_v55, %v1763_v47  ;;  %v1831_v1 = vadd.f32 (!%p2130_p11), %v1830_v28, %v1816_v49 }
 0x1bd   : > { %v1773_v62 = vld [vmem:[#allocation2 + $0x60] sm:$0xff] (!%p2130_p11) }
 0x1be   : > { %1755 = vst [vmem:[#allocation2 + $0x70] sm:$0xff] %v1739_v41  ;;  %v1740_v44 = vadd.f32 %v1722_v43, %v440_v39  ;;  %v1795_v2 = vadd.f32 (!%p2130_p11), %v1794_v58, %v1764_v26  ;;  %1789 = vst [vmem:[%s2991_s2 + $0x60] sm:$0xff] (!%p2130_p11), %v1773_v62  ;;  %v1832_v7 = vadd.f32 (!%p2130_p11), %v1831_v1, %v1817_v59 }
 0x1bf   : > { %v1774_v63 = vld [vmem:[#allocation2 + $0x68] sm:$0xff] (!%p2130_p11)  ;;  %v1826_v31 = vmul.f32 (!%p2130_p11), %v1773_v62, %v1773_v62 }
 0x1c0   : > { %1756 = vst [vmem:[#allocation2 + $0x78] sm:$0xff] %v1740_v44  ;;  %1790 = vst [vmem:[%s2991_s2 + $0x68] sm:$0xff] (!%p2130_p11), %v1774_v63  ;;  %v1796_v8 = vadd.f32 (!%p2130_p11), %v1795_v2, %v1765_v50  ;;  %v1833_v40 = vadd.f32 (!%p2130_p11), %v1832_v7, %v1818_v3  ;;  %v1827_v54 = vmul.f32 (!%p2130_p11), %v1774_v63, %v1774_v63 }
 0x1c2   : > { %v1797_v10 = vadd.f32 %v1796_v8, %v1766_v51  ;;  %v1834_v11 = vadd.f32 %v1833_v40, %v1819_v9 }
 0x1c4   : > { %v1798_v13 = vadd.f32 %v1797_v10, %v1767_v53  ;;  %v1835_v42 = vadd.f32 %v1834_v11, %v1820_v20 }
 0x1c5   : > { %v1775_v0 = vld [vmem:[#allocation2 + $0x70] sm:$0xff] }
 0x1c6   : > { %1791 = vst [vmem:[%s2991_s2 + $0x70] sm:$0xff] %v1775_v0  ;;  %v1799_v22 = vadd.f32 %v1798_v13, %v1768_v4  ;;  %v1836_v17 = vadd.f32 %v1835_v42, %v1821_v15  ;;  %v1828_v34 = vmul.f32 %v1775_v0, %v1775_v0 }
 0x1c7   : > { %v1776_v5 = vld [vmem:[#allocation2 + $0x78] sm:$0xff] }
 0x1c8   : > { %1792 = vst [vmem:[%s2991_s2 + $0x78] sm:$0xff] %v1776_v5  ;;  %v1800_v18 = vadd.f32 %v1799_v22, %v1769_v57  ;;  %v1837_v21 = vadd.f32 %v1836_v17, %v1822_v16  ;;  %v1829_v56 = vmul.f32 %v1776_v5, %v1776_v5 }
 0x1ca   : > { %v1801_v23 = vadd.f32 %v1800_v18, %v1770_v6  ;;  %v1838_v25 = vadd.f32 %v1837_v21, %v1823_v19 }
 0x1cc   : > { %v1802_v12 = vadd.f32 %v1801_v23, %v1771_v60  ;;  %v1839_v29 = vadd.f32 %v1838_v25, %v1824_v24 }
 0x1ce   : > { %v1803_v30 = vadd.f32 %v1802_v12, %v1772_v61  ;;  %v1840_v14 = vadd.f32 %v1839_v29, %v1825_v27 }
 0x1d0   : > { %v1804_v36 = vadd.f32 %v1803_v30, %v1773_v62  ;;  %v1841_v32 = vadd.f32 %v1840_v14, %v1826_v31 }
 0x1d2   : > { %v1805_v33 = vadd.f32 %v1804_v36, %v1774_v63  ;;  %v1842_v38 = vadd.f32 %v1841_v32, %v1827_v54 }
 0x1d4   : > { %v1806_v35 = vadd.f32 %v1805_v33, %v1775_v0  ;;  %v1843_v37 = vadd.f32 %v1842_v38, %v1828_v34 }
 0x1d6   : > { %v1807_v39 = vadd.f32 %v1806_v35, %v1776_v5  ;;  %v1844_v43 = vadd.f32 %v1843_v37, %v1829_v56 }
 0x1d8   : > { %v1808_v41 = vrot.slane %v1807_v39, 4  ;;  %v1845_v45 = vrot.slane %v1844_v43, 4 }
 0x1da   : > { %v1809_v44 = vadd.f32 %v1808_v41, %v1807_v39  ;;  %v1846_v47 = vadd.f32 %v1845_v45, %v1844_v43 }
 0x1dc   : > { %v1810_v46 = vrot.slane %v1809_v44, 2  ;;  %v1847_v55 = vrot.slane %v1846_v47, 2 }
 0x1de   : > { %v1811_v52 = vadd.f32 %v1810_v46, %v1809_v44  ;;  %v1848_v49 = vadd.f32 %v1847_v55, %v1846_v47 }
 0x1e0   : > { %v1812_v48 = vrot.slane %v1811_v52, 1  ;;  %v1849_v50 = vrot.slane %v1848_v49, 1 }
 0x1e2   : > { %v1813_v26 = vadd.f32 %v1812_v48, %v1811_v52  ;;  %v1850_v51 = vadd.f32 %v1849_v50, %v1848_v49 }
 0x1e4   : > { %v1852_v53 = vsel %vm1851_vm0, %v1813_v26, %v1850_v51 }
 0x1e5   : > { %1853 = vst [vmem:[%s2992_s3] sm:$0x3] %v1852_v53 }
 0x1e6 PF: > { %s14_s16 = sadd.s32 1, %s2536_s16   ;;  %s2993_s12 = smov %s2524_s13 }
 0x1e7   : > { %p11_p12 = scmp.ge.s32.totalorder %s14_s16, 4   ;;  %s2994_s13 = smov %s2594_s20 }
 0x1e8   : > { %s2995_s14 = smov %s2532_s15  ;;  %s2996_s15 = smov %s2998_s17 }
 0x1e9   :  { %13 = sbr.rel (!%p11_p12) target bundleno = 3 (0x3), region = 109 }

// kernel: discriminator_critic_forward.14
= control target key start
LH: loop header
LB: loop body
LE: loop exit
PB: predicated region body
PF: predicated region fallthrough
CT: control target
= control target key end

     0   :  { %s129_s0 = inlined_call_operand.vmem [shape: f32[32,128], index: 0, kind: input, shape index: {}]   ;;  %s130_s1 = inlined_call_operand.vmem [shape: f32[2,128], index: 1, kind: input, shape index: {}]   ;;  %s131_s2 = inlined_call_operand.vmem [shape: bf16[32,128], index: 2, kind: output, shape index: {}]  }
   0x1   :  { %v11_v0 = vld [vmem:[%s129_s0] sm:$0xff]  ;;  %v12_v1 = vld [vmem:[%s129_s0 + $0x8] sm:$0xff]  ;;  %v13_v6 = vld [vmem:[%s129_s0 + $0x10] sm:$0xff] }
   0x2   :  { %v69_v2 = vld [vmem:[%s130_s1] ss:$0 sm:$0xff]  ;;  %v70_v5 = vld [vmem:[%s130_s1 + $0x1] ss:$0 sm:$0xff]  ;;  %v14_v7 = vld [vmem:[%s129_s0 + $0x18] sm:$0xff] }
   0x3   :  { %v20_v3 = vmul.f32 %v69_v2, %v11_v0  ;;  %v21_v4 = vmul.f32 %v69_v2, %v12_v1  ;;  %v22_v8 = vmul.f32 %v69_v2, %v13_v6  ;;  %v23_v9 = vmul.f32 %v69_v2, %v14_v7 }
   0x5   :  { %v29_v10 = vadd.f32 %v70_v5, %v20_v3  ;;  %v30_v11 = vadd.f32 %v70_v5, %v21_v4  ;;  %v31_v12 = vadd.f32 %v70_v5, %v22_v8  ;;  %v32_v13 = vadd.f32 %v70_v5, %v23_v9 }
   0x7   :  { %vm33_vm0 = vcmp.ge.f32.partialorder %v29_v10, 0.0  ;;  %vm34_vm1 = vcmp.ge.f32.partialorder %v30_v11, 0.0  ;;  %v37_v14 = vmul.f32 0.2, %v29_v10  ;;  %v38_v15 = vmul.f32 0.2, %v30_v11 }
   0x8   :  { %vm35_vm2 = vcmp.ge.f32.partialorder %v31_v12, 0.0  ;;  %vm36_vm3 = vcmp.ge.f32.partialorder %v32_v13, 0.0  ;;  %v39_v16 = vmul.f32 0.2, %v31_v12  ;;  %v40_v17 = vmul.f32 0.2, %v32_v13 }
   0x9   :  { %v41_v18 = vsel %vm33_vm0, %v29_v10, %v37_v14  ;;  %v42_v19 = vsel %vm34_vm1, %v30_v11, %v38_v15 }
   0xa   :  { %v82_v20 = vpack.c.bf16 %v42_v19, %v41_v18  ;;  %v43_v21 = vsel %vm35_vm2, %v31_v12, %v39_v16  ;;  %v44_v22 = vsel %vm36_vm3, %v32_v13, %v40_v17 }
   0xb   :  { %v87_v23 = vpack.c.bf16 %v44_v22, %v43_v21 }
   0xc   :  { %83 = vst [vmem:[%s131_s2] sm:$0xff] %v82_v20  }
   0xd   :  { %89 = vst [vmem:[%s131_s2 + $0x8] sm:$0xff] %v87_v23  }

// kernel: discriminator_critic_forward.13
= control target key start
LH: loop header
LB: loop body
LE: loop exit
PB: predicated region body
PF: predicated region fallthrough
CT: control target
= control target key end

     0   :  { %s1683_s12 = smov 0   ;;  %s1685_s13 = smov 0   ;;  %s1867_s0 = inlined_call_operand.vmem [shape: bf16[32,2048], index: 0, kind: input, shape index: {}]   ;;  %s1868_s1 = inlined_call_operand.vmem [shape: bf16[2048,128], index: 1, kind: input, shape index: {}]   ;;  %s1869_s2 = inlined_call_operand.vmem [shape: f32[32,128], index: 2, kind: output, shape index: {0}]   ;;  %s1870_s3 = inlined_call_operand.vmem [shape: f32[1,2,128], index: 3, kind: output, shape index: {1}]  }
   0x1   :  { %s1687_s14 = smov 0   ;;  %s1689_s15 = smov 0  }
   0x2   :  { %s1691_s16 = smov 0  }
   0x3 LB: > { %s26_s17 = sadd.s32 1, %s1656_s15  ;;  %p49_p1 = scmp.ne.s32.totalorder %s1648_s13, %s1644_s12  ;;  %s1660_s16 = sphi %s1691_s16, %s14_s16   ;;  %s1656_s15 = sphi %s1689_s15, %s1874_s15   ;;  %s1652_s14 = sphi %s1687_s14, %s1873_s14   ;;  %s1648_s13 = sphi %s1685_s13, %s1872_s13   ;;  %s1644_s12 = sphi %s1683_s12, %s1871_s12  }
   0x4   : > { %p27_p0 = scmp.ge.s32.totalorder %s26_s17, 2  ;;  %p50_p2 = scmp.eq.s32.totalorder %s1660_s16, 0 }
   0x5   : > { %s42_s19 = sadd.s32 1, %s1648_s13  ;;  %p1309_p5 = scmp.ge.s32.totalorder %s1660_s16, 2 }
   0x6   : > { %s1876_s17 = smov (%p27_p0, %s26_s17), 0  ;;  %p51_p3 = por %p50_p2, %p49_p1 }
   0x7   : > { %s38_s18 = ssub.s32 %s1656_s15, %s1876_s17  ;;  %159 = sbr.rel (%p1309_p5) target bundleno = 26 (0x1a), region = 16 }
   0x8   : > { %p40_p4 = scmp.eq.s32.totalorder %s38_s18, 0 }
   0xa   : > { %s1718_s20 = scalar_select %p40_p4, %s1648_s13, %s42_s19  }
   0xe   : > { %162 = sbr.rel (!%p51_p3) target bundleno = 26 (0x1a), region = 20  ;;  %s164_s21 = sand.u32 (%p51_p3), 1, %s1648_s13  }
   0xf   : > { %s1404_s22 = sshll.u32 (%p51_p3), %s1656_s15, 5  ;;  %s1310_s23 = sshll.u32 (%p51_p3), %s164_s21, 7 }
  0x10   : > { %s1726_s26 = scalar_lea.vmem (%p51_p3), %s1867_s0, %s1404_s22  ;;  %s166_s27 = scalar_lea.vmem (%p51_p3), [#allocation3], %s1310_s23 }
  0x11   : > { %v185_v0 = vld [vmem:[%s1726_s26] sm:$0xff] (%p51_p3)  ;;  %v187_v1 = vld [vmem:[%s1726_s26 + $0x8] sm:$0xff] (%p51_p3)  ;;  %v189_v2 = vld [vmem:[%s1726_s26 + $0x10] sm:$0xff] (%p51_p3) }
  0x12   : > { %186 = vst [vmem:[%s166_s27] sm:$0xff] (%p51_p3), %v185_v0  ;;  %188 = vst [vmem:[%s166_s27 + $0x8] sm:$0xff] (%p51_p3), %v187_v1  ;;  %v191_v3 = vld [vmem:[%s1726_s26 + $0x18] sm:$0xff] (%p51_p3)  ;;  %v193_v4 = vld [vmem:[%s1726_s26 + $0x40] sm:$0xff] (%p51_p3) }
  0x13   : > { %190 = vst [vmem:[%s166_s27 + $0x10] sm:$0xff] (%p51_p3), %v189_v2  ;;  %v195_v5 = vld [vmem:[%s1726_s26 + $0x48] sm:$0xff] (%p51_p3)  ;;  %192 = vst [vmem:[%s166_s27 + $0x18] sm:$0xff] (%p51_p3), %v191_v3  ;;  %v197_v6 = vld [vmem:[%s1726_s26 + $0x50] sm:$0xff] (%p51_p3) }
  0x14   : > { %194 = vst [vmem:[%s166_s27 + $0x20] sm:$0xff] (%p51_p3), %v193_v4  ;;  %196 = vst [vmem:[%s166_s27 + $0x28] sm:$0xff] (%p51_p3), %v195_v5  ;;  %v199_v7 = vld [vmem:[%s1726_s26 + $0x58] sm:$0xff] (%p51_p3)  ;;  %v201_v8 = vld [vmem:[%s1726_s26 + $0x80] sm:$0xff] (%p51_p3) }
  0x15   : > { %198 = vst [vmem:[%s166_s27 + $0x30] sm:$0xff] %v197_v6  ;;  %200 = vst [vmem:[%s166_s27 + $0x38] sm:$0xff] %v199_v7  ;;  %v203_v9 = vld [vmem:[%s1726_s26 + $0x88] sm:$0xff]  ;;  %v205_v10 = vld [vmem:[%s1726_s26 + $0x90] sm:$0xff] }
  0x16   : > { %202 = vst [vmem:[%s166_s27 + $0x40] sm:$0xff] %v201_v8  ;;  %v207_v11 = vld [vmem:[%s1726_s26 + $0x98] sm:$0xff]  ;;  %204 = vst [vmem:[%s166_s27 + $0x48] sm:$0xff] %v203_v9  ;;  %v209_v12 = vld [vmem:[%s1726_s26 + $0xc0] sm:$0xff] }
  0x17   : > { %206 = vst [vmem:[%s166_s27 + $0x50] sm:$0xff] %v205_v10  ;;  %208 = vst [vmem:[%s166_s27 + $0x58] sm:$0xff] %v207_v11  ;;  %v211_v13 = vld [vmem:[%s1726_s26 + $0xc8] sm:$0xff]  ;;  %v213_v14 = vld [vmem:[%s1726_s26 + $0xd0] sm:$0xff] }
  0x18   : > { %210 = vst [vmem:[%s166_s27 + $0x60] sm:$0xff] %v209_v12  ;;  %212 = vst [vmem:[%s166_s27 + $0x68] sm:$0xff] %v211_v13  ;;  %v215_v15 = vld [vmem:[%s1726_s26 + $0xd8] sm:$0xff] }
  0x19   : > { %214 = vst [vmem:[%s166_s27 + $0x70] sm:$0xff] %v213_v14  ;;  %216 = vst [vmem:[%s166_s27 + $0x78] sm:$0xff] %v215_v15 }
  0x1a PF: > { %p1313_p6 = scmp.ge.s32.totalorder %s1660_s16, 1  ;;  %p233_p7 = scmp.lt.s32.totalorder %s1660_s16, 3 }
  0x1c   : > { %p234_p8 = pnand %p1313_p6, %p233_p7 }
  0x1d   : > { %s240_s28 = sand.u32 (!%p234_p8), 1, %s1644_s12   ;;  %s1315_s29 = sshll.u32 (!%p234_p8), %s1652_s14, 7 }
  0x1e   : > { %237 = sbr.rel (%p234_p8) target bundleno = 367 (0x16f), region = 47  ;;  %s1314_s30 = sshll.u32 (!%p234_p8), %s240_s28, 7 }
  0x1f   : > { %p284_p9 = scmp.lt.s32.totalorder (!%p234_p8), %s1315_s29, 255  ;;  %s1753_s8 = scalar_lea.vmem (!%p234_p8), [#allocation3], %s1314_s30 }
  0x20   : > { %p1317_p10 = scmp.ne.s32.totalorder (!%p234_p8), %s1652_s14, 0 }
  0x25   : > { %s1878_s29 = smov (!%p284_p9, %s1315_s29), 255  ;;  %312 = sbr.rel (%p1317_p10) target bundleno = 44 (0x2c), region = 55 }
  0x26   : > { %s1316_s4 = sshll.u32 %s1878_s29, 2  ;;  %v1662_v16 = vmov (!%p1317_p10), 0.0  }
  0x27   : > { %s1751_s7 = scalar_lea.vmem %s1868_s1, %s1316_s4  ;;  %313 = vst [vmem:[#allocation2] sm:$0xff] (!%p1317_p10), %v1662_v16  ;;  %314 = vst [vmem:[#allocation2 + $0x8] sm:$0xff] (!%p1317_p10), %v1662_v16 }
  0x28   : > { %315 = vst [vmem:[#allocation2 + $0x10] sm:$0xff] (!%p1317_p10), %v1662_v16  ;;  %316 = vst [vmem:[#allocation2 + $0x18] sm:$0xff] (!%p1317_p10), %v1662_v16 }
  0x2c PF: > { %v1558_v17 = vld [vmem:[%s1751_s7 + $0x40] sm:$0xff]   ;;  %v1562_v21 = vld [vmem:[%s1751_s7 + $0x48] sm:$0xff]   ;;  %v1566_v25 = vld [vmem:[%s1751_s7 + $0x50] sm:$0xff]   ;;  %p1398_p11 = scmp.ne.s32.totalorder %s1652_s14, 1 }
  0x2d   : > { %v1559_v18 = vld [vmem:[%s1751_s7 + $0xc0] sm:$0xff]   ;;  %1405 = vmatprep.subr.bf16.mxu0 %v1558_v17  ;;  %v1563_v22 = vld [vmem:[%s1751_s7 + $0xc8] sm:$0xff]   ;;  %v1567_v26 = vld [vmem:[%s1751_s7 + $0xd0] sm:$0xff]   ;;  %vm1167_vm0 = vcmask (!%p1398_p11), 1040384  }
  0x2e   : > { %v1560_v19 = vld [vmem:[%s1751_s7] sm:$0xff]   ;;  %1433 = vmatprep.subr.bf16.mxu1 %v1559_v18  ;;  %v1564_v23 = vld [vmem:[%s1751_s7 + $0x8] sm:$0xff]   ;;  %v1568_v27 = vld [vmem:[%s1751_s7 + $0x10] sm:$0xff]  }
  0x2f   : > { %v1561_v20 = vld [vmem:[%s1751_s7 + $0x80] sm:$0xff]   ;;  %1406 = vmatpush3.bf16.msra.mxu0 %v1560_v19  ;;  %v1565_v24 = vld [vmem:[%s1751_s7 + $0x88] sm:$0xff]   ;;  %v1569_v28 = vld [vmem:[%s1751_s7 + $0x90] sm:$0xff]  }
  0x30   : > { %1434 = vmatpush3.bf16.msra.mxu1 %v1561_v20  ;;  %1407 = vmatprep.subr.bf16.mxu0 %v1562_v21  ;;  %v1570_v29 = vld [vmem:[%s1751_s7 + $0x58] sm:$0xff]   ;;  %v1574_v33 = vld [vmem:[%s1751_s7 + $0x60] sm:$0xff]   ;;  %v1578_v37 = vld [vmem:[%s1751_s7 + $0x68] sm:$0xff]  }
  0x31   : > { %1435 = vmatprep.subr.bf16.mxu1 %v1563_v22  ;;  %v1571_v30 = vld [vmem:[%s1751_s7 + $0xd8] sm:$0xff]   ;;  %v1575_v34 = vld [vmem:[%s1751_s7 + $0xe0] sm:$0xff]   ;;  %v1579_v38 = vld [vmem:[%s1751_s7 + $0xe8] sm:$0xff]  }
  0x32   : > { %v1572_v31 = vld [vmem:[%s1751_s7 + $0x18] sm:$0xff]   ;;  %v1576_v35 = vld [vmem:[%s1751_s7 + $0x20] sm:$0xff]   ;;  %v1580_v39 = vld [vmem:[%s1751_s7 + $0x28] sm:$0xff]  }
  0x33   : > { %1408 = vmatpush3.bf16.msra.mxu0 %v1564_v23  ;;  %v1573_v32 = vld [vmem:[%s1751_s7 + $0x98] sm:$0xff]   ;;  %v1577_v36 = vld [vmem:[%s1751_s7 + $0xa0] sm:$0xff]   ;;  %v1581_v40 = vld [vmem:[%s1751_s7 + $0xa8] sm:$0xff]  }
  0x34   : > { %1436 = vmatpush3.bf16.msra.mxu1 %v1565_v24  ;;  %1409 = vmatprep.subr.bf16.mxu0 %v1566_v25  ;;  %v1582_v41 = vld [vmem:[%s1751_s7 + $0x70] sm:$0xff]   ;;  %v1586_v45 = vld [vmem:[%s1751_s7 + $0x78] sm:$0xff]   ;;  %v321_v49 = vld [vmem:[%s1753_s8] sm:$0xff] }
  0x35   : > { %1437 = vmatprep.subr.bf16.mxu1 %v1567_v26  ;;  %v1583_v42 = vld [vmem:[%s1751_s7 + $0xf0] sm:$0xff]   ;;  %v1587_v46 = vld [vmem:[%s1751_s7 + $0xf8] sm:$0xff]   ;;  %v325_v50 = vld [vmem:[%s1753_s8 + $0x20] sm:$0xff] }
  0x36   : > { %v1584_v43 = vld [vmem:[%s1751_s7 + $0x30] sm:$0xff]   ;;  %v1588_v47 = vld [vmem:[%s1751_s7 + $0x38] sm:$0xff]   ;;  %v322_v51 = vld [vmem:[%s1753_s8 + $0x8] sm:$0xff]  ;;  %v1318_v52 = vcombine.low %v321_v49, %v325_v50  ;;  %v1319_v53 = vcombine.high %v321_v49, %v325_v50 }
  0x37   : > { %1410 = vmatpush3.bf16.msra.mxu0 %v1568_v27  ;;  %v1585_v44 = vld [vmem:[%s1751_s7 + $0xb0] sm:$0xff]   ;;  %v1589_v48 = vld [vmem:[%s1751_s7 + $0xb8] sm:$0xff]   ;;  %v326_v54 = vld [vmem:[%s1753_s8 + $0x28] sm:$0xff] }
  0x38   : > { %1438 = vmatpush3.bf16.msra.mxu1 %v1569_v28  ;;  %1411 = vmatprep.subr.bf16.mxu0 %v1570_v29  ;;  %v1320_v55 = vcombine.low %v322_v51, %v326_v54  ;;  %v1321_v56 = vcombine.high %v322_v51, %v326_v54  ;;  %v1590_v57 = vld [vmem:[%s1751_s7 + $0x140] sm:$0xff]   ;;  %v1594_v61 = vld [vmem:[%s1751_s7 + $0x148] sm:$0xff]   ;;  %v1598_v1 = vld [vmem:[%s1751_s7 + $0x150] sm:$0xff]  }
  0x39   : > { %1439 = vmatprep.subr.bf16.mxu1 %v1571_v30  ;;  %961 = vmatprep.mubr.bf16.mxu0 %v1319_v53  ;;  %v1591_v58 = vld [vmem:[%s1751_s7 + $0x1c0] sm:$0xff]   ;;  %v1595_v62 = vld [vmem:[%s1751_s7 + $0x1c8] sm:$0xff]   ;;  %v1599_v2 = vld [vmem:[%s1751_s7 + $0x1d0] sm:$0xff]  }
  0x3a   : > { %1010 = vmatprep.mubr.bf16.mxu1 %v1321_v56  ;;  %v1592_v59 = vld [vmem:[%s1751_s7 + $0x100] sm:$0xff]   ;;  %v1596_v63 = vld [vmem:[%s1751_s7 + $0x108] sm:$0xff]   ;;  %v1600_v3 = vld [vmem:[%s1751_s7 + $0x110] sm:$0xff]  }
  0x3b   : > { %1412 = vmatpush3.bf16.msra.mxu0 %v1572_v31  ;;  %v1593_v60 = vld [vmem:[%s1751_s7 + $0x180] sm:$0xff]   ;;  %v1597_v0 = vld [vmem:[%s1751_s7 + $0x188] sm:$0xff]   ;;  %v1601_v4 = vld [vmem:[%s1751_s7 + $0x190] sm:$0xff]  }
  0x3c   : > { %1440 = vmatpush3.bf16.msra.mxu1 %v1573_v32  ;;  %1413 = vmatprep.subr.bf16.mxu0 %v1574_v33  ;;  %v1602_v5 = vld [vmem:[%s1751_s7 + $0x158] sm:$0xff]   ;;  %v1606_v9 = vld [vmem:[%s1751_s7 + $0x160] sm:$0xff]   ;;  %v330_v16 = vld [vmem:[%s1753_s8 + $0x48] sm:$0xff] }
  0x3d   : > { %1441 = vmatprep.subr.bf16.mxu1 %v1575_v34  ;;  %v1603_v6 = vld [vmem:[%s1751_s7 + $0x1d8] sm:$0xff]   ;;  %v1607_v10 = vld [vmem:[%s1751_s7 + $0x1e0] sm:$0xff]   ;;  %v334_v17 = vld [vmem:[%s1753_s8 + $0x68] sm:$0xff] }
  0x3e   : > { %v1604_v7 = vld [vmem:[%s1751_s7 + $0x118] sm:$0xff]   ;;  %v1608_v11 = vld [vmem:[%s1751_s7 + $0x120] sm:$0xff]   ;;  %v1329_v19 = vcombine.high %v330_v16, %v334_v17  ;;  %v1610_v20 = vld [vmem:[%s1751_s7 + $0x168] sm:$0xff]   ;;  %v1328_v21 = vcombine.low %v330_v16, %v334_v17 }
  0x3f   : > { %1414 = vmatpush3.bf16.msra.mxu0 %v1576_v35  ;;  %v1605_v8 = vld [vmem:[%s1751_s7 + $0x198] sm:$0xff]   ;;  %v1609_v12 = vld [vmem:[%s1751_s7 + $0x1a0] sm:$0xff]   ;;  %v1611_v22 = vld [vmem:[%s1751_s7 + $0x1e8] sm:$0xff]  }
  0x40   : > { %1442 = vmatpush3.bf16.msra.mxu1 %v1577_v36  ;;  %1415 = vmatprep.subr.bf16.mxu0 %v1578_v37  ;;  %v329_v13 = vld [vmem:[%s1753_s8 + $0x40] sm:$0xff]  ;;  %v1612_v23 = vld [vmem:[%s1751_s7 + $0x128] sm:$0xff]   ;;  %v1614_v25 = vld [vmem:[%s1751_s7 + $0x170] sm:$0xff]  }
  0x41   : > { %1443 = vmatprep.subr.bf16.mxu1 %v1579_v38  ;;  %v333_v14 = vld [vmem:[%s1753_s8 + $0x60] sm:$0xff]  ;;  %v1613_v24 = vld [vmem:[%s1751_s7 + $0x1a8] sm:$0xff]   ;;  %v1615_v26 = vld [vmem:[%s1751_s7 + $0x1f0] sm:$0xff]  }
  0x42   : > { %v1327_v15 = vcombine.high %v329_v13, %v333_v14  ;;  %v1326_v18 = vcombine.low %v329_v13, %v333_v14  ;;  %v1616_v27 = vld [vmem:[%s1751_s7 + $0x130] sm:$0xff]   ;;  %v1618_v29 = vld [vmem:[%s1751_s7 + $0x178] sm:$0xff]  }
  0x43   : > { %1416 = vmatpush3.bf16.msra.mxu0 %v1580_v39  ;;  %v1617_v28 = vld [vmem:[%s1751_s7 + $0x1b0] sm:$0xff]   ;;  %v1619_v30 = vld [vmem:[%s1751_s7 + $0x1f8] sm:$0xff]  }
  0x44   : > { %1444 = vmatpush3.bf16.msra.mxu1 %v1581_v40  ;;  %1417 = vmatprep.subr.bf16.mxu0 %v1582_v41  ;;  %v1620_v31 = vld [vmem:[%s1751_s7 + $0x138] sm:$0xff]   ;;  %v323_v33 = vld [vmem:[%s1753_s8 + $0x10] sm:$0xff] }
  0x45   : > { %1445 = vmatprep.subr.bf16.mxu1 %v1583_v42  ;;  %v1621_v32 = vld [vmem:[%s1751_s7 + $0x1b8] sm:$0xff]   ;;  %v327_v34 = vld [vmem:[%s1753_s8 + $0x30] sm:$0xff] }
  0x46   : > { %v324_v35 = vld [vmem:[%s1753_s8 + $0x18] sm:$0xff]  ;;  %v1322_v37 = vcombine.low %v323_v33, %v327_v34  ;;  %v1323_v38 = vcombine.high %v323_v33, %v327_v34  ;;  %v331_v41 = vld [vmem:[%s1753_s8 + $0x50] sm:$0xff] }
  0x47   : > { %1418 = vmatpush3.bf16.msra.mxu0 %v1584_v43  ;;  %v328_v36 = vld [vmem:[%s1753_s8 + $0x38] sm:$0xff]  ;;  %v335_v42 = vld [vmem:[%s1753_s8 + $0x70] sm:$0xff] }
  0x48   : > { %1446 = vmatpush3.bf16.msra.mxu1 %v1585_v44  ;;  %1419 = vmatprep.subr.bf16.mxu0 %v1586_v45  ;;  %v1324_v39 = vcombine.low %v324_v35, %v328_v36  ;;  %v1325_v40 = vcombine.high %v324_v35, %v328_v36  ;;  %v332_v43 = vld [vmem:[%s1753_s8 + $0x58] sm:$0xff]  ;;  %v1331_v44 = vcombine.high %v331_v41, %v335_v42 }
  0x49   : > { %1447 = vmatprep.subr.bf16.mxu1 %v1587_v46  ;;  %v336_v45 = vld [vmem:[%s1753_s8 + $0x78] sm:$0xff] }
  0x4a   : > { %v1333_v46 = vcombine.high %v332_v43, %v336_v45 }
  0x4b   : > { %1420 = vmatpush3.bf16.msra.mxu0 %v1588_v47  ;;  %v1330_v47 = vcombine.low %v331_v41, %v335_v42 }
  0x4c   : > { %1448 = vmatpush3.bf16.msra.mxu1 %v1589_v48  ;;  %1461 = vmatprep.subr.bf16.mxu0 %v1590_v57  ;;  %v1332_v48 = vcombine.low %v332_v43, %v336_v45 }
  0x4d   : > { %1489 = vmatprep.subr.bf16.mxu1 %v1591_v58 }
  0x4e   : > { %962 = vmatmul.mubr.bf16.vlgmr.msra.gmra.mrb[0].mxu0 %v1318_v52 }
  0x4f   : > { %1011 = vmatmul.mubr.bf16.vlgmr.msra.gmra.mrb[0].mxu1 %v1320_v55  ;;  %1462 = vmatpush3.bf16.msra.mxu0 %v1592_v59 }
  0x50   : > { %1490 = vmatpush3.bf16.msra.mxu1 %v1593_v60  ;;  %1463 = vmatprep.subr.bf16.mxu0 %v1594_v61 }
  0x51   : > { %1491 = vmatprep.subr.bf16.mxu1 %v1595_v62  ;;  %969 = vmatprep.mubr.bf16.mxu0 %v1327_v15 }
  0x52   : > { %1018 = vmatprep.mubr.bf16.mxu1 %v1329_v19 }
  0x53   : > { %1464 = vmatpush3.bf16.msra.mxu0 %v1596_v63 }
  0x54   : > { %1492 = vmatpush3.bf16.msra.mxu1 %v1597_v0  ;;  %1465 = vmatprep.subr.bf16.mxu0 %v1598_v1 }
  0x55   : > { %1493 = vmatprep.subr.bf16.mxu1 %v1599_v2 }
  0x56   : > { %970 = vmatmul.mubr.bf16.gmra.mrb[4].mxu0 %v1326_v18 }
  0x57   : > { %1466 = vmatpush3.bf16.msra.mxu0 %v1600_v3  ;;  %1019 = vmatmul.mubr.bf16.gmra.mrb[4].mxu1 %v1328_v21 }
  0x58   : > { %1494 = vmatpush3.bf16.msra.mxu1 %v1601_v4  ;;  %1467 = vmatprep.subr.bf16.mxu0 %v1602_v5 }
  0x59   : > { %1495 = vmatprep.subr.bf16.mxu1 %v1603_v6  ;;  %1059 = vmatprep.mubr.bf16.mxu0 %v1323_v38 }
  0x5a   : > { %1108 = vmatprep.mubr.bf16.mxu1 %v1325_v40 }
  0x5b   : > { %1468 = vmatpush3.bf16.msra.mxu0 %v1604_v7 }
  0x5c   : > { %1496 = vmatpush3.bf16.msra.mxu1 %v1605_v8  ;;  %1469 = vmatprep.subr.bf16.mxu0 %v1606_v9 }
  0x5d   : > { %1497 = vmatprep.subr.bf16.mxu1 %v1607_v10 }
  0x5f   : > { %1470 = vmatpush3.bf16.msra.mxu0 %v1608_v11 }
  0x60   : > { %1498 = vmatpush3.bf16.msra.mxu1 %v1609_v12  ;;  %1471 = vmatprep.subr.bf16.mxu0 %v1610_v20 }
  0x61   : > { %1499 = vmatprep.subr.bf16.mxu1 %v1611_v22 }
  0x63   : > { %1472 = vmatpush3.bf16.msra.mxu0 %v1612_v23 }
  0x64   : > { %1500 = vmatpush3.bf16.msra.mxu1 %v1613_v24  ;;  %1473 = vmatprep.subr.bf16.mxu0 %v1614_v25 }
  0x65   : > { %1501 = vmatprep.subr.bf16.mxu1 %v1615_v26  ;;  %v317_v26 = vld [vmem:[#allocation2] sm:$0xff] }
  0x67   : > { %1474 = vmatpush3.bf16.msra.mxu0 %v1616_v27 }
  0x68   : > { %1502 = vmatpush3.bf16.msra.mxu1 %v1617_v28  ;;  %1475 = vmatprep.subr.bf16.mxu0 %v1618_v29  ;;  %v318_v29 = vld [vmem:[#allocation2 + $0x8] sm:$0xff] }
  0x69   : > { %1503 = vmatprep.subr.bf16.mxu1 %v1619_v30 }
  0x6b   : > { %1476 = vmatpush3.bf16.msra.mxu0 %v1620_v31 }
  0x6c   : > { %1504 = vmatpush3.bf16.msra.mxu1 %v1621_v32 }
  0x6e   : > { %1060 = vmatmul.mubr.bf16.vlgmr.msra.gmra.mrb[8].mxu0 %v1322_v37 }
  0x6f   : > { %1109 = vmatmul.mubr.bf16.vlgmr.msra.gmra.mrb[8].mxu1 %v1324_v39  ;;  %1067 = vmatprep.mubr.bf16.mxu0 %v1331_v44 }
  0x70   : > { %1116 = vmatprep.mubr.bf16.mxu1 %v1333_v46  ;;  %v319_v46 = vld [vmem:[#allocation2 + $0x10] sm:$0xff] }
  0x76   : > { %1068 = vmatmul.mubr.bf16.gmra.mrb[12].mxu0 %v1330_v47 }
  0x77   : > { %1117 = vmatmul.mubr.bf16.gmra.mrb[12].mxu1 %v1332_v48 }
 0x121   : > { %v1421_v49 = vpop.f32.mrb[0].mxu0 }
 0x122   : > { %v1449_v50 = vpop.f32.mrb[0].mxu1  ;;  %v1422_v51 = vpop.f32.mrb[1].mxu0 }
 0x123   : > { %v1423_v52 = vadd.f32 %v1422_v51, %v1421_v49  ;;  %v1450_v53 = vpop.f32.mrb[1].mxu1  ;;  %v1424_v54 = vpop.f32.mrb[2].mxu0  ;;  %v320_v49 = vld [vmem:[#allocation2 + $0x18] sm:$0xff] }
 0x124   : > { %v1451_v55 = vadd.f32 %v1450_v53, %v1449_v50  ;;  %v1452_v56 = vpop.f32.mrb[2].mxu1  ;;  %v1425_v57 = vpop.f32.mrb[3].mxu0 }
 0x125   : > { %v1426_v58 = vadd.f32 %v1425_v57, %v1424_v54  ;;  %v1453_v59 = vpop.f32.mrb[3].mxu1 }
 0x126   : > { %v1013_v60 = vadd.f32 %v1451_v55, %v1423_v52  ;;  %v1454_v61 = vadd.f32 %v1453_v59, %v1452_v56 }
 0x128   : > { %v1016_v62 = vadd.f32 %v1454_v61, %v1426_v58 }
 0x129   : > { %v1427_v63 = vpop.f32.mrb[4].mxu0 }
 0x12a   : > { %v1455_v0 = vpop.f32.mrb[4].mxu1  ;;  %v1428_v1 = vpop.f32.mrb[5].mxu0 }
 0x12b   : > { %v1429_v2 = vadd.f32 %v1428_v1, %v1427_v63  ;;  %v1456_v3 = vpop.f32.mrb[5].mxu1  ;;  %v1430_v4 = vpop.f32.mrb[6].mxu0 }
 0x12c   : > { %v1457_v5 = vadd.f32 %v1456_v3, %v1455_v0  ;;  %v1458_v6 = vpop.f32.mrb[6].mxu1  ;;  %v1431_v7 = vpop.f32.mrb[7].mxu0 }
 0x12d   : > { %v1432_v8 = vadd.f32 %v1431_v7, %v1430_v4  ;;  %v1459_v9 = vpop.f32.mrb[7].mxu1 }
 0x12e   : > { %v1021_v10 = vadd.f32 %v1457_v5, %v1429_v2  ;;  %v1460_v11 = vadd.f32 %v1459_v9, %v1458_v6 }
 0x130   : > { %v1024_v12 = vadd.f32 %v1460_v11, %v1432_v8 }
 0x141   : > { %v1477_v13 = vpop.f32.mrb[8].mxu0 }
 0x142   : > { %v1505_v14 = vpop.f32.mrb[8].mxu1  ;;  %v1478_v15 = vpop.f32.mrb[9].mxu0 }
 0x143   : > { %v1506_v16 = vpop.f32.mrb[9].mxu1  ;;  %v1479_v17 = vadd.f32 %v1478_v15, %v1477_v13  ;;  %v1480_v19 = vpop.f32.mrb[10].mxu0 }
 0x144   : > { %v1507_v18 = vadd.f32 %v1506_v16, %v1505_v14  ;;  %v1508_v20 = vpop.f32.mrb[10].mxu1  ;;  %v1481_v21 = vpop.f32.mrb[11].mxu0 }
 0x145   : > { %v1509_v22 = vpop.f32.mrb[11].mxu1  ;;  %v1062_v23 = vadd.f32 %v1479_v17, %v1013_v60  ;;  %v1482_v24 = vadd.f32 %v1481_v21, %v1480_v19 }
 0x146   : > { %v1510_v25 = vadd.f32 %v1509_v22, %v1508_v20 }
 0x147   : > { %v1111_v27 = vadd.f32 %v1507_v18, %v1062_v23  ;;  %v1065_v28 = vadd.f32 %v1482_v24, %v1016_v62 }
 0x149   : > { %v1125_v30 = vadd.f32 %v1111_v27, %v317_v26  ;;  %v1114_v31 = vadd.f32 %v1510_v25, %v1065_v28  ;;  %v1483_v32 = vpop.f32.mrb[12].mxu0 }
 0x14a   : > { %v1511_v33 = vpop.f32.mrb[12].mxu1  ;;  %v1484_v34 = vpop.f32.mrb[13].mxu0 }
 0x14b   : > { %v1512_v35 = vpop.f32.mrb[13].mxu1  ;;  %1129 = vst [vmem:[#allocation2] sm:$0xff] %v1125_v30  ;;  %v1126_v36 = vadd.f32 %v1114_v31, %v318_v29  ;;  %v1485_v37 = vadd.f32 %v1484_v34, %v1483_v32  ;;  %v1486_v39 = vpop.f32.mrb[14].mxu0 }
 0x14c   : > { %v1513_v38 = vadd.f32 %v1512_v35, %v1511_v33  ;;  %v1514_v40 = vpop.f32.mrb[14].mxu1  ;;  %v1487_v41 = vpop.f32.mrb[15].mxu0 }
 0x14d   : > { %v1515_v42 = vpop.f32.mrb[15].mxu1  ;;  %1130 = vst [vmem:[#allocation2 + $0x8] sm:$0xff] %v1126_v36  ;;  %v1070_v43 = vadd.f32 %v1485_v37, %v1021_v10  ;;  %v1488_v44 = vadd.f32 %v1487_v41, %v1486_v39 }
 0x14e   : > { %v1516_v45 = vadd.f32 %v1515_v42, %v1514_v40 }
 0x14f   : > { %v1119_v47 = vadd.f32 %v1513_v38, %v1070_v43  ;;  %v1073_v48 = vadd.f32 %v1488_v44, %v1024_v12  ;;  %1136 = sbr.rel (%p1398_p11) target bundleno = 367 (0x16f), region = 59 }
 0x151   : > { %v1127_v50 = vadd.f32 %v1119_v47, %v319_v46  ;;  %v1122_v51 = vadd.f32 %v1516_v45, %v1073_v48 }
 0x152   : > { %v1137_v53 = vld [vmem:[#allocation2] sm:$0xff] (!%p1398_p11) }
 0x153   : > { %1131 = vst [vmem:[#allocation2 + $0x10] sm:$0xff] %v1127_v50  ;;  %v1128_v52 = vadd.f32 %v1122_v51, %v320_v49  ;;  %1141 = vst [vmem:[%s1869_s2] sm:$0xff] (!%p1398_p11), %v1137_v53  ;;  %v1154_v56 = vmul.f32 (!%p1398_p11), %v1137_v53, %v1137_v53 }
 0x154   : > { %v1138_v54 = vld [vmem:[#allocation2 + $0x8] sm:$0xff] (!%p1398_p11) }
 0x155   : > { %1132 = vst [vmem:[#allocation2 + $0x18] sm:$0xff] %v1128_v52  ;;  %1142 = vst [vmem:[%s1869_s2 + $0x8] sm:$0xff] (!%p1398_p11), %v1138_v54  ;;  %v1145_v57 = vadd.f32 (!%p1398_p11), %v1138_v54, %v1137_v53  ;;  %v1155_v58 = vmul.f32 (!%p1398_p11), %v1138_v54, %v1138_v54 }
 0x157   : > { %v1158_v61 = vadd.f32 %v1155_v58, %v1154_v56 }
 0x15a   : > { %v1139_v55 = vld [vmem:[#allocation2 + $0x10] sm:$0xff] }
 0x15b   : > { %1143 = vst [vmem:[%s1869_s2 + $0x10] sm:$0xff] %v1139_v55  ;;  %v1156_v59 = vmul.f32 %v1139_v55, %v1139_v55  ;;  %v1146_v62 = vadd.f32 %v1145_v57, %v1139_v55 }
 0x15c   : > { %v1140_v60 = vld [vmem:[#allocation2 + $0x18] sm:$0xff] }
 0x15d   : > { %1144 = vst [vmem:[%s1869_s2 + $0x18] sm:$0xff] %v1140_v60  ;;  %v1157_v63 = vmul.f32 %v1140_v60, %v1140_v60  ;;  %v1159_v0 = vadd.f32 %v1158_v61, %v1156_v59  ;;  %v1147_v1 = vadd.f32 %v1146_v62, %v1140_v60 }
 0x15f   : > { %v1148_v2 = vrot.slane %v1147_v1, 4  ;;  %v1160_v3 = vadd.f32 %v1159_v0, %v1157_v63 }
 0x161   : > { %v1149_v4 = vadd.f32 %v1148_v2, %v1147_v1  ;;  %v1161_v5 = vrot.slane %v1160_v3, 4 }
 0x163   : > { %v1150_v6 = vrot.slane %v1149_v4, 2  ;;  %v1162_v7 = vadd.f32 %v1161_v5, %v1160_v3 }
 0x165   : > { %v1151_v8 = vadd.f32 %v1150_v6, %v1149_v4  ;;  %v1163_v9 = vrot.slane %v1162_v7, 2 }
 0x167   : > { %v1152_v10 = vrot.slane %v1151_v8, 1  ;;  %v1164_v11 = vadd.f32 %v1163_v9, %v1162_v7 }
 0x169   : > { %v1153_v12 = vadd.f32 %v1152_v10, %v1151_v8  ;;  %v1165_v13 = vrot.slane %v1164_v11, 1 }
 0x16b   : > { %v1166_v14 = vadd.f32 %v1165_v13, %v1164_v11 }
 0x16d   : > { %v1168_v15 = vsel %vm1167_vm0, %v1153_v12, %v1166_v14 }
 0x16e   : > { %1169 = vst [vmem:[%s1870_s3] sm:$0x3] %v1168_v15 }
 0x16f PF: > { %s14_s16 = sadd.s32 1, %s1660_s16   ;;  %s1871_s12 = smov %s1648_s13 }
 0x170   : > { %p11_p12 = scmp.ge.s32.totalorder %s14_s16, 4   ;;  %s1872_s13 = smov %s1718_s20 }
 0x171   : > { %s1873_s14 = smov %s1656_s15  ;;  %s1874_s15 = smov %s1876_s17 }
 0x172   :  { %13 = sbr.rel (!%p11_p12) target bundleno = 3 (0x3), region = 109 }

// kernel: discriminator_critic_forward.15
= control target key start
LH: loop header
LB: loop body
LE: loop exit
PB: predicated region body
PF: predicated region fallthrough
CT: control target
= control target key end

     0   :  { %v2124_v22 = vmov 1966171168   ;;  %v304_v24 = vlaneseq  ;;  %vm2126_vm0 = vmmov 0   ;;  %vm1528_vm2 = vcmask 130048   ;;  %s2634_s2 = inlined_call_operand.vmem [shape: bf16[2048,16], index: 2, kind: input, shape index: {}]   ;;  %s2635_s0 = inlined_call_operand.vmem [shape: bf16[2,2048], index: 0, kind: input, shape index: {}]   ;;  %s2636_s4 = inlined_call_operand.vmem [shape: bf16[16,32], index: 4, kind: input, shape index: {}]   ;;  %s2637_s1 = inlined_call_operand.vmem [shape: f32[2,1], index: 1, kind: input, shape index: {}]   ;;  %s2638_s3 = inlined_call_operand.vmem [shape: f32[1,16], index: 3, kind: input, shape index: {}]   ;;  %s2639_s7 = inlined_call_operand.vmem [shape: bf16[32,128], index: 7, kind: input, shape index: {}]   ;;  %s2640_s5 = inlined_call_operand.vmem [shape: f32[1,32], index: 5, kind: input, shape index: {}]   ;;  %s2641_s6 = inlined_call_operand.vmem [shape: f32[1,32], index: 6, kind: input, shape index: {}]   ;;  %s2642_s8 = inlined_call_operand.vmem [shape: f32[1,128], index: 8, kind: input, shape index: {}]   ;;  %s2643_s9 = inlined_call_operand.vmem [shape: f32[2,128], index: 9, kind: output, shape index: {}]  }
   0x1   :  { %v1991_v0 = vld [vmem:[%s2634_s2 + $0x40] sm:$0xff]   ;;  %v1995_v4 = vld [vmem:[%s2634_s2 + $0x48] sm:$0xff]   ;;  %v1999_v8 = vld [vmem:[%s2634_s2 + $0x50] sm:$0xff]   ;;  %v302_v23 = vunpack.c.l.s4 %v2124_v22  ;;  %vm1605_vm3 = vcmask 261120  }
   0x2   :  { %v1992_v1 = vld [vmem:[%s2634_s2 + $0xc0] sm:$0xff]   ;;  %1791 = vmatprep.subr.bf16.mxu0 %v1991_v0  ;;  %v1996_v5 = vld [vmem:[%s2634_s2 + $0xc8] sm:$0xff]   ;;  %v2000_v9 = vld [vmem:[%s2634_s2 + $0xd0] sm:$0xff]   ;;  %v305_v30 = vshrl.u32 %v304_v24, 7 }
   0x3   :  { %v1993_v2 = vld [vmem:[%s2634_s2] sm:$0xff]   ;;  %1813 = vmatprep.subr.bf16.mxu1 %v1992_v1  ;;  %v1997_v6 = vld [vmem:[%s2634_s2 + $0x8] sm:$0xff]   ;;  %v2001_v10 = vld [vmem:[%s2634_s2 + $0x10] sm:$0xff]   ;;  %v303_v29 = vunpack.c.0.s8 %v302_v23 }
   0x4   :  { %v1994_v3 = vld [vmem:[%s2634_s2 + $0x80] sm:$0xff]   ;;  %1792 = vmatpush3.bf16.msra.mxu0 %v1993_v2  ;;  %v1998_v7 = vld [vmem:[%s2634_s2 + $0x88] sm:$0xff]   ;;  %v2002_v11 = vld [vmem:[%s2634_s2 + $0x90] sm:$0xff]  }
   0x5   :  { %1814 = vmatpush3.bf16.msra.mxu1 %v1994_v3  ;;  %1793 = vmatprep.subr.bf16.mxu0 %v1995_v4  ;;  %v2003_v12 = vld [vmem:[%s2634_s2 + $0x58] sm:$0xff]   ;;  %v2007_v16 = vld [vmem:[%s2634_s2 + $0x60] sm:$0xff]   ;;  %v2011_v20 = vld [vmem:[%s2634_s2 + $0x68] sm:$0xff]   ;;  %v2268_v35 = vsub.s32 %v303_v29, %v305_v30 }
   0x6   :  { %1815 = vmatprep.subr.bf16.mxu1 %v1996_v5  ;;  %v2004_v13 = vld [vmem:[%s2634_s2 + $0xd8] sm:$0xff]   ;;  %v2008_v17 = vld [vmem:[%s2634_s2 + $0xe0] sm:$0xff]   ;;  %v2012_v21 = vld [vmem:[%s2634_s2 + $0xe8] sm:$0xff]  }
   0x7   :  { %v2005_v14 = vld [vmem:[%s2634_s2 + $0x18] sm:$0xff]   ;;  %v2009_v18 = vld [vmem:[%s2634_s2 + $0x20] sm:$0xff]   ;;  %v2013_v25 = vld [vmem:[%s2634_s2 + $0x28] sm:$0xff]  }
   0x8   :  { %1794 = vmatpush3.bf16.msra.mxu0 %v1997_v6  ;;  %v2006_v15 = vld [vmem:[%s2634_s2 + $0x98] sm:$0xff]   ;;  %v2010_v19 = vld [vmem:[%s2634_s2 + $0xa0] sm:$0xff]   ;;  %v2014_v26 = vld [vmem:[%s2634_s2 + $0xa8] sm:$0xff]  }
   0x9   :  { %1816 = vmatpush3.bf16.msra.mxu1 %v1998_v7  ;;  %1795 = vmatprep.subr.bf16.mxu0 %v1999_v8  ;;  %v2015_v27 = vld [vmem:[%s2634_s2 + $0x70] sm:$0xff]   ;;  %v2019_v33 = vld [vmem:[%s2634_s2 + $0x78] sm:$0xff]   ;;  %v33_v38 = vld [vmem:[%s2635_s0] sm:$0xff] }
   0xa   :  { %1817 = vmatprep.subr.bf16.mxu1 %v2000_v9  ;;  %v2016_v28 = vld [vmem:[%s2634_s2 + $0xf0] sm:$0xff]   ;;  %v2020_v34 = vld [vmem:[%s2634_s2 + $0xf8] sm:$0xff]   ;;  %v300_v39 = vcombine.high %v33_v38, %v33_v38  ;;  %v307_v40 = vrot.slane %v33_v38, %v2268_v35  ;;  %v2025_v41 = vld [vmem:[%s2634_s2 + $0x140] sm:$0xff]  }
   0xb   :  { %v2017_v31 = vld [vmem:[%s2634_s2 + $0x30] sm:$0xff]   ;;  %v2021_v36 = vld [vmem:[%s2634_s2 + $0x38] sm:$0xff]   ;;  %v2026_v42 = vld [vmem:[%s2634_s2 + $0x1c0] sm:$0xff]  }
   0xc   :  { %1796 = vmatpush3.bf16.msra.mxu0 %v2001_v10  ;;  %v2018_v32 = vld [vmem:[%s2634_s2 + $0xb0] sm:$0xff]   ;;  %v2022_v37 = vld [vmem:[%s2634_s2 + $0xb8] sm:$0xff]   ;;  %v315_v43 = vcombine.high %v307_v40, %v307_v40  ;;  %v323_v44 = vrot.slane %v307_v40, %v2268_v35  ;;  %v2288_v45 = vrot.slane %v300_v39, %v2268_v35  ;;  %v2027_v47 = vld [vmem:[%s2634_s2 + $0x100] sm:$0xff]  }
   0xd   :  { %1818 = vmatpush3.bf16.msra.mxu1 %v2002_v11  ;;  %1797 = vmatprep.subr.bf16.mxu0 %v2003_v12  ;;  %v2029_v50 = vld [vmem:[%s2634_s2 + $0x148] sm:$0xff]   ;;  %v2028_v52 = vld [vmem:[%s2634_s2 + $0x180] sm:$0xff]   ;;  %v2033_v57 = vld [vmem:[%s2634_s2 + $0x150] sm:$0xff]  }
   0xe   :  { %1819 = vmatprep.subr.bf16.mxu1 %v2004_v13  ;;  %v337_v46 = vrot.slane %v315_v43, %v2268_v35  ;;  %v316_v48 = vcombine.high %v2288_v45, %v2288_v45  ;;  %v345_v49 = vcombine.high %v323_v44, %v323_v44  ;;  %v2030_v54 = vld [vmem:[%s2634_s2 + $0x1c8] sm:$0xff]   ;;  %v2034_v59 = vld [vmem:[%s2634_s2 + $0x1d0] sm:$0xff]   ;;  %v2037_v61 = vld [vmem:[%s2634_s2 + $0x158] sm:$0xff]  }
   0xf   :  { %v2031_v55 = vld [vmem:[%s2634_s2 + $0x108] sm:$0xff]   ;;  %v2035_v60 = vld [vmem:[%s2634_s2 + $0x110] sm:$0xff]   ;;  %v2038_v63 = vld [vmem:[%s2634_s2 + $0x1d8] sm:$0xff]  }
  0x10   :  { %1798 = vmatpush3.bf16.msra.mxu0 %v2005_v14  ;;  %1214 = vmatprep.mubr.bf16.mxu0 %v337_v46  ;;  %v347_v51 = vcombine.high %v337_v46, %v337_v46  ;;  %v344_v53 = vrot.slane %v316_v48, %v2268_v35  ;;  %v2032_v58 = vld [vmem:[%s2634_s2 + $0x188] sm:$0xff]   ;;  %v2036_v62 = vld [vmem:[%s2634_s2 + $0x190] sm:$0xff]   ;;  %v2039_v0 = vld [vmem:[%s2634_s2 + $0x118] sm:$0xff]  }
  0x11   :  { %1820 = vmatpush3.bf16.msra.mxu1 %v2006_v15  ;;  %1799 = vmatprep.subr.bf16.mxu0 %v2007_v16  ;;  %v2041_v1 = vld [vmem:[%s2634_s2 + $0x160] sm:$0xff]   ;;  %v2040_v2 = vld [vmem:[%s2634_s2 + $0x198] sm:$0xff]   ;;  %v2348_v5 = vld [vmem:[%s2635_s0 + $0x8] sm:$0xff] }
  0x12   :  { %1821 = vmatprep.subr.bf16.mxu1 %v2008_v17  ;;  %1254 = vmatprep.mubr.bf16.mxu1 %v347_v51  ;;  %v348_v56 = vcombine.high %v344_v53, %v344_v53  ;;  %v2042_v3 = vld [vmem:[%s2634_s2 + $0x1e0] sm:$0xff]   ;;  %v2045_v6 = vld [vmem:[%s2634_s2 + $0x168] sm:$0xff]   ;;  %v2049_v10 = vld [vmem:[%s2634_s2 + $0x170] sm:$0xff]   ;;  %v2370_v12 = vrot.slane %v2348_v5, %v2268_v35  ;;  %v349_v46 = vcombine.high %v2348_v5, %v2348_v5 }
  0x13   :  { %v2043_v4 = vld [vmem:[%s2634_s2 + $0x120] sm:$0xff]   ;;  %v2046_v8 = vld [vmem:[%s2634_s2 + $0x1e8] sm:$0xff]   ;;  %v2050_v13 = vld [vmem:[%s2634_s2 + $0x1f0] sm:$0xff]  }
  0x14   :  { %1800 = vmatpush3.bf16.msra.mxu0 %v2009_v18  ;;  %v2044_v7 = vld [vmem:[%s2634_s2 + $0x1a0] sm:$0xff]   ;;  %v2047_v9 = vld [vmem:[%s2634_s2 + $0x128] sm:$0xff]   ;;  %v2051_v14 = vld [vmem:[%s2634_s2 + $0x130] sm:$0xff]   ;;  %v364_v17 = vcombine.high %v2370_v12, %v2370_v12 }
  0x15   :  { %1822 = vmatpush3.bf16.msra.mxu1 %v2010_v19  ;;  %1801 = vmatprep.subr.bf16.mxu0 %v2011_v20  ;;  %v2048_v11 = vld [vmem:[%s2634_s2 + $0x1a8] sm:$0xff]   ;;  %v2053_v15 = vld [vmem:[%s2634_s2 + $0x178] sm:$0xff]   ;;  %v2052_v16 = vld [vmem:[%s2634_s2 + $0x1b0] sm:$0xff]   ;;  %v330_v20 = vrot.slane %v2288_v45, %v2268_v35 }
  0x16   :  { %1823 = vmatprep.subr.bf16.mxu1 %v2012_v21  ;;  %v2054_v18 = vld [vmem:[%s2634_s2 + $0x1f8] sm:$0xff]   ;;  %v2057_v21 = vld [vmem:[%s2634_s2 + $0x240] sm:$0xff]   ;;  %v386_v23 = vrot.slane %v364_v17, %v2268_v35  ;;  %v2062_v30 = vld [vmem:[%s2634_s2 + $0x2c8] sm:$0xff]  }
  0x17   :  { %v2055_v19 = vld [vmem:[%s2634_s2 + $0x138] sm:$0xff]   ;;  %v2058_v24 = vld [vmem:[%s2634_s2 + $0x2c0] sm:$0xff]   ;;  %v2068_v38 = vld [vmem:[%s2634_s2 + $0x290] sm:$0xff]  }
  0x18   :  { %1802 = vmatpush3.bf16.msra.mxu0 %v2013_v25  ;;  %v2056_v22 = vld [vmem:[%s2634_s2 + $0x1b8] sm:$0xff]   ;;  %v2059_v25 = vld [vmem:[%s2634_s2 + $0x200] sm:$0xff]   ;;  %v396_v29 = vcombine.high %v386_v23, %v386_v23  ;;  %v2077_v45 = vld [vmem:[%s2634_s2 + $0x268] sm:$0xff]  }
  0x19   :  { %1824 = vmatpush3.bf16.msra.mxu1 %v2014_v26  ;;  %1803 = vmatprep.subr.bf16.mxu0 %v2015_v27  ;;  %v346_v26 = vcombine.high %v330_v20, %v330_v20  ;;  %v2061_v27 = vld [vmem:[%s2634_s2 + $0x248] sm:$0xff]   ;;  %v2070_v39 = vld [vmem:[%s2634_s2 + $0x2d8] sm:$0xff]   ;;  %v2074_v43 = vld [vmem:[%s2634_s2 + $0x2e0] sm:$0xff]  }
  0x1a   :  { %1825 = vmatprep.subr.bf16.mxu1 %v2016_v28  ;;  %v2060_v28 = vld [vmem:[%s2634_s2 + $0x280] sm:$0xff]   ;;  %v2071_v40 = vld [vmem:[%s2634_s2 + $0x218] sm:$0xff]   ;;  %v2078_v48 = vld [vmem:[%s2634_s2 + $0x2e8] sm:$0xff]  }
  0x1b   :  { %v2080_v51 = vld [vmem:[%s2634_s2 + $0x2a8] sm:$0xff]   ;;  %v2104_v17 = vld [vmem:[%s2634_s2 + $0x398] sm:$0xff]  }
  0x1c   :  { %1804 = vmatpush3.bf16.msra.mxu0 %v2017_v31  ;;  %v2063_v31 = vld [vmem:[%s2634_s2 + $0x208] sm:$0xff]  }
  0x1d   :  { %1826 = vmatpush3.bf16.msra.mxu1 %v2018_v32  ;;  %1805 = vmatprep.subr.bf16.mxu0 %v2019_v33  ;;  %v2065_v32 = vld [vmem:[%s2634_s2 + $0x250] sm:$0xff]   ;;  %v2064_v33 = vld [vmem:[%s2634_s2 + $0x288] sm:$0xff]  }
  0x1e   :  { %1827 = vmatprep.subr.bf16.mxu1 %v2020_v34  ;;  %v2066_v34 = vld [vmem:[%s2634_s2 + $0x2d0] sm:$0xff]  }
  0x20   :  { %1806 = vmatpush3.bf16.msra.mxu0 %v2021_v36  ;;  %v2067_v36 = vld [vmem:[%s2634_s2 + $0x210] sm:$0xff]  }
  0x21   :  { %1828 = vmatpush3.bf16.msra.mxu1 %v2022_v37  ;;  %1835 = vmatprep.subr.bf16.mxu0 %v2025_v41  ;;  %v2069_v37 = vld [vmem:[%s2634_s2 + $0x258] sm:$0xff]   ;;  %v2073_v41 = vld [vmem:[%s2634_s2 + $0x260] sm:$0xff]  }
  0x22   :  { %1857 = vmatprep.subr.bf16.mxu1 %v2026_v42  ;;  %v2072_v42 = vld [vmem:[%s2634_s2 + $0x298] sm:$0xff]  }
  0x23   :  { %1215 = vmatmul.mubr.bf16.vlgmr.msra.gmra.mrb[0].mxu0 %v323_v44  ;;  %v2075_v44 = vld [vmem:[%s2634_s2 + $0x220] sm:$0xff]  }
  0x24   :  { %1836 = vmatpush3.bf16.msra.mxu0 %v2027_v47  ;;  %1255 = vmatmul.mubr.bf16.vlgmr.msra.gmra.mrb[0].mxu1 %v345_v49  ;;  %v2076_v47 = vld [vmem:[%s2634_s2 + $0x2a0] sm:$0xff]   ;;  %v2079_v49 = vld [vmem:[%s2634_s2 + $0x228] sm:$0xff]  }
  0x25   :  { %1837 = vmatprep.subr.bf16.mxu0 %v2029_v50  ;;  %1858 = vmatpush3.bf16.msra.mxu1 %v2028_v52  ;;  %v2081_v50 = vld [vmem:[%s2634_s2 + $0x270] sm:$0xff]   ;;  %v2476_v52 = vrot.slane %v349_v46, %v2268_v35 }
  0x26   :  { %1294 = vmatprep.mubr.bf16.mxu0 %v344_v53  ;;  %1859 = vmatprep.subr.bf16.mxu1 %v2030_v54  ;;  %v2082_v53 = vld [vmem:[%s2634_s2 + $0x2f0] sm:$0xff]  }
  0x27   :  { %1334 = vmatprep.mubr.bf16.mxu1 %v348_v56  ;;  %v2083_v54 = vld [vmem:[%s2634_s2 + $0x230] sm:$0xff]  }
  0x28   :  { %1838 = vmatpush3.bf16.msra.mxu0 %v2031_v55  ;;  %v2085_v55 = vld [vmem:[%s2634_s2 + $0x278] sm:$0xff]   ;;  %v2084_v56 = vld [vmem:[%s2634_s2 + $0x2b0] sm:$0xff]  }
  0x29   :  { %1839 = vmatprep.subr.bf16.mxu0 %v2033_v57  ;;  %1860 = vmatpush3.bf16.msra.mxu1 %v2032_v58  ;;  %v365_v57 = vcombine.high %v2476_v52, %v2476_v52  ;;  %v2086_v58 = vld [vmem:[%s2634_s2 + $0x2f8] sm:$0xff]  }
  0x2a   :  { %1861 = vmatprep.subr.bf16.mxu1 %v2034_v59  ;;  %v2087_v59 = vld [vmem:[%s2634_s2 + $0x238] sm:$0xff]  }
  0x2c   :  { %1840 = vmatpush3.bf16.msra.mxu0 %v2035_v60  ;;  %v372_v60 = vrot.slane %v2370_v12, %v2268_v35  ;;  %v2101_v12 = vld [vmem:[%s2634_s2 + $0x358] sm:$0xff]  }
  0x2d   :  { %1841 = vmatprep.subr.bf16.mxu0 %v2037_v61  ;;  %1862 = vmatpush3.bf16.msra.mxu1 %v2036_v62  ;;  %v2089_v61 = vld [vmem:[%s2634_s2 + $0x340] sm:$0xff]   ;;  %v2088_v62 = vld [vmem:[%s2634_s2 + $0x2b8] sm:$0xff]  }
  0x2e   :  { %1863 = vmatprep.subr.bf16.mxu1 %v2038_v63  ;;  %v393_v63 = vrot.slane %v365_v57, %v2268_v35 }
  0x30   :  { %1842 = vmatpush3.bf16.msra.mxu0 %v2039_v0  ;;  %v2090_v0 = vld [vmem:[%s2634_s2 + $0x3c0] sm:$0xff]   ;;  %v397_v5 = vcombine.high %v393_v63, %v393_v63 }
  0x31   :  { %1843 = vmatprep.subr.bf16.mxu0 %v2041_v1  ;;  %1864 = vmatpush3.bf16.msra.mxu1 %v2040_v2  ;;  %v2091_v1 = vld [vmem:[%s2634_s2 + $0x300] sm:$0xff]   ;;  %v394_v2 = vcombine.high %v372_v60, %v372_v60 }
  0x32   :  { %1865 = vmatprep.subr.bf16.mxu1 %v2042_v3  ;;  %v2093_v3 = vld [vmem:[%s2634_s2 + $0x348] sm:$0xff]  }
  0x34   :  { %1844 = vmatpush3.bf16.msra.mxu0 %v2043_v4  ;;  %v2092_v4 = vld [vmem:[%s2634_s2 + $0x380] sm:$0xff]  }
  0x35   :  { %1845 = vmatprep.subr.bf16.mxu0 %v2045_v6  ;;  %1866 = vmatpush3.bf16.msra.mxu1 %v2044_v7  ;;  %v2094_v6 = vld [vmem:[%s2634_s2 + $0x3c8] sm:$0xff]  }
  0x36   :  { %1867 = vmatprep.subr.bf16.mxu1 %v2046_v8  ;;  %v2095_v7 = vld [vmem:[%s2634_s2 + $0x308] sm:$0xff]   ;;  %v2097_v8 = vld [vmem:[%s2634_s2 + $0x350] sm:$0xff]  }
  0x38   :  { %1846 = vmatpush3.bf16.msra.mxu0 %v2047_v9  ;;  %v2096_v9 = vld [vmem:[%s2634_s2 + $0x388] sm:$0xff]  }
  0x39   :  { %1847 = vmatprep.subr.bf16.mxu0 %v2049_v10  ;;  %1868 = vmatpush3.bf16.msra.mxu1 %v2048_v11  ;;  %v2098_v10 = vld [vmem:[%s2634_s2 + $0x3d0] sm:$0xff]  }
  0x3a   :  { %1869 = vmatprep.subr.bf16.mxu1 %v2050_v13  ;;  %v2099_v11 = vld [vmem:[%s2634_s2 + $0x310] sm:$0xff]  }
  0x3b   :  { %v2100_v13 = vld [vmem:[%s2634_s2 + $0x390] sm:$0xff]  }
  0x3c   :  { %1848 = vmatpush3.bf16.msra.mxu0 %v2051_v14  ;;  %v2102_v14 = vld [vmem:[%s2634_s2 + $0x3d8] sm:$0xff]  }
  0x3d   :  { %1849 = vmatprep.subr.bf16.mxu0 %v2053_v15  ;;  %1870 = vmatpush3.bf16.msra.mxu1 %v2052_v16  ;;  %v2103_v15 = vld [vmem:[%s2634_s2 + $0x318] sm:$0xff]   ;;  %v2105_v16 = vld [vmem:[%s2634_s2 + $0x360] sm:$0xff]  }
  0x3e   :  { %1871 = vmatprep.subr.bf16.mxu1 %v2054_v18  ;;  %v2106_v18 = vld [vmem:[%s2634_s2 + $0x3e0] sm:$0xff]  }
  0x40   :  { %1850 = vmatpush3.bf16.msra.mxu0 %v2055_v19  ;;  %v2107_v19 = vld [vmem:[%s2634_s2 + $0x320] sm:$0xff]  }
  0x41   :  { %1879 = vmatprep.subr.bf16.mxu0 %v2057_v21  ;;  %1872 = vmatpush3.bf16.msra.mxu1 %v2056_v22  ;;  %v2108_v21 = vld [vmem:[%s2634_s2 + $0x3a0] sm:$0xff]   ;;  %v2110_v22 = vld [vmem:[%s2634_s2 + $0x3e8] sm:$0xff]  }
  0x42   :  { %1901 = vmatprep.subr.bf16.mxu1 %v2058_v24  ;;  %v2113_v24 = vld [vmem:[%s2634_s2 + $0x370] sm:$0xff]  }
  0x43   :  { %1295 = vmatmul.mubr.bf16.vlgmr.msra.gmra.mrb[4].mxu0 %v330_v20  ;;  %v2109_v20 = vld [vmem:[%s2634_s2 + $0x368] sm:$0xff]  }
  0x44   :  { %1880 = vmatpush3.bf16.msra.mxu0 %v2059_v25  ;;  %1374 = vmatprep.mubr.bf16.mxu0 %v386_v23  ;;  %v2111_v23 = vld [vmem:[%s2634_s2 + $0x328] sm:$0xff]  }
  0x45   :  { %1335 = vmatmul.mubr.bf16.vlgmr.msra.gmra.mrb[4].mxu1 %v346_v26  ;;  %1881 = vmatprep.subr.bf16.mxu0 %v2061_v27  ;;  %v2112_v25 = vld [vmem:[%s2634_s2 + $0x3a8] sm:$0xff]   ;;  %v2114_v26 = vld [vmem:[%s2634_s2 + $0x3f0] sm:$0xff]  }
  0x46   :  { %1902 = vmatpush3.bf16.msra.mxu1 %v2060_v28  ;;  %1414 = vmatprep.mubr.bf16.mxu1 %v396_v29  ;;  %v2115_v27 = vld [vmem:[%s2634_s2 + $0x330] sm:$0xff]   ;;  %v2117_v28 = vld [vmem:[%s2634_s2 + $0x378] sm:$0xff]  }
  0x47   :  { %1903 = vmatprep.subr.bf16.mxu1 %v2062_v30  ;;  %v2116_v29 = vld [vmem:[%s2634_s2 + $0x3b0] sm:$0xff]   ;;  %v2118_v30 = vld [vmem:[%s2634_s2 + $0x3f8] sm:$0xff]  }
  0x48   :  { %1882 = vmatpush3.bf16.msra.mxu0 %v2063_v31  ;;  %v2119_v31 = vld [vmem:[%s2634_s2 + $0x338] sm:$0xff]  }
  0x49   :  { %1883 = vmatprep.subr.bf16.mxu0 %v2065_v32  ;;  %v379_v32 = vrot.slane %v2476_v52, %v2268_v35  ;;  %v2127_v35 = vmov 0  }
  0x4a   :  { %1904 = vmatpush3.bf16.msra.mxu1 %v2064_v33  ;;  %v2120_v33 = vld [vmem:[%s2634_s2 + $0x3b8] sm:$0xff]   ;;  %1990 = vset.pattern.permute.xlu0 %v2127_v35 }
  0x4b   :  { %1905 = vmatprep.subr.bf16.mxu1 %v2066_v34  ;;  %v395_v34 = vcombine.high %v379_v32, %v379_v32 }
  0x4c   :  { %1884 = vmatpush3.bf16.msra.mxu0 %v2067_v36  ;;  %v2121_v36 = vld [vmem:[%s2636_s4] sm:$0xff]  }
  0x4d   :  { %1885 = vmatprep.subr.bf16.mxu0 %v2069_v37  ;;  %v2125_v37 = vmov 0.0  }
  0x4e   :  { %1906 = vmatpush3.bf16.msra.mxu1 %v2068_v38  ;;  %v1508_v38 = vld [vmem:[%s2637_s1] sm:$0x3] }
  0x4f   :  { %1907 = vmatprep.subr.bf16.mxu1 %v2070_v39  ;;  %1512 = vperm.xlu0 %1990, %v1508_v38  }
  0x50   :  { %1886 = vmatpush3.bf16.msra.mxu0 %v2071_v40  ;;  %v1654_v40 = vld [vmem:[%s2638_s3] ss:$0 sm:$0xff] }
  0x51   :  { %1887 = vmatprep.subr.bf16.mxu0 %v2073_v41 }
  0x52   :  { %1908 = vmatpush3.bf16.msra.mxu1 %v2072_v42 }
  0x53   :  { %1909 = vmatprep.subr.bf16.mxu1 %v2074_v43 }
  0x54   :  { %1888 = vmatpush3.bf16.msra.mxu0 %v2075_v44 }
  0x55   :  { %1889 = vmatprep.subr.bf16.mxu0 %v2077_v45 }
  0x56   :  { %1910 = vmatpush3.bf16.msra.mxu1 %v2076_v47 }
  0x57   :  { %1911 = vmatprep.subr.bf16.mxu1 %v2078_v48 }
  0x58   :  { %1890 = vmatpush3.bf16.msra.mxu0 %v2079_v49 }
  0x59   :  { %1891 = vmatprep.subr.bf16.mxu0 %v2081_v50 }
  0x5a   :  { %1912 = vmatpush3.bf16.msra.mxu1 %v2080_v51 }
  0x5b   :  { %1913 = vmatprep.subr.bf16.mxu1 %v2082_v53 }
  0x5c   :  { %1892 = vmatpush3.bf16.msra.mxu0 %v2083_v54 }
  0x5d   :  { %1893 = vmatprep.subr.bf16.mxu0 %v2085_v55 }
  0x5e   :  { %1914 = vmatpush3.bf16.msra.mxu1 %v2084_v56 }
  0x5f   :  { %1915 = vmatprep.subr.bf16.mxu1 %v2086_v58 }
  0x60   :  { %1894 = vmatpush3.bf16.msra.mxu0 %v2087_v59 }
  0x61   :  { %1923 = vmatprep.subr.bf16.mxu0 %v2089_v61 }
  0x62   :  { %1916 = vmatpush3.bf16.msra.mxu1 %v2088_v62 }
  0x63   :  { %1375 = vmatmul.mubr.bf16.vlgmr.msra.gmra.mrb[8].mxu0 %v372_v60  ;;  %1945 = vmatprep.subr.bf16.mxu1 %v2090_v0 }
  0x64   :  { %1924 = vmatpush3.bf16.msra.mxu0 %v2091_v1  ;;  %1454 = vmatprep.mubr.bf16.mxu0 %v393_v63 }
  0x65   :  { %1415 = vmatmul.mubr.bf16.vlgmr.msra.gmra.mrb[8].mxu1 %v394_v2  ;;  %1925 = vmatprep.subr.bf16.mxu0 %v2093_v3 }
  0x66   :  { %1946 = vmatpush3.bf16.msra.mxu1 %v2092_v4  ;;  %1494 = vmatprep.mubr.bf16.mxu1 %v397_v5 }
  0x67   :  { %1947 = vmatprep.subr.bf16.mxu1 %v2094_v6 }
  0x68   :  { %1926 = vmatpush3.bf16.msra.mxu0 %v2095_v7 }
  0x69   :  { %1927 = vmatprep.subr.bf16.mxu0 %v2097_v8 }
  0x6a   :  { %1948 = vmatpush3.bf16.msra.mxu1 %v2096_v9 }
  0x6b   :  { %1949 = vmatprep.subr.bf16.mxu1 %v2098_v10 }
  0x6c   :  { %1928 = vmatpush3.bf16.msra.mxu0 %v2099_v11 }
  0x6d   :  { %1929 = vmatprep.subr.bf16.mxu0 %v2101_v12 }
  0x6e   :  { %1950 = vmatpush3.bf16.msra.mxu1 %v2100_v13 }
  0x6f   :  { %1951 = vmatprep.subr.bf16.mxu1 %v2102_v14 }
  0x70   :  { %1930 = vmatpush3.bf16.msra.mxu0 %v2103_v15 }
  0x71   :  { %1931 = vmatprep.subr.bf16.mxu0 %v2105_v16 }
  0x72   :  { %1952 = vmatpush3.bf16.msra.mxu1 %v2104_v17 }
  0x73   :  { %1953 = vmatprep.subr.bf16.mxu1 %v2106_v18 }
  0x74   :  { %1932 = vmatpush3.bf16.msra.mxu0 %v2107_v19 }
  0x75   :  { %1933 = vmatprep.subr.bf16.mxu0 %v2109_v20 }
  0x76   :  { %1954 = vmatpush3.bf16.msra.mxu1 %v2108_v21 }
  0x77   :  { %1955 = vmatprep.subr.bf16.mxu1 %v2110_v22 }
  0x78   :  { %1934 = vmatpush3.bf16.msra.mxu0 %v2111_v23 }
  0x79   :  { %1935 = vmatprep.subr.bf16.mxu0 %v2113_v24 }
  0x7a   :  { %1956 = vmatpush3.bf16.msra.mxu1 %v2112_v25 }
  0x7b   :  { %1957 = vmatprep.subr.bf16.mxu1 %v2114_v26 }
  0x7c   :  { %1936 = vmatpush3.bf16.msra.mxu0 %v2115_v27  ;;  %v2122_v27 = vld [vmem:[%s2639_s7] sm:$0xff]  }
  0x7d   :  { %1937 = vmatprep.subr.bf16.mxu0 %v2117_v28  ;;  %v2123_v28 = vld [vmem:[%s2639_s7 + $0x8] sm:$0xff]  }
  0x7e   :  { %1958 = vmatpush3.bf16.msra.mxu1 %v2116_v29  ;;  %v1783_v29 = vld [vmem:[%s2640_s5] ss:$0 sm:$0xff] }
  0x7f   :  { %1959 = vmatprep.subr.bf16.mxu1 %v2118_v30 }
  0x80   :  { %1938 = vmatpush3.bf16.msra.mxu0 %v2119_v31 }
  0x81   :  { %1972 = vmatprep.subr.bf16.mxu0 %v2125_v37 }
  0x82   :  { %1960 = vmatpush3.bf16.msra.mxu1 %v2120_v33  ;;  %v1786_v33 = vld [vmem:[%s2641_s6] ss:$0 sm:$0xff] }
  0x83   :  { %1455 = vmatmul.mubr.bf16.vlgmr.msra.gmra.mrb[12].mxu0 %v379_v32  ;;  %1978 = vmatprep.subr.bf16.mxu1 %v2125_v37 }
  0x84   :  { %1973 = vmatpush3.bf16.msra.mxu0 %v2121_v36  ;;  %1974 = vmatprep.mubr.msk.bf16.mxu0 %vm2126_vm0, %v2125_v37 }
  0x85   :  { %1495 = vmatmul.mubr.bf16.vlgmr.msra.gmra.mrb[12].mxu1 %v395_v34 }
  0x86   :  { %1982 = vmatprep.mubr.msk.bf16.mxu1 %vm2126_vm0, %v2125_v37  ;;  %1979 = vmatpush3.bf16.msra.mxu1 %v2122_v27 }
  0x87   :  { %1980 = vmatprep.subr.bf16.mxu1 %v2125_v37 }
  0x8a   :  { %1981 = vmatpush3.bf16.msra.mxu1 %v2123_v28 }
  0xce   :  { %v1513_v30 = vpop.permute.xlu0 %1512 }
  0xcf   :  { %v1521_v31 = vmul.f32 %v1783_v29, %v1513_v30 }
  0xf6   :  { %v1807_v39 = vpop.f32.mrb[0].mxu0 }
  0xf7   :  { %v1808_v41 = vpop.f32.mrb[1].mxu0  ;;  %v1829_v42 = vpop.f32.mrb[0].mxu1 }
  0xf8   :  { %v1809_v43 = vadd.f32 %v1808_v41, %v1807_v39  ;;  %v1810_v44 = vpop.f32.mrb[2].mxu0  ;;  %v1830_v45 = vpop.f32.mrb[1].mxu1  ;;  %v1787_v41 = vld [vmem:[%s2642_s8] ss:$0 sm:$0xff] }
  0xf9   :  { %v1811_v46 = vpop.f32.mrb[3].mxu0  ;;  %v1831_v48 = vadd.f32 %v1830_v45, %v1829_v42  ;;  %v1832_v49 = vpop.f32.mrb[2].mxu1 }
  0xfa   :  { %v1217_v47 = vadd.f32 %v1809_v43, %v1654_v40  ;;  %v1833_v50 = vpop.f32.mrb[3].mxu1 }
  0xfc   :  { %v1257_v51 = vadd.f32 %v1831_v48, %v1217_v47 }
 0x116   :  { %v1851_v52 = vpop.f32.mrb[4].mxu0 }
 0x117   :  { %v1852_v53 = vpop.f32.mrb[5].mxu0 }
 0x118   :  { %v1873_v54 = vpop.f32.mrb[4].mxu1  ;;  %v1853_v55 = vadd.f32 %v1852_v53, %v1851_v52  ;;  %v1854_v56 = vpop.f32.mrb[6].mxu0 }
 0x119   :  { %v1874_v57 = vpop.f32.mrb[5].mxu1  ;;  %v1855_v58 = vpop.f32.mrb[7].mxu0 }
 0x11a   :  { %v1297_v59 = vadd.f32 %v1853_v55, %v1257_v51  ;;  %v1875_v60 = vadd.f32 %v1874_v57, %v1873_v54  ;;  %v1876_v61 = vpop.f32.mrb[6].mxu1 }
 0x11b   :  { %v1877_v62 = vpop.f32.mrb[7].mxu1 }
 0x11c   :  { %v1337_v63 = vadd.f32 %v1875_v60, %v1297_v59 }
 0x136   :  { %v1895_v0 = vpop.f32.mrb[8].mxu0 }
 0x137   :  { %v1896_v1 = vpop.f32.mrb[9].mxu0 }
 0x138   :  { %v1917_v2 = vpop.f32.mrb[8].mxu1  ;;  %v1897_v3 = vadd.f32 %v1896_v1, %v1895_v0  ;;  %v1898_v4 = vpop.f32.mrb[10].mxu0 }
 0x139   :  { %v1918_v5 = vpop.f32.mrb[9].mxu1  ;;  %v1899_v6 = vpop.f32.mrb[11].mxu0 }
 0x13a   :  { %v1377_v7 = vadd.f32 %v1897_v3, %v1337_v63  ;;  %v1919_v8 = vadd.f32 %v1918_v5, %v1917_v2  ;;  %v1920_v9 = vpop.f32.mrb[10].mxu1 }
 0x13b   :  { %v1921_v10 = vpop.f32.mrb[11].mxu1 }
 0x13c   :  { %v1417_v11 = vadd.f32 %v1919_v8, %v1377_v7 }
 0x156   :  { %v1939_v12 = vpop.f32.mrb[12].mxu0 }
 0x157   :  { %v1940_v13 = vpop.f32.mrb[13].mxu0 }
 0x158   :  { %v1961_v14 = vpop.f32.mrb[12].mxu1  ;;  %v1941_v15 = vadd.f32 %v1940_v13, %v1939_v12  ;;  %v1942_v16 = vpop.f32.mrb[14].mxu0 }
 0x159   :  { %v1962_v17 = vpop.f32.mrb[13].mxu1  ;;  %v1943_v18 = vpop.f32.mrb[15].mxu0 }
 0x15a   :  { %v1457_v19 = vadd.f32 %v1941_v15, %v1417_v11  ;;  %v1963_v20 = vadd.f32 %v1962_v17, %v1961_v14  ;;  %v1964_v21 = vpop.f32.mrb[14].mxu1 }
 0x15b   :  { %v1965_v22 = vpop.f32.mrb[15].mxu1 }
 0x15c   :  { %v1497_v23 = vadd.f32 %v1963_v20, %v1457_v19 }
 0x15e   :  { %vm1502_vm1 = vcmp.ge.f32.partialorder %v1497_v23, 0.0  ;;  %v1503_v24 = vmul.f32 0.2, %v1497_v23 }
 0x160   :  { %v1504_v25 = vsel %vm1502_vm1, %v1497_v23, %v1503_v24 }
 0x161   :  { %v1505_v26 = vpack.c.bf16 %v1504_v25, %v1504_v25 }
 0x163   :  { %1975 = vmatmul.mubr.msk.bf16.vlgmr.msra.gmra.mrb[16].mxu0 %vm1528_vm2, %v1505_v26 }
 0x236   :  { %v1566_v32 = vpop.f32.mrb[16].mxu0 }
 0x237   :  { %v1567_v34 = vadd.f32 %v1566_v32, %v1521_v31  ;;  %v1976_v36 = vpop.f32.mrb[17].mxu0 }
 0x238   :  { %v1569_v35 = vpop.f32.mrb[18].mxu0 }
 0x239   :  { %v1579_v37 = vadd.f32 %v1786_v33, %v1567_v34  ;;  %v1977_v38 = vpop.f32.mrb[19].mxu0 }
 0x23b   :  { %v1580_v39 = vmax.f32 %v1579_v37, 0.0 }
 0x23d   :  { %v1581_v40 = vpack.c.bf16 %v1580_v39, %v1580_v39 }
 0x23f   :  { %1983 = vmatmul.mubr.msk.bf16.vlgmr.msra.gmra.mrb[16].mxu1 %vm1605_vm3, %v1581_v40 }
 0x312   :  { %v1643_v42 = vpop.f32.mrb[16].mxu1 }
 0x313   :  { %v1644_v43 = vadd.f32 %v1787_v41, %v1643_v42  ;;  %v1984_v44 = vpop.f32.mrb[17].mxu1 }
 0x314   :  { %v1646_v45 = vpop.f32.mrb[18].mxu1 }
 0x315   :  { %1649 = vst [vmem:[%s2643_s9] sm:$0x3] %v1644_v43  ;;  %v1985_v46 = vpop.f32.mrb[19].mxu1 }

</bundles_post_ra>
